<compile_context>
chip_gen: v7x
topology: tpu7x:2x2x1
jax: 0.10.0
libtpu: 0.0.40
codegen_flags: <defaults>
</compile_context>

<pallas_src>
import functools
import numpy as np
import jax
import jax.numpy as jnp
from jax.experimental import pallas as pl
from jax.experimental.pallas import tpu as pltpu


# ----------------------------------------------------------------------------------
# Pallas kernel: tiled matmul + fused bias / residual / ReLU epilogue
# ----------------------------------------------------------------------------------
def _mm_kernel(x_ref, w_ref, b_ref, *rest, relu, has_res):
    """grid = (M tiles, N tiles, K tiles); K is the reduction (last, 'arbitrary') axis."""
    if has_res:
        res_ref, o_ref, acc_ref = rest
    else:
        o_ref, acc_ref = rest
        res_ref = None

    @pl.when(pl.program_id(2) == 0)
    def _():
        acc_ref[...] = jnp.zeros_like(acc_ref)

    acc_ref[...] += jnp.dot(x_ref[...], w_ref[...],
                            preferred_element_type=jnp.float32)

    @pl.when(pl.program_id(2) == pl.num_programs(2) - 1)
    def _():
        out = acc_ref[...] + b_ref[...].astype(jnp.float32)
        if has_res:
            out = out + res_ref[...].astype(jnp.float32)
        if relu:
            out = jnp.maximum(out, 0.0)
        o_ref[...] = out.astype(o_ref.dtype)


def pallas_matmul(x, w, b, *, relu=False, residual=None, out_dtype=jnp.bfloat16):
    """x:(M,K), w:(K,N) bf16 GEMM with f32 accumulation and fused epilogue.

    bias b:(1,N) f32;  residual (optional): (M,N) added before ReLU.
    """
    M, K = x.shape
    Kw, N = w.shape
    assert K == Kw, (K, Kw)

    x = x.astype(jnp.bfloat16)
    w = w.astype(jnp.bfloat16)
    b = b.astype(jnp.float32).reshape(1, N)

    # Tile selection: 128/256-aligned tiles, or full (possibly ragged) dims — never pad.
    tm = M if M <= 512 else 512
    tn = N if N <= 512 else 512
    if K % 256 == 0:
        tk = 256                 # feeds the full 256-wide MXU on v6e / v7x
    elif K % 128 == 0:
        tk = 128
    else:
        tk = K                   # full-K single reduction step (e.g. stem K=147, K=576)

    gm, gn, gk = pl.cdiv(M, tm), pl.cdiv(N, tn), pl.cdiv(K, tk)

    in_specs = [
        pl.BlockSpec((tm, tk), lambda i, j, k: (i, k)),
        pl.BlockSpec((tk, tn), lambda i, j, k: (k, j)),
        pl.BlockSpec((1, tn), lambda i, j, k: (0, j)),
    ]
    inputs = [x, w, b]
    has_res = residual is not None
    if has_res:
        in_specs.append(pl.BlockSpec((tm, tn), lambda i, j, k: (i, j)))
        inputs.append(residual)

    return pl.pallas_call(
        functools.partial(_mm_kernel, relu=relu, has_res=has_res),
        out_shape=jax.ShapeDtypeStruct((M, N), out_dtype),
        grid_spec=pltpu.PrefetchScalarGridSpec(
            num_scalar_prefetch=0,
            grid=(gm, gn, gk),
            in_specs=in_specs,
            out_specs=pl.BlockSpec((tm, tn), lambda i, j, k: (i, j)),
            scratch_shapes=[pltpu.VMEM((tm, tn), jnp.float32)],
        ),
        compiler_params=pltpu.CompilerParams(
            dimension_semantics=("parallel", "parallel", "arbitrary"),
            vmem_limit_bytes=32 * 1024 * 1024,
        ),
    )(*inputs)


# ----------------------------------------------------------------------------------
# Conv glue: im2col (bf16) + Pallas GEMM
# ----------------------------------------------------------------------------------
def im2col(x, kh, kw, stride, pad):
    """x: NHWC bf16 -> (N*Ho*Wo, kh*kw*C) patches, feature ordering (kh, kw, C)."""
    # TODO(synk): implicit-GEMM (no HBM-materialized patch matrix) not implemented;
    #             patches are still built here (bf16, single pass, no extra pad copy).
    n, h, w, c = x.shape
    xp = jnp.pad(x, ((0, 0), (pad, pad), (pad, pad), (0, 0)))
    ho = (h + 2 * pad - kh) // stride + 1
    wo = (w + 2 * pad - kw) // stride + 1
    cols = [xp[:, i:i + stride * ho:stride, j:j + stride * wo:stride, :]
            for i in range(kh) for j in range(kw)]
    patches = jnp.concatenate(cols, axis=-1)              # (N, Ho, Wo, kh*kw*C)
    return patches.reshape(n * ho * wo, kh * kw * c), (n, ho, wo)


def conv_bn(x, layer, kh, kw, stride, pad, relu, residual=None):
    """Conv2d (no bias) + folded BatchNorm [+ residual] [+ ReLU]; heavy math in Pallas."""
    cols, (n, ho, wo) = im2col(x, kh, kw, stride, pad)
    res = None
    if residual is not None:
        res = residual.reshape(n * ho * wo, residual.shape[-1])
    y = pallas_matmul(cols, layer['w'], layer['b'], relu=relu, residual=res)
    return y.reshape(n, ho, wo, y.shape[-1])


def maxpool_3x3_s2(x):
    # glue: 3x3/2 max pool with pad=1 (NHWC, bf16).
    return jax.lax.reduce_window(
        x, jnp.array(-jnp.inf, x.dtype), jax.lax.max,
        window_dimensions=(1, 3, 3, 1),
        window_strides=(1, 2, 2, 1),
        padding=((0, 0), (1, 1), (1, 1), (0, 0)),
    )


# ----------------------------------------------------------------------------------
# Parameter initialization (deterministic, synthetic; BN folded + GEMM-packed at init)
# ----------------------------------------------------------------------------------
def _init_bn(key, c):
    k1, k2, k3, k4 = jax.random.split(key, 4)
    gamma = 1.0 + 0.1 * jax.random.normal(k1, (c,), jnp.float32)
    beta = 0.1 * jax.random.normal(k2, (c,), jnp.float32)
    mean = 0.1 * jax.random.normal(k3, (c,), jnp.float32)
    var = 1.0 + 0.1 * jax.random.uniform(k4, (c,), jnp.float32)
    return gamma, beta, mean, var


def _fold_bn(w_hwio, bn, eps=1e-5):
    gamma, beta, mean, var = bn
    scale = gamma / jnp.sqrt(var + eps)
    return w_hwio * scale, beta - mean * scale


def make_conv_bn(key, kh, kw, cin, cout):
    kc, kb = jax.random.split(key)
    w = jax.random.normal(kc, (kh, kw, cin, cout), jnp.float32) / np.sqrt(kh * kw * cin)
    wf, b = _fold_bn(w, _init_bn(kb, cout))
    return {'w': wf.reshape(kh * kw * cin, cout).astype(jnp.bfloat16),
            'b': b.reshape(1, cout).astype(jnp.float32)}


def make_linear(key, fan_in, fan_out):
    kw_, kb = jax.random.split(key)
    w = jax.random.normal(kw_, (fan_in, fan_out), jnp.float32) / np.sqrt(fan_in)
    b = 0.01 * jax.random.normal(kb, (fan_out,), jnp.float32)
    return {'w': w.astype(jnp.bfloat16), 'b': b.reshape(1, fan_out).astype(jnp.float32)}


def init_resnet18(key, out_features):
    keys = iter(jax.random.split(key, 64))
    params = {'stem': make_conv_bn(next(keys), 7, 7, 3, 64)}

    def make_block(cin, cout, downsample):
        blk = {'conv1': make_conv_bn(next(keys), 3, 3, cin, cout),
               'conv2': make_conv_bn(next(keys), 3, 3, cout, cout)}
        if downsample:
            blk['down'] = make_conv_bn(next(keys), 1, 1, cin, cout)
        return blk

    layers = []
    cin = 64
    for cout, stride in [(64, 1), (128, 2), (256, 2), (512, 2)]:
        layers.append([make_block(cin, cout, stride != 1 or cin != cout),
                       make_block(cout, cout, False)])
        cin = cout
    params['layers'] = layers
    params['fc'] = make_linear(next(keys), 512, out_features)
    return params


def init_ingredient_net(key, middle_feat, num_classes):
    k_rgb, k_deep, k_head = jax.random.split(key, 3)
    k1, k2, k3 = jax.random.split(k_head, 3)
    return {
        'rgb': init_resnet18(k_rgb, middle_feat),
        'deep': init_resnet18(k_deep, middle_feat),
        'fc1': make_linear(k1, middle_feat * 2, 1024),
        'fc2': make_linear(k2, 1024, 512),
        'fc3': make_linear(k3, 512, num_classes),
    }


# ----------------------------------------------------------------------------------
# Forward passes
# ----------------------------------------------------------------------------------
def basic_block(x, blk, stride):
    if 'down' in blk:
        identity = conv_bn(x, blk['down'], 1, 1, stride, 0, relu=False)
    else:
        identity = x
    out = conv_bn(x, blk['conv1'], 3, 3, stride, 1, relu=True)
    # conv2 + BN + residual add + ReLU, all fused into one GEMM epilogue.
    out = conv_bn(out, blk['conv2'], 3, 3, 1, 1, relu=True, residual=identity)
    return out


def resnet18_forward(params, x_nchw):
    x = jnp.transpose(x_nchw, (0, 2, 3, 1)).astype(jnp.bfloat16)   # NCHW -> NHWC, bf16
    x = conv_bn(x, params['stem'], 7, 7, 2, 3, relu=True)
    x = maxpool_3x3_s2(x)
    for layer, stride in zip(params['layers'], [1, 2, 2, 2]):
        x = basic_block(x, layer[0], stride)
        x = basic_block(x, layer[1], 1)
    x = jnp.mean(x.astype(jnp.float32), axis=(1, 2))               # GAP -> (N, 512) f32
    return pallas_matmul(x, params['fc']['w'], params['fc']['b'],
                         relu=False, out_dtype=jnp.float32)


def ingredient_net_forward(params, rgb_x, deep_x):
    rgb_fv = resnet18_forward(params['rgb'], rgb_x)
    deep_fv = resnet18_forward(params['deep'], deep_x)
    features = jnp.concatenate([rgb_fv, deep_fv], axis=1)
    h = pallas_matmul(features, params['fc1']['w'], params['fc1']['b'], relu=True)
    h = pallas_matmul(h, params['fc2']['w'], params['fc2']['b'], relu=True)
    # TODO(synk): Dropout(0.5) is identity at inference (eval mode); no RNG mask applied.
    out = pallas_matmul(h, params['fc3']['w'], params['fc3']['b'],
                        relu=False, out_dtype=jnp.float32)
    return out


# ----------------------------------------------------------------------------------
# Main
# ----------------------------------------------------------------------------------
if __name__ == "__main__":
    MIDDLE_FEAT = 64
    NUM_CLASSES = 8
    BATCH = 2

    key = jax.random.PRNGKey(0)
    k_params, k_rgb, k_deep = jax.random.split(key, 3)

    params = init_ingredient_net(k_params, MIDDLE_FEAT, NUM_CLASSES)

    # PyTorch-style NCHW inputs (small spatial size; /32 downsampling still valid).
    rgb_x = jax.random.normal(k_rgb, (BATCH, 3, 32, 32), jnp.float32)
    deep_x = jax.random.normal(k_deep, (BATCH, 3, 32, 32), jnp.float32)

    fwd = jax.jit(ingredient_net_forward)
    out = jax.block_until_ready(fwd(params, rgb_x, deep_x))

    assert out.shape == (BATCH, NUM_CLASSES), out.shape
    assert bool(jnp.all(jnp.isfinite(out)))
    print("KERNEL_OK")
</pallas_src>

<mosaic_0001>
module attributes {stable_mosaic.version = 11 : i64} {
  func.func @_mm_kernel(%arg0: i32, %arg1: i32, %arg2: i32, %arg3: memref<512x147xbf16, #tpu.memory_space<vmem>>, %arg4: memref<147x64xbf16, #tpu.memory_space<vmem>>, %arg5: memref<1x64xf32, #tpu.memory_space<vmem>>, %arg6: memref<512x64xbf16, #tpu.memory_space<vmem>>, %arg7: memref<512x64xf32, #tpu.memory_space<vmem>>) attributes {dimension_semantics = [#tpu.dimension_semantics<parallel>, #tpu.dimension_semantics<parallel>, #tpu.dimension_semantics<arbitrary>], iteration_bounds = array<i64: 1, 1, 1>, scalar_prefetch = 0 : i64, scratch_operands = 1 : i64, tpu.core_type = #tpu.core_type<tc>, window_params = [{transform_indices = @transform_0, window_bounds = array<i64: 512, 147>}, {transform_indices = @transform_1, window_bounds = array<i64: 147, 64>}, {transform_indices = @transform_2, window_bounds = array<i64: 1, 64>}, {transform_indices = @transform_3, window_bounds = array<i64: 512, 64>}]} {
    %c0_i32 = arith.constant 0 : i32
    %0 = arith.cmpi eq, %arg2, %c0_i32 : i32
    %1 = arith.extui %0 : i1 to i32
    %c0_i32_0 = arith.constant 0 : i32
    %2 = arith.cmpi ne, %1, %c0_i32_0 : i32
    scf.if %2 {
      %cst_10 = arith.constant 0.000000e+00 : f32
      %12 = vector.broadcast %cst_10 : f32 to vector<512x64xf32>
      %c0_11 = arith.constant 0 : index
      %c0_12 = arith.constant 0 : index
      %13 = vector.load %arg7[%c0_11, %c0_12] : memref<512x64xf32, #tpu.memory_space<vmem>>, vector<512x64xf32>
      tpu.vector_store %arg7[%c0_11, %c0_12], %12 {strides = array<i32>} : memref<512x64xf32, #tpu.memory_space<vmem>>, vector<512x64xf32>,
    } else {
    }
    %c0 = arith.constant 0 : index
    %c0_1 = arith.constant 0 : index
    %3 = vector.load %arg7[%c0, %c0_1] : memref<512x64xf32, #tpu.memory_space<vmem>>, vector<512x64xf32>
    %c0_2 = arith.constant 0 : index
    %c0_3 = arith.constant 0 : index
    %4 = vector.load %arg3[%c0_2, %c0_3] : memref<512x147xbf16, #tpu.memory_space<vmem>>, vector<512x147xbf16>
    %c0_4 = arith.constant 0 : index
    %c0_5 = arith.constant 0 : index
    %5 = vector.load %arg4[%c0_4, %c0_5] : memref<147x64xbf16, #tpu.memory_space<vmem>>, vector<147x64xbf16>
    %cst = arith.constant dense<0.000000e+00> : vector<512x64xf32>
    %6 = tpu.matmul %4, %5, %cst {dimension_numbers = #tpu.dot_dimension_numbers<[1], [0], [0], [1], [0, 0, 1, 1], [], []>} : vector<512x147xbf16>, vector<147x64xbf16>, vector<512x64xf32> -> vector<512x64xf32>
    %7 = arith.addf %3, %6 : vector<512x64xf32>
    %c0_6 = arith.constant 0 : index
    %c0_7 = arith.constant 0 : index
    %8 = vector.load %arg7[%c0_6, %c0_7] : memref<512x64xf32, #tpu.memory_space<vmem>>, vector<512x64xf32>
    tpu.vector_store %arg7[%c0_6, %c0_7], %7 {strides = array<i32>} : memref<512x64xf32, #tpu.memory_space<vmem>>, vector<512x64xf32>,
    %c0_i32_8 = arith.constant 0 : i32
    %9 = arith.cmpi eq, %arg2, %c0_i32_8 : i32
    %10 = arith.extui %9 : i1 to i32
    %c0_i32_9 = arith.constant 0 : i32
    %11 = arith.cmpi ne, %10, %c0_i32_9 : i32
    scf.if %11 {
      %c0_10 = arith.constant 0 : index
      %c0_11 = arith.constant 0 : index
      %12 = vector.load %arg7[%c0_10, %c0_11] : memref<512x64xf32, #tpu.memory_space<vmem>>, vector<512x64xf32>
      %c0_12 = arith.constant 0 : index
      %c0_13 = arith.constant 0 : index
      %13 = vector.load %arg5[%c0_12, %c0_13] : memref<1x64xf32, #tpu.memory_space<vmem>>, vector<1x64xf32>
      %14 = vector.broadcast %13 : vector<1x64xf32> to vector<512x64xf32>
      %15 = arith.addf %12, %14 : vector<512x64xf32>
      %cst_14 = arith.constant 0.000000e+00 : f32
      %16 = vector.broadcast %cst_14 : f32 to vector<512x64xf32>
      %17 = arith.maximumf %15, %16 : vector<512x64xf32>
      %18 = arith.truncf %17 : vector<512x64xf32> to vector<512x64xbf16>
      %c0_15 = arith.constant 0 : index
      %c0_16 = arith.constant 0 : index
      %19 = vector.load %arg6[%c0_15, %c0_16] : memref<512x64xbf16, #tpu.memory_space<vmem>>, vector<512x64xbf16>
      tpu.vector_store %arg6[%c0_15, %c0_16], %18 {strides = array<i32>} : memref<512x64xbf16, #tpu.memory_space<vmem>>, vector<512x64xbf16>,
    } else {
    }
    return
  }
  func.func @transform_0(%arg0: i32, %arg1: i32, %arg2: i32) -> (i32, i32) {
    %c0_i32 = arith.constant 0 : i32
    return %arg0, %arg2 : i32, i32
  }
  func.func @transform_1(%arg0: i32, %arg1: i32, %arg2: i32) -> (i32, i32) {
    %c0_i32 = arith.constant 0 : i32
    return %arg2, %arg1 : i32, i32
  }
  func.func @transform_2(%arg0: i32, %arg1: i32, %arg2: i32) -> (i32, i32) {
    %c0_i32 = arith.constant 0 : i32
    %c0_i32_0 = arith.constant 0 : i32
    return %c0_i32, %arg1 : i32, i32
  }
  func.func @transform_3(%arg0: i32, %arg1: i32, %arg2: i32) -> (i32, i32) {
    %c0_i32 = arith.constant 0 : i32
    return %arg0, %arg1 : i32, i32
  }
}

module attributes {stable_mosaic.version = 11 : i64} {
  func.func @_mm_kernel(%arg0: i32, %arg1: i32, %arg2: i32, %arg3: memref<128x576xbf16, #tpu.memory_space<vmem>>, %arg4: memref<576x64xbf16, #tpu.memory_space<vmem>>, %arg5: memref<1x64xf32, #tpu.memory_space<vmem>>, %arg6: memref<128x64xbf16, #tpu.memory_space<vmem>>, %arg7: memref<128x64xf32, #tpu.memory_space<vmem>>) attributes {dimension_semantics = [#tpu.dimension_semantics<parallel>, #tpu.dimension_semantics<parallel>, #tpu.dimension_semantics<arbitrary>], iteration_bounds = array<i64: 1, 1, 1>, scalar_prefetch = 0 : i64, scratch_operands = 1 : i64, tpu.core_type = #tpu.core_type<tc>, window_params = [{transform_indices = @transform_0, window_bounds = array<i64: 128, 576>}, {transform_indices = @transform_1, window_bounds = array<i64: 576, 64>}, {transform_indices = @transform_2, window_bounds = array<i64: 1, 64>}, {transform_indices = @transform_3, window_bounds = array<i64: 128, 64>}]} {
    %c0_i32 = arith.constant 0 : i32
    %0 = arith.cmpi eq, %arg2, %c0_i32 : i32
    %1 = arith.extui %0 : i1 to i32
    %c0_i32_0 = arith.constant 0 : i32
    %2 = arith.cmpi ne, %1, %c0_i32_0 : i32
    scf.if %2 {
      %cst_10 = arith.constant 0.000000e+00 : f32
      %12 = vector.broadcast %cst_10 : f32 to vector<128x64xf32>
      %c0_11 = arith.constant 0 : index
      %c0_12 = arith.constant 0 : index
      %13 = vector.load %arg7[%c0_11, %c0_12] : memref<128x64xf32, #tpu.memory_space<vmem>>, vector<128x64xf32>
      tpu.vector_store %arg7[%c0_11, %c0_12], %12 {strides = array<i32>} : memref<128x64xf32, #tpu.memory_space<vmem>>, vector<128x64xf32>,
    } else {
    }
    %c0 = arith.constant 0 : index
    %c0_1 = arith.constant 0 : index
    %3 = vector.load %arg7[%c0, %c0_1] : memref<128x64xf32, #tpu.memory_space<vmem>>, vector<128x64xf32>
    %c0_2 = arith.constant 0 : index
    %c0_3 = arith.constant 0 : index
    %4 = vector.load %arg3[%c0_2, %c0_3] : memref<128x576xbf16, #tpu.memory_space<vmem>>, vector<128x576xbf16>
    %c0_4 = arith.constant 0 : index
    %c0_5 = arith.constant 0 : index
    %5 = vector.load %arg4[%c0_4, %c0_5] : memref<576x64xbf16, #tpu.memory_space<vmem>>, vector<576x64xbf16>
    %cst = arith.constant dense<0.000000e+00> : vector<128x64xf32>
    %6 = tpu.matmul %4, %5, %cst {dimension_numbers = #tpu.dot_dimension_numbers<[1], [0], [0], [1], [0, 0, 1, 1], [], []>} : vector<128x576xbf16>, vector<576x64xbf16>, vector<128x64xf32> -> vector<128x64xf32>
    %7 = arith.addf %3, %6 : vector<128x64xf32>
    %c0_6 = arith.constant 0 : index
    %c0_7 = arith.constant 0 : index
    %8 = vector.load %arg7[%c0_6, %c0_7] : memref<128x64xf32, #tpu.memory_space<vmem>>, vector<128x64xf32>
    tpu.vector_store %arg7[%c0_6, %c0_7], %7 {strides = array<i32>} : memref<128x64xf32, #tpu.memory_space<vmem>>, vector<128x64xf32>,
    %c0_i32_8 = arith.constant 0 : i32
    %9 = arith.cmpi eq, %arg2, %c0_i32_8 : i32
    %10 = arith.extui %9 : i1 to i32
    %c0_i32_9 = arith.constant 0 : i32
    %11 = arith.cmpi ne, %10, %c0_i32_9 : i32
    scf.if %11 {
      %c0_10 = arith.constant 0 : index
      %c0_11 = arith.constant 0 : index
      %12 = vector.load %arg7[%c0_10, %c0_11] : memref<128x64xf32, #tpu.memory_space<vmem>>, vector<128x64xf32>
      %c0_12 = arith.constant 0 : index
      %c0_13 = arith.constant 0 : index
      %13 = vector.load %arg5[%c0_12, %c0_13] : memref<1x64xf32, #tpu.memory_space<vmem>>, vector<1x64xf32>
      %14 = vector.broadcast %13 : vector<1x64xf32> to vector<128x64xf32>
      %15 = arith.addf %12, %14 : vector<128x64xf32>
      %cst_14 = arith.constant 0.000000e+00 : f32
      %16 = vector.broadcast %cst_14 : f32 to vector<128x64xf32>
      %17 = arith.maximumf %15, %16 : vector<128x64xf32>
      %18 = arith.truncf %17 : vector<128x64xf32> to vector<128x64xbf16>
      %c0_15 = arith.constant 0 : index
      %c0_16 = arith.constant 0 : index
      %19 = vector.load %arg6[%c0_15, %c0_16] : memref<128x64xbf16, #tpu.memory_space<vmem>>, vector<128x64xbf16>
      tpu.vector_store %arg6[%c0_15, %c0_16], %18 {strides = array<i32>} : memref<128x64xbf16, #tpu.memory_space<vmem>>, vector<128x64xbf16>,
    } else {
    }
    return
  }
  func.func @transform_0(%arg0: i32, %arg1: i32, %arg2: i32) -> (i32, i32) {
    %c0_i32 = arith.constant 0 : i32
    return %arg0, %arg2 : i32, i32
  }
  func.func @transform_1(%arg0: i32, %arg1: i32, %arg2: i32) -> (i32, i32) {
    %c0_i32 = arith.constant 0 : i32
    return %arg2, %arg1 : i32, i32
  }
  func.func @transform_2(%arg0: i32, %arg1: i32, %arg2: i32) -> (i32, i32) {
    %c0_i32 = arith.constant 0 : i32
    %c0_i32_0 = arith.constant 0 : i32
    return %c0_i32, %arg1 : i32, i32
  }
  func.func @transform_3(%arg0: i32, %arg1: i32, %arg2: i32) -> (i32, i32) {
    %c0_i32 = arith.constant 0 : i32
    return %arg0, %arg1 : i32, i32
  }
}

module attributes {stable_mosaic.version = 11 : i64} {
  func.func @_mm_kernel(%arg0: i32, %arg1: i32, %arg2: i32, %arg3: memref<128x576xbf16, #tpu.memory_space<vmem>>, %arg4: memref<576x64xbf16, #tpu.memory_space<vmem>>, %arg5: memref<1x64xf32, #tpu.memory_space<vmem>>, %arg6: memref<128x64xbf16, #tpu.memory_space<vmem>>, %arg7: memref<128x64xbf16, #tpu.memory_space<vmem>>, %arg8: memref<128x64xf32, #tpu.memory_space<vmem>>) attributes {dimension_semantics = [#tpu.dimension_semantics<parallel>, #tpu.dimension_semantics<parallel>, #tpu.dimension_semantics<arbitrary>], iteration_bounds = array<i64: 1, 1, 1>, scalar_prefetch = 0 : i64, scratch_operands = 1 : i64, tpu.core_type = #tpu.core_type<tc>, window_params = [{transform_indices = @transform_0, window_bounds = array<i64: 128, 576>}, {transform_indices = @transform_1, window_bounds = array<i64: 576, 64>}, {transform_indices = @transform_2, window_bounds = array<i64: 1, 64>}, {transform_indices = @transform_3, window_bounds = array<i64: 128, 64>}, {transform_indices = @transform_4, window_bounds = array<i64: 128, 64>}]} {
    %c0_i32 = arith.constant 0 : i32
    %0 = arith.cmpi eq, %arg2, %c0_i32 : i32
    %1 = arith.extui %0 : i1 to i32
    %c0_i32_0 = arith.constant 0 : i32
    %2 = arith.cmpi ne, %1, %c0_i32_0 : i32
    scf.if %2 {
      %cst_10 = arith.constant 0.000000e+00 : f32
      %12 = vector.broadcast %cst_10 : f32 to vector<128x64xf32>
      %c0_11 = arith.constant 0 : index
      %c0_12 = arith.constant 0 : index
      %13 = vector.load %arg8[%c0_11, %c0_12] : memref<128x64xf32, #tpu.memory_space<vmem>>, vector<128x64xf32>
      tpu.vector_store %arg8[%c0_11, %c0_12], %12 {strides = array<i32>} : memref<128x64xf32, #tpu.memory_space<vmem>>, vector<128x64xf32>,
    } else {
    }
    %c0 = arith.constant 0 : index
    %c0_1 = arith.constant 0 : index
    %3 = vector.load %arg8[%c0, %c0_1] : memref<128x64xf32, #tpu.memory_space<vmem>>, vector<128x64xf32>
    %c0_2 = arith.constant 0 : index
    %c0_3 = arith.constant 0 : index
    %4 = vector.load %arg3[%c0_2, %c0_3] : memref<128x576xbf16, #tpu.memory_space<vmem>>, vector<128x576xbf16>
    %c0_4 = arith.constant 0 : index
    %c0_5 = arith.constant 0 : index
    %5 = vector.load %arg4[%c0_4, %c0_5] : memref<576x64xbf16, #tpu.memory_space<vmem>>, vector<576x64xbf16>
    %cst = arith.constant dense<0.000000e+00> : vector<128x64xf32>
    %6 = tpu.matmul %4, %5, %cst {dimension_numbers = #tpu.dot_dimension_numbers<[1], [0], [0], [1], [0, 0, 1, 1], [], []>} : vector<128x576xbf16>, vector<576x64xbf16>, vector<128x64xf32> -> vector<128x64xf32>
    %7 = arith.addf %3, %6 : vector<128x64xf32>
    %c0_6 = arith.constant 0 : index
    %c0_7 = arith.constant 0 : index
    %8 = vector.load %arg8[%c0_6, %c0_7] : memref<128x64xf32, #tpu.memory_space<vmem>>, vector<128x64xf32>
    tpu.vector_store %arg8[%c0_6, %c0_7], %7 {strides = array<i32>} : memref<128x64xf32, #tpu.memory_space<vmem>>, vector<128x64xf32>,
    %c0_i32_8 = arith.constant 0 : i32
    %9 = arith.cmpi eq, %arg2, %c0_i32_8 : i32
    %10 = arith.extui %9 : i1 to i32
    %c0_i32_9 = arith.constant 0 : i32
    %11 = arith.cmpi ne, %10, %c0_i32_9 : i32
    scf.if %11 {
      %c0_10 = arith.constant 0 : index
      %c0_11 = arith.constant 0 : index
      %12 = vector.load %arg8[%c0_10, %c0_11] : memref<128x64xf32, #tpu.memory_space<vmem>>, vector<128x64xf32>
      %c0_12 = arith.constant 0 : index
      %c0_13 = arith.constant 0 : index
      %13 = vector.load %arg5[%c0_12, %c0_13] : memref<1x64xf32, #tpu.memory_space<vmem>>, vector<1x64xf32>
      %14 = vector.broadcast %13 : vector<1x64xf32> to vector<128x64xf32>
      %15 = arith.addf %12, %14 : vector<128x64xf32>
      %c0_14 = arith.constant 0 : index
      %c0_15 = arith.constant 0 : index
      %16 = vector.load %arg6[%c0_14, %c0_15] : memref<128x64xbf16, #tpu.memory_space<vmem>>, vector<128x64xbf16>
      %17 = arith.extf %16 : vector<128x64xbf16> to vector<128x64xf32>
      %18 = arith.addf %15, %17 : vector<128x64xf32>
      %cst_16 = arith.constant 0.000000e+00 : f32
      %19 = vector.broadcast %cst_16 : f32 to vector<128x64xf32>
      %20 = arith.maximumf %18, %19 : vector<128x64xf32>
      %21 = arith.truncf %20 : vector<128x64xf32> to vector<128x64xbf16>
      %c0_17 = arith.constant 0 : index
      %c0_18 = arith.constant 0 : index
      %22 = vector.load %arg7[%c0_17, %c0_18] : memref<128x64xbf16, #tpu.memory_space<vmem>>, vector<128x64xbf16>
      tpu.vector_store %arg7[%c0_17, %c0_18], %21 {strides = array<i32>} : memref<128x64xbf16, #tpu.memory_space<vmem>>, vector<128x64xbf16>,
    } else {
    }
    return
  }
  func.func @transform_0(%arg0: i32, %arg1: i32, %arg2: i32) -> (i32, i32) {
    %c0_i32 = arith.constant 0 : i32
    return %arg0, %arg2 : i32, i32
  }
  func.func @transform_1(%arg0: i32, %arg1: i32, %arg2: i32) -> (i32, i32) {
    %c0_i32 = arith.constant 0 : i32
    return %arg2, %arg1 : i32, i32
  }
  func.func @transform_2(%arg0: i32, %arg1: i32, %arg2: i32) -> (i32, i32) {
    %c0_i32 = arith.constant 0 : i32
    %c0_i32_0 = arith.constant 0 : i32
    return %c0_i32, %arg1 : i32, i32
  }
  func.func @transform_3(%arg0: i32, %arg1: i32, %arg2: i32) -> (i32, i32) {
    %c0_i32 = arith.constant 0 : i32
    return %arg0, %arg1 : i32, i32
  }
  func.func @transform_4(%arg0: i32, %arg1: i32, %arg2: i32) -> (i32, i32) {
    %c0_i32 = arith.constant 0 : i32
    return %arg0, %arg1 : i32, i32
  }
}

module attributes {stable_mosaic.version = 11 : i64} {
  func.func @_mm_kernel(%arg0: i32, %arg1: i32, %arg2: i32, %arg3: memref<32x576xbf16, #tpu.memory_space<vmem>>, %arg4: memref<576x128xbf16, #tpu.memory_space<vmem>>, %arg5: memref<1x128xf32, #tpu.memory_space<vmem>>, %arg6: memref<32x128xbf16, #tpu.memory_space<vmem>>, %arg7: memref<32x128xf32, #tpu.memory_space<vmem>>) attributes {dimension_semantics = [#tpu.dimension_semantics<parallel>, #tpu.dimension_semantics<parallel>, #tpu.dimension_semantics<arbitrary>], iteration_bounds = array<i64: 1, 1, 1>, scalar_prefetch = 0 : i64, scratch_operands = 1 : i64, tpu.core_type = #tpu.core_type<tc>, window_params = [{transform_indices = @transform_0, window_bounds = array<i64: 32, 576>}, {transform_indices = @transform_1, window_bounds = array<i64: 576, 128>}, {transform_indices = @transform_2, window_bounds = array<i64: 1, 128>}, {transform_indices = @transform_3, window_bounds = array<i64: 32, 128>}]} {
    %c0_i32 = arith.constant 0 : i32
    %0 = arith.cmpi eq, %arg2, %c0_i32 : i32
    %1 = arith.extui %0 : i1 to i32
    %c0_i32_0 = arith.constant 0 : i32
    %2 = arith.cmpi ne, %1, %c0_i32_0 : i32
    scf.if %2 {
      %cst_10 = arith.constant 0.000000e+00 : f32
      %12 = vector.broadcast %cst_10 : f32 to vector<32x128xf32>
      %c0_11 = arith.constant 0 : index
      %c0_12 = arith.constant 0 : index
      %13 = vector.load %arg7[%c0_11, %c0_12] : memref<32x128xf32, #tpu.memory_space<vmem>>, vector<32x128xf32>
      tpu.vector_store %arg7[%c0_11, %c0_12], %12 {strides = array<i32>} : memref<32x128xf32, #tpu.memory_space<vmem>>, vector<32x128xf32>,
    } else {
    }
    %c0 = arith.constant 0 : index
    %c0_1 = arith.constant 0 : index
    %3 = vector.load %arg7[%c0, %c0_1] : memref<32x128xf32, #tpu.memory_space<vmem>>, vector<32x128xf32>
    %c0_2 = arith.constant 0 : index
    %c0_3 = arith.constant 0 : index
    %4 = vector.load %arg3[%c0_2, %c0_3] : memref<32x576xbf16, #tpu.memory_space<vmem>>, vector<32x576xbf16>
    %c0_4 = arith.constant 0 : index
    %c0_5 = arith.constant 0 : index
    %5 = vector.load %arg4[%c0_4, %c0_5] : memref<576x128xbf16, #tpu.memory_space<vmem>>, vector<576x128xbf16>
    %cst = arith.constant dense<0.000000e+00> : vector<32x128xf32>
    %6 = tpu.matmul %4, %5, %cst {dimension_numbers = #tpu.dot_dimension_numbers<[1], [0], [0], [1], [0, 0, 1, 1], [], []>} : vector<32x576xbf16>, vector<576x128xbf16>, vector<32x128xf32> -> vector<32x128xf32>
    %7 = arith.addf %3, %6 : vector<32x128xf32>
    %c0_6 = arith.constant 0 : index
    %c0_7 = arith.constant 0 : index
    %8 = vector.load %arg7[%c0_6, %c0_7] : memref<32x128xf32, #tpu.memory_space<vmem>>, vector<32x128xf32>
    tpu.vector_store %arg7[%c0_6, %c0_7], %7 {strides = array<i32>} : memref<32x128xf32, #tpu.memory_space<vmem>>, vector<32x128xf32>,
    %c0_i32_8 = arith.constant 0 : i32
    %9 = arith.cmpi eq, %arg2, %c0_i32_8 : i32
    %10 = arith.extui %9 : i1 to i32
    %c0_i32_9 = arith.constant 0 : i32
    %11 = arith.cmpi ne, %10, %c0_i32_9 : i32
    scf.if %11 {
      %c0_10 = arith.constant 0 : index
      %c0_11 = arith.constant 0 : index
      %12 = vector.load %arg7[%c0_10, %c0_11] : memref<32x128xf32, #tpu.memory_space<vmem>>, vector<32x128xf32>
      %c0_12 = arith.constant 0 : index
      %c0_13 = arith.constant 0 : index
      %13 = vector.load %arg5[%c0_12, %c0_13] : memref<1x128xf32, #tpu.memory_space<vmem>>, vector<1x128xf32>
      %14 = vector.broadcast %13 : vector<1x128xf32> to vector<32x128xf32>
      %15 = arith.addf %12, %14 : vector<32x128xf32>
      %cst_14 = arith.constant 0.000000e+00 : f32
      %16 = vector.broadcast %cst_14 : f32 to vector<32x128xf32>
      %17 = arith.maximumf %15, %16 : vector<32x128xf32>
      %18 = arith.truncf %17 : vector<32x128xf32> to vector<32x128xbf16>
      %c0_15 = arith.constant 0 : index
      %c0_16 = arith.constant 0 : index
      %19 = vector.load %arg6[%c0_15, %c0_16] : memref<32x128xbf16, #tpu.memory_space<vmem>>, vector<32x128xbf16>
      tpu.vector_store %arg6[%c0_15, %c0_16], %18 {strides = array<i32>} : memref<32x128xbf16, #tpu.memory_space<vmem>>, vector<32x128xbf16>,
    } else {
    }
    return
  }
  func.func @transform_0(%arg0: i32, %arg1: i32, %arg2: i32) -> (i32, i32) {
    %c0_i32 = arith.constant 0 : i32
    return %arg0, %arg2 : i32, i32
  }
  func.func @transform_1(%arg0: i32, %arg1: i32, %arg2: i32) -> (i32, i32) {
    %c0_i32 = arith.constant 0 : i32
    return %arg2, %arg1 : i32, i32
  }
  func.func @transform_2(%arg0: i32, %arg1: i32, %arg2: i32) -> (i32, i32) {
    %c0_i32 = arith.constant 0 : i32
    %c0_i32_0 = arith.constant 0 : i32
    return %c0_i32, %arg1 : i32, i32
  }
  func.func @transform_3(%arg0: i32, %arg1: i32, %arg2: i32) -> (i32, i32) {
    %c0_i32 = arith.constant 0 : i32
    return %arg0, %arg1 : i32, i32
  }
}

module attributes {stable_mosaic.version = 11 : i64} {
  func.func @_mm_kernel(%arg0: i32, %arg1: i32, %arg2: i32, %arg3: memref<32x128xbf16, #tpu.memory_space<vmem>>, %arg4: memref<128x128xbf16, #tpu.memory_space<vmem>>, %arg5: memref<1x128xf32, #tpu.memory_space<vmem>>, %arg6: memref<32x128xbf16, #tpu.memory_space<vmem>>, %arg7: memref<32x128xf32, #tpu.memory_space<vmem>>) attributes {dimension_semantics = [#tpu.dimension_semantics<parallel>, #tpu.dimension_semantics<parallel>, #tpu.dimension_semantics<arbitrary>], iteration_bounds = array<i64: 1, 1, 9>, scalar_prefetch = 0 : i64, scratch_operands = 1 : i64, tpu.core_type = #tpu.core_type<tc>, window_params = [{transform_indices = @transform_0, window_bounds = array<i64: 32, 128>}, {transform_indices = @transform_1, window_bounds = array<i64: 128, 128>}, {transform_indices = @transform_2, window_bounds = array<i64: 1, 128>}, {transform_indices = @transform_3, window_bounds = array<i64: 32, 128>}]} {
    %c0_i32 = arith.constant 0 : i32
    %0 = arith.cmpi eq, %arg2, %c0_i32 : i32
    %1 = arith.extui %0 : i1 to i32
    %c0_i32_0 = arith.constant 0 : i32
    %2 = arith.cmpi ne, %1, %c0_i32_0 : i32
    scf.if %2 {
      %cst_9 = arith.constant 0.000000e+00 : f32
      %12 = vector.broadcast %cst_9 : f32 to vector<32x128xf32>
      %c0_10 = arith.constant 0 : index
      %c0_11 = arith.constant 0 : index
      %13 = vector.load %arg7[%c0_10, %c0_11] : memref<32x128xf32, #tpu.memory_space<vmem>>, vector<32x128xf32>
      tpu.vector_store %arg7[%c0_10, %c0_11], %12 {strides = array<i32>} : memref<32x128xf32, #tpu.memory_space<vmem>>, vector<32x128xf32>,
    } else {
    }
    %c0 = arith.constant 0 : index
    %c0_1 = arith.constant 0 : index
    %3 = vector.load %arg7[%c0, %c0_1] : memref<32x128xf32, #tpu.memory_space<vmem>>, vector<32x128xf32>
    %c0_2 = arith.constant 0 : index
    %c0_3 = arith.constant 0 : index
    %4 = vector.load %arg3[%c0_2, %c0_3] : memref<32x128xbf16, #tpu.memory_space<vmem>>, vector<32x128xbf16>
    %c0_4 = arith.constant 0 : index
    %c0_5 = arith.constant 0 : index
    %5 = vector.load %arg4[%c0_4, %c0_5] : memref<128x128xbf16, #tpu.memory_space<vmem>>, vector<128x128xbf16>
    %cst = arith.constant dense<0.000000e+00> : vector<32x128xf32>
    %6 = tpu.matmul %4, %5, %cst {dimension_numbers = #tpu.dot_dimension_numbers<[1], [0], [0], [1], [0, 0, 1, 1], [], []>} : vector<32x128xbf16>, vector<128x128xbf16>, vector<32x128xf32> -> vector<32x128xf32>
    %7 = arith.addf %3, %6 : vector<32x128xf32>
    %c0_6 = arith.constant 0 : index
    %c0_7 = arith.constant 0 : index
    %8 = vector.load %arg7[%c0_6, %c0_7] : memref<32x128xf32, #tpu.memory_space<vmem>>, vector<32x128xf32>
    tpu.vector_store %arg7[%c0_6, %c0_7], %7 {strides = array<i32>} : memref<32x128xf32, #tpu.memory_space<vmem>>, vector<32x128xf32>,
    %c8_i32 = arith.constant 8 : i32
    %9 = arith.cmpi eq, %arg2, %c8_i32 : i32
    %10 = arith.extui %9 : i1 to i32
    %c0_i32_8 = arith.constant 0 : i32
    %11 = arith.cmpi ne, %10, %c0_i32_8 : i32
    scf.if %11 {
      %c0_9 = arith.constant 0 : index
      %c0_10 = arith.constant 0 : index
      %12 = vector.load %arg7[%c0_9, %c0_10] : memref<32x128xf32, #tpu.memory_space<vmem>>, vector<32x128xf32>
      %c0_11 = arith.constant 0 : index
      %c0_12 = arith.constant 0 : index
      %13 = vector.load %arg5[%c0_11, %c0_12] : memref<1x128xf32, #tpu.memory_space<vmem>>, vector<1x128xf32>
      %14 = vector.broadcast %13 : vector<1x128xf32> to vector<32x128xf32>
      %15 = arith.addf %12, %14 : vector<32x128xf32>
      %cst_13 = arith.constant 0.000000e+00 : f32
      %16 = vector.broadcast %cst_13 : f32 to vector<32x128xf32>
      %17 = arith.maximumf %15, %16 : vector<32x128xf32>
      %18 = arith.truncf %17 : vector<32x128xf32> to vector<32x128xbf16>
      %c0_14 = arith.constant 0 : index
      %c0_15 = arith.constant 0 : index
      %19 = vector.load %arg6[%c0_14, %c0_15] : memref<32x128xbf16, #tpu.memory_space<vmem>>, vector<32x128xbf16>
      tpu.vector_store %arg6[%c0_14, %c0_15], %18 {strides = array<i32>} : memref<32x128xbf16, #tpu.memory_space<vmem>>, vector<32x128xbf16>,
    } else {
    }
    return
  }
  func.func @transform_0(%arg0: i32, %arg1: i32, %arg2: i32) -> (i32, i32) {
    %c0_i32 = arith.constant 0 : i32
    return %arg0, %arg2 : i32, i32
  }
  func.func @transform_1(%arg0: i32, %arg1: i32, %arg2: i32) -> (i32, i32) {
    %c0_i32 = arith.constant 0 : i32
    return %arg2, %arg1 : i32, i32
  }
  func.func @transform_2(%arg0: i32, %arg1: i32, %arg2: i32) -> (i32, i32) {
    %c0_i32 = arith.constant 0 : i32
    %c0_i32_0 = arith.constant 0 : i32
    return %c0_i32, %arg1 : i32, i32
  }
  func.func @transform_3(%arg0: i32, %arg1: i32, %arg2: i32) -> (i32, i32) {
    %c0_i32 = arith.constant 0 : i32
    return %arg0, %arg1 : i32, i32
  }
}

module attributes {stable_mosaic.version = 11 : i64} {
  func.func @_mm_kernel(%arg0: i32, %arg1: i32, %arg2: i32, %arg3: memref<32x128xbf16, #tpu.memory_space<vmem>>, %arg4: memref<128x128xbf16, #tpu.memory_space<vmem>>, %arg5: memref<1x128xf32, #tpu.memory_space<vmem>>, %arg6: memref<32x128xbf16, #tpu.memory_space<vmem>>, %arg7: memref<32x128xbf16, #tpu.memory_space<vmem>>, %arg8: memref<32x128xf32, #tpu.memory_space<vmem>>) attributes {dimension_semantics = [#tpu.dimension_semantics<parallel>, #tpu.dimension_semantics<parallel>, #tpu.dimension_semantics<arbitrary>], iteration_bounds = array<i64: 1, 1, 9>, scalar_prefetch = 0 : i64, scratch_operands = 1 : i64, tpu.core_type = #tpu.core_type<tc>, window_params = [{transform_indices = @transform_0, window_bounds = array<i64: 32, 128>}, {transform_indices = @transform_1, window_bounds = array<i64: 128, 128>}, {transform_indices = @transform_2, window_bounds = array<i64: 1, 128>}, {transform_indices = @transform_3, window_bounds = array<i64: 32, 128>}, {transform_indices = @transform_4, window_bounds = array<i64: 32, 128>}]} {
    %c0_i32 = arith.constant 0 : i32
    %0 = arith.cmpi eq, %arg2, %c0_i32 : i32
    %1 = arith.extui %0 : i1 to i32
    %c0_i32_0 = arith.constant 0 : i32
    %2 = arith.cmpi ne, %1, %c0_i32_0 : i32
    scf.if %2 {
      %cst_9 = arith.constant 0.000000e+00 : f32
      %12 = vector.broadcast %cst_9 : f32 to vector<32x128xf32>
      %c0_10 = arith.constant 0 : index
      %c0_11 = arith.constant 0 : index
      %13 = vector.load %arg8[%c0_10, %c0_11] : memref<32x128xf32, #tpu.memory_space<vmem>>, vector<32x128xf32>
      tpu.vector_store %arg8[%c0_10, %c0_11], %12 {strides = array<i32>} : memref<32x128xf32, #tpu.memory_space<vmem>>, vector<32x128xf32>,
    } else {
    }
    %c0 = arith.constant 0 : index
    %c0_1 = arith.constant 0 : index
    %3 = vector.load %arg8[%c0, %c0_1] : memref<32x128xf32, #tpu.memory_space<vmem>>, vector<32x128xf32>
    %c0_2 = arith.constant 0 : index
    %c0_3 = arith.constant 0 : index
    %4 = vector.load %arg3[%c0_2, %c0_3] : memref<32x128xbf16, #tpu.memory_space<vmem>>, vector<32x128xbf16>
    %c0_4 = arith.constant 0 : index
    %c0_5 = arith.constant 0 : index
    %5 = vector.load %arg4[%c0_4, %c0_5] : memref<128x128xbf16, #tpu.memory_space<vmem>>, vector<128x128xbf16>
    %cst = arith.constant dense<0.000000e+00> : vector<32x128xf32>
    %6 = tpu.matmul %4, %5, %cst {dimension_numbers = #tpu.dot_dimension_numbers<[1], [0], [0], [1], [0, 0, 1, 1], [], []>} : vector<32x128xbf16>, vector<128x128xbf16>, vector<32x128xf32> -> vector<32x128xf32>
    %7 = arith.addf %3, %6 : vector<32x128xf32>
    %c0_6 = arith.constant 0 : index
    %c0_7 = arith.constant 0 : index
    %8 = vector.load %arg8[%c0_6, %c0_7] : memref<32x128xf32, #tpu.memory_space<vmem>>, vector<32x128xf32>
    tpu.vector_store %arg8[%c0_6, %c0_7], %7 {strides = array<i32>} : memref<32x128xf32, #tpu.memory_space<vmem>>, vector<32x128xf32>,
    %c8_i32 = arith.constant 8 : i32
    %9 = arith.cmpi eq, %arg2, %c8_i32 : i32
    %10 = arith.extui %9 : i1 to i32
    %c0_i32_8 = arith.constant 0 : i32
    %11 = arith.cmpi ne, %10, %c0_i32_8 : i32
    scf.if %11 {
      %c0_9 = arith.constant 0 : index
      %c0_10 = arith.constant 0 : index
      %12 = vector.load %arg8[%c0_9, %c0_10] : memref<32x128xf32, #tpu.memory_space<vmem>>, vector<32x128xf32>
      %c0_11 = arith.constant 0 : index
      %c0_12 = arith.constant 0 : index
      %13 = vector.load %arg5[%c0_11, %c0_12] : memref<1x128xf32, #tpu.memory_space<vmem>>, vector<1x128xf32>
      %14 = vector.broadcast %13 : vector<1x128xf32> to vector<32x128xf32>
      %15 = arith.addf %12, %14 : vector<32x128xf32>
      %c0_13 = arith.constant 0 : index
      %c0_14 = arith.constant 0 : index
      %16 = vector.load %arg6[%c0_13, %c0_14] : memref<32x128xbf16, #tpu.memory_space<vmem>>, vector<32x128xbf16>
      %17 = arith.extf %16 : vector<32x128xbf16> to vector<32x128xf32>
      %18 = arith.addf %15, %17 : vector<32x128xf32>
      %cst_15 = arith.constant 0.000000e+00 : f32
      %19 = vector.broadcast %cst_15 : f32 to vector<32x128xf32>
      %20 = arith.maximumf %18, %19 : vector<32x128xf32>
      %21 = arith.truncf %20 : vector<32x128xf32> to vector<32x128xbf16>
      %c0_16 = arith.constant 0 : index
      %c0_17 = arith.constant 0 : index
      %22 = vector.load %arg7[%c0_16, %c0_17] : memref<32x128xbf16, #tpu.memory_space<vmem>>, vector<32x128xbf16>
      tpu.vector_store %arg7[%c0_16, %c0_17], %21 {strides = array<i32>} : memref<32x128xbf16, #tpu.memory_space<vmem>>, vector<32x128xbf16>,
    } else {
    }
    return
  }
  func.func @transform_0(%arg0: i32, %arg1: i32, %arg2: i32) -> (i32, i32) {
    %c0_i32 = arith.constant 0 : i32
    return %arg0, %arg2 : i32, i32
  }
  func.func @transform_1(%arg0: i32, %arg1: i32, %arg2: i32) -> (i32, i32) {
    %c0_i32 = arith.constant 0 : i32
    return %arg2, %arg1 : i32, i32
  }
  func.func @transform_2(%arg0: i32, %arg1: i32, %arg2: i32) -> (i32, i32) {
    %c0_i32 = arith.constant 0 : i32
    %c0_i32_0 = arith.constant 0 : i32
    return %c0_i32, %arg1 : i32, i32
  }
  func.func @transform_3(%arg0: i32, %arg1: i32, %arg2: i32) -> (i32, i32) {
    %c0_i32 = arith.constant 0 : i32
    return %arg0, %arg1 : i32, i32
  }
  func.func @transform_4(%arg0: i32, %arg1: i32, %arg2: i32) -> (i32, i32) {
    %c0_i32 = arith.constant 0 : i32
    return %arg0, %arg1 : i32, i32
  }
}

module attributes {stable_mosaic.version = 11 : i64} {
  func.func @_mm_kernel(%arg0: i32, %arg1: i32, %arg2: i32, %arg3: memref<32x64xbf16, #tpu.memory_space<vmem>>, %arg4: memref<64x128xbf16, #tpu.memory_space<vmem>>, %arg5: memref<1x128xf32, #tpu.memory_space<vmem>>, %arg6: memref<32x128xbf16, #tpu.memory_space<vmem>>, %arg7: memref<32x128xf32, #tpu.memory_space<vmem>>) attributes {dimension_semantics = [#tpu.dimension_semantics<parallel>, #tpu.dimension_semantics<parallel>, #tpu.dimension_semantics<arbitrary>], iteration_bounds = array<i64: 1, 1, 1>, scalar_prefetch = 0 : i64, scratch_operands = 1 : i64, tpu.core_type = #tpu.core_type<tc>, window_params = [{transform_indices = @transform_0, window_bounds = array<i64: 32, 64>}, {transform_indices = @transform_1, window_bounds = array<i64: 64, 128>}, {transform_indices = @transform_2, window_bounds = array<i64: 1, 128>}, {transform_indices = @transform_3, window_bounds = array<i64: 32, 128>}]} {
    %c0_i32 = arith.constant 0 : i32
    %0 = arith.cmpi eq, %arg2, %c0_i32 : i32
    %1 = arith.extui %0 : i1 to i32
    %c0_i32_0 = arith.constant 0 : i32
    %2 = arith.cmpi ne, %1, %c0_i32_0 : i32
    scf.if %2 {
      %cst_10 = arith.constant 0.000000e+00 : f32
      %12 = vector.broadcast %cst_10 : f32 to vector<32x128xf32>
      %c0_11 = arith.constant 0 : index
      %c0_12 = arith.constant 0 : index
      %13 = vector.load %arg7[%c0_11, %c0_12] : memref<32x128xf32, #tpu.memory_space<vmem>>, vector<32x128xf32>
      tpu.vector_store %arg7[%c0_11, %c0_12], %12 {strides = array<i32>} : memref<32x128xf32, #tpu.memory_space<vmem>>, vector<32x128xf32>,
    } else {
    }
    %c0 = arith.constant 0 : index
    %c0_1 = arith.constant 0 : index
    %3 = vector.load %arg7[%c0, %c0_1] : memref<32x128xf32, #tpu.memory_space<vmem>>, vector<32x128xf32>
    %c0_2 = arith.constant 0 : index
    %c0_3 = arith.constant 0 : index
    %4 = vector.load %arg3[%c0_2, %c0_3] : memref<32x64xbf16, #tpu.memory_space<vmem>>, vector<32x64xbf16>
    %c0_4 = arith.constant 0 : index
    %c0_5 = arith.constant 0 : index
    %5 = vector.load %arg4[%c0_4, %c0_5] : memref<64x128xbf16, #tpu.memory_space<vmem>>, vector<64x128xbf16>
    %cst = arith.constant dense<0.000000e+00> : vector<32x128xf32>
    %6 = tpu.matmul %4, %5, %cst {dimension_numbers = #tpu.dot_dimension_numbers<[1], [0], [0], [1], [0, 0, 1, 1], [], []>} : vector<32x64xbf16>, vector<64x128xbf16>, vector<32x128xf32> -> vector<32x128xf32>
    %7 = arith.addf %3, %6 : vector<32x128xf32>
    %c0_6 = arith.constant 0 : index
    %c0_7 = arith.constant 0 : index
    %8 = vector.load %arg7[%c0_6, %c0_7] : memref<32x128xf32, #tpu.memory_space<vmem>>, vector<32x128xf32>
    tpu.vector_store %arg7[%c0_6, %c0_7], %7 {strides = array<i32>} : memref<32x128xf32, #tpu.memory_space<vmem>>, vector<32x128xf32>,
    %c0_i32_8 = arith.constant 0 : i32
    %9 = arith.cmpi eq, %arg2, %c0_i32_8 : i32
    %10 = arith.extui %9 : i1 to i32
    %c0_i32_9 = arith.constant 0 : i32
    %11 = arith.cmpi ne, %10, %c0_i32_9 : i32
    scf.if %11 {
      %c0_10 = arith.constant 0 : index
      %c0_11 = arith.constant 0 : index
      %12 = vector.load %arg7[%c0_10, %c0_11] : memref<32x128xf32, #tpu.memory_space<vmem>>, vector<32x128xf32>
      %c0_12 = arith.constant 0 : index
      %c0_13 = arith.constant 0 : index
      %13 = vector.load %arg5[%c0_12, %c0_13] : memref<1x128xf32, #tpu.memory_space<vmem>>, vector<1x128xf32>
      %14 = vector.broadcast %13 : vector<1x128xf32> to vector<32x128xf32>
      %15 = arith.addf %12, %14 : vector<32x128xf32>
      %16 = arith.truncf %15 : vector<32x128xf32> to vector<32x128xbf16>
      %c0_14 = arith.constant 0 : index
      %c0_15 = arith.constant 0 : index
      %17 = vector.load %arg6[%c0_14, %c0_15] : memref<32x128xbf16, #tpu.memory_space<vmem>>, vector<32x128xbf16>
      tpu.vector_store %arg6[%c0_14, %c0_15], %16 {strides = array<i32>} : memref<32x128xbf16, #tpu.memory_space<vmem>>, vector<32x128xbf16>,
    } else {
    }
    return
  }
  func.func @transform_0(%arg0: i32, %arg1: i32, %arg2: i32) -> (i32, i32) {
    %c0_i32 = arith.constant 0 : i32
    return %arg0, %arg2 : i32, i32
  }
  func.func @transform_1(%arg0: i32, %arg1: i32, %arg2: i32) -> (i32, i32) {
    %c0_i32 = arith.constant 0 : i32
    return %arg2, %arg1 : i32, i32
  }
  func.func @transform_2(%arg0: i32, %arg1: i32, %arg2: i32) -> (i32, i32) {
    %c0_i32 = arith.constant 0 : i32
    %c0_i32_0 = arith.constant 0 : i32
    return %c0_i32, %arg1 : i32, i32
  }
  func.func @transform_3(%arg0: i32, %arg1: i32, %arg2: i32) -> (i32, i32) {
    %c0_i32 = arith.constant 0 : i32
    return %arg0, %arg1 : i32, i32
  }
}

module attributes {stable_mosaic.version = 11 : i64} {
  func.func @_mm_kernel(%arg0: i32, %arg1: i32, %arg2: i32, %arg3: memref<8x128xbf16, #tpu.memory_space<vmem>>, %arg4: memref<128x256xbf16, #tpu.memory_space<vmem>>, %arg5: memref<1x256xf32, #tpu.memory_space<vmem>>, %arg6: memref<8x256xbf16, #tpu.memory_space<vmem>>, %arg7: memref<8x256xf32, #tpu.memory_space<vmem>>) attributes {dimension_semantics = [#tpu.dimension_semantics<parallel>, #tpu.dimension_semantics<parallel>, #tpu.dimension_semantics<arbitrary>], iteration_bounds = array<i64: 1, 1, 9>, scalar_prefetch = 0 : i64, scratch_operands = 1 : i64, tpu.core_type = #tpu.core_type<tc>, window_params = [{transform_indices = @transform_0, window_bounds = array<i64: 8, 128>}, {transform_indices = @transform_1, window_bounds = array<i64: 128, 256>}, {transform_indices = @transform_2, window_bounds = array<i64: 1, 256>}, {transform_indices = @transform_3, window_bounds = array<i64: 8, 256>}]} {
    %c0_i32 = arith.constant 0 : i32
    %0 = arith.cmpi eq, %arg2, %c0_i32 : i32
    %1 = arith.extui %0 : i1 to i32
    %c0_i32_0 = arith.constant 0 : i32
    %2 = arith.cmpi ne, %1, %c0_i32_0 : i32
    scf.if %2 {
      %cst_9 = arith.constant 0.000000e+00 : f32
      %12 = vector.broadcast %cst_9 : f32 to vector<8x256xf32>
      %c0_10 = arith.constant 0 : index
      %c0_11 = arith.constant 0 : index
      %13 = vector.load %arg7[%c0_10, %c0_11] : memref<8x256xf32, #tpu.memory_space<vmem>>, vector<8x256xf32>
      tpu.vector_store %arg7[%c0_10, %c0_11], %12 {strides = array<i32>} : memref<8x256xf32, #tpu.memory_space<vmem>>, vector<8x256xf32>,
    } else {
    }
    %c0 = arith.constant 0 : index
    %c0_1 = arith.constant 0 : index
    %3 = vector.load %arg7[%c0, %c0_1] : memref<8x256xf32, #tpu.memory_space<vmem>>, vector<8x256xf32>
    %c0_2 = arith.constant 0 : index
    %c0_3 = arith.constant 0 : index
    %4 = vector.load %arg3[%c0_2, %c0_3] : memref<8x128xbf16, #tpu.memory_space<vmem>>, vector<8x128xbf16>
    %c0_4 = arith.constant 0 : index
    %c0_5 = arith.constant 0 : index
    %5 = vector.load %arg4[%c0_4, %c0_5] : memref<128x256xbf16, #tpu.memory_space<vmem>>, vector<128x256xbf16>
    %cst = arith.constant dense<0.000000e+00> : vector<8x256xf32>
    %6 = tpu.matmul %4, %5, %cst {dimension_numbers = #tpu.dot_dimension_numbers<[1], [0], [0], [1], [0, 0, 1, 1], [], []>} : vector<8x128xbf16>, vector<128x256xbf16>, vector<8x256xf32> -> vector<8x256xf32>
    %7 = arith.addf %3, %6 : vector<8x256xf32>
    %c0_6 = arith.constant 0 : index
    %c0_7 = arith.constant 0 : index
    %8 = vector.load %arg7[%c0_6, %c0_7] : memref<8x256xf32, #tpu.memory_space<vmem>>, vector<8x256xf32>
    tpu.vector_store %arg7[%c0_6, %c0_7], %7 {strides = array<i32>} : memref<8x256xf32, #tpu.memory_space<vmem>>, vector<8x256xf32>,
    %c8_i32 = arith.constant 8 : i32
    %9 = arith.cmpi eq, %arg2, %c8_i32 : i32
    %10 = arith.extui %9 : i1 to i32
    %c0_i32_8 = arith.constant 0 : i32
    %11 = arith.cmpi ne, %10, %c0_i32_8 : i32
    scf.if %11 {
      %c0_9 = arith.constant 0 : index
      %c0_10 = arith.constant 0 : index
      %12 = vector.load %arg7[%c0_9, %c0_10] : memref<8x256xf32, #tpu.memory_space<vmem>>, vector<8x256xf32>
      %c0_11 = arith.constant 0 : index
      %c0_12 = arith.constant 0 : index
      %13 = vector.load %arg5[%c0_11, %c0_12] : memref<1x256xf32, #tpu.memory_space<vmem>>, vector<1x256xf32>
      %14 = vector.broadcast %13 : vector<1x256xf32> to vector<8x256xf32>
      %15 = arith.addf %12, %14 : vector<8x256xf32>
      %cst_13 = arith.constant 0.000000e+00 : f32
      %16 = vector.broadcast %cst_13 : f32 to vector<8x256xf32>
      %17 = arith.maximumf %15, %16 : vector<8x256xf32>
      %18 = arith.truncf %17 : vector<8x256xf32> to vector<8x256xbf16>
      %c0_14 = arith.constant 0 : index
      %c0_15 = arith.constant 0 : index
      %19 = vector.load %arg6[%c0_14, %c0_15] : memref<8x256xbf16, #tpu.memory_space<vmem>>, vector<8x256xbf16>
      tpu.vector_store %arg6[%c0_14, %c0_15], %18 {strides = array<i32>} : memref<8x256xbf16, #tpu.memory_space<vmem>>, vector<8x256xbf16>,
    } else {
    }
    return
  }
  func.func @transform_0(%arg0: i32, %arg1: i32, %arg2: i32) -> (i32, i32) {
    %c0_i32 = arith.constant 0 : i32
    return %arg0, %arg2 : i32, i32
  }
  func.func @transform_1(%arg0: i32, %arg1: i32, %arg2: i32) -> (i32, i32) {
    %c0_i32 = arith.constant 0 : i32
    return %arg2, %arg1 : i32, i32
  }
  func.func @transform_2(%arg0: i32, %arg1: i32, %arg2: i32) -> (i32, i32) {
    %c0_i32 = arith.constant 0 : i32
    %c0_i32_0 = arith.constant 0 : i32
    return %c0_i32, %arg1 : i32, i32
  }
  func.func @transform_3(%arg0: i32, %arg1: i32, %arg2: i32) -> (i32, i32) {
    %c0_i32 = arith.constant 0 : i32
    return %arg0, %arg1 : i32, i32
  }
}

module attributes {stable_mosaic.version = 11 : i64} {
  func.func @_mm_kernel(%arg0: i32, %arg1: i32, %arg2: i32, %arg3: memref<8x256xbf16, #tpu.memory_space<vmem>>, %arg4: memref<256x256xbf16, #tpu.memory_space<vmem>>, %arg5: memref<1x256xf32, #tpu.memory_space<vmem>>, %arg6: memref<8x256xbf16, #tpu.memory_space<vmem>>, %arg7: memref<8x256xbf16, #tpu.memory_space<vmem>>, %arg8: memref<8x256xf32, #tpu.memory_space<vmem>>) attributes {dimension_semantics = [#tpu.dimension_semantics<parallel>, #tpu.dimension_semantics<parallel>, #tpu.dimension_semantics<arbitrary>], iteration_bounds = array<i64: 1, 1, 9>, scalar_prefetch = 0 : i64, scratch_operands = 1 : i64, tpu.core_type = #tpu.core_type<tc>, window_params = [{transform_indices = @transform_0, window_bounds = array<i64: 8, 256>}, {transform_indices = @transform_1, window_bounds = array<i64: 256, 256>}, {transform_indices = @transform_2, window_bounds = array<i64: 1, 256>}, {transform_indices = @transform_3, window_bounds = array<i64: 8, 256>}, {transform_indices = @transform_4, window_bounds = array<i64: 8, 256>}]} {
    %c0_i32 = arith.constant 0 : i32
    %0 = arith.cmpi eq, %arg2, %c0_i32 : i32
    %1 = arith.extui %0 : i1 to i32
    %c0_i32_0 = arith.constant 0 : i32
    %2 = arith.cmpi ne, %1, %c0_i32_0 : i32
    scf.if %2 {
      %cst_9 = arith.constant 0.000000e+00 : f32
      %12 = vector.broadcast %cst_9 : f32 to vector<8x256xf32>
      %c0_10 = arith.constant 0 : index
      %c0_11 = arith.constant 0 : index
      %13 = vector.load %arg8[%c0_10, %c0_11] : memref<8x256xf32, #tpu.memory_space<vmem>>, vector<8x256xf32>
      tpu.vector_store %arg8[%c0_10, %c0_11], %12 {strides = array<i32>} : memref<8x256xf32, #tpu.memory_space<vmem>>, vector<8x256xf32>,
    } else {
    }
    %c0 = arith.constant 0 : index
    %c0_1 = arith.constant 0 : index
    %3 = vector.load %arg8[%c0, %c0_1] : memref<8x256xf32, #tpu.memory_space<vmem>>, vector<8x256xf32>
    %c0_2 = arith.constant 0 : index
    %c0_3 = arith.constant 0 : index
    %4 = vector.load %arg3[%c0_2, %c0_3] : memref<8x256xbf16, #tpu.memory_space<vmem>>, vector<8x256xbf16>
    %c0_4 = arith.constant 0 : index
    %c0_5 = arith.constant 0 : index
    %5 = vector.load %arg4[%c0_4, %c0_5] : memref<256x256xbf16, #tpu.memory_space<vmem>>, vector<256x256xbf16>
    %cst = arith.constant dense<0.000000e+00> : vector<8x256xf32>
    %6 = tpu.matmul %4, %5, %cst {dimension_numbers = #tpu.dot_dimension_numbers<[1], [0], [0], [1], [0, 0, 1, 1], [], []>} : vector<8x256xbf16>, vector<256x256xbf16>, vector<8x256xf32> -> vector<8x256xf32>
    %7 = arith.addf %3, %6 : vector<8x256xf32>
    %c0_6 = arith.constant 0 : index
    %c0_7 = arith.constant 0 : index
    %8 = vector.load %arg8[%c0_6, %c0_7] : memref<8x256xf32, #tpu.memory_space<vmem>>, vector<8x256xf32>
    tpu.vector_store %arg8[%c0_6, %c0_7], %7 {strides = array<i32>} : memref<8x256xf32, #tpu.memory_space<vmem>>, vector<8x256xf32>,
    %c8_i32 = arith.constant 8 : i32
    %9 = arith.cmpi eq, %arg2, %c8_i32 : i32
    %10 = arith.extui %9 : i1 to i32
    %c0_i32_8 = arith.constant 0 : i32
    %11 = arith.cmpi ne, %10, %c0_i32_8 : i32
    scf.if %11 {
      %c0_9 = arith.constant 0 : index
      %c0_10 = arith.constant 0 : index
      %12 = vector.load %arg8[%c0_9, %c0_10] : memref<8x256xf32, #tpu.memory_space<vmem>>, vector<8x256xf32>
      %c0_11 = arith.constant 0 : index
      %c0_12 = arith.constant 0 : index
      %13 = vector.load %arg5[%c0_11, %c0_12] : memref<1x256xf32, #tpu.memory_space<vmem>>, vector<1x256xf32>
      %14 = vector.broadcast %13 : vector<1x256xf32> to vector<8x256xf32>
      %15 = arith.addf %12, %14 : vector<8x256xf32>
      %c0_13 = arith.constant 0 : index
      %c0_14 = arith.constant 0 : index
      %16 = vector.load %arg6[%c0_13, %c0_14] : memref<8x256xbf16, #tpu.memory_space<vmem>>, vector<8x256xbf16>
      %17 = arith.extf %16 : vector<8x256xbf16> to vector<8x256xf32>
      %18 = arith.addf %15, %17 : vector<8x256xf32>
      %cst_15 = arith.constant 0.000000e+00 : f32
      %19 = vector.broadcast %cst_15 : f32 to vector<8x256xf32>
      %20 = arith.maximumf %18, %19 : vector<8x256xf32>
      %21 = arith.truncf %20 : vector<8x256xf32> to vector<8x256xbf16>
      %c0_16 = arith.constant 0 : index
      %c0_17 = arith.constant 0 : index
      %22 = vector.load %arg7[%c0_16, %c0_17] : memref<8x256xbf16, #tpu.memory_space<vmem>>, vector<8x256xbf16>
      tpu.vector_store %arg7[%c0_16, %c0_17], %21 {strides = array<i32>} : memref<8x256xbf16, #tpu.memory_space<vmem>>, vector<8x256xbf16>,
    } else {
    }
    return
  }
  func.func @transform_0(%arg0: i32, %arg1: i32, %arg2: i32) -> (i32, i32) {
    %c0_i32 = arith.constant 0 : i32
    return %arg0, %arg2 : i32, i32
  }
  func.func @transform_1(%arg0: i32, %arg1: i32, %arg2: i32) -> (i32, i32) {
    %c0_i32 = arith.constant 0 : i32
    return %arg2, %arg1 : i32, i32
  }
  func.func @transform_2(%arg0: i32, %arg1: i32, %arg2: i32) -> (i32, i32) {
    %c0_i32 = arith.constant 0 : i32
    %c0_i32_0 = arith.constant 0 : i32
    return %c0_i32, %arg1 : i32, i32
  }
  func.func @transform_3(%arg0: i32, %arg1: i32, %arg2: i32) -> (i32, i32) {
    %c0_i32 = arith.constant 0 : i32
    return %arg0, %arg1 : i32, i32
  }
  func.func @transform_4(%arg0: i32, %arg1: i32, %arg2: i32) -> (i32, i32) {
    %c0_i32 = arith.constant 0 : i32
    return %arg0, %arg1 : i32, i32
  }
}

module attributes {stable_mosaic.version = 11 : i64} {
  func.func @_mm_kernel(%arg0: i32, %arg1: i32, %arg2: i32, %arg3: memref<8x128xbf16, #tpu.memory_space<vmem>>, %arg4: memref<128x256xbf16, #tpu.memory_space<vmem>>, %arg5: memref<1x256xf32, #tpu.memory_space<vmem>>, %arg6: memref<8x256xbf16, #tpu.memory_space<vmem>>, %arg7: memref<8x256xf32, #tpu.memory_space<vmem>>) attributes {dimension_semantics = [#tpu.dimension_semantics<parallel>, #tpu.dimension_semantics<parallel>, #tpu.dimension_semantics<arbitrary>], iteration_bounds = array<i64: 1, 1, 1>, scalar_prefetch = 0 : i64, scratch_operands = 1 : i64, tpu.core_type = #tpu.core_type<tc>, window_params = [{transform_indices = @transform_0, window_bounds = array<i64: 8, 128>}, {transform_indices = @transform_1, window_bounds = array<i64: 128, 256>}, {transform_indices = @transform_2, window_bounds = array<i64: 1, 256>}, {transform_indices = @transform_3, window_bounds = array<i64: 8, 256>}]} {
    %c0_i32 = arith.constant 0 : i32
    %0 = arith.cmpi eq, %arg2, %c0_i32 : i32
    %1 = arith.extui %0 : i1 to i32
    %c0_i32_0 = arith.constant 0 : i32
    %2 = arith.cmpi ne, %1, %c0_i32_0 : i32
    scf.if %2 {
      %cst_10 = arith.constant 0.000000e+00 : f32
      %12 = vector.broadcast %cst_10 : f32 to vector<8x256xf32>
      %c0_11 = arith.constant 0 : index
      %c0_12 = arith.constant 0 : index
      %13 = vector.load %arg7[%c0_11, %c0_12] : memref<8x256xf32, #tpu.memory_space<vmem>>, vector<8x256xf32>
      tpu.vector_store %arg7[%c0_11, %c0_12], %12 {strides = array<i32>} : memref<8x256xf32, #tpu.memory_space<vmem>>, vector<8x256xf32>,
    } else {
    }
    %c0 = arith.constant 0 : index
    %c0_1 = arith.constant 0 : index
    %3 = vector.load %arg7[%c0, %c0_1] : memref<8x256xf32, #tpu.memory_space<vmem>>, vector<8x256xf32>
    %c0_2 = arith.constant 0 : index
    %c0_3 = arith.constant 0 : index
    %4 = vector.load %arg3[%c0_2, %c0_3] : memref<8x128xbf16, #tpu.memory_space<vmem>>, vector<8x128xbf16>
    %c0_4 = arith.constant 0 : index
    %c0_5 = arith.constant 0 : index
    %5 = vector.load %arg4[%c0_4, %c0_5] : memref<128x256xbf16, #tpu.memory_space<vmem>>, vector<128x256xbf16>
    %cst = arith.constant dense<0.000000e+00> : vector<8x256xf32>
    %6 = tpu.matmul %4, %5, %cst {dimension_numbers = #tpu.dot_dimension_numbers<[1], [0], [0], [1], [0, 0, 1, 1], [], []>} : vector<8x128xbf16>, vector<128x256xbf16>, vector<8x256xf32> -> vector<8x256xf32>
    %7 = arith.addf %3, %6 : vector<8x256xf32>
    %c0_6 = arith.constant 0 : index
    %c0_7 = arith.constant 0 : index
    %8 = vector.load %arg7[%c0_6, %c0_7] : memref<8x256xf32, #tpu.memory_space<vmem>>, vector<8x256xf32>
    tpu.vector_store %arg7[%c0_6, %c0_7], %7 {strides = array<i32>} : memref<8x256xf32, #tpu.memory_space<vmem>>, vector<8x256xf32>,
    %c0_i32_8 = arith.constant 0 : i32
    %9 = arith.cmpi eq, %arg2, %c0_i32_8 : i32
    %10 = arith.extui %9 : i1 to i32
    %c0_i32_9 = arith.constant 0 : i32
    %11 = arith.cmpi ne, %10, %c0_i32_9 : i32
    scf.if %11 {
      %c0_10 = arith.constant 0 : index
      %c0_11 = arith.constant 0 : index
      %12 = vector.load %arg7[%c0_10, %c0_11] : memref<8x256xf32, #tpu.memory_space<vmem>>, vector<8x256xf32>
      %c0_12 = arith.constant 0 : index
      %c0_13 = arith.constant 0 : index
      %13 = vector.load %arg5[%c0_12, %c0_13] : memref<1x256xf32, #tpu.memory_space<vmem>>, vector<1x256xf32>
      %14 = vector.broadcast %13 : vector<1x256xf32> to vector<8x256xf32>
      %15 = arith.addf %12, %14 : vector<8x256xf32>
      %16 = arith.truncf %15 : vector<8x256xf32> to vector<8x256xbf16>
      %c0_14 = arith.constant 0 : index
      %c0_15 = arith.constant 0 : index
      %17 = vector.load %arg6[%c0_14, %c0_15] : memref<8x256xbf16, #tpu.memory_space<vmem>>, vector<8x256xbf16>
      tpu.vector_store %arg6[%c0_14, %c0_15], %16 {strides = array<i32>} : memref<8x256xbf16, #tpu.memory_space<vmem>>, vector<8x256xbf16>,
    } else {
    }
    return
  }
  func.func @transform_0(%arg0: i32, %arg1: i32, %arg2: i32) -> (i32, i32) {
    %c0_i32 = arith.constant 0 : i32
    return %arg0, %arg2 : i32, i32
  }
  func.func @transform_1(%arg0: i32, %arg1: i32, %arg2: i32) -> (i32, i32) {
    %c0_i32 = arith.constant 0 : i32
    return %arg2, %arg1 : i32, i32
  }
  func.func @transform_2(%arg0: i32, %arg1: i32, %arg2: i32) -> (i32, i32) {
    %c0_i32 = arith.constant 0 : i32
    %c0_i32_0 = arith.constant 0 : i32
    return %c0_i32, %arg1 : i32, i32
  }
  func.func @transform_3(%arg0: i32, %arg1: i32, %arg2: i32) -> (i32, i32) {
    %c0_i32 = arith.constant 0 : i32
    return %arg0, %arg1 : i32, i32
  }
}

module attributes {stable_mosaic.version = 11 : i64} {
  func.func @_mm_kernel(%arg0: i32, %arg1: i32, %arg2: i32, %arg3: memref<8x256xbf16, #tpu.memory_space<vmem>>, %arg4: memref<256x256xbf16, #tpu.memory_space<vmem>>, %arg5: memref<1x256xf32, #tpu.memory_space<vmem>>, %arg6: memref<8x256xbf16, #tpu.memory_space<vmem>>, %arg7: memref<8x256xf32, #tpu.memory_space<vmem>>) attributes {dimension_semantics = [#tpu.dimension_semantics<parallel>, #tpu.dimension_semantics<parallel>, #tpu.dimension_semantics<arbitrary>], iteration_bounds = array<i64: 1, 1, 9>, scalar_prefetch = 0 : i64, scratch_operands = 1 : i64, tpu.core_type = #tpu.core_type<tc>, window_params = [{transform_indices = @transform_0, window_bounds = array<i64: 8, 256>}, {transform_indices = @transform_1, window_bounds = array<i64: 256, 256>}, {transform_indices = @transform_2, window_bounds = array<i64: 1, 256>}, {transform_indices = @transform_3, window_bounds = array<i64: 8, 256>}]} {
    %c0_i32 = arith.constant 0 : i32
    %0 = arith.cmpi eq, %arg2, %c0_i32 : i32
    %1 = arith.extui %0 : i1 to i32
    %c0_i32_0 = arith.constant 0 : i32
    %2 = arith.cmpi ne, %1, %c0_i32_0 : i32
    scf.if %2 {
      %cst_9 = arith.constant 0.000000e+00 : f32
      %12 = vector.broadcast %cst_9 : f32 to vector<8x256xf32>
      %c0_10 = arith.constant 0 : index
      %c0_11 = arith.constant 0 : index
      %13 = vector.load %arg7[%c0_10, %c0_11] : memref<8x256xf32, #tpu.memory_space<vmem>>, vector<8x256xf32>
      tpu.vector_store %arg7[%c0_10, %c0_11], %12 {strides = array<i32>} : memref<8x256xf32, #tpu.memory_space<vmem>>, vector<8x256xf32>,
    } else {
    }
    %c0 = arith.constant 0 : index
    %c0_1 = arith.constant 0 : index
    %3 = vector.load %arg7[%c0, %c0_1] : memref<8x256xf32, #tpu.memory_space<vmem>>, vector<8x256xf32>
    %c0_2 = arith.constant 0 : index
    %c0_3 = arith.constant 0 : index
    %4 = vector.load %arg3[%c0_2, %c0_3] : memref<8x256xbf16, #tpu.memory_space<vmem>>, vector<8x256xbf16>
    %c0_4 = arith.constant 0 : index
    %c0_5 = arith.constant 0 : index
    %5 = vector.load %arg4[%c0_4, %c0_5] : memref<256x256xbf16, #tpu.memory_space<vmem>>, vector<256x256xbf16>
    %cst = arith.constant dense<0.000000e+00> : vector<8x256xf32>
    %6 = tpu.matmul %4, %5, %cst {dimension_numbers = #tpu.dot_dimension_numbers<[1], [0], [0], [1], [0, 0, 1, 1], [], []>} : vector<8x256xbf16>, vector<256x256xbf16>, vector<8x256xf32> -> vector<8x256xf32>
    %7 = arith.addf %3, %6 : vector<8x256xf32>
    %c0_6 = arith.constant 0 : index
    %c0_7 = arith.constant 0 : index
    %8 = vector.load %arg7[%c0_6, %c0_7] : memref<8x256xf32, #tpu.memory_space<vmem>>, vector<8x256xf32>
    tpu.vector_store %arg7[%c0_6, %c0_7], %7 {strides = array<i32>} : memref<8x256xf32, #tpu.memory_space<vmem>>, vector<8x256xf32>,
    %c8_i32 = arith.constant 8 : i32
    %9 = arith.cmpi eq, %arg2, %c8_i32 : i32
    %10 = arith.extui %9 : i1 to i32
    %c0_i32_8 = arith.constant 0 : i32
    %11 = arith.cmpi ne, %10, %c0_i32_8 : i32
    scf.if %11 {
      %c0_9 = arith.constant 0 : index
      %c0_10 = arith.constant 0 : index
      %12 = vector.load %arg7[%c0_9, %c0_10] : memref<8x256xf32, #tpu.memory_space<vmem>>, vector<8x256xf32>
      %c0_11 = arith.constant 0 : index
      %c0_12 = arith.constant 0 : index
      %13 = vector.load %arg5[%c0_11, %c0_12] : memref<1x256xf32, #tpu.memory_space<vmem>>, vector<1x256xf32>
      %14 = vector.broadcast %13 : vector<1x256xf32> to vector<8x256xf32>
      %15 = arith.addf %12, %14 : vector<8x256xf32>
      %cst_13 = arith.constant 0.000000e+00 : f32
      %16 = vector.broadcast %cst_13 : f32 to vector<8x256xf32>
      %17 = arith.maximumf %15, %16 : vector<8x256xf32>
      %18 = arith.truncf %17 : vector<8x256xf32> to vector<8x256xbf16>
      %c0_14 = arith.constant 0 : index
      %c0_15 = arith.constant 0 : index
      %19 = vector.load %arg6[%c0_14, %c0_15] : memref<8x256xbf16, #tpu.memory_space<vmem>>, vector<8x256xbf16>
      tpu.vector_store %arg6[%c0_14, %c0_15], %18 {strides = array<i32>} : memref<8x256xbf16, #tpu.memory_space<vmem>>, vector<8x256xbf16>,
    } else {
    }
    return
  }
  func.func @transform_0(%arg0: i32, %arg1: i32, %arg2: i32) -> (i32, i32) {
    %c0_i32 = arith.constant 0 : i32
    return %arg0, %arg2 : i32, i32
  }
  func.func @transform_1(%arg0: i32, %arg1: i32, %arg2: i32) -> (i32, i32) {
    %c0_i32 = arith.constant 0 : i32
    return %arg2, %arg1 : i32, i32
  }
  func.func @transform_2(%arg0: i32, %arg1: i32, %arg2: i32) -> (i32, i32) {
    %c0_i32 = arith.constant 0 : i32
    %c0_i32_0 = arith.constant 0 : i32
    return %c0_i32, %arg1 : i32, i32
  }
  func.func @transform_3(%arg0: i32, %arg1: i32, %arg2: i32) -> (i32, i32) {
    %c0_i32 = arith.constant 0 : i32
    return %arg0, %arg1 : i32, i32
  }
}

module attributes {stable_mosaic.version = 11 : i64} {
  func.func @_mm_kernel(%arg0: i32, %arg1: i32, %arg2: i32, %arg3: memref<2x256xbf16, #tpu.memory_space<vmem>>, %arg4: memref<256x512xbf16, #tpu.memory_space<vmem>>, %arg5: memref<1x512xf32, #tpu.memory_space<vmem>>, %arg6: memref<2x512xbf16, #tpu.memory_space<vmem>>, %arg7: memref<2x512xf32, #tpu.memory_space<vmem>>) attributes {dimension_semantics = [#tpu.dimension_semantics<parallel>, #tpu.dimension_semantics<parallel>, #tpu.dimension_semantics<arbitrary>], iteration_bounds = array<i64: 1, 1, 9>, scalar_prefetch = 0 : i64, scratch_operands = 1 : i64, tpu.core_type = #tpu.core_type<tc>, window_params = [{transform_indices = @transform_0, window_bounds = array<i64: 2, 256>}, {transform_indices = @transform_1, window_bounds = array<i64: 256, 512>}, {transform_indices = @transform_2, window_bounds = array<i64: 1, 512>}, {transform_indices = @transform_3, window_bounds = array<i64: 2, 512>}]} {
    %c0_i32 = arith.constant 0 : i32
    %0 = arith.cmpi eq, %arg2, %c0_i32 : i32
    %1 = arith.extui %0 : i1 to i32
    %c0_i32_0 = arith.constant 0 : i32
    %2 = arith.cmpi ne, %1, %c0_i32_0 : i32
    scf.if %2 {
      %cst_9 = arith.constant 0.000000e+00 : f32
      %12 = vector.broadcast %cst_9 : f32 to vector<2x512xf32>
      %c0_10 = arith.constant 0 : index
      %c0_11 = arith.constant 0 : index
      %13 = vector.load %arg7[%c0_10, %c0_11] : memref<2x512xf32, #tpu.memory_space<vmem>>, vector<2x512xf32>
      tpu.vector_store %arg7[%c0_10, %c0_11], %12 {strides = array<i32>} : memref<2x512xf32, #tpu.memory_space<vmem>>, vector<2x512xf32>,
    } else {
    }
    %c0 = arith.constant 0 : index
    %c0_1 = arith.constant 0 : index
    %3 = vector.load %arg7[%c0, %c0_1] : memref<2x512xf32, #tpu.memory_space<vmem>>, vector<2x512xf32>
    %c0_2 = arith.constant 0 : index
    %c0_3 = arith.constant 0 : index
    %4 = vector.load %arg3[%c0_2, %c0_3] : memref<2x256xbf16, #tpu.memory_space<vmem>>, vector<2x256xbf16>
    %c0_4 = arith.constant 0 : index
    %c0_5 = arith.constant 0 : index
    %5 = vector.load %arg4[%c0_4, %c0_5] : memref<256x512xbf16, #tpu.memory_space<vmem>>, vector<256x512xbf16>
    %cst = arith.constant dense<0.000000e+00> : vector<2x512xf32>
    %6 = tpu.matmul %4, %5, %cst {dimension_numbers = #tpu.dot_dimension_numbers<[1], [0], [0], [1], [0, 0, 1, 1], [], []>} : vector<2x256xbf16>, vector<256x512xbf16>, vector<2x512xf32> -> vector<2x512xf32>
    %7 = arith.addf %3, %6 : vector<2x512xf32>
    %c0_6 = arith.constant 0 : index
    %c0_7 = arith.constant 0 : index
    %8 = vector.load %arg7[%c0_6, %c0_7] : memref<2x512xf32, #tpu.memory_space<vmem>>, vector<2x512xf32>
    tpu.vector_store %arg7[%c0_6, %c0_7], %7 {strides = array<i32>} : memref<2x512xf32, #tpu.memory_space<vmem>>, vector<2x512xf32>,
    %c8_i32 = arith.constant 8 : i32
    %9 = arith.cmpi eq, %arg2, %c8_i32 : i32
    %10 = arith.extui %9 : i1 to i32
    %c0_i32_8 = arith.constant 0 : i32
    %11 = arith.cmpi ne, %10, %c0_i32_8 : i32
    scf.if %11 {
      %c0_9 = arith.constant 0 : index
      %c0_10 = arith.constant 0 : index
      %12 = vector.load %arg7[%c0_9, %c0_10] : memref<2x512xf32, #tpu.memory_space<vmem>>, vector<2x512xf32>
      %c0_11 = arith.constant 0 : index
      %c0_12 = arith.constant 0 : index
      %13 = vector.load %arg5[%c0_11, %c0_12] : memref<1x512xf32, #tpu.memory_space<vmem>>, vector<1x512xf32>
      %14 = vector.broadcast %13 : vector<1x512xf32> to vector<2x512xf32>
      %15 = arith.addf %12, %14 : vector<2x512xf32>
      %cst_13 = arith.constant 0.000000e+00 : f32
      %16 = vector.broadcast %cst_13 : f32 to vector<2x512xf32>
      %17 = arith.maximumf %15, %16 : vector<2x512xf32>
      %18 = arith.truncf %17 : vector<2x512xf32> to vector<2x512xbf16>
      %c0_14 = arith.constant 0 : index
      %c0_15 = arith.constant 0 : index
      %19 = vector.load %arg6[%c0_14, %c0_15] : memref<2x512xbf16, #tpu.memory_space<vmem>>, vector<2x512xbf16>
      tpu.vector_store %arg6[%c0_14, %c0_15], %18 {strides = array<i32>} : memref<2x512xbf16, #tpu.memory_space<vmem>>, vector<2x512xbf16>,
    } else {
    }
    return
  }
  func.func @transform_0(%arg0: i32, %arg1: i32, %arg2: i32) -> (i32, i32) {
    %c0_i32 = arith.constant 0 : i32
    return %arg0, %arg2 : i32, i32
  }
  func.func @transform_1(%arg0: i32, %arg1: i32, %arg2: i32) -> (i32, i32) {
    %c0_i32 = arith.constant 0 : i32
    return %arg2, %arg1 : i32, i32
  }
  func.func @transform_2(%arg0: i32, %arg1: i32, %arg2: i32) -> (i32, i32) {
    %c0_i32 = arith.constant 0 : i32
    %c0_i32_0 = arith.constant 0 : i32
    return %c0_i32, %arg1 : i32, i32
  }
  func.func @transform_3(%arg0: i32, %arg1: i32, %arg2: i32) -> (i32, i32) {
    %c0_i32 = arith.constant 0 : i32
    return %arg0, %arg1 : i32, i32
  }
}

module attributes {stable_mosaic.version = 11 : i64} {
  func.func @_mm_kernel(%arg0: i32, %arg1: i32, %arg2: i32, %arg3: memref<2x256xbf16, #tpu.memory_space<vmem>>, %arg4: memref<256x512xbf16, #tpu.memory_space<vmem>>, %arg5: memref<1x512xf32, #tpu.memory_space<vmem>>, %arg6: memref<2x512xbf16, #tpu.memory_space<vmem>>, %arg7: memref<2x512xf32, #tpu.memory_space<vmem>>) attributes {dimension_semantics = [#tpu.dimension_semantics<parallel>, #tpu.dimension_semantics<parallel>, #tpu.dimension_semantics<arbitrary>], iteration_bounds = array<i64: 1, 1, 1>, scalar_prefetch = 0 : i64, scratch_operands = 1 : i64, tpu.core_type = #tpu.core_type<tc>, window_params = [{transform_indices = @transform_0, window_bounds = array<i64: 2, 256>}, {transform_indices = @transform_1, window_bounds = array<i64: 256, 512>}, {transform_indices = @transform_2, window_bounds = array<i64: 1, 512>}, {transform_indices = @transform_3, window_bounds = array<i64: 2, 512>}]} {
    %c0_i32 = arith.constant 0 : i32
    %0 = arith.cmpi eq, %arg2, %c0_i32 : i32
    %1 = arith.extui %0 : i1 to i32
    %c0_i32_0 = arith.constant 0 : i32
    %2 = arith.cmpi ne, %1, %c0_i32_0 : i32
    scf.if %2 {
      %cst_10 = arith.constant 0.000000e+00 : f32
      %12 = vector.broadcast %cst_10 : f32 to vector<2x512xf32>
      %c0_11 = arith.constant 0 : index
      %c0_12 = arith.constant 0 : index
      %13 = vector.load %arg7[%c0_11, %c0_12] : memref<2x512xf32, #tpu.memory_space<vmem>>, vector<2x512xf32>
      tpu.vector_store %arg7[%c0_11, %c0_12], %12 {strides = array<i32>} : memref<2x512xf32, #tpu.memory_space<vmem>>, vector<2x512xf32>,
    } else {
    }
    %c0 = arith.constant 0 : index
    %c0_1 = arith.constant 0 : index
    %3 = vector.load %arg7[%c0, %c0_1] : memref<2x512xf32, #tpu.memory_space<vmem>>, vector<2x512xf32>
    %c0_2 = arith.constant 0 : index
    %c0_3 = arith.constant 0 : index
    %4 = vector.load %arg3[%c0_2, %c0_3] : memref<2x256xbf16, #tpu.memory_space<vmem>>, vector<2x256xbf16>
    %c0_4 = arith.constant 0 : index
    %c0_5 = arith.constant 0 : index
    %5 = vector.load %arg4[%c0_4, %c0_5] : memref<256x512xbf16, #tpu.memory_space<vmem>>, vector<256x512xbf16>
    %cst = arith.constant dense<0.000000e+00> : vector<2x512xf32>
    %6 = tpu.matmul %4, %5, %cst {dimension_numbers = #tpu.dot_dimension_numbers<[1], [0], [0], [1], [0, 0, 1, 1], [], []>} : vector<2x256xbf16>, vector<256x512xbf16>, vector<2x512xf32> -> vector<2x512xf32>
    %7 = arith.addf %3, %6 : vector<2x512xf32>
    %c0_6 = arith.constant 0 : index
    %c0_7 = arith.constant 0 : index
    %8 = vector.load %arg7[%c0_6, %c0_7] : memref<2x512xf32, #tpu.memory_space<vmem>>, vector<2x512xf32>
    tpu.vector_store %arg7[%c0_6, %c0_7], %7 {strides = array<i32>} : memref<2x512xf32, #tpu.memory_space<vmem>>, vector<2x512xf32>,
    %c0_i32_8 = arith.constant 0 : i32
    %9 = arith.cmpi eq, %arg2, %c0_i32_8 : i32
    %10 = arith.extui %9 : i1 to i32
    %c0_i32_9 = arith.constant 0 : i32
    %11 = arith.cmpi ne, %10, %c0_i32_9 : i32
    scf.if %11 {
      %c0_10 = arith.constant 0 : index
      %c0_11 = arith.constant 0 : index
      %12 = vector.load %arg7[%c0_10, %c0_11] : memref<2x512xf32, #tpu.memory_space<vmem>>, vector<2x512xf32>
      %c0_12 = arith.constant 0 : index
      %c0_13 = arith.constant 0 : index
      %13 = vector.load %arg5[%c0_12, %c0_13] : memref<1x512xf32, #tpu.memory_space<vmem>>, vector<1x512xf32>
      %14 = vector.broadcast %13 : vector<1x512xf32> to vector<2x512xf32>
      %15 = arith.addf %12, %14 : vector<2x512xf32>
      %16 = arith.truncf %15 : vector<2x512xf32> to vector<2x512xbf16>
      %c0_14 = arith.constant 0 : index
      %c0_15 = arith.constant 0 : index
      %17 = vector.load %arg6[%c0_14, %c0_15] : memref<2x512xbf16, #tpu.memory_space<vmem>>, vector<2x512xbf16>
      tpu.vector_store %arg6[%c0_14, %c0_15], %16 {strides = array<i32>} : memref<2x512xbf16, #tpu.memory_space<vmem>>, vector<2x512xbf16>,
    } else {
    }
    return
  }
  func.func @transform_0(%arg0: i32, %arg1: i32, %arg2: i32) -> (i32, i32) {
    %c0_i32 = arith.constant 0 : i32
    return %arg0, %arg2 : i32, i32
  }
  func.func @transform_1(%arg0: i32, %arg1: i32, %arg2: i32) -> (i32, i32) {
    %c0_i32 = arith.constant 0 : i32
    return %arg2, %arg1 : i32, i32
  }
  func.func @transform_2(%arg0: i32, %arg1: i32, %arg2: i32) -> (i32, i32) {
    %c0_i32 = arith.constant 0 : i32
    %c0_i32_0 = arith.constant 0 : i32
    return %c0_i32, %arg1 : i32, i32
  }
  func.func @transform_3(%arg0: i32, %arg1: i32, %arg2: i32) -> (i32, i32) {
    %c0_i32 = arith.constant 0 : i32
    return %arg0, %arg1 : i32, i32
  }
}

module attributes {stable_mosaic.version = 11 : i64} {
  func.func @_mm_kernel(%arg0: i32, %arg1: i32, %arg2: i32, %arg3: memref<2x256xbf16, #tpu.memory_space<vmem>>, %arg4: memref<256x512xbf16, #tpu.memory_space<vmem>>, %arg5: memref<1x512xf32, #tpu.memory_space<vmem>>, %arg6: memref<2x512xbf16, #tpu.memory_space<vmem>>, %arg7: memref<2x512xf32, #tpu.memory_space<vmem>>) attributes {dimension_semantics = [#tpu.dimension_semantics<parallel>, #tpu.dimension_semantics<parallel>, #tpu.dimension_semantics<arbitrary>], iteration_bounds = array<i64: 1, 1, 18>, scalar_prefetch = 0 : i64, scratch_operands = 1 : i64, tpu.core_type = #tpu.core_type<tc>, window_params = [{transform_indices = @transform_0, window_bounds = array<i64: 2, 256>}, {transform_indices = @transform_1, window_bounds = array<i64: 256, 512>}, {transform_indices = @transform_2, window_bounds = array<i64: 1, 512>}, {transform_indices = @transform_3, window_bounds = array<i64: 2, 512>}]} {
    %c0_i32 = arith.constant 0 : i32
    %0 = arith.cmpi eq, %arg2, %c0_i32 : i32
    %1 = arith.extui %0 : i1 to i32
    %c0_i32_0 = arith.constant 0 : i32
    %2 = arith.cmpi ne, %1, %c0_i32_0 : i32
    scf.if %2 {
      %cst_9 = arith.constant 0.000000e+00 : f32
      %12 = vector.broadcast %cst_9 : f32 to vector<2x512xf32>
      %c0_10 = arith.constant 0 : index
      %c0_11 = arith.constant 0 : index
      %13 = vector.load %arg7[%c0_10, %c0_11] : memref<2x512xf32, #tpu.memory_space<vmem>>, vector<2x512xf32>
      tpu.vector_store %arg7[%c0_10, %c0_11], %12 {strides = array<i32>} : memref<2x512xf32, #tpu.memory_space<vmem>>, vector<2x512xf32>,
    } else {
    }
    %c0 = arith.constant 0 : index
    %c0_1 = arith.constant 0 : index
    %3 = vector.load %arg7[%c0, %c0_1] : memref<2x512xf32, #tpu.memory_space<vmem>>, vector<2x512xf32>
    %c0_2 = arith.constant 0 : index
    %c0_3 = arith.constant 0 : index
    %4 = vector.load %arg3[%c0_2, %c0_3] : memref<2x256xbf16, #tpu.memory_space<vmem>>, vector<2x256xbf16>
    %c0_4 = arith.constant 0 : index
    %c0_5 = arith.constant 0 : index
    %5 = vector.load %arg4[%c0_4, %c0_5] : memref<256x512xbf16, #tpu.memory_space<vmem>>, vector<256x512xbf16>
    %cst = arith.constant dense<0.000000e+00> : vector<2x512xf32>
    %6 = tpu.matmul %4, %5, %cst {dimension_numbers = #tpu.dot_dimension_numbers<[1], [0], [0], [1], [0, 0, 1, 1], [], []>} : vector<2x256xbf16>, vector<256x512xbf16>, vector<2x512xf32> -> vector<2x512xf32>
    %7 = arith.addf %3, %6 : vector<2x512xf32>
    %c0_6 = arith.constant 0 : index
    %c0_7 = arith.constant 0 : index
    %8 = vector.load %arg7[%c0_6, %c0_7] : memref<2x512xf32, #tpu.memory_space<vmem>>, vector<2x512xf32>
    tpu.vector_store %arg7[%c0_6, %c0_7], %7 {strides = array<i32>} : memref<2x512xf32, #tpu.memory_space<vmem>>, vector<2x512xf32>,
    %c17_i32 = arith.constant 17 : i32
    %9 = arith.cmpi eq, %arg2, %c17_i32 : i32
    %10 = arith.extui %9 : i1 to i32
    %c0_i32_8 = arith.constant 0 : i32
    %11 = arith.cmpi ne, %10, %c0_i32_8 : i32
    scf.if %11 {
      %c0_9 = arith.constant 0 : index
      %c0_10 = arith.constant 0 : index
      %12 = vector.load %arg7[%c0_9, %c0_10] : memref<2x512xf32, #tpu.memory_space<vmem>>, vector<2x512xf32>
      %c0_11 = arith.constant 0 : index
      %c0_12 = arith.constant 0 : index
      %13 = vector.load %arg5[%c0_11, %c0_12] : memref<1x512xf32, #tpu.memory_space<vmem>>, vector<1x512xf32>
      %14 = vector.broadcast %13 : vector<1x512xf32> to vector<2x512xf32>
      %15 = arith.addf %12, %14 : vector<2x512xf32>
      %cst_13 = arith.constant 0.000000e+00 : f32
      %16 = vector.broadcast %cst_13 : f32 to vector<2x512xf32>
      %17 = arith.maximumf %15, %16 : vector<2x512xf32>
      %18 = arith.truncf %17 : vector<2x512xf32> to vector<2x512xbf16>
      %c0_14 = arith.constant 0 : index
      %c0_15 = arith.constant 0 : index
      %19 = vector.load %arg6[%c0_14, %c0_15] : memref<2x512xbf16, #tpu.memory_space<vmem>>, vector<2x512xbf16>
      tpu.vector_store %arg6[%c0_14, %c0_15], %18 {strides = array<i32>} : memref<2x512xbf16, #tpu.memory_space<vmem>>, vector<2x512xbf16>,
    } else {
    }
    return
  }
  func.func @transform_0(%arg0: i32, %arg1: i32, %arg2: i32) -> (i32, i32) {
    %c0_i32 = arith.constant 0 : i32
    return %arg0, %arg2 : i32, i32
  }
  func.func @transform_1(%arg0: i32, %arg1: i32, %arg2: i32) -> (i32, i32) {
    %c0_i32 = arith.constant 0 : i32
    return %arg2, %arg1 : i32, i32
  }
  func.func @transform_2(%arg0: i32, %arg1: i32, %arg2: i32) -> (i32, i32) {
    %c0_i32 = arith.constant 0 : i32
    %c0_i32_0 = arith.constant 0 : i32
    return %c0_i32, %arg1 : i32, i32
  }
  func.func @transform_3(%arg0: i32, %arg1: i32, %arg2: i32) -> (i32, i32) {
    %c0_i32 = arith.constant 0 : i32
    return %arg0, %arg1 : i32, i32
  }
}

module attributes {stable_mosaic.version = 11 : i64} {
  func.func @_mm_kernel(%arg0: i32, %arg1: i32, %arg2: i32, %arg3: memref<2x256xbf16, #tpu.memory_space<vmem>>, %arg4: memref<256x512xbf16, #tpu.memory_space<vmem>>, %arg5: memref<1x512xf32, #tpu.memory_space<vmem>>, %arg6: memref<2x512xbf16, #tpu.memory_space<vmem>>, %arg7: memref<2x512xbf16, #tpu.memory_space<vmem>>, %arg8: memref<2x512xf32, #tpu.memory_space<vmem>>) attributes {dimension_semantics = [#tpu.dimension_semantics<parallel>, #tpu.dimension_semantics<parallel>, #tpu.dimension_semantics<arbitrary>], iteration_bounds = array<i64: 1, 1, 18>, scalar_prefetch = 0 : i64, scratch_operands = 1 : i64, tpu.core_type = #tpu.core_type<tc>, window_params = [{transform_indices = @transform_0, window_bounds = array<i64: 2, 256>}, {transform_indices = @transform_1, window_bounds = array<i64: 256, 512>}, {transform_indices = @transform_2, window_bounds = array<i64: 1, 512>}, {transform_indices = @transform_3, window_bounds = array<i64: 2, 512>}, {transform_indices = @transform_4, window_bounds = array<i64: 2, 512>}]} {
    %c0_i32 = arith.constant 0 : i32
    %0 = arith.cmpi eq, %arg2, %c0_i32 : i32
    %1 = arith.extui %0 : i1 to i32
    %c0_i32_0 = arith.constant 0 : i32
    %2 = arith.cmpi ne, %1, %c0_i32_0 : i32
    scf.if %2 {
      %cst_9 = arith.constant 0.000000e+00 : f32
      %12 = vector.broadcast %cst_9 : f32 to vector<2x512xf32>
      %c0_10 = arith.constant 0 : index
      %c0_11 = arith.constant 0 : index
      %13 = vector.load %arg8[%c0_10, %c0_11] : memref<2x512xf32, #tpu.memory_space<vmem>>, vector<2x512xf32>
      tpu.vector_store %arg8[%c0_10, %c0_11], %12 {strides = array<i32>} : memref<2x512xf32, #tpu.memory_space<vmem>>, vector<2x512xf32>,
    } else {
    }
    %c0 = arith.constant 0 : index
    %c0_1 = arith.constant 0 : index
    %3 = vector.load %arg8[%c0, %c0_1] : memref<2x512xf32, #tpu.memory_space<vmem>>, vector<2x512xf32>
    %c0_2 = arith.constant 0 : index
    %c0_3 = arith.constant 0 : index
    %4 = vector.load %arg3[%c0_2, %c0_3] : memref<2x256xbf16, #tpu.memory_space<vmem>>, vector<2x256xbf16>
    %c0_4 = arith.constant 0 : index
    %c0_5 = arith.constant 0 : index
    %5 = vector.load %arg4[%c0_4, %c0_5] : memref<256x512xbf16, #tpu.memory_space<vmem>>, vector<256x512xbf16>
    %cst = arith.constant dense<0.000000e+00> : vector<2x512xf32>
    %6 = tpu.matmul %4, %5, %cst {dimension_numbers = #tpu.dot_dimension_numbers<[1], [0], [0], [1], [0, 0, 1, 1], [], []>} : vector<2x256xbf16>, vector<256x512xbf16>, vector<2x512xf32> -> vector<2x512xf32>
    %7 = arith.addf %3, %6 : vector<2x512xf32>
    %c0_6 = arith.constant 0 : index
    %c0_7 = arith.constant 0 : index
    %8 = vector.load %arg8[%c0_6, %c0_7] : memref<2x512xf32, #tpu.memory_space<vmem>>, vector<2x512xf32>
    tpu.vector_store %arg8[%c0_6, %c0_7], %7 {strides = array<i32>} : memref<2x512xf32, #tpu.memory_space<vmem>>, vector<2x512xf32>,
    %c17_i32 = arith.constant 17 : i32
    %9 = arith.cmpi eq, %arg2, %c17_i32 : i32
    %10 = arith.extui %9 : i1 to i32
    %c0_i32_8 = arith.constant 0 : i32
    %11 = arith.cmpi ne, %10, %c0_i32_8 : i32
    scf.if %11 {
      %c0_9 = arith.constant 0 : index
      %c0_10 = arith.constant 0 : index
      %12 = vector.load %arg8[%c0_9, %c0_10] : memref<2x512xf32, #tpu.memory_space<vmem>>, vector<2x512xf32>
      %c0_11 = arith.constant 0 : index
      %c0_12 = arith.constant 0 : index
      %13 = vector.load %arg5[%c0_11, %c0_12] : memref<1x512xf32, #tpu.memory_space<vmem>>, vector<1x512xf32>
      %14 = vector.broadcast %13 : vector<1x512xf32> to vector<2x512xf32>
      %15 = arith.addf %12, %14 : vector<2x512xf32>
      %c0_13 = arith.constant 0 : index
      %c0_14 = arith.constant 0 : index
      %16 = vector.load %arg6[%c0_13, %c0_14] : memref<2x512xbf16, #tpu.memory_space<vmem>>, vector<2x512xbf16>
      %17 = arith.extf %16 : vector<2x512xbf16> to vector<2x512xf32>
      %18 = arith.addf %15, %17 : vector<2x512xf32>
      %cst_15 = arith.constant 0.000000e+00 : f32
      %19 = vector.broadcast %cst_15 : f32 to vector<2x512xf32>
      %20 = arith.maximumf %18, %19 : vector<2x512xf32>
      %21 = arith.truncf %20 : vector<2x512xf32> to vector<2x512xbf16>
      %c0_16 = arith.constant 0 : index
      %c0_17 = arith.constant 0 : index
      %22 = vector.load %arg7[%c0_16, %c0_17] : memref<2x512xbf16, #tpu.memory_space<vmem>>, vector<2x512xbf16>
      tpu.vector_store %arg7[%c0_16, %c0_17], %21 {strides = array<i32>} : memref<2x512xbf16, #tpu.memory_space<vmem>>, vector<2x512xbf16>,
    } else {
    }
    return
  }
  func.func @transform_0(%arg0: i32, %arg1: i32, %arg2: i32) -> (i32, i32) {
    %c0_i32 = arith.constant 0 : i32
    return %arg0, %arg2 : i32, i32
  }
  func.func @transform_1(%arg0: i32, %arg1: i32, %arg2: i32) -> (i32, i32) {
    %c0_i32 = arith.constant 0 : i32
    return %arg2, %arg1 : i32, i32
  }
  func.func @transform_2(%arg0: i32, %arg1: i32, %arg2: i32) -> (i32, i32) {
    %c0_i32 = arith.constant 0 : i32
    %c0_i32_0 = arith.constant 0 : i32
    return %c0_i32, %arg1 : i32, i32
  }
  func.func @transform_3(%arg0: i32, %arg1: i32, %arg2: i32) -> (i32, i32) {
    %c0_i32 = arith.constant 0 : i32
    return %arg0, %arg1 : i32, i32
  }
  func.func @transform_4(%arg0: i32, %arg1: i32, %arg2: i32) -> (i32, i32) {
    %c0_i32 = arith.constant 0 : i32
    return %arg0, %arg1 : i32, i32
  }
}

module attributes {stable_mosaic.version = 11 : i64} {
  func.func @_mm_kernel(%arg0: i32, %arg1: i32, %arg2: i32, %arg3: memref<2x256xbf16, #tpu.memory_space<vmem>>, %arg4: memref<256x64xbf16, #tpu.memory_space<vmem>>, %arg5: memref<1x64xf32, #tpu.memory_space<vmem>>, %arg6: memref<2x64xf32, #tpu.memory_space<vmem>>, %arg7: memref<2x64xf32, #tpu.memory_space<vmem>>) attributes {dimension_semantics = [#tpu.dimension_semantics<parallel>, #tpu.dimension_semantics<parallel>, #tpu.dimension_semantics<arbitrary>], iteration_bounds = array<i64: 1, 1, 2>, scalar_prefetch = 0 : i64, scratch_operands = 1 : i64, tpu.core_type = #tpu.core_type<tc>, window_params = [{transform_indices = @transform_0, window_bounds = array<i64: 2, 256>}, {transform_indices = @transform_1, window_bounds = array<i64: 256, 64>}, {transform_indices = @transform_2, window_bounds = array<i64: 1, 64>}, {transform_indices = @transform_3, window_bounds = array<i64: 2, 64>}]} {
    %c0_i32 = arith.constant 0 : i32
    %0 = arith.cmpi eq, %arg2, %c0_i32 : i32
    %1 = arith.extui %0 : i1 to i32
    %c0_i32_0 = arith.constant 0 : i32
    %2 = arith.cmpi ne, %1, %c0_i32_0 : i32
    scf.if %2 {
      %cst_9 = arith.constant 0.000000e+00 : f32
      %12 = vector.broadcast %cst_9 : f32 to vector<2x64xf32>
      %c0_10 = arith.constant 0 : index
      %c0_11 = arith.constant 0 : index
      %13 = vector.load %arg7[%c0_10, %c0_11] : memref<2x64xf32, #tpu.memory_space<vmem>>, vector<2x64xf32>
      tpu.vector_store %arg7[%c0_10, %c0_11], %12 {strides = array<i32>} : memref<2x64xf32, #tpu.memory_space<vmem>>, vector<2x64xf32>,
    } else {
    }
    %c0 = arith.constant 0 : index
    %c0_1 = arith.constant 0 : index
    %3 = vector.load %arg7[%c0, %c0_1] : memref<2x64xf32, #tpu.memory_space<vmem>>, vector<2x64xf32>
    %c0_2 = arith.constant 0 : index
    %c0_3 = arith.constant 0 : index
    %4 = vector.load %arg3[%c0_2, %c0_3] : memref<2x256xbf16, #tpu.memory_space<vmem>>, vector<2x256xbf16>
    %c0_4 = arith.constant 0 : index
    %c0_5 = arith.constant 0 : index
    %5 = vector.load %arg4[%c0_4, %c0_5] : memref<256x64xbf16, #tpu.memory_space<vmem>>, vector<256x64xbf16>
    %cst = arith.constant dense<0.000000e+00> : vector<2x64xf32>
    %6 = tpu.matmul %4, %5, %cst {dimension_numbers = #tpu.dot_dimension_numbers<[1], [0], [0], [1], [0, 0, 1, 1], [], []>} : vector<2x256xbf16>, vector<256x64xbf16>, vector<2x64xf32> -> vector<2x64xf32>
    %7 = arith.addf %3, %6 : vector<2x64xf32>
    %c0_6 = arith.constant 0 : index
    %c0_7 = arith.constant 0 : index
    %8 = vector.load %arg7[%c0_6, %c0_7] : memref<2x64xf32, #tpu.memory_space<vmem>>, vector<2x64xf32>
    tpu.vector_store %arg7[%c0_6, %c0_7], %7 {strides = array<i32>} : memref<2x64xf32, #tpu.memory_space<vmem>>, vector<2x64xf32>,
    %c1_i32 = arith.constant 1 : i32
    %9 = arith.cmpi eq, %arg2, %c1_i32 : i32
    %10 = arith.extui %9 : i1 to i32
    %c0_i32_8 = arith.constant 0 : i32
    %11 = arith.cmpi ne, %10, %c0_i32_8 : i32
    scf.if %11 {
      %c0_9 = arith.constant 0 : index
      %c0_10 = arith.constant 0 : index
      %12 = vector.load %arg7[%c0_9, %c0_10] : memref<2x64xf32, #tpu.memory_space<vmem>>, vector<2x64xf32>
      %c0_11 = arith.constant 0 : index
      %c0_12 = arith.constant 0 : index
      %13 = vector.load %arg5[%c0_11, %c0_12] : memref<1x64xf32, #tpu.memory_space<vmem>>, vector<1x64xf32>
      %14 = vector.broadcast %13 : vector<1x64xf32> to vector<2x64xf32>
      %15 = arith.addf %12, %14 : vector<2x64xf32>
      %c0_13 = arith.constant 0 : index
      %c0_14 = arith.constant 0 : index
      %16 = vector.load %arg6[%c0_13, %c0_14] : memref<2x64xf32, #tpu.memory_space<vmem>>, vector<2x64xf32>
      tpu.vector_store %arg6[%c0_13, %c0_14], %15 {strides = array<i32>} : memref<2x64xf32, #tpu.memory_space<vmem>>, vector<2x64xf32>,
    } else {
    }
    return
  }
  func.func @transform_0(%arg0: i32, %arg1: i32, %arg2: i32) -> (i32, i32) {
    %c0_i32 = arith.constant 0 : i32
    return %arg0, %arg2 : i32, i32
  }
  func.func @transform_1(%arg0: i32, %arg1: i32, %arg2: i32) -> (i32, i32) {
    %c0_i32 = arith.constant 0 : i32
    return %arg2, %arg1 : i32, i32
  }
  func.func @transform_2(%arg0: i32, %arg1: i32, %arg2: i32) -> (i32, i32) {
    %c0_i32 = arith.constant 0 : i32
    %c0_i32_0 = arith.constant 0 : i32
    return %c0_i32, %arg1 : i32, i32
  }
  func.func @transform_3(%arg0: i32, %arg1: i32, %arg2: i32) -> (i32, i32) {
    %c0_i32 = arith.constant 0 : i32
    return %arg0, %arg1 : i32, i32
  }
}

module attributes {stable_mosaic.version = 11 : i64} {
  func.func @_mm_kernel(%arg0: i32, %arg1: i32, %arg2: i32, %arg3: memref<2x128xbf16, #tpu.memory_space<vmem>>, %arg4: memref<128x512xbf16, #tpu.memory_space<vmem>>, %arg5: memref<1x512xf32, #tpu.memory_space<vmem>>, %arg6: memref<2x512xbf16, #tpu.memory_space<vmem>>, %arg7: memref<2x512xf32, #tpu.memory_space<vmem>>) attributes {dimension_semantics = [#tpu.dimension_semantics<parallel>, #tpu.dimension_semantics<parallel>, #tpu.dimension_semantics<arbitrary>], iteration_bounds = array<i64: 1, 2, 1>, scalar_prefetch = 0 : i64, scratch_operands = 1 : i64, tpu.core_type = #tpu.core_type<tc>, window_params = [{transform_indices = @transform_0, window_bounds = array<i64: 2, 128>}, {transform_indices = @transform_1, window_bounds = array<i64: 128, 512>}, {transform_indices = @transform_2, window_bounds = array<i64: 1, 512>}, {transform_indices = @transform_3, window_bounds = array<i64: 2, 512>}]} {
    %c0_i32 = arith.constant 0 : i32
    %0 = arith.cmpi eq, %arg2, %c0_i32 : i32
    %1 = arith.extui %0 : i1 to i32
    %c0_i32_0 = arith.constant 0 : i32
    %2 = arith.cmpi ne, %1, %c0_i32_0 : i32
    scf.if %2 {
      %cst_10 = arith.constant 0.000000e+00 : f32
      %12 = vector.broadcast %cst_10 : f32 to vector<2x512xf32>
      %c0_11 = arith.constant 0 : index
      %c0_12 = arith.constant 0 : index
      %13 = vector.load %arg7[%c0_11, %c0_12] : memref<2x512xf32, #tpu.memory_space<vmem>>, vector<2x512xf32>
      tpu.vector_store %arg7[%c0_11, %c0_12], %12 {strides = array<i32>} : memref<2x512xf32, #tpu.memory_space<vmem>>, vector<2x512xf32>,
    } else {
    }
    %c0 = arith.constant 0 : index
    %c0_1 = arith.constant 0 : index
    %3 = vector.load %arg7[%c0, %c0_1] : memref<2x512xf32, #tpu.memory_space<vmem>>, vector<2x512xf32>
    %c0_2 = arith.constant 0 : index
    %c0_3 = arith.constant 0 : index
    %4 = vector.load %arg3[%c0_2, %c0_3] : memref<2x128xbf16, #tpu.memory_space<vmem>>, vector<2x128xbf16>
    %c0_4 = arith.constant 0 : index
    %c0_5 = arith.constant 0 : index
    %5 = vector.load %arg4[%c0_4, %c0_5] : memref<128x512xbf16, #tpu.memory_space<vmem>>, vector<128x512xbf16>
    %cst = arith.constant dense<0.000000e+00> : vector<2x512xf32>
    %6 = tpu.matmul %4, %5, %cst {dimension_numbers = #tpu.dot_dimension_numbers<[1], [0], [0], [1], [0, 0, 1, 1], [], []>} : vector<2x128xbf16>, vector<128x512xbf16>, vector<2x512xf32> -> vector<2x512xf32>
    %7 = arith.addf %3, %6 : vector<2x512xf32>
    %c0_6 = arith.constant 0 : index
    %c0_7 = arith.constant 0 : index
    %8 = vector.load %arg7[%c0_6, %c0_7] : memref<2x512xf32, #tpu.memory_space<vmem>>, vector<2x512xf32>
    tpu.vector_store %arg7[%c0_6, %c0_7], %7 {strides = array<i32>} : memref<2x512xf32, #tpu.memory_space<vmem>>, vector<2x512xf32>,
    %c0_i32_8 = arith.constant 0 : i32
    %9 = arith.cmpi eq, %arg2, %c0_i32_8 : i32
    %10 = arith.extui %9 : i1 to i32
    %c0_i32_9 = arith.constant 0 : i32
    %11 = arith.cmpi ne, %10, %c0_i32_9 : i32
    scf.if %11 {
      %c0_10 = arith.constant 0 : index
      %c0_11 = arith.constant 0 : index
      %12 = vector.load %arg7[%c0_10, %c0_11] : memref<2x512xf32, #tpu.memory_space<vmem>>, vector<2x512xf32>
      %c0_12 = arith.constant 0 : index
      %c0_13 = arith.constant 0 : index
      %13 = vector.load %arg5[%c0_12, %c0_13] : memref<1x512xf32, #tpu.memory_space<vmem>>, vector<1x512xf32>
      %14 = vector.broadcast %13 : vector<1x512xf32> to vector<2x512xf32>
      %15 = arith.addf %12, %14 : vector<2x512xf32>
      %cst_14 = arith.constant 0.000000e+00 : f32
      %16 = vector.broadcast %cst_14 : f32 to vector<2x512xf32>
      %17 = arith.maximumf %15, %16 : vector<2x512xf32>
      %18 = arith.truncf %17 : vector<2x512xf32> to vector<2x512xbf16>
      %c0_15 = arith.constant 0 : index
      %c0_16 = arith.constant 0 : index
      %19 = vector.load %arg6[%c0_15, %c0_16] : memref<2x512xbf16, #tpu.memory_space<vmem>>, vector<2x512xbf16>
      tpu.vector_store %arg6[%c0_15, %c0_16], %18 {strides = array<i32>} : memref<2x512xbf16, #tpu.memory_space<vmem>>, vector<2x512xbf16>,
    } else {
    }
    return
  }
  func.func @transform_0(%arg0: i32, %arg1: i32, %arg2: i32) -> (i32, i32) {
    %c0_i32 = arith.constant 0 : i32
    return %arg0, %arg2 : i32, i32
  }
  func.func @transform_1(%arg0: i32, %arg1: i32, %arg2: i32) -> (i32, i32) {
    %c0_i32 = arith.constant 0 : i32
    return %arg2, %arg1 : i32, i32
  }
  func.func @transform_2(%arg0: i32, %arg1: i32, %arg2: i32) -> (i32, i32) {
    %c0_i32 = arith.constant 0 : i32
    %c0_i32_0 = arith.constant 0 : i32
    return %c0_i32, %arg1 : i32, i32
  }
  func.func @transform_3(%arg0: i32, %arg1: i32, %arg2: i32) -> (i32, i32) {
    %c0_i32 = arith.constant 0 : i32
    return %arg0, %arg1 : i32, i32
  }
}

module attributes {stable_mosaic.version = 11 : i64} {
  func.func @_mm_kernel(%arg0: i32, %arg1: i32, %arg2: i32, %arg3: memref<2x256xbf16, #tpu.memory_space<vmem>>, %arg4: memref<256x512xbf16, #tpu.memory_space<vmem>>, %arg5: memref<1x512xf32, #tpu.memory_space<vmem>>, %arg6: memref<2x512xbf16, #tpu.memory_space<vmem>>, %arg7: memref<2x512xf32, #tpu.memory_space<vmem>>) attributes {dimension_semantics = [#tpu.dimension_semantics<parallel>, #tpu.dimension_semantics<parallel>, #tpu.dimension_semantics<arbitrary>], iteration_bounds = array<i64: 1, 1, 4>, scalar_prefetch = 0 : i64, scratch_operands = 1 : i64, tpu.core_type = #tpu.core_type<tc>, window_params = [{transform_indices = @transform_0, window_bounds = array<i64: 2, 256>}, {transform_indices = @transform_1, window_bounds = array<i64: 256, 512>}, {transform_indices = @transform_2, window_bounds = array<i64: 1, 512>}, {transform_indices = @transform_3, window_bounds = array<i64: 2, 512>}]} {
    %c0_i32 = arith.constant 0 : i32
    %0 = arith.cmpi eq, %arg2, %c0_i32 : i32
    %1 = arith.extui %0 : i1 to i32
    %c0_i32_0 = arith.constant 0 : i32
    %2 = arith.cmpi ne, %1, %c0_i32_0 : i32
    scf.if %2 {
      %cst_9 = arith.constant 0.000000e+00 : f32
      %12 = vector.broadcast %cst_9 : f32 to vector<2x512xf32>
      %c0_10 = arith.constant 0 : index
      %c0_11 = arith.constant 0 : index
      %13 = vector.load %arg7[%c0_10, %c0_11] : memref<2x512xf32, #tpu.memory_space<vmem>>, vector<2x512xf32>
      tpu.vector_store %arg7[%c0_10, %c0_11], %12 {strides = array<i32>} : memref<2x512xf32, #tpu.memory_space<vmem>>, vector<2x512xf32>,
    } else {
    }
    %c0 = arith.constant 0 : index
    %c0_1 = arith.constant 0 : index
    %3 = vector.load %arg7[%c0, %c0_1] : memref<2x512xf32, #tpu.memory_space<vmem>>, vector<2x512xf32>
    %c0_2 = arith.constant 0 : index
    %c0_3 = arith.constant 0 : index
    %4 = vector.load %arg3[%c0_2, %c0_3] : memref<2x256xbf16, #tpu.memory_space<vmem>>, vector<2x256xbf16>
    %c0_4 = arith.constant 0 : index
    %c0_5 = arith.constant 0 : index
    %5 = vector.load %arg4[%c0_4, %c0_5] : memref<256x512xbf16, #tpu.memory_space<vmem>>, vector<256x512xbf16>
    %cst = arith.constant dense<0.000000e+00> : vector<2x512xf32>
    %6 = tpu.matmul %4, %5, %cst {dimension_numbers = #tpu.dot_dimension_numbers<[1], [0], [0], [1], [0, 0, 1, 1], [], []>} : vector<2x256xbf16>, vector<256x512xbf16>, vector<2x512xf32> -> vector<2x512xf32>
    %7 = arith.addf %3, %6 : vector<2x512xf32>
    %c0_6 = arith.constant 0 : index
    %c0_7 = arith.constant 0 : index
    %8 = vector.load %arg7[%c0_6, %c0_7] : memref<2x512xf32, #tpu.memory_space<vmem>>, vector<2x512xf32>
    tpu.vector_store %arg7[%c0_6, %c0_7], %7 {strides = array<i32>} : memref<2x512xf32, #tpu.memory_space<vmem>>, vector<2x512xf32>,
    %c3_i32 = arith.constant 3 : i32
    %9 = arith.cmpi eq, %arg2, %c3_i32 : i32
    %10 = arith.extui %9 : i1 to i32
    %c0_i32_8 = arith.constant 0 : i32
    %11 = arith.cmpi ne, %10, %c0_i32_8 : i32
    scf.if %11 {
      %c0_9 = arith.constant 0 : index
      %c0_10 = arith.constant 0 : index
      %12 = vector.load %arg7[%c0_9, %c0_10] : memref<2x512xf32, #tpu.memory_space<vmem>>, vector<2x512xf32>
      %c0_11 = arith.constant 0 : index
      %c0_12 = arith.constant 0 : index
      %13 = vector.load %arg5[%c0_11, %c0_12] : memref<1x512xf32, #tpu.memory_space<vmem>>, vector<1x512xf32>
      %14 = vector.broadcast %13 : vector<1x512xf32> to vector<2x512xf32>
      %15 = arith.addf %12, %14 : vector<2x512xf32>
      %cst_13 = arith.constant 0.000000e+00 : f32
      %16 = vector.broadcast %cst_13 : f32 to vector<2x512xf32>
      %17 = arith.maximumf %15, %16 : vector<2x512xf32>
      %18 = arith.truncf %17 : vector<2x512xf32> to vector<2x512xbf16>
      %c0_14 = arith.constant 0 : index
      %c0_15 = arith.constant 0 : index
      %19 = vector.load %arg6[%c0_14, %c0_15] : memref<2x512xbf16, #tpu.memory_space<vmem>>, vector<2x512xbf16>
      tpu.vector_store %arg6[%c0_14, %c0_15], %18 {strides = array<i32>} : memref<2x512xbf16, #tpu.memory_space<vmem>>, vector<2x512xbf16>,
    } else {
    }
    return
  }
  func.func @transform_0(%arg0: i32, %arg1: i32, %arg2: i32) -> (i32, i32) {
    %c0_i32 = arith.constant 0 : i32
    return %arg0, %arg2 : i32, i32
  }
  func.func @transform_1(%arg0: i32, %arg1: i32, %arg2: i32) -> (i32, i32) {
    %c0_i32 = arith.constant 0 : i32
    return %arg2, %arg1 : i32, i32
  }
  func.func @transform_2(%arg0: i32, %arg1: i32, %arg2: i32) -> (i32, i32) {
    %c0_i32 = arith.constant 0 : i32
    %c0_i32_0 = arith.constant 0 : i32
    return %c0_i32, %arg1 : i32, i32
  }
  func.func @transform_3(%arg0: i32, %arg1: i32, %arg2: i32) -> (i32, i32) {
    %c0_i32 = arith.constant 0 : i32
    return %arg0, %arg1 : i32, i32
  }
}

module attributes {stable_mosaic.version = 11 : i64} {
  func.func @_mm_kernel(%arg0: i32, %arg1: i32, %arg2: i32, %arg3: memref<2x256xbf16, #tpu.memory_space<vmem>>, %arg4: memref<256x8xbf16, #tpu.memory_space<vmem>>, %arg5: memref<1x8xf32, #tpu.memory_space<vmem>>, %arg6: memref<2x8xf32, #tpu.memory_space<vmem>>, %arg7: memref<2x8xf32, #tpu.memory_space<vmem>>) attributes {dimension_semantics = [#tpu.dimension_semantics<parallel>, #tpu.dimension_semantics<parallel>, #tpu.dimension_semantics<arbitrary>], iteration_bounds = array<i64: 1, 1, 2>, scalar_prefetch = 0 : i64, scratch_operands = 1 : i64, tpu.core_type = #tpu.core_type<tc>, window_params = [{transform_indices = @transform_0, window_bounds = array<i64: 2, 256>}, {transform_indices = @transform_1, window_bounds = array<i64: 256, 8>}, {transform_indices = @transform_2, window_bounds = array<i64: 1, 8>}, {transform_indices = @transform_3, window_bounds = array<i64: 2, 8>}]} {
    %c0_i32 = arith.constant 0 : i32
    %0 = arith.cmpi eq, %arg2, %c0_i32 : i32
    %1 = arith.extui %0 : i1 to i32
    %c0_i32_0 = arith.constant 0 : i32
    %2 = arith.cmpi ne, %1, %c0_i32_0 : i32
    scf.if %2 {
      %cst_9 = arith.constant 0.000000e+00 : f32
      %12 = vector.broadcast %cst_9 : f32 to vector<2x8xf32>
      %c0_10 = arith.constant 0 : index
      %c0_11 = arith.constant 0 : index
      %13 = vector.load %arg7[%c0_10, %c0_11] : memref<2x8xf32, #tpu.memory_space<vmem>>, vector<2x8xf32>
      tpu.vector_store %arg7[%c0_10, %c0_11], %12 {strides = array<i32>} : memref<2x8xf32, #tpu.memory_space<vmem>>, vector<2x8xf32>,
    } else {
    }
    %c0 = arith.constant 0 : index
    %c0_1 = arith.constant 0 : index
    %3 = vector.load %arg7[%c0, %c0_1] : memref<2x8xf32, #tpu.memory_space<vmem>>, vector<2x8xf32>
    %c0_2 = arith.constant 0 : index
    %c0_3 = arith.constant 0 : index
    %4 = vector.load %arg3[%c0_2, %c0_3] : memref<2x256xbf16, #tpu.memory_space<vmem>>, vector<2x256xbf16>
    %c0_4 = arith.constant 0 : index
    %c0_5 = arith.constant 0 : index
    %5 = vector.load %arg4[%c0_4, %c0_5] : memref<256x8xbf16, #tpu.memory_space<vmem>>, vector<256x8xbf16>
    %cst = arith.constant dense<0.000000e+00> : vector<2x8xf32>
    %6 = tpu.matmul %4, %5, %cst {dimension_numbers = #tpu.dot_dimension_numbers<[1], [0], [0], [1], [0, 0, 1, 1], [], []>} : vector<2x256xbf16>, vector<256x8xbf16>, vector<2x8xf32> -> vector<2x8xf32>
    %7 = arith.addf %3, %6 : vector<2x8xf32>
    %c0_6 = arith.constant 0 : index
    %c0_7 = arith.constant 0 : index
    %8 = vector.load %arg7[%c0_6, %c0_7] : memref<2x8xf32, #tpu.memory_space<vmem>>, vector<2x8xf32>
    tpu.vector_store %arg7[%c0_6, %c0_7], %7 {strides = array<i32>} : memref<2x8xf32, #tpu.memory_space<vmem>>, vector<2x8xf32>,
    %c1_i32 = arith.constant 1 : i32
    %9 = arith.cmpi eq, %arg2, %c1_i32 : i32
    %10 = arith.extui %9 : i1 to i32
    %c0_i32_8 = arith.constant 0 : i32
    %11 = arith.cmpi ne, %10, %c0_i32_8 : i32
    scf.if %11 {
      %c0_9 = arith.constant 0 : index
      %c0_10 = arith.constant 0 : index
      %12 = vector.load %arg7[%c0_9, %c0_10] : memref<2x8xf32, #tpu.memory_space<vmem>>, vector<2x8xf32>
      %c0_11 = arith.constant 0 : index
      %c0_12 = arith.constant 0 : index
      %13 = vector.load %arg5[%c0_11, %c0_12] : memref<1x8xf32, #tpu.memory_space<vmem>>, vector<1x8xf32>
      %14 = vector.broadcast %13 : vector<1x8xf32> to vector<2x8xf32>
      %15 = arith.addf %12, %14 : vector<2x8xf32>
      %c0_13 = arith.constant 0 : index
      %c0_14 = arith.constant 0 : index
      %16 = vector.load %arg6[%c0_13, %c0_14] : memref<2x8xf32, #tpu.memory_space<vmem>>, vector<2x8xf32>
      tpu.vector_store %arg6[%c0_13, %c0_14], %15 {strides = array<i32>} : memref<2x8xf32, #tpu.memory_space<vmem>>, vector<2x8xf32>,
    } else {
    }
    return
  }
  func.func @transform_0(%arg0: i32, %arg1: i32, %arg2: i32) -> (i32, i32) {
    %c0_i32 = arith.constant 0 : i32
    return %arg0, %arg2 : i32, i32
  }
  func.func @transform_1(%arg0: i32, %arg1: i32, %arg2: i32) -> (i32, i32) {
    %c0_i32 = arith.constant 0 : i32
    return %arg2, %arg1 : i32, i32
  }
  func.func @transform_2(%arg0: i32, %arg1: i32, %arg2: i32) -> (i32, i32) {
    %c0_i32 = arith.constant 0 : i32
    %c0_i32_0 = arith.constant 0 : i32
    return %c0_i32, %arg1 : i32, i32
  }
  func.func @transform_3(%arg0: i32, %arg1: i32, %arg2: i32) -> (i32, i32) {
    %c0_i32 = arith.constant 0 : i32
    return %arg0, %arg1 : i32, i32
  }
}

</mosaic_0001>

<bundles_post_ra>
// kernel: ingredient_net_forward.47
= control target key start
LH: loop header
LB: loop body
LE: loop exit
PB: predicated region body
PF: predicated region fallthrough
CT: control target
= control target key end

     0   :  { %vm22_vm0 = vcmask 523264   ;;  %vm1109_vm1 = vcmask 519168   ;;  %s2060_s1 = inlined_call_operand.vmem [shape: bf16[576,64], index: 1, kind: input, shape index: {}]   ;;  %s2061_s0 = inlined_call_operand.vmem [shape: bf16[128,576], index: 0, kind: input, shape index: {}]   ;;  %s2062_s3 = inlined_call_operand.vmem [shape: bf16[128,64], index: 3, kind: input, shape index: {}]   ;;  %s2063_s2 = inlined_call_operand.vmem [shape: f32[1,64], index: 2, kind: input, shape index: {}]   ;;  %s2064_s4 = inlined_call_operand.vmem [shape: bf16[128,64], index: 4, kind: output, shape index: {}]  }
   0x1   :  { %v1459_v0 = vld [vmem:[%s2060_s1 + $0x40] sm:$0xff]   ;;  %v1463_v4 = vld [vmem:[%s2060_s1 + $0x48] sm:$0xff]   ;;  %v1467_v8 = vld [vmem:[%s2060_s1 + $0x50] sm:$0xff]  }
   0x2   :  { %v1460_v1 = vld [vmem:[%s2060_s1 + $0xc0] sm:$0xff]   ;;  %1286 = vmatprep.subr.bf16.mxu0 %v1459_v0  ;;  %v1464_v5 = vld [vmem:[%s2060_s1 + $0xc8] sm:$0xff]   ;;  %v1468_v9 = vld [vmem:[%s2060_s1 + $0xd0] sm:$0xff]  }
   0x3   :  { %v1461_v2 = vld [vmem:[%s2060_s1] sm:$0xff]   ;;  %1350 = vmatprep.subr.bf16.mxu1 %v1460_v1  ;;  %v1465_v6 = vld [vmem:[%s2060_s1 + $0x8] sm:$0xff]   ;;  %v1469_v10 = vld [vmem:[%s2060_s1 + $0x10] sm:$0xff]  }
   0x4   :  { %v1462_v3 = vld [vmem:[%s2060_s1 + $0x80] sm:$0xff]   ;;  %1287 = vmatpush3.bf16.msra.mxu0 %v1461_v2  ;;  %v1466_v7 = vld [vmem:[%s2060_s1 + $0x88] sm:$0xff]   ;;  %v1470_v11 = vld [vmem:[%s2060_s1 + $0x90] sm:$0xff]  }
   0x5   :  { %1351 = vmatpush3.bf16.msra.mxu1 %v1462_v3  ;;  %1288 = vmatprep.subr.bf16.mxu0 %v1463_v4  ;;  %v1471_v12 = vld [vmem:[%s2060_s1 + $0x58] sm:$0xff]   ;;  %v1475_v16 = vld [vmem:[%s2060_s1 + $0x60] sm:$0xff]   ;;  %v1479_v20 = vld [vmem:[%s2060_s1 + $0x68] sm:$0xff]  }
   0x6   :  { %1352 = vmatprep.subr.bf16.mxu1 %v1464_v5  ;;  %v1472_v13 = vld [vmem:[%s2060_s1 + $0xd8] sm:$0xff]   ;;  %v1476_v17 = vld [vmem:[%s2060_s1 + $0xe0] sm:$0xff]   ;;  %v1480_v21 = vld [vmem:[%s2060_s1 + $0xe8] sm:$0xff]  }
   0x7   :  { %v1473_v14 = vld [vmem:[%s2060_s1 + $0x18] sm:$0xff]   ;;  %v1477_v18 = vld [vmem:[%s2060_s1 + $0x20] sm:$0xff]   ;;  %v1481_v22 = vld [vmem:[%s2060_s1 + $0x28] sm:$0xff]  }
   0x8   :  { %1289 = vmatpush3.bf16.msra.mxu0 %v1465_v6  ;;  %v1474_v15 = vld [vmem:[%s2060_s1 + $0x98] sm:$0xff]   ;;  %v1478_v19 = vld [vmem:[%s2060_s1 + $0xa0] sm:$0xff]   ;;  %v1482_v23 = vld [vmem:[%s2060_s1 + $0xa8] sm:$0xff]  }
   0x9   :  { %1353 = vmatpush3.bf16.msra.mxu1 %v1466_v7  ;;  %1290 = vmatprep.subr.bf16.mxu0 %v1467_v8  ;;  %v1483_v24 = vld [vmem:[%s2060_s1 + $0x70] sm:$0xff]   ;;  %v1487_v28 = vld [vmem:[%s2060_s1 + $0x78] sm:$0xff]   ;;  %v1496_v35 = vld [vmem:[%s2061_s0 + $0xc] ss:$20 sps:$4 sm:$0xff]  }
   0xa   :  { %1354 = vmatprep.subr.bf16.mxu1 %v1468_v9  ;;  %v1484_v25 = vld [vmem:[%s2060_s1 + $0xf0] sm:$0xff]   ;;  %v1488_v29 = vld [vmem:[%s2060_s1 + $0xf8] sm:$0xff]   ;;  %v1497_v36 = vld [vmem:[%s2060_s1 + $0x100] sm:$0xff]   ;;  %745 = vmatprep.mubr.bf16.mxu1 %v1496_v35 }
   0xb   :  { %v1485_v26 = vld [vmem:[%s2060_s1 + $0x30] sm:$0xff]   ;;  %v1489_v30 = vld [vmem:[%s2060_s1 + $0x38] sm:$0xff]   ;;  %v1498_v37 = vld [vmem:[%s2061_s0 + $0x2c] ss:$20 sps:$4 sm:$0xff]  }
   0xc   :  { %1291 = vmatpush3.bf16.msra.mxu0 %v1469_v10  ;;  %v1486_v27 = vld [vmem:[%s2060_s1 + $0xb0] sm:$0xff]   ;;  %v1490_v31 = vld [vmem:[%s2060_s1 + $0xb8] sm:$0xff]   ;;  %v1510_v42 = vld [vmem:[%s2060_s1 + $0x108] sm:$0xff]  }
   0xd   :  { %1355 = vmatpush3.bf16.msra.mxu1 %v1470_v11  ;;  %1292 = vmatprep.subr.bf16.mxu0 %v1471_v12  ;;  %v1491_v32 = vld [vmem:[%s2061_s0] ss:$20 sps:$4 sm:$0xff]   ;;  %v1493_v33 = vld [vmem:[%s2061_s0 + $0x4] ss:$20 sps:$4 sm:$0xff]   ;;  %v1494_v34 = vld [vmem:[%s2061_s0 + $0x8] ss:$20 sps:$4 sm:$0xff]  }
   0xe   :  { %1356 = vmatprep.subr.bf16.mxu1 %v1472_v13  ;;  %648 = vmatprep.mubr.bf16.mxu0 %v1493_v33  ;;  %v1500_v38 = vld [vmem:[%s2061_s0 + $0x34] ss:$20 sps:$4 sm:$0xff]   ;;  %v1503_v40 = vld [vmem:[%s2061_s0 + $0x30] ss:$20 sps:$4 sm:$0xff]   ;;  %v1509_v45 = vld [vmem:[%s2061_s0 + $0x58] ss:$20 sps:$4 sm:$0xff]  }
   0xf   :  { %v1502_v39 = vld [vmem:[%s2061_s0 + $0x28] ss:$20 sps:$4 sm:$0xff]   ;;  %v1508_v44 = vld [vmem:[%s2061_s0 + $0x50] ss:$20 sps:$4 sm:$0xff]   ;;  %v1515_v50 = vld [vmem:[%s2061_s0 + $0x78] ss:$20 sps:$4 sm:$0xff]  }
  0x10   :  { %1293 = vmatpush3.bf16.msra.mxu0 %v1473_v14  ;;  %v1504_v41 = vld [vmem:[%s2061_s0 + $0x54] ss:$20 sps:$4 sm:$0xff]   ;;  %v1506_v43 = vld [vmem:[%s2061_s0 + $0x5c] ss:$20 sps:$4 sm:$0xff]   ;;  %v1513_v48 = vld [vmem:[%s2061_s0 + $0x84] ss:$20 sps:$4 sm:$0xff]  }
  0x11   :  { %1357 = vmatpush3.bf16.msra.mxu1 %v1474_v15  ;;  %1294 = vmatprep.subr.bf16.mxu0 %v1475_v16  ;;  %v1523_v46 = vld [vmem:[%s2060_s1 + $0x110] sm:$0xff]   ;;  %v1536_v49 = vld [vmem:[%s2060_s1 + $0x118] sm:$0xff]   ;;  %v1519_v53 = vld [vmem:[%s2061_s0 + $0xac] ss:$20 sps:$4 sm:$0xff]   ;;  %v1551_v12 = vmov 0.0  }
  0x12   :  { %1358 = vmatprep.subr.bf16.mxu1 %v1476_v17  ;;  %v1511_v47 = vld [vmem:[%s2061_s0 + $0x7c] ss:$20 sps:$4 sm:$0xff]   ;;  %v1516_v51 = vld [vmem:[%s2061_s0 + $0x80] ss:$20 sps:$4 sm:$0xff]   ;;  %v1517_v52 = vld [vmem:[%s2061_s0 + $0xa4] ss:$20 sps:$4 sm:$0xff]  }
  0x13   :  { %v1521_v54 = vld [vmem:[%s2061_s0 + $0xa0] ss:$20 sps:$4 sm:$0xff]   ;;  %v1522_v55 = vld [vmem:[%s2061_s0 + $0xa8] ss:$20 sps:$4 sm:$0xff]   ;;  %v1529_v59 = vld [vmem:[%s2061_s0 + $0xd0] ss:$20 sps:$4 sm:$0xff]  }
  0x14   :  { %1295 = vmatpush3.bf16.msra.mxu0 %v1477_v18  ;;  %v1524_v56 = vld [vmem:[%s2061_s0 + $0xcc] ss:$20 sps:$4 sm:$0xff]   ;;  %v1526_v57 = vld [vmem:[%s2061_s0 + $0xd4] ss:$20 sps:$4 sm:$0xff]   ;;  %v1532_v61 = vld [vmem:[%s2061_s0 + $0xfc] ss:$20 sps:$4 sm:$0xff]  }
  0x15   :  { %1359 = vmatpush3.bf16.msra.mxu1 %v1478_v19  ;;  %1296 = vmatprep.subr.bf16.mxu0 %v1479_v20  ;;  %v1528_v58 = vld [vmem:[%s2061_s0 + $0xc8] ss:$20 sps:$4 sm:$0xff]   ;;  %v1534_v62 = vld [vmem:[%s2061_s0 + $0xf0] ss:$20 sps:$4 sm:$0xff]   ;;  %v1535_v63 = vld [vmem:[%s2061_s0 + $0xf8] ss:$20 sps:$4 sm:$0xff]  }
  0x16   :  { %1360 = vmatprep.subr.bf16.mxu1 %v1480_v21  ;;  %v1530_v60 = vld [vmem:[%s2061_s0 + $0xf4] ss:$20 sps:$4 sm:$0xff]   ;;  %v1537_v0 = vld [vmem:[%s2061_s0 + $0x11c] ss:$20 sps:$4 sm:$0xff]   ;;  %v1539_v1 = vld [vmem:[%s2061_s0 + $0x124] ss:$20 sps:$4 sm:$0xff]  }
  0x17   :  { %v1541_v2 = vld [vmem:[%s2061_s0 + $0x118] ss:$20 sps:$4 sm:$0xff]   ;;  %v1542_v3 = vld [vmem:[%s2061_s0 + $0x120] ss:$20 sps:$4 sm:$0xff]   ;;  %v1543_v4 = vld [vmem:[%s2061_s0 + $0x10] ss:$20 sps:$4 sm:$0xff]  }
  0x18   :  { %1297 = vmatpush3.bf16.msra.mxu0 %v1481_v22  ;;  %v1544_v5 = vld [vmem:[%s2061_s0 + $0xb0] ss:$20 sps:$4 sm:$0xff]   ;;  %v1545_v6 = vld [vmem:[%s2061_s0 + $0x38] ss:$20 sps:$4 sm:$0xff]   ;;  %v1547_v8 = vld [vmem:[%s2061_s0 + $0x60] ss:$20 sps:$4 sm:$0xff]  }
  0x19   :  { %1361 = vmatpush3.bf16.msra.mxu1 %v1482_v23  ;;  %1298 = vmatprep.subr.bf16.mxu0 %v1483_v24  ;;  %v1546_v7 = vld [vmem:[%s2061_s0 + $0xd8] ss:$20 sps:$4 sm:$0xff]   ;;  %v1548_v9 = vld [vmem:[%s2061_s0 + $0x100] ss:$20 sps:$4 sm:$0xff]   ;;  %v1549_v10 = vld [vmem:[%s2061_s0 + $0x88] ss:$20 sps:$4 sm:$0xff]  }
  0x1a   :  { %1362 = vmatprep.subr.bf16.mxu1 %v1484_v25  ;;  %v1550_v11 = vld [vmem:[%s2061_s0 + $0x128] ss:$20 sps:$4 sm:$0xff]   ;;  %25 = vst.msk [vmem:[#allocation2 + $0x10] sm:$0xff] %vm22_vm0, %v1551_v12  ;;  %23 = vst.msk [vmem:[#allocation2] sm:$0xff] %vm22_vm0, %v1551_v12 }
  0x1b   :  { %24 = vst.msk [vmem:[#allocation2 + $0x8] sm:$0xff] %vm22_vm0, %v1551_v12  ;;  %26 = vst.msk [vmem:[#allocation2 + $0x18] sm:$0xff] %vm22_vm0, %v1551_v12 }
  0x1c   :  { %1299 = vmatpush3.bf16.msra.mxu0 %v1485_v26  ;;  %27 = vst.msk [vmem:[#allocation2 + $0x20] sm:$0xff] %vm22_vm0, %v1551_v12  ;;  %28 = vst.msk [vmem:[#allocation2 + $0x28] sm:$0xff] %vm22_vm0, %v1551_v12 }
  0x1d   :  { %1363 = vmatpush3.bf16.msra.mxu1 %v1486_v27  ;;  %1300 = vmatprep.subr.bf16.mxu0 %v1487_v28  ;;  %29 = vst.msk [vmem:[#allocation2 + $0x30] sm:$0xff] %vm22_vm0, %v1551_v12  ;;  %30 = vst.msk [vmem:[#allocation2 + $0x38] sm:$0xff] %vm22_vm0, %v1551_v12 }
  0x1e   :  { %1364 = vmatprep.subr.bf16.mxu1 %v1488_v29  ;;  %31 = vst.msk [vmem:[#allocation2 + $0x40] sm:$0xff] %vm22_vm0, %v1551_v12  ;;  %32 = vst.msk [vmem:[#allocation2 + $0x48] sm:$0xff] %vm22_vm0, %v1551_v12 }
  0x1f   :  { %33 = vst.msk [vmem:[#allocation2 + $0x50] sm:$0xff] %vm22_vm0, %v1551_v12  ;;  %34 = vst.msk [vmem:[#allocation2 + $0x58] sm:$0xff] %vm22_vm0, %v1551_v12 }
  0x20   :  { %1301 = vmatpush3.bf16.msra.mxu0 %v1489_v30  ;;  %35 = vst.msk [vmem:[#allocation2 + $0x60] sm:$0xff] %vm22_vm0, %v1551_v12  ;;  %36 = vst.msk [vmem:[#allocation2 + $0x68] sm:$0xff] %vm22_vm0, %v1551_v12 }
  0x21   :  { %1365 = vmatpush3.bf16.msra.mxu1 %v1490_v31  ;;  %1426 = vmatprep.subr.bf16.mxu0 %v1497_v36  ;;  %37 = vst.msk [vmem:[#allocation2 + $0x70] sm:$0xff] %vm22_vm0, %v1551_v12  ;;  %38 = vst.msk [vmem:[#allocation2 + $0x78] sm:$0xff] %vm22_vm0, %v1551_v12 }
  0x22   :  { %1450 = vmatprep.subr.bf16.mxu1 %v1497_v36 }
  0x23   :  { %649 = vmatmul.mubr.bf16.vlgmr.msra.gmra.mrb[0].mxu0 %v1491_v32 }
  0x24   :  { %746 = vmatmul.mubr.bf16.vlgmr.msra.gmra.mrb[0].mxu1 %v1494_v34  ;;  %1427 = vmatpush3.bf16.msra.mxu0 %v1497_v36 }
  0x25   :  { %1454 = vmatpush3.bf16.msra.mxu1 %v1497_v36  ;;  %656 = vmatprep.mubr.bf16.mxu0 %v1498_v37 }
  0x26   :  { %753 = vmatprep.mubr.bf16.mxu1 %v1500_v38  ;;  %1428 = vmatprep.subr.bf16.mxu0 %v1510_v42 }
  0x27   :  { %1451 = vmatprep.subr.bf16.mxu1 %v1510_v42 }
  0x28   :  { %1429 = vmatpush3.bf16.msra.mxu0 %v1510_v42 }
  0x29   :  { %1455 = vmatpush3.bf16.msra.mxu1 %v1510_v42  ;;  %1430 = vmatprep.subr.bf16.mxu0 %v1523_v46 }
  0x2a   :  { %1452 = vmatprep.subr.bf16.mxu1 %v1523_v46 }
  0x2b   :  { %657 = vmatmul.mubr.bf16.gmra.mrb[4].mxu0 %v1502_v39 }
  0x2c   :  { %754 = vmatmul.mubr.bf16.gmra.mrb[4].mxu1 %v1503_v40  ;;  %664 = vmatprep.mubr.bf16.mxu0 %v1504_v41 }
  0x2d   :  { %761 = vmatprep.mubr.bf16.mxu1 %v1506_v43  ;;  %1431 = vmatpush3.bf16.msra.mxu0 %v1523_v46 }
  0x2e   :  { %1456 = vmatpush3.bf16.msra.mxu1 %v1523_v46  ;;  %1432 = vmatprep.subr.bf16.mxu0 %v1536_v49 }
  0x2f   :  { %1453 = vmatprep.subr.bf16.mxu1 %v1536_v49 }
  0x31   :  { %1433 = vmatpush3.bf16.msra.mxu0 %v1536_v49 }
  0x32   :  { %1457 = vmatpush3.bf16.msra.mxu1 %v1536_v49 }
  0x33   :  { %665 = vmatmul.mubr.bf16.gmra.mrb[8].mxu0 %v1508_v44 }
  0x34   :  { %762 = vmatmul.mubr.bf16.gmra.mrb[8].mxu1 %v1509_v45  ;;  %672 = vmatprep.mubr.bf16.mxu0 %v1511_v47 }
  0x35   :  { %769 = vmatprep.mubr.bf16.mxu1 %v1513_v48 }
  0x3b   :  { %673 = vmatmul.mubr.bf16.gmra.mrb[12].mxu0 %v1515_v50 }
  0x3c   :  { %770 = vmatmul.mubr.bf16.gmra.mrb[12].mxu1 %v1516_v51  ;;  %680 = vmatprep.mubr.bf16.mxu0 %v1517_v52 }
  0x3d   :  { %777 = vmatprep.mubr.bf16.mxu1 %v1519_v53 }
  0x43   :  { %681 = vmatmul.mubr.bf16.gmra.mrb[16].mxu0 %v1521_v54 }
  0x44   :  { %778 = vmatmul.mubr.bf16.gmra.mrb[16].mxu1 %v1522_v55  ;;  %688 = vmatprep.mubr.bf16.mxu0 %v1524_v56 }
  0x45   :  { %785 = vmatprep.mubr.bf16.mxu1 %v1526_v57 }
  0x4b   :  { %689 = vmatmul.mubr.bf16.gmra.mrb[20].mxu0 %v1528_v58 }
  0x4c   :  { %786 = vmatmul.mubr.bf16.gmra.mrb[20].mxu1 %v1529_v59  ;;  %696 = vmatprep.mubr.bf16.mxu0 %v1530_v60 }
  0x4d   :  { %793 = vmatprep.mubr.bf16.mxu1 %v1532_v61 }
  0x53   :  { %697 = vmatmul.mubr.bf16.gmra.mrb[24].mxu0 %v1534_v62 }
  0x54   :  { %794 = vmatmul.mubr.bf16.gmra.mrb[24].mxu1 %v1535_v63  ;;  %704 = vmatprep.mubr.bf16.mxu0 %v1537_v0 }
  0x55   :  { %801 = vmatprep.mubr.bf16.mxu1 %v1539_v1 }
  0x5b   :  { %705 = vmatmul.mubr.bf16.gmra.mrb[28].mxu0 %v1541_v2 }
  0x5c   :  { %802 = vmatmul.mubr.bf16.gmra.mrb[28].mxu1 %v1542_v3  ;;  %1434 = vmatprep.mubr.msk.bf16.mxu0 %vm22_vm0, %v1543_v4 }
  0x5d   :  { %1442 = vmatprep.mubr.msk.bf16.mxu1 %vm22_vm0, %v1544_v5 }
  0x63   :  { %1435 = vmatmul.mubr.msk.bf16.vlgmr.msra.gmra.mrb[32].mxu0 %vm22_vm0, %v1545_v6 }
  0x64   :  { %1443 = vmatmul.mubr.msk.bf16.vlgmr.msra.gmra.mrb[32].mxu1 %vm22_vm0, %v1546_v7  ;;  %1438 = vmatprep.mubr.msk.bf16.mxu0 %vm22_vm0, %v1547_v8 }
  0x65   :  { %1446 = vmatprep.mubr.msk.bf16.mxu1 %vm22_vm0, %v1548_v9 }
  0x6b   :  { %1439 = vmatmul.mubr.msk.bf16.gmra.mrb[36].mxu0 %vm22_vm0, %v1549_v10 }
  0x6c   :  { %1447 = vmatmul.mubr.msk.bf16.gmra.mrb[36].mxu1 %vm22_vm0, %v1550_v11 }
  0xf6   :  { %v1302_v13 = vpop.f32.mrb[0].mxu0 }
  0xf7   :  { %v1366_v14 = vpop.f32.mrb[0].mxu1  ;;  %v1303_v15 = vpop.f32.mrb[1].mxu0 }
  0xf8   :  { %v1304_v16 = vadd.f32 %v1303_v15, %v1302_v13  ;;  %v1367_v17 = vpop.f32.mrb[1].mxu1  ;;  %v1305_v18 = vpop.f32.mrb[2].mxu0 }
  0xf9   :  { %v1368_v19 = vadd.f32 %v1367_v17, %v1366_v14  ;;  %v1369_v20 = vpop.f32.mrb[2].mxu1  ;;  %v1306_v21 = vpop.f32.mrb[3].mxu0 }
  0xfa   :  { %v1307_v22 = vadd.f32 %v1306_v21, %v1305_v18  ;;  %v1370_v23 = vpop.f32.mrb[3].mxu1 }
  0xfb   :  { %v1371_v24 = vadd.f32 %v1370_v23, %v1369_v20  ;;  %v1829_v25 = vadd.f32 %v1368_v19, %v1304_v16 }
  0xfd   :  { %v1831_v26 = vadd.f32 %v1371_v24, %v1307_v22 }
  0xfe   :  { %v1308_v27 = vpop.f32.mrb[4].mxu0 }
  0xff   :  { %v1372_v28 = vpop.f32.mrb[4].mxu1  ;;  %v1309_v29 = vpop.f32.mrb[5].mxu0 }
 0x100   :  { %v1310_v30 = vadd.f32 %v1309_v29, %v1308_v27  ;;  %v1373_v31 = vpop.f32.mrb[5].mxu1  ;;  %v1311_v32 = vpop.f32.mrb[6].mxu0 }
 0x101   :  { %v1374_v33 = vadd.f32 %v1373_v31, %v1372_v28  ;;  %v1375_v34 = vpop.f32.mrb[6].mxu1  ;;  %v1312_v35 = vpop.f32.mrb[7].mxu0 }
 0x102   :  { %v1313_v36 = vadd.f32 %v1312_v35, %v1311_v32  ;;  %v1376_v37 = vpop.f32.mrb[7].mxu1 }
 0x103   :  { %v1377_v38 = vadd.f32 %v1376_v37, %v1375_v34  ;;  %v1833_v39 = vadd.f32 %v1374_v33, %v1310_v30 }
 0x105   :  { %v1835_v40 = vadd.f32 %v1377_v38, %v1313_v36 }
 0x106   :  { %v1314_v41 = vpop.f32.mrb[8].mxu0 }
 0x107   :  { %v1378_v42 = vpop.f32.mrb[8].mxu1  ;;  %v1315_v43 = vpop.f32.mrb[9].mxu0 }
 0x108   :  { %v1316_v44 = vadd.f32 %v1315_v43, %v1314_v41  ;;  %v1379_v45 = vpop.f32.mrb[9].mxu1  ;;  %v1317_v46 = vpop.f32.mrb[10].mxu0 }
 0x109   :  { %v1380_v47 = vadd.f32 %v1379_v45, %v1378_v42  ;;  %v1381_v48 = vpop.f32.mrb[10].mxu1  ;;  %v1318_v49 = vpop.f32.mrb[11].mxu0 }
 0x10a   :  { %v1319_v50 = vadd.f32 %v1318_v49, %v1317_v46  ;;  %v1382_v51 = vpop.f32.mrb[11].mxu1 }
 0x10b   :  { %v1383_v52 = vadd.f32 %v1382_v51, %v1381_v48  ;;  %v1837_v53 = vadd.f32 %v1380_v47, %v1316_v44 }
 0x10d   :  { %v1839_v54 = vadd.f32 %v1383_v52, %v1319_v50 }
 0x10e   :  { %v1320_v55 = vpop.f32.mrb[12].mxu0 }
 0x10f   :  { %v1384_v56 = vpop.f32.mrb[12].mxu1  ;;  %v1321_v57 = vpop.f32.mrb[13].mxu0 }
 0x110   :  { %v1322_v58 = vadd.f32 %v1321_v57, %v1320_v55  ;;  %v1385_v59 = vpop.f32.mrb[13].mxu1  ;;  %v1323_v60 = vpop.f32.mrb[14].mxu0 }
 0x111   :  { %v1386_v61 = vadd.f32 %v1385_v59, %v1384_v56  ;;  %v1387_v62 = vpop.f32.mrb[14].mxu1  ;;  %v1324_v63 = vpop.f32.mrb[15].mxu0 }
 0x112   :  { %v1325_v0 = vadd.f32 %v1324_v63, %v1323_v60  ;;  %v1388_v1 = vpop.f32.mrb[15].mxu1 }
 0x113   :  { %v1389_v2 = vadd.f32 %v1388_v1, %v1387_v62  ;;  %v1841_v3 = vadd.f32 %v1386_v61, %v1322_v58 }
 0x115   :  { %v1843_v4 = vadd.f32 %v1389_v2, %v1325_v0 }
 0x116   :  { %v1326_v5 = vpop.f32.mrb[16].mxu0 }
 0x117   :  { %v1390_v6 = vpop.f32.mrb[16].mxu1  ;;  %v1327_v7 = vpop.f32.mrb[17].mxu0 }
 0x118   :  { %v1328_v8 = vadd.f32 %v1327_v7, %v1326_v5  ;;  %v1391_v9 = vpop.f32.mrb[17].mxu1  ;;  %v1329_v10 = vpop.f32.mrb[18].mxu0  ;;  %v41_v5 = vld [vmem:[#allocation2 + $0x10] sm:$0xff] }
 0x119   :  { %v1392_v11 = vadd.f32 %v1391_v9, %v1390_v6  ;;  %v1393_v12 = vpop.f32.mrb[18].mxu1  ;;  %v1330_v13 = vpop.f32.mrb[19].mxu0 }
 0x11a   :  { %v1331_v14 = vadd.f32 %v1330_v13, %v1329_v10  ;;  %v1394_v15 = vpop.f32.mrb[19].mxu1  ;;  %v39_v10 = vld [vmem:[#allocation2] sm:$0xff]  ;;  %v1861_v13 = vld [vmem:[%s2062_s3 + $0x8] sm:$0xff]  }
 0x11b   :  { %v1395_v16 = vadd.f32 %v1394_v15, %v1393_v12  ;;  %v1845_v17 = vadd.f32 %v1392_v11, %v1328_v8  ;;  %v49_v8 = vld [vmem:[#allocation2 + $0x50] sm:$0xff]  ;;  %v47_v12 = vld [vmem:[#allocation2 + $0x40] sm:$0xff] }
 0x11d   :  { %v1847_v18 = vadd.f32 %v1395_v16, %v1331_v14 }
 0x11e   :  { %v1332_v19 = vpop.f32.mrb[20].mxu0 }
 0x11f   :  { %v1396_v20 = vpop.f32.mrb[20].mxu1  ;;  %v1333_v21 = vpop.f32.mrb[21].mxu0 }
 0x120   :  { %v1334_v22 = vadd.f32 %v1333_v21, %v1332_v19  ;;  %v1397_v23 = vpop.f32.mrb[21].mxu1  ;;  %v1335_v24 = vpop.f32.mrb[22].mxu0  ;;  %v42_v19 = vld [vmem:[#allocation2 + $0x18] sm:$0xff] }
 0x121   :  { %v1398_v27 = vadd.f32 %v1397_v23, %v1396_v20  ;;  %v1399_v28 = vpop.f32.mrb[22].mxu1  ;;  %v1336_v29 = vpop.f32.mrb[23].mxu0  ;;  %v50_v21 = vld [vmem:[#allocation2 + $0x58] sm:$0xff]  ;;  %v1872_v23 = vld [vmem:[%s2062_s3] sm:$0xff]  }
 0x122   :  { %v1337_v30 = vadd.f32 %v1336_v29, %v1335_v24  ;;  %v1400_v31 = vpop.f32.mrb[23].mxu1 }
 0x123   :  { %v1401_v32 = vadd.f32 %v1400_v31, %v1399_v28  ;;  %v788_v33 = vadd.f32 %v1398_v27, %v1334_v22  ;;  %v40_v28 = vld [vmem:[#allocation2 + $0x8] sm:$0xff] }
 0x125   :  { %v791_v34 = vadd.f32 %v1401_v32, %v1337_v30  ;;  %v1879_v32 = vld [vmem:[%s2062_s3 + $0x20] sm:$0xff]  }
 0x126   :  { %v1338_v35 = vpop.f32.mrb[24].mxu0 }
 0x127   :  { %v1402_v36 = vpop.f32.mrb[24].mxu1  ;;  %v1339_v37 = vpop.f32.mrb[25].mxu0 }
 0x128   :  { %v1340_v38 = vadd.f32 %v1339_v37, %v1338_v35  ;;  %v1403_v41 = vpop.f32.mrb[25].mxu1  ;;  %v1341_v42 = vpop.f32.mrb[26].mxu0 }
 0x129   :  { %v1404_v43 = vadd.f32 %v1403_v41, %v1402_v36  ;;  %v1405_v44 = vpop.f32.mrb[26].mxu1  ;;  %v1342_v45 = vpop.f32.mrb[27].mxu0  ;;  %v48_v36 = vld [vmem:[#allocation2 + $0x48] sm:$0xff] }
 0x12a   :  { %v1343_v46 = vadd.f32 %v1342_v45, %v1341_v42  ;;  %v1406_v47 = vpop.f32.mrb[27].mxu1  ;;  %v1888_v42 = vld [vmem:[%s2062_s3 + $0x18] sm:$0xff]   ;;  %v1902_v45 = vld [vmem:[%s2062_s3 + $0x10] sm:$0xff]  }
 0x12b   :  { %v1407_v48 = vadd.f32 %v1406_v47, %v1405_v44  ;;  %v1849_v49 = vadd.f32 %v1404_v43, %v1340_v38  ;;  %v1249_v43 = vunpack.c.l.bf16 %v1872_v23  ;;  %v1265_v47 = vunpack.c.l.bf16 %v1879_v32 }
 0x12d   :  { %v1851_v50 = vadd.f32 %v1407_v48, %v1343_v46  ;;  %v1907_v46 = vld [vmem:[%s2062_s3 + $0x30] sm:$0xff]   ;;  %v1254_v48 = vunpack.c.h.bf16 %v1861_v13 }
 0x12e   :  { %v1344_v51 = vpop.f32.mrb[28].mxu0 }
 0x12f   :  { %v1408_v52 = vpop.f32.mrb[28].mxu1  ;;  %v1345_v55 = vpop.f32.mrb[29].mxu0 }
 0x130   :  { %v1346_v56 = vadd.f32 %v1345_v55, %v1344_v51  ;;  %v1409_v57 = vpop.f32.mrb[29].mxu1  ;;  %v1347_v58 = vpop.f32.mrb[30].mxu0  ;;  %v1250_v55 = vunpack.c.h.bf16 %v1872_v23 }
 0x131   :  { %v1410_v59 = vadd.f32 %v1409_v57, %v1408_v52  ;;  %v1411_v60 = vpop.f32.mrb[30].mxu1  ;;  %v1348_v61 = vpop.f32.mrb[31].mxu0  ;;  %v45_v57 = vld [vmem:[#allocation2 + $0x30] sm:$0xff] }
 0x132   :  { %v1349_v62 = vadd.f32 %v1348_v61, %v1347_v58  ;;  %v1412_v63 = vpop.f32.mrb[31].mxu1 }
 0x133   :  { %v1413_v0 = vadd.f32 %v1412_v63, %v1411_v60  ;;  %v1853_v1 = vadd.f32 %v1410_v59, %v1346_v56  ;;  %v1266_v56 = vunpack.c.h.bf16 %v1879_v32  ;;  %v1261_v59 = vunpack.c.l.bf16 %v1888_v42 }
 0x135   :  { %v1855_v2 = vadd.f32 %v1413_v0, %v1349_v62  ;;  %v53_v62 = vld [vmem:[#allocation2 + $0x70] sm:$0xff]  ;;  %v43_v0 = vld [vmem:[#allocation2 + $0x20] sm:$0xff] }
 0x136   :  { %v1436_v6 = vpop.f32.mrb[32].mxu0 }
 0x137   :  { %v853_v7 = vadd.f32 %v1436_v6, %v1833_v39  ;;  %v1444_v9 = vpop.f32.mrb[32].mxu1  ;;  %v844_v11 = vpop.f32.mrb[33].mxu0  ;;  %v1867_v39 = vld [vmem:[%s2062_s3 + $0x28] sm:$0xff]   ;;  %v1257_v6 = vunpack.c.l.bf16 %v1902_v45 }
 0x138   :  { %v885_v14 = vadd.f32 %v1444_v9, %v788_v33  ;;  %v845_v15 = vadd.f32 %v844_v11, %v1829_v25  ;;  %v876_v16 = vpop.f32.mrb[33].mxu1  ;;  %v1437_v20 = vpop.f32.mrb[34].mxu0  ;;  %v1270_v51 = vunpack.c.h.bf16 %v1867_v39  ;;  %v1928_v9 = vld [vmem:[%s2063_s2] ss:$0 sm:$0xff] }
 0x139   :  { %v909_v22 = vadd.f32 %v853_v7, %v41_v5  ;;  %v877_v24 = vadd.f32 %v876_v16, %v1845_v17  ;;  %v856_v27 = vadd.f32 %v1437_v20, %v1835_v40  ;;  %v1445_v25 = vpop.f32.mrb[34].mxu1  ;;  %v847_v29 = vpop.f32.mrb[35].mxu0  ;;  %v1253_v17 = vunpack.c.l.bf16 %v1861_v13  ;;  %v51_v11 = vld [vmem:[#allocation2 + $0x60] sm:$0xff] }
 0x13a   :  { %v917_v30 = vadd.f32 %v885_v14, %v49_v8  ;;  %v907_v31 = vadd.f32 %v845_v15, %v39_v10  ;;  %v888_v33 = vadd.f32 %v1445_v25, %v791_v34  ;;  %v848_v35 = vadd.f32 %v847_v29, %v1831_v26  ;;  %v879_v37 = vpop.f32.mrb[35].mxu1  ;;  %v1893_v34 = vld [vmem:[%s2062_s3 + $0x38] sm:$0xff]   ;;  %v44_v25 = vld [vmem:[#allocation2 + $0x28] sm:$0xff] }
 0x13b   :  { %925 = vst.msk [vmem:[#allocation2 + $0x10] sm:$0xff] %vm22_vm0, %v909_v22  ;;  %v915_v40 = vadd.f32 %v877_v24, %v47_v12  ;;  %v910_v38 = vadd.f32 %v856_v27, %v42_v19  ;;  %v880_v41 = vadd.f32 %v879_v37, %v1847_v18  ;;  %v1269_v26 = vunpack.c.l.bf16 %v1867_v39  ;;  %v46_v14 = vld [vmem:[#allocation2 + $0x38] sm:$0xff] }
 0x13c   :  { %933 = vst.msk [vmem:[#allocation2 + $0x50] sm:$0xff] %vm22_vm0, %v917_v30  ;;  %923 = vst.msk [vmem:[#allocation2] sm:$0xff] %vm22_vm0, %v907_v31  ;;  %v918_v44 = vadd.f32 %v888_v33, %v50_v21  ;;  %v908_v18 = vadd.f32 %v848_v35, %v40_v28  ;;  %v1277_v60 = vunpack.c.l.bf16 %v1893_v34  ;;  %v1273_v7 = vunpack.c.l.bf16 %v1907_v46  ;;  %v54_v24 = vld [vmem:[#allocation2 + $0x78] sm:$0xff]  ;;  %v52_v35 = vld [vmem:[#allocation2 + $0x68] sm:$0xff] }
 0x13d   :  { %931 = vst.msk [vmem:[#allocation2 + $0x40] sm:$0xff] %vm22_vm0, %v915_v40  ;;  %926 = vst.msk [vmem:[#allocation2 + $0x18] sm:$0xff] %vm22_vm0, %v910_v38  ;;  %v916_v52 = vadd.f32 %v880_v41, %v48_v36  ;;  %v1262_v8 = vunpack.c.h.bf16 %v1888_v42  ;;  %v1278_v16 = vunpack.c.h.bf16 %v1893_v34  ;;  %v1258_v19 = vunpack.c.h.bf16 %v1902_v45 }
 0x13e   :  { %934 = vst.msk [vmem:[#allocation2 + $0x58] sm:$0xff] %vm22_vm0, %v918_v44  ;;  %924 = vst.msk [vmem:[#allocation2 + $0x8] sm:$0xff] %vm22_vm0, %v908_v18  ;;  %v1440_v58 = vpop.f32.mrb[36].mxu0 }
 0x13f   :  { %932 = vst.msk [vmem:[#allocation2 + $0x48] sm:$0xff] %vm22_vm0, %v916_v52  ;;  %v869_v61 = vadd.f32 %v1440_v58, %v1841_v3  ;;  %v1448_v63 = vpop.f32.mrb[36].mxu1  ;;  %v860_v5 = vpop.f32.mrb[37].mxu0 }
 0x140   :  { %v901_v10 = vadd.f32 %v1448_v63, %v1853_v1  ;;  %v861_v3 = vadd.f32 %v860_v5, %v1837_v53  ;;  %v892_v12 = vpop.f32.mrb[37].mxu1  ;;  %v1441_v15 = vpop.f32.mrb[38].mxu0  ;;  %v1274_v1 = vunpack.c.h.bf16 %v1907_v46 }
 0x141   :  { %v913_v20 = vadd.f32 %v869_v61, %v45_v57  ;;  %v893_v21 = vadd.f32 %v892_v12, %v1849_v49  ;;  %v872_v22 = vadd.f32 %v1441_v15, %v1843_v4  ;;  %v1449_v27 = vpop.f32.mrb[38].mxu1  ;;  %v863_v28 = vpop.f32.mrb[39].mxu0 }
 0x142   :  { %v944_v53 = vld [vmem:[#allocation2 + $0x10] sm:$0xff]  ;;  %v921_v29 = vadd.f32 %v901_v10, %v53_v62  ;;  %v911_v30 = vadd.f32 %v861_v3, %v43_v0  ;;  %v904_v31 = vadd.f32 %v1449_v27, %v1855_v2  ;;  %v864_v33 = vadd.f32 %v863_v28, %v1839_v54  ;;  %v895_v36 = vpop.f32.mrb[39].mxu1 }
 0x143   :  { %v967_v37 = vadd.f32 %v1928_v9, %v944_v53  ;;  %v952_v49 = vld [vmem:[#allocation2 + $0x50] sm:$0xff]  ;;  %v942_v40 = vld [vmem:[#allocation2] sm:$0xff]  ;;  %929 = vst.msk [vmem:[#allocation2 + $0x30] sm:$0xff] %vm22_vm0, %v913_v20  ;;  %v919_v4 = vadd.f32 %v893_v21, %v51_v11  ;;  %v914_v38 = vadd.f32 %v872_v22, %v46_v14  ;;  %v896_v41 = vadd.f32 %v895_v36, %v1851_v50 }
 0x144   :  { %v975_v44 = vadd.f32 %v1928_v9, %v952_v49  ;;  %v965_v18 = vadd.f32 %v1928_v9, %v942_v40  ;;  %v950_v52 = vld [vmem:[#allocation2 + $0x40] sm:$0xff]  ;;  %v945_v2 = vld [vmem:[#allocation2 + $0x18] sm:$0xff]  ;;  %937 = vst.msk [vmem:[#allocation2 + $0x70] sm:$0xff] %vm22_vm0, %v921_v29  ;;  %927 = vst.msk [vmem:[#allocation2 + $0x20] sm:$0xff] %vm22_vm0, %v911_v30  ;;  %v922_v54 = vadd.f32 %v904_v31, %v54_v24 }
 0x145   :  { %v912_v57 = vadd.f32 %v864_v33, %v44_v25  ;;  %v1015_v58 = vadd.f32 %v1253_v17, %v967_v37  ;;  %v973_v61 = vadd.f32 %v1928_v9, %v950_v52  ;;  %v968_v62 = vadd.f32 %v1928_v9, %v945_v2  ;;  %v953_v50 = vld [vmem:[#allocation2 + $0x58] sm:$0xff]  ;;  %v943_v63 = vld [vmem:[#allocation2 + $0x8] sm:$0xff]  ;;  %935 = vst.msk [vmem:[#allocation2 + $0x60] sm:$0xff] %vm22_vm0, %v919_v4 }
 0x146   :  { %930 = vst.msk [vmem:[#allocation2 + $0x38] sm:$0xff] %vm22_vm0, %v914_v38  ;;  %v920_v0 = vadd.f32 %v896_v41, %v52_v35  ;;  %v1023_v5 = vadd.f32 %v1269_v26, %v975_v44  ;;  %v1013_v10 = vadd.f32 %v1249_v43, %v965_v18  ;;  %v976_v3 = vadd.f32 %v1928_v9, %v953_v50  ;;  %v951_v11 = vld [vmem:[#allocation2 + $0x48] sm:$0xff] }
 0x147   :  { %v966_v17 = vadd.f32 %v1928_v9, %v943_v63  ;;  %938 = vst.msk [vmem:[#allocation2 + $0x78] sm:$0xff] %vm22_vm0, %v922_v54  ;;  %928 = vst.msk [vmem:[#allocation2 + $0x28] sm:$0xff] %vm22_vm0, %v912_v57  ;;  %v1031_v12 = vmax.f32 %v1015_v58, 0.0  ;;  %v1021_v14 = vadd.f32 %v1265_v47, %v973_v61  ;;  %v1016_v15 = vadd.f32 %v1254_v48, %v968_v62 }
 0x148   :  { %v974_v26 = vadd.f32 %v1928_v9, %v951_v11  ;;  %936 = vst.msk [vmem:[#allocation2 + $0x68] sm:$0xff] %vm22_vm0, %v920_v0  ;;  %v1039_v43 = vmax.f32 %v1023_v5, 0.0  ;;  %v1029_v20 = vmax.f32 %v1013_v10, 0.0  ;;  %v1024_v21 = vadd.f32 %v1270_v51, %v976_v3 }
 0x149   :  { %v1014_v22 = vadd.f32 %v1250_v55, %v966_v17  ;;  %v1233_v24 = vpack.c.bf16 %v1031_v12, %v1031_v12  ;;  %v1037_v27 = vmax.f32 %v1021_v14, 0.0  ;;  %v1032_v25 = vmax.f32 %v1016_v15, 0.0 }
 0x14a   :  { %v1022_v47 = vadd.f32 %v1266_v56, %v974_v26  ;;  %v1241_v13 = vpack.c.bf16 %v1039_v43, %v1039_v43  ;;  %v1231_v48 = vpack.c.bf16 %v1029_v20, %v1029_v20  ;;  %v1040_v28 = vmax.f32 %v1024_v21, 0.0  ;;  %v948_v29 = vld [vmem:[#allocation2 + $0x30] sm:$0xff] }
 0x14b   :  { %v1030_v53 = vmax.f32 %v1014_v22, 0.0  ;;  %1112 = vst.msk [vmem:[%s2064_s4 + $0x8] sm:$0xf] %vm1109_vm1, %v1233_v24  ;;  %v1239_v39 = vpack.c.bf16 %v1037_v27, %v1037_v27  ;;  %v1234_v51 = vpack.c.bf16 %v1032_v25, %v1032_v25  ;;  %v971_v55 = vadd.f32 %v1928_v9, %v948_v29  ;;  %v956_v30 = vld [vmem:[#allocation2 + $0x70] sm:$0xff]  ;;  %v946_v31 = vld [vmem:[#allocation2 + $0x20] sm:$0xff] }
 0x14c   :  { %v1038_v23 = vmax.f32 %v1022_v47, 0.0  ;;  %1120 = vst.msk [vmem:[%s2064_s4 + $0x28] sm:$0xf] %vm1109_vm1, %v1241_v13  ;;  %1110 = vst.msk [vmem:[%s2064_s4] sm:$0xf] %vm1109_vm1, %v1231_v48  ;;  %v1242_v32 = vpack.c.bf16 %v1040_v28, %v1040_v28  ;;  %v979_v33 = vadd.f32 %v1928_v9, %v956_v30  ;;  %v969_v35 = vadd.f32 %v1928_v9, %v946_v31  ;;  %v954_v36 = vld [vmem:[#allocation2 + $0x60] sm:$0xff] }
 0x14d   :  { %v1232_v56 = vpack.c.bf16 %v1030_v53, %v1030_v53  ;;  %v949_v37 = vld [vmem:[#allocation2 + $0x38] sm:$0xff]  ;;  %1118 = vst.msk [vmem:[%s2064_s4 + $0x20] sm:$0xf] %vm1109_vm1, %v1239_v39  ;;  %1113 = vst.msk [vmem:[%s2064_s4 + $0xc] sm:$0xf] %vm1109_vm1, %v1234_v51  ;;  %v1019_v40 = vadd.f32 %v1261_v59, %v971_v55  ;;  %v977_v4 = vadd.f32 %v1928_v9, %v954_v36 }
 0x14e   :  { %v1240_v49 = vpack.c.bf16 %v1038_v23, %v1038_v23  ;;  %v972_v38 = vadd.f32 %v1928_v9, %v949_v37  ;;  %v957_v41 = vld [vmem:[#allocation2 + $0x78] sm:$0xff]  ;;  %v947_v44 = vld [vmem:[#allocation2 + $0x28] sm:$0xff]  ;;  %1121 = vst.msk [vmem:[%s2064_s4 + $0x2c] sm:$0xf] %vm1109_vm1, %v1242_v32  ;;  %v1027_v18 = vadd.f32 %v1277_v60, %v979_v33  ;;  %v1017_v59 = vadd.f32 %v1257_v6, %v969_v35 }
 0x14f   :  { %1111 = vst.msk [vmem:[%s2064_s4 + $0x4] sm:$0xf] %vm1109_vm1, %v1232_v56  ;;  %v980_v52 = vadd.f32 %v1928_v9, %v957_v41  ;;  %v970_v2 = vadd.f32 %v1928_v9, %v947_v44  ;;  %v955_v54 = vld [vmem:[#allocation2 + $0x68] sm:$0xff]  ;;  %v1035_v57 = vmax.f32 %v1019_v40, 0.0  ;;  %v1025_v58 = vadd.f32 %v1273_v7, %v977_v4 }
 0x150   :  { %1119 = vst.msk [vmem:[%s2064_s4 + $0x24] sm:$0xf] %vm1109_vm1, %v1240_v49  ;;  %v1020_v60 = vadd.f32 %v1262_v8, %v972_v38  ;;  %v978_v61 = vadd.f32 %v1928_v9, %v955_v54  ;;  %v1043_v6 = vmax.f32 %v1027_v18, 0.0  ;;  %v1033_v62 = vmax.f32 %v1017_v59, 0.0 }
 0x151   :  { %v1028_v50 = vadd.f32 %v1278_v16, %v980_v52  ;;  %v1018_v63 = vadd.f32 %v1258_v19, %v970_v2  ;;  %v1237_v0 = vpack.c.bf16 %v1035_v57, %v1035_v57  ;;  %v1041_v5 = vmax.f32 %v1025_v58, 0.0 }
 0x152   :  { %v1036_v10 = vmax.f32 %v1020_v60, 0.0  ;;  %v1026_v3 = vadd.f32 %v1274_v1, %v978_v61  ;;  %v1245_v7 = vpack.c.bf16 %v1043_v6, %v1043_v6  ;;  %v1235_v17 = vpack.c.bf16 %v1033_v62, %v1033_v62 }
 0x153   :  { %v1044_v42 = vmax.f32 %v1028_v50, 0.0  ;;  %v1034_v8 = vmax.f32 %v1018_v63, 0.0  ;;  %1116 = vst.msk [vmem:[%s2064_s4 + $0x18] sm:$0xf] %vm1109_vm1, %v1237_v0  ;;  %v1243_v34 = vpack.c.bf16 %v1041_v5, %v1041_v5 }
 0x154   :  { %v1238_v9 = vpack.c.bf16 %v1036_v10, %v1036_v10  ;;  %v1042_v16 = vmax.f32 %v1026_v3, 0.0  ;;  %1124 = vst.msk [vmem:[%s2064_s4 + $0x38] sm:$0xf] %vm1109_vm1, %v1245_v7  ;;  %1114 = vst.msk [vmem:[%s2064_s4 + $0x10] sm:$0xf] %vm1109_vm1, %v1235_v17 }
 0x155   :  { %v1246_v45 = vpack.c.bf16 %v1044_v42, %v1044_v42  ;;  %v1236_v46 = vpack.c.bf16 %v1034_v8, %v1034_v8  ;;  %1122 = vst.msk [vmem:[%s2064_s4 + $0x30] sm:$0xf] %vm1109_vm1, %v1243_v34 }
 0x156   :  { %1117 = vst.msk [vmem:[%s2064_s4 + $0x1c] sm:$0xf] %vm1109_vm1, %v1238_v9  ;;  %v1244_v19 = vpack.c.bf16 %v1042_v16, %v1042_v16 }
 0x157   :  { %1125 = vst.msk [vmem:[%s2064_s4 + $0x3c] sm:$0xf] %vm1109_vm1, %v1246_v45  ;;  %1115 = vst.msk [vmem:[%s2064_s4 + $0x14] sm:$0xf] %vm1109_vm1, %v1236_v46 }
 0x158   :  { %1123 = vst.msk [vmem:[%s2064_s4 + $0x34] sm:$0xf] %vm1109_vm1, %v1244_v19 }

// kernel: ingredient_net_forward.46
= control target key start
LH: loop header
LB: loop body
LE: loop exit
PB: predicated region body
PF: predicated region fallthrough
CT: control target
= control target key end

     0   :  { %vm19_vm0 = vcmask 523264   ;;  %vm1058_vm1 = vcmask 519168   ;;  %s1871_s1 = inlined_call_operand.vmem [shape: bf16[576,64], index: 1, kind: input, shape index: {}]   ;;  %s1872_s0 = inlined_call_operand.vmem [shape: bf16[128,576], index: 0, kind: input, shape index: {}]   ;;  %s1873_s2 = inlined_call_operand.vmem [shape: f32[1,64], index: 2, kind: input, shape index: {}]   ;;  %s1874_s3 = inlined_call_operand.vmem [shape: bf16[128,64], index: 3, kind: output, shape index: {}]  }
   0x1   :  { %v1369_v0 = vld [vmem:[%s1871_s1 + $0x40] sm:$0xff]   ;;  %v1373_v4 = vld [vmem:[%s1871_s1 + $0x48] sm:$0xff]   ;;  %v1377_v8 = vld [vmem:[%s1871_s1 + $0x50] sm:$0xff]  }
   0x2   :  { %v1370_v1 = vld [vmem:[%s1871_s1 + $0xc0] sm:$0xff]   ;;  %1196 = vmatprep.subr.bf16.mxu0 %v1369_v0  ;;  %v1374_v5 = vld [vmem:[%s1871_s1 + $0xc8] sm:$0xff]   ;;  %v1378_v9 = vld [vmem:[%s1871_s1 + $0xd0] sm:$0xff]  }
   0x3   :  { %v1371_v2 = vld [vmem:[%s1871_s1] sm:$0xff]   ;;  %1260 = vmatprep.subr.bf16.mxu1 %v1370_v1  ;;  %v1375_v6 = vld [vmem:[%s1871_s1 + $0x8] sm:$0xff]   ;;  %v1379_v10 = vld [vmem:[%s1871_s1 + $0x10] sm:$0xff]  }
   0x4   :  { %v1372_v3 = vld [vmem:[%s1871_s1 + $0x80] sm:$0xff]   ;;  %1197 = vmatpush3.bf16.msra.mxu0 %v1371_v2  ;;  %v1376_v7 = vld [vmem:[%s1871_s1 + $0x88] sm:$0xff]   ;;  %v1380_v11 = vld [vmem:[%s1871_s1 + $0x90] sm:$0xff]  }
   0x5   :  { %1261 = vmatpush3.bf16.msra.mxu1 %v1372_v3  ;;  %1198 = vmatprep.subr.bf16.mxu0 %v1373_v4  ;;  %v1381_v12 = vld [vmem:[%s1871_s1 + $0x58] sm:$0xff]   ;;  %v1385_v16 = vld [vmem:[%s1871_s1 + $0x60] sm:$0xff]   ;;  %v1389_v20 = vld [vmem:[%s1871_s1 + $0x68] sm:$0xff]  }
   0x6   :  { %1262 = vmatprep.subr.bf16.mxu1 %v1374_v5  ;;  %v1382_v13 = vld [vmem:[%s1871_s1 + $0xd8] sm:$0xff]   ;;  %v1386_v17 = vld [vmem:[%s1871_s1 + $0xe0] sm:$0xff]   ;;  %v1390_v21 = vld [vmem:[%s1871_s1 + $0xe8] sm:$0xff]  }
   0x7   :  { %v1383_v14 = vld [vmem:[%s1871_s1 + $0x18] sm:$0xff]   ;;  %v1387_v18 = vld [vmem:[%s1871_s1 + $0x20] sm:$0xff]   ;;  %v1391_v22 = vld [vmem:[%s1871_s1 + $0x28] sm:$0xff]  }
   0x8   :  { %1199 = vmatpush3.bf16.msra.mxu0 %v1375_v6  ;;  %v1384_v15 = vld [vmem:[%s1871_s1 + $0x98] sm:$0xff]   ;;  %v1388_v19 = vld [vmem:[%s1871_s1 + $0xa0] sm:$0xff]   ;;  %v1392_v23 = vld [vmem:[%s1871_s1 + $0xa8] sm:$0xff]  }
   0x9   :  { %1263 = vmatpush3.bf16.msra.mxu1 %v1376_v7  ;;  %1200 = vmatprep.subr.bf16.mxu0 %v1377_v8  ;;  %v1393_v24 = vld [vmem:[%s1871_s1 + $0x70] sm:$0xff]   ;;  %v1397_v28 = vld [vmem:[%s1871_s1 + $0x78] sm:$0xff]   ;;  %v1406_v35 = vld [vmem:[%s1872_s0 + $0xc] ss:$20 sps:$4 sm:$0xff]  }
   0xa   :  { %1264 = vmatprep.subr.bf16.mxu1 %v1378_v9  ;;  %v1394_v25 = vld [vmem:[%s1871_s1 + $0xf0] sm:$0xff]   ;;  %v1398_v29 = vld [vmem:[%s1871_s1 + $0xf8] sm:$0xff]   ;;  %v1407_v36 = vld [vmem:[%s1871_s1 + $0x100] sm:$0xff]   ;;  %742 = vmatprep.mubr.bf16.mxu1 %v1406_v35 }
   0xb   :  { %v1395_v26 = vld [vmem:[%s1871_s1 + $0x30] sm:$0xff]   ;;  %v1399_v30 = vld [vmem:[%s1871_s1 + $0x38] sm:$0xff]   ;;  %v1408_v37 = vld [vmem:[%s1872_s0 + $0x2c] ss:$20 sps:$4 sm:$0xff]  }
   0xc   :  { %1201 = vmatpush3.bf16.msra.mxu0 %v1379_v10  ;;  %v1396_v27 = vld [vmem:[%s1871_s1 + $0xb0] sm:$0xff]   ;;  %v1400_v31 = vld [vmem:[%s1871_s1 + $0xb8] sm:$0xff]   ;;  %v1420_v42 = vld [vmem:[%s1871_s1 + $0x108] sm:$0xff]  }
   0xd   :  { %1265 = vmatpush3.bf16.msra.mxu1 %v1380_v11  ;;  %1202 = vmatprep.subr.bf16.mxu0 %v1381_v12  ;;  %v1401_v32 = vld [vmem:[%s1872_s0] ss:$20 sps:$4 sm:$0xff]   ;;  %v1403_v33 = vld [vmem:[%s1872_s0 + $0x4] ss:$20 sps:$4 sm:$0xff]   ;;  %v1404_v34 = vld [vmem:[%s1872_s0 + $0x8] ss:$20 sps:$4 sm:$0xff]  }
   0xe   :  { %1266 = vmatprep.subr.bf16.mxu1 %v1382_v13  ;;  %645 = vmatprep.mubr.bf16.mxu0 %v1403_v33  ;;  %v1410_v38 = vld [vmem:[%s1872_s0 + $0x34] ss:$20 sps:$4 sm:$0xff]   ;;  %v1413_v40 = vld [vmem:[%s1872_s0 + $0x30] ss:$20 sps:$4 sm:$0xff]   ;;  %v1419_v45 = vld [vmem:[%s1872_s0 + $0x58] ss:$20 sps:$4 sm:$0xff]  }
   0xf   :  { %v1412_v39 = vld [vmem:[%s1872_s0 + $0x28] ss:$20 sps:$4 sm:$0xff]   ;;  %v1418_v44 = vld [vmem:[%s1872_s0 + $0x50] ss:$20 sps:$4 sm:$0xff]   ;;  %v1425_v50 = vld [vmem:[%s1872_s0 + $0x78] ss:$20 sps:$4 sm:$0xff]  }
  0x10   :  { %1203 = vmatpush3.bf16.msra.mxu0 %v1383_v14  ;;  %v1414_v41 = vld [vmem:[%s1872_s0 + $0x54] ss:$20 sps:$4 sm:$0xff]   ;;  %v1416_v43 = vld [vmem:[%s1872_s0 + $0x5c] ss:$20 sps:$4 sm:$0xff]   ;;  %v1423_v48 = vld [vmem:[%s1872_s0 + $0x84] ss:$20 sps:$4 sm:$0xff]  }
  0x11   :  { %1267 = vmatpush3.bf16.msra.mxu1 %v1384_v15  ;;  %1204 = vmatprep.subr.bf16.mxu0 %v1385_v16  ;;  %v1433_v46 = vld [vmem:[%s1871_s1 + $0x110] sm:$0xff]   ;;  %v1446_v49 = vld [vmem:[%s1871_s1 + $0x118] sm:$0xff]   ;;  %v1429_v53 = vld [vmem:[%s1872_s0 + $0xac] ss:$20 sps:$4 sm:$0xff]   ;;  %v1461_v12 = vmov 0.0  }
  0x12   :  { %1268 = vmatprep.subr.bf16.mxu1 %v1386_v17  ;;  %v1421_v47 = vld [vmem:[%s1872_s0 + $0x7c] ss:$20 sps:$4 sm:$0xff]   ;;  %v1426_v51 = vld [vmem:[%s1872_s0 + $0x80] ss:$20 sps:$4 sm:$0xff]   ;;  %v1427_v52 = vld [vmem:[%s1872_s0 + $0xa4] ss:$20 sps:$4 sm:$0xff]  }
  0x13   :  { %v1431_v54 = vld [vmem:[%s1872_s0 + $0xa0] ss:$20 sps:$4 sm:$0xff]   ;;  %v1432_v55 = vld [vmem:[%s1872_s0 + $0xa8] ss:$20 sps:$4 sm:$0xff]   ;;  %v1439_v59 = vld [vmem:[%s1872_s0 + $0xd0] ss:$20 sps:$4 sm:$0xff]  }
  0x14   :  { %1205 = vmatpush3.bf16.msra.mxu0 %v1387_v18  ;;  %v1434_v56 = vld [vmem:[%s1872_s0 + $0xcc] ss:$20 sps:$4 sm:$0xff]   ;;  %v1436_v57 = vld [vmem:[%s1872_s0 + $0xd4] ss:$20 sps:$4 sm:$0xff]   ;;  %v1442_v61 = vld [vmem:[%s1872_s0 + $0xfc] ss:$20 sps:$4 sm:$0xff]  }
  0x15   :  { %1269 = vmatpush3.bf16.msra.mxu1 %v1388_v19  ;;  %1206 = vmatprep.subr.bf16.mxu0 %v1389_v20  ;;  %v1438_v58 = vld [vmem:[%s1872_s0 + $0xc8] ss:$20 sps:$4 sm:$0xff]   ;;  %v1444_v62 = vld [vmem:[%s1872_s0 + $0xf0] ss:$20 sps:$4 sm:$0xff]   ;;  %v1445_v63 = vld [vmem:[%s1872_s0 + $0xf8] ss:$20 sps:$4 sm:$0xff]  }
  0x16   :  { %1270 = vmatprep.subr.bf16.mxu1 %v1390_v21  ;;  %v1440_v60 = vld [vmem:[%s1872_s0 + $0xf4] ss:$20 sps:$4 sm:$0xff]   ;;  %v1447_v0 = vld [vmem:[%s1872_s0 + $0x11c] ss:$20 sps:$4 sm:$0xff]   ;;  %v1449_v1 = vld [vmem:[%s1872_s0 + $0x124] ss:$20 sps:$4 sm:$0xff]  }
  0x17   :  { %v1451_v2 = vld [vmem:[%s1872_s0 + $0x118] ss:$20 sps:$4 sm:$0xff]   ;;  %v1452_v3 = vld [vmem:[%s1872_s0 + $0x120] ss:$20 sps:$4 sm:$0xff]   ;;  %v1453_v4 = vld [vmem:[%s1872_s0 + $0x10] ss:$20 sps:$4 sm:$0xff]  }
  0x18   :  { %1207 = vmatpush3.bf16.msra.mxu0 %v1391_v22  ;;  %v1454_v5 = vld [vmem:[%s1872_s0 + $0xb0] ss:$20 sps:$4 sm:$0xff]   ;;  %v1455_v6 = vld [vmem:[%s1872_s0 + $0x38] ss:$20 sps:$4 sm:$0xff]   ;;  %v1457_v8 = vld [vmem:[%s1872_s0 + $0x60] ss:$20 sps:$4 sm:$0xff]  }
  0x19   :  { %1271 = vmatpush3.bf16.msra.mxu1 %v1392_v23  ;;  %1208 = vmatprep.subr.bf16.mxu0 %v1393_v24  ;;  %v1456_v7 = vld [vmem:[%s1872_s0 + $0xd8] ss:$20 sps:$4 sm:$0xff]   ;;  %v1458_v9 = vld [vmem:[%s1872_s0 + $0x100] ss:$20 sps:$4 sm:$0xff]   ;;  %v1459_v10 = vld [vmem:[%s1872_s0 + $0x88] ss:$20 sps:$4 sm:$0xff]  }
  0x1a   :  { %1272 = vmatprep.subr.bf16.mxu1 %v1394_v25  ;;  %v1460_v11 = vld [vmem:[%s1872_s0 + $0x128] ss:$20 sps:$4 sm:$0xff]   ;;  %22 = vst.msk [vmem:[#allocation2 + $0x10] sm:$0xff] %vm19_vm0, %v1461_v12  ;;  %20 = vst.msk [vmem:[#allocation2] sm:$0xff] %vm19_vm0, %v1461_v12 }
  0x1b   :  { %21 = vst.msk [vmem:[#allocation2 + $0x8] sm:$0xff] %vm19_vm0, %v1461_v12  ;;  %23 = vst.msk [vmem:[#allocation2 + $0x18] sm:$0xff] %vm19_vm0, %v1461_v12 }
  0x1c   :  { %1209 = vmatpush3.bf16.msra.mxu0 %v1395_v26  ;;  %24 = vst.msk [vmem:[#allocation2 + $0x20] sm:$0xff] %vm19_vm0, %v1461_v12  ;;  %25 = vst.msk [vmem:[#allocation2 + $0x28] sm:$0xff] %vm19_vm0, %v1461_v12 }
  0x1d   :  { %1273 = vmatpush3.bf16.msra.mxu1 %v1396_v27  ;;  %1210 = vmatprep.subr.bf16.mxu0 %v1397_v28  ;;  %26 = vst.msk [vmem:[#allocation2 + $0x30] sm:$0xff] %vm19_vm0, %v1461_v12  ;;  %27 = vst.msk [vmem:[#allocation2 + $0x38] sm:$0xff] %vm19_vm0, %v1461_v12 }
  0x1e   :  { %1274 = vmatprep.subr.bf16.mxu1 %v1398_v29  ;;  %28 = vst.msk [vmem:[#allocation2 + $0x40] sm:$0xff] %vm19_vm0, %v1461_v12  ;;  %29 = vst.msk [vmem:[#allocation2 + $0x48] sm:$0xff] %vm19_vm0, %v1461_v12 }
  0x1f   :  { %30 = vst.msk [vmem:[#allocation2 + $0x50] sm:$0xff] %vm19_vm0, %v1461_v12  ;;  %31 = vst.msk [vmem:[#allocation2 + $0x58] sm:$0xff] %vm19_vm0, %v1461_v12 }
  0x20   :  { %1211 = vmatpush3.bf16.msra.mxu0 %v1399_v30  ;;  %32 = vst.msk [vmem:[#allocation2 + $0x60] sm:$0xff] %vm19_vm0, %v1461_v12  ;;  %33 = vst.msk [vmem:[#allocation2 + $0x68] sm:$0xff] %vm19_vm0, %v1461_v12 }
  0x21   :  { %1275 = vmatpush3.bf16.msra.mxu1 %v1400_v31  ;;  %1336 = vmatprep.subr.bf16.mxu0 %v1407_v36  ;;  %34 = vst.msk [vmem:[#allocation2 + $0x70] sm:$0xff] %vm19_vm0, %v1461_v12  ;;  %35 = vst.msk [vmem:[#allocation2 + $0x78] sm:$0xff] %vm19_vm0, %v1461_v12 }
  0x22   :  { %1360 = vmatprep.subr.bf16.mxu1 %v1407_v36 }
  0x23   :  { %646 = vmatmul.mubr.bf16.vlgmr.msra.gmra.mrb[0].mxu0 %v1401_v32 }
  0x24   :  { %743 = vmatmul.mubr.bf16.vlgmr.msra.gmra.mrb[0].mxu1 %v1404_v34  ;;  %1337 = vmatpush3.bf16.msra.mxu0 %v1407_v36 }
  0x25   :  { %1364 = vmatpush3.bf16.msra.mxu1 %v1407_v36  ;;  %653 = vmatprep.mubr.bf16.mxu0 %v1408_v37 }
  0x26   :  { %750 = vmatprep.mubr.bf16.mxu1 %v1410_v38  ;;  %1338 = vmatprep.subr.bf16.mxu0 %v1420_v42 }
  0x27   :  { %1361 = vmatprep.subr.bf16.mxu1 %v1420_v42 }
  0x28   :  { %1339 = vmatpush3.bf16.msra.mxu0 %v1420_v42 }
  0x29   :  { %1365 = vmatpush3.bf16.msra.mxu1 %v1420_v42  ;;  %1340 = vmatprep.subr.bf16.mxu0 %v1433_v46 }
  0x2a   :  { %1362 = vmatprep.subr.bf16.mxu1 %v1433_v46 }
  0x2b   :  { %654 = vmatmul.mubr.bf16.gmra.mrb[4].mxu0 %v1412_v39 }
  0x2c   :  { %751 = vmatmul.mubr.bf16.gmra.mrb[4].mxu1 %v1413_v40  ;;  %661 = vmatprep.mubr.bf16.mxu0 %v1414_v41 }
  0x2d   :  { %758 = vmatprep.mubr.bf16.mxu1 %v1416_v43  ;;  %1341 = vmatpush3.bf16.msra.mxu0 %v1433_v46 }
  0x2e   :  { %1366 = vmatpush3.bf16.msra.mxu1 %v1433_v46  ;;  %1342 = vmatprep.subr.bf16.mxu0 %v1446_v49 }
  0x2f   :  { %1363 = vmatprep.subr.bf16.mxu1 %v1446_v49 }
  0x31   :  { %1343 = vmatpush3.bf16.msra.mxu0 %v1446_v49 }
  0x32   :  { %1367 = vmatpush3.bf16.msra.mxu1 %v1446_v49 }
  0x33   :  { %662 = vmatmul.mubr.bf16.gmra.mrb[8].mxu0 %v1418_v44 }
  0x34   :  { %759 = vmatmul.mubr.bf16.gmra.mrb[8].mxu1 %v1419_v45  ;;  %669 = vmatprep.mubr.bf16.mxu0 %v1421_v47 }
  0x35   :  { %766 = vmatprep.mubr.bf16.mxu1 %v1423_v48 }
  0x3b   :  { %670 = vmatmul.mubr.bf16.gmra.mrb[12].mxu0 %v1425_v50 }
  0x3c   :  { %767 = vmatmul.mubr.bf16.gmra.mrb[12].mxu1 %v1426_v51  ;;  %677 = vmatprep.mubr.bf16.mxu0 %v1427_v52 }
  0x3d   :  { %774 = vmatprep.mubr.bf16.mxu1 %v1429_v53 }
  0x43   :  { %678 = vmatmul.mubr.bf16.gmra.mrb[16].mxu0 %v1431_v54 }
  0x44   :  { %775 = vmatmul.mubr.bf16.gmra.mrb[16].mxu1 %v1432_v55  ;;  %685 = vmatprep.mubr.bf16.mxu0 %v1434_v56 }
  0x45   :  { %782 = vmatprep.mubr.bf16.mxu1 %v1436_v57 }
  0x4b   :  { %686 = vmatmul.mubr.bf16.gmra.mrb[20].mxu0 %v1438_v58 }
  0x4c   :  { %783 = vmatmul.mubr.bf16.gmra.mrb[20].mxu1 %v1439_v59  ;;  %693 = vmatprep.mubr.bf16.mxu0 %v1440_v60 }
  0x4d   :  { %790 = vmatprep.mubr.bf16.mxu1 %v1442_v61 }
  0x53   :  { %694 = vmatmul.mubr.bf16.gmra.mrb[24].mxu0 %v1444_v62 }
  0x54   :  { %791 = vmatmul.mubr.bf16.gmra.mrb[24].mxu1 %v1445_v63  ;;  %701 = vmatprep.mubr.bf16.mxu0 %v1447_v0 }
  0x55   :  { %798 = vmatprep.mubr.bf16.mxu1 %v1449_v1 }
  0x5b   :  { %702 = vmatmul.mubr.bf16.gmra.mrb[28].mxu0 %v1451_v2 }
  0x5c   :  { %799 = vmatmul.mubr.bf16.gmra.mrb[28].mxu1 %v1452_v3  ;;  %1344 = vmatprep.mubr.msk.bf16.mxu0 %vm19_vm0, %v1453_v4 }
  0x5d   :  { %1352 = vmatprep.mubr.msk.bf16.mxu1 %vm19_vm0, %v1454_v5 }
  0x63   :  { %1345 = vmatmul.mubr.msk.bf16.vlgmr.msra.gmra.mrb[32].mxu0 %vm19_vm0, %v1455_v6 }
  0x64   :  { %1353 = vmatmul.mubr.msk.bf16.vlgmr.msra.gmra.mrb[32].mxu1 %vm19_vm0, %v1456_v7  ;;  %1348 = vmatprep.mubr.msk.bf16.mxu0 %vm19_vm0, %v1457_v8 }
  0x65   :  { %1356 = vmatprep.mubr.msk.bf16.mxu1 %vm19_vm0, %v1458_v9 }
  0x6b   :  { %1349 = vmatmul.mubr.msk.bf16.gmra.mrb[36].mxu0 %vm19_vm0, %v1459_v10 }
  0x6c   :  { %1357 = vmatmul.mubr.msk.bf16.gmra.mrb[36].mxu1 %vm19_vm0, %v1460_v11 }
  0xf6   :  { %v1212_v13 = vpop.f32.mrb[0].mxu0 }
  0xf7   :  { %v1276_v14 = vpop.f32.mrb[0].mxu1  ;;  %v1213_v15 = vpop.f32.mrb[1].mxu0 }
  0xf8   :  { %v1214_v16 = vadd.f32 %v1213_v15, %v1212_v13  ;;  %v1277_v17 = vpop.f32.mrb[1].mxu1  ;;  %v1215_v18 = vpop.f32.mrb[2].mxu0 }
  0xf9   :  { %v1278_v19 = vadd.f32 %v1277_v17, %v1276_v14  ;;  %v1279_v20 = vpop.f32.mrb[2].mxu1  ;;  %v1216_v21 = vpop.f32.mrb[3].mxu0 }
  0xfa   :  { %v1217_v22 = vadd.f32 %v1216_v21, %v1215_v18  ;;  %v1280_v23 = vpop.f32.mrb[3].mxu1 }
  0xfb   :  { %v1281_v24 = vadd.f32 %v1280_v23, %v1279_v20  ;;  %v1734_v25 = vadd.f32 %v1278_v19, %v1214_v16 }
  0xfd   :  { %v1736_v26 = vadd.f32 %v1281_v24, %v1217_v22 }
  0xfe   :  { %v1218_v27 = vpop.f32.mrb[4].mxu0 }
  0xff   :  { %v1282_v28 = vpop.f32.mrb[4].mxu1  ;;  %v1219_v29 = vpop.f32.mrb[5].mxu0 }
 0x100   :  { %v1220_v30 = vadd.f32 %v1219_v29, %v1218_v27  ;;  %v1283_v31 = vpop.f32.mrb[5].mxu1  ;;  %v1221_v32 = vpop.f32.mrb[6].mxu0 }
 0x101   :  { %v1284_v33 = vadd.f32 %v1283_v31, %v1282_v28  ;;  %v1285_v34 = vpop.f32.mrb[6].mxu1  ;;  %v1222_v35 = vpop.f32.mrb[7].mxu0 }
 0x102   :  { %v1223_v36 = vadd.f32 %v1222_v35, %v1221_v32  ;;  %v1286_v37 = vpop.f32.mrb[7].mxu1 }
 0x103   :  { %v1287_v38 = vadd.f32 %v1286_v37, %v1285_v34  ;;  %v1738_v39 = vadd.f32 %v1284_v33, %v1220_v30 }
 0x105   :  { %v1740_v40 = vadd.f32 %v1287_v38, %v1223_v36 }
 0x106   :  { %v1224_v41 = vpop.f32.mrb[8].mxu0 }
 0x107   :  { %v1288_v42 = vpop.f32.mrb[8].mxu1  ;;  %v1225_v43 = vpop.f32.mrb[9].mxu0 }
 0x108   :  { %v1226_v44 = vadd.f32 %v1225_v43, %v1224_v41  ;;  %v1289_v45 = vpop.f32.mrb[9].mxu1  ;;  %v1227_v46 = vpop.f32.mrb[10].mxu0 }
 0x109   :  { %v1290_v47 = vadd.f32 %v1289_v45, %v1288_v42  ;;  %v1291_v48 = vpop.f32.mrb[10].mxu1  ;;  %v1228_v49 = vpop.f32.mrb[11].mxu0 }
 0x10a   :  { %v1229_v50 = vadd.f32 %v1228_v49, %v1227_v46  ;;  %v1292_v51 = vpop.f32.mrb[11].mxu1 }
 0x10b   :  { %v1293_v52 = vadd.f32 %v1292_v51, %v1291_v48  ;;  %v1742_v53 = vadd.f32 %v1290_v47, %v1226_v44 }
 0x10d   :  { %v1744_v54 = vadd.f32 %v1293_v52, %v1229_v50 }
 0x10e   :  { %v1230_v55 = vpop.f32.mrb[12].mxu0 }
 0x10f   :  { %v1294_v56 = vpop.f32.mrb[12].mxu1  ;;  %v1231_v57 = vpop.f32.mrb[13].mxu0 }
 0x110   :  { %v1232_v58 = vadd.f32 %v1231_v57, %v1230_v55  ;;  %v1295_v59 = vpop.f32.mrb[13].mxu1  ;;  %v1233_v60 = vpop.f32.mrb[14].mxu0 }
 0x111   :  { %v1296_v61 = vadd.f32 %v1295_v59, %v1294_v56  ;;  %v1297_v62 = vpop.f32.mrb[14].mxu1  ;;  %v1234_v63 = vpop.f32.mrb[15].mxu0 }
 0x112   :  { %v1235_v0 = vadd.f32 %v1234_v63, %v1233_v60  ;;  %v1298_v1 = vpop.f32.mrb[15].mxu1 }
 0x113   :  { %v1299_v2 = vadd.f32 %v1298_v1, %v1297_v62  ;;  %v1746_v3 = vadd.f32 %v1296_v61, %v1232_v58 }
 0x115   :  { %v1748_v4 = vadd.f32 %v1299_v2, %v1235_v0 }
 0x116   :  { %v1236_v5 = vpop.f32.mrb[16].mxu0 }
 0x117   :  { %v1300_v6 = vpop.f32.mrb[16].mxu1  ;;  %v1237_v7 = vpop.f32.mrb[17].mxu0 }
 0x118   :  { %v1238_v8 = vadd.f32 %v1237_v7, %v1236_v5  ;;  %v1301_v9 = vpop.f32.mrb[17].mxu1  ;;  %v1239_v10 = vpop.f32.mrb[18].mxu0  ;;  %v38_v5 = vld [vmem:[#allocation2 + $0x10] sm:$0xff] }
 0x119   :  { %v1302_v11 = vadd.f32 %v1301_v9, %v1300_v6  ;;  %v1303_v12 = vpop.f32.mrb[18].mxu1  ;;  %v1240_v13 = vpop.f32.mrb[19].mxu0 }
 0x11a   :  { %v1241_v14 = vadd.f32 %v1240_v13, %v1239_v10  ;;  %v1304_v15 = vpop.f32.mrb[19].mxu1  ;;  %v36_v10 = vld [vmem:[#allocation2] sm:$0xff] }
 0x11b   :  { %v1305_v16 = vadd.f32 %v1304_v15, %v1303_v12  ;;  %v777_v17 = vadd.f32 %v1302_v11, %v1238_v8  ;;  %v46_v8 = vld [vmem:[#allocation2 + $0x50] sm:$0xff] }
 0x11d   :  { %v1750_v18 = vadd.f32 %v1305_v16, %v1241_v14  ;;  %v44_v14 = vld [vmem:[#allocation2 + $0x40] sm:$0xff]  ;;  %v39_v16 = vld [vmem:[#allocation2 + $0x18] sm:$0xff] }
 0x11e   :  { %v1242_v19 = vpop.f32.mrb[20].mxu0 }
 0x11f   :  { %v1306_v20 = vpop.f32.mrb[20].mxu1  ;;  %v1243_v21 = vpop.f32.mrb[21].mxu0 }
 0x120   :  { %v1244_v22 = vadd.f32 %v1243_v21, %v1242_v19  ;;  %v1307_v23 = vpop.f32.mrb[21].mxu1  ;;  %v1245_v24 = vpop.f32.mrb[22].mxu0 }
 0x121   :  { %v1308_v27 = vadd.f32 %v1307_v23, %v1306_v20  ;;  %v1309_v28 = vpop.f32.mrb[22].mxu1  ;;  %v1246_v29 = vpop.f32.mrb[23].mxu0  ;;  %v47_v23 = vld [vmem:[#allocation2 + $0x58] sm:$0xff] }
 0x122   :  { %v1247_v30 = vadd.f32 %v1246_v29, %v1245_v24  ;;  %v1310_v31 = vpop.f32.mrb[23].mxu1 }
 0x123   :  { %v1311_v32 = vadd.f32 %v1310_v31, %v1309_v28  ;;  %v785_v33 = vadd.f32 %v1308_v27, %v1244_v22  ;;  %v37_v27 = vld [vmem:[#allocation2 + $0x8] sm:$0xff] }
 0x125   :  { %v788_v34 = vadd.f32 %v1311_v32, %v1247_v30  ;;  %v45_v32 = vld [vmem:[#allocation2 + $0x48] sm:$0xff] }
 0x126   :  { %v1248_v35 = vpop.f32.mrb[24].mxu0 }
 0x127   :  { %v1312_v36 = vpop.f32.mrb[24].mxu1  ;;  %v1249_v37 = vpop.f32.mrb[25].mxu0 }
 0x128   :  { %v1250_v38 = vadd.f32 %v1249_v37, %v1248_v35  ;;  %v1313_v41 = vpop.f32.mrb[25].mxu1  ;;  %v1251_v42 = vpop.f32.mrb[26].mxu0 }
 0x129   :  { %v1314_v43 = vadd.f32 %v1313_v41, %v1312_v36  ;;  %v1315_v44 = vpop.f32.mrb[26].mxu1  ;;  %v1252_v45 = vpop.f32.mrb[27].mxu0 }
 0x12a   :  { %v1253_v46 = vadd.f32 %v1252_v45, %v1251_v42  ;;  %v1316_v47 = vpop.f32.mrb[27].mxu1  ;;  %v40_v42 = vld [vmem:[#allocation2 + $0x20] sm:$0xff] }
 0x12b   :  { %v1317_v48 = vadd.f32 %v1316_v47, %v1315_v44  ;;  %v1752_v49 = vadd.f32 %v1314_v43, %v1250_v38  ;;  %v50_v38 = vld [vmem:[#allocation2 + $0x70] sm:$0xff]  ;;  %v1775_v44 = vld [vmem:[%s1873_s2] ss:$0 sm:$0xff] }
 0x12c   :  { %v48_v47 = vld [vmem:[#allocation2 + $0x60] sm:$0xff] }
 0x12d   :  { %v1754_v50 = vadd.f32 %v1317_v48, %v1253_v46 }
 0x12e   :  { %v1254_v51 = vpop.f32.mrb[28].mxu0 }
 0x12f   :  { %v1318_v52 = vpop.f32.mrb[28].mxu1  ;;  %v1255_v55 = vpop.f32.mrb[29].mxu0 }
 0x130   :  { %v1256_v56 = vadd.f32 %v1255_v55, %v1254_v51  ;;  %v1319_v57 = vpop.f32.mrb[29].mxu1  ;;  %v1257_v58 = vpop.f32.mrb[30].mxu0  ;;  %v43_v51 = vld [vmem:[#allocation2 + $0x38] sm:$0xff] }
 0x131   :  { %v1320_v59 = vadd.f32 %v1319_v57, %v1318_v52  ;;  %v1321_v60 = vpop.f32.mrb[30].mxu1  ;;  %v1258_v61 = vpop.f32.mrb[31].mxu0  ;;  %v51_v57 = vld [vmem:[#allocation2 + $0x78] sm:$0xff] }
 0x132   :  { %v1259_v62 = vadd.f32 %v1258_v61, %v1257_v58  ;;  %v1322_v63 = vpop.f32.mrb[31].mxu1 }
 0x133   :  { %v1323_v0 = vadd.f32 %v1322_v63, %v1321_v60  ;;  %v801_v1 = vadd.f32 %v1320_v59, %v1256_v56  ;;  %v41_v59 = vld [vmem:[#allocation2 + $0x28] sm:$0xff] }
 0x135   :  { %v1756_v2 = vadd.f32 %v1323_v0, %v1259_v62 }
 0x136   :  { %v1346_v6 = vpop.f32.mrb[32].mxu0 }
 0x137   :  { %v850_v7 = vadd.f32 %v1346_v6, %v1738_v39  ;;  %v1354_v9 = vpop.f32.mrb[32].mxu1  ;;  %v841_v11 = vpop.f32.mrb[33].mxu0 }
 0x138   :  { %v882_v12 = vadd.f32 %v1354_v9, %v785_v33  ;;  %v842_v13 = vadd.f32 %v841_v11, %v1734_v25  ;;  %v873_v15 = vpop.f32.mrb[33].mxu1  ;;  %v1347_v19 = vpop.f32.mrb[34].mxu0 }
 0x139   :  { %v906_v20 = vadd.f32 %v850_v7, %v38_v5  ;;  %v874_v21 = vadd.f32 %v873_v15, %v777_v17  ;;  %v853_v22 = vadd.f32 %v1347_v19, %v1740_v40  ;;  %v1355_v24 = vpop.f32.mrb[34].mxu1  ;;  %v844_v28 = vpop.f32.mrb[35].mxu0 }
 0x13a   :  { %v914_v39 = vadd.f32 %v882_v12, %v46_v8  ;;  %v904_v29 = vadd.f32 %v842_v13, %v36_v10  ;;  %v885_v30 = vadd.f32 %v1355_v24, %v788_v34  ;;  %v845_v31 = vadd.f32 %v844_v28, %v1736_v26  ;;  %v876_v33 = vpop.f32.mrb[35].mxu1  ;;  %v42_v26 = vld [vmem:[#allocation2 + $0x30] sm:$0xff] }
 0x13b   :  { %922 = vst.msk [vmem:[#allocation2 + $0x10] sm:$0xff] %vm19_vm0, %v906_v20  ;;  %v912_v25 = vadd.f32 %v874_v21, %v44_v14  ;;  %v907_v35 = vadd.f32 %v853_v22, %v39_v16  ;;  %v877_v36 = vadd.f32 %v876_v33, %v1750_v18 }
 0x13c   :  { %930 = vst.msk [vmem:[#allocation2 + $0x50] sm:$0xff] %vm19_vm0, %v914_v39  ;;  %920 = vst.msk [vmem:[#allocation2] sm:$0xff] %vm19_vm0, %v904_v29  ;;  %v915_v40 = vadd.f32 %v885_v30, %v47_v23  ;;  %v905_v17 = vadd.f32 %v845_v31, %v37_v27 }
 0x13d   :  { %928 = vst.msk [vmem:[#allocation2 + $0x40] sm:$0xff] %vm19_vm0, %v912_v25  ;;  %923 = vst.msk [vmem:[#allocation2 + $0x18] sm:$0xff] %vm19_vm0, %v907_v35  ;;  %v913_v34 = vadd.f32 %v877_v36, %v45_v32 }
 0x13e   :  { %931 = vst.msk [vmem:[#allocation2 + $0x58] sm:$0xff] %vm19_vm0, %v915_v40  ;;  %921 = vst.msk [vmem:[#allocation2 + $0x8] sm:$0xff] %vm19_vm0, %v905_v17  ;;  %v1350_v37 = vpop.f32.mrb[36].mxu0 }
 0x13f   :  { %929 = vst.msk [vmem:[#allocation2 + $0x48] sm:$0xff] %vm19_vm0, %v913_v34  ;;  %v866_v18 = vadd.f32 %v1350_v37, %v1746_v3  ;;  %v1358_v41 = vpop.f32.mrb[36].mxu1  ;;  %v857_v43 = vpop.f32.mrb[37].mxu0 }
 0x140   :  { %v898_v45 = vadd.f32 %v1358_v41, %v801_v1  ;;  %v858_v46 = vadd.f32 %v857_v43, %v1742_v53  ;;  %v889_v48 = vpop.f32.mrb[37].mxu1  ;;  %v1351_v52 = vpop.f32.mrb[38].mxu0  ;;  %v49_v1 = vld [vmem:[#allocation2 + $0x68] sm:$0xff] }
 0x141   :  { %v910_v55 = vadd.f32 %v866_v18, %v42_v26  ;;  %v890_v3 = vadd.f32 %v889_v48, %v1752_v49  ;;  %v869_v56 = vadd.f32 %v1351_v52, %v1748_v4  ;;  %v1359_v58 = vpop.f32.mrb[38].mxu1  ;;  %v860_v60 = vpop.f32.mrb[39].mxu0 }
 0x142   :  { %v941_v61 = vld [vmem:[#allocation2 + $0x10] sm:$0xff]  ;;  %v918_v62 = vadd.f32 %v898_v45, %v50_v38  ;;  %v908_v63 = vadd.f32 %v858_v46, %v40_v42  ;;  %v901_v0 = vadd.f32 %v1359_v58, %v1756_v2  ;;  %v861_v53 = vadd.f32 %v860_v60, %v1744_v54  ;;  %v892_v5 = vpop.f32.mrb[39].mxu1 }
 0x143   :  { %v964_v6 = vadd.f32 %v1775_v44, %v941_v61  ;;  %v949_v7 = vld [vmem:[#allocation2 + $0x50] sm:$0xff]  ;;  %v939_v8 = vld [vmem:[#allocation2] sm:$0xff]  ;;  %926 = vst.msk [vmem:[#allocation2 + $0x30] sm:$0xff] %vm19_vm0, %v910_v55  ;;  %v916_v4 = vadd.f32 %v890_v3, %v48_v47  ;;  %v911_v49 = vadd.f32 %v869_v56, %v43_v51  ;;  %v893_v9 = vadd.f32 %v892_v5, %v1754_v50 }
 0x144   :  { %v972_v10 = vadd.f32 %v1775_v44, %v949_v7  ;;  %v962_v11 = vadd.f32 %v1775_v44, %v939_v8  ;;  %v947_v12 = vld [vmem:[#allocation2 + $0x40] sm:$0xff]  ;;  %v942_v2 = vld [vmem:[#allocation2 + $0x18] sm:$0xff]  ;;  %934 = vst.msk [vmem:[#allocation2 + $0x70] sm:$0xff] %vm19_vm0, %v918_v62  ;;  %924 = vst.msk [vmem:[#allocation2 + $0x20] sm:$0xff] %vm19_vm0, %v908_v63  ;;  %v919_v54 = vadd.f32 %v901_v0, %v51_v57 }
 0x145   :  { %v909_v13 = vadd.f32 %v861_v53, %v41_v59  ;;  %v980_v14 = vmax.f32 %v964_v6, 0.0  ;;  %v970_v15 = vadd.f32 %v1775_v44, %v947_v12  ;;  %v965_v16 = vadd.f32 %v1775_v44, %v942_v2  ;;  %v950_v19 = vld [vmem:[#allocation2 + $0x58] sm:$0xff]  ;;  %v940_v20 = vld [vmem:[#allocation2 + $0x8] sm:$0xff]  ;;  %932 = vst.msk [vmem:[#allocation2 + $0x60] sm:$0xff] %vm19_vm0, %v916_v4  ;;  %927 = vst.msk [vmem:[#allocation2 + $0x38] sm:$0xff] %vm19_vm0, %v911_v49 }
 0x146   :  { %v917_v50 = vadd.f32 %v893_v9, %v49_v1  ;;  %v988_v21 = vmax.f32 %v972_v10, 0.0  ;;  %v978_v22 = vmax.f32 %v962_v11, 0.0  ;;  %v973_v23 = vadd.f32 %v1775_v44, %v950_v19  ;;  %v948_v27 = vld [vmem:[#allocation2 + $0x48] sm:$0xff]  ;;  %935 = vst.msk [vmem:[#allocation2 + $0x78] sm:$0xff] %vm19_vm0, %v919_v54 }
 0x147   :  { %v963_v24 = vadd.f32 %v1775_v44, %v940_v20  ;;  %925 = vst.msk [vmem:[#allocation2 + $0x28] sm:$0xff] %vm19_vm0, %v909_v13  ;;  %v1182_v28 = vpack.c.bf16 %v980_v14, %v980_v14  ;;  %v986_v39 = vmax.f32 %v970_v15, 0.0  ;;  %v981_v29 = vmax.f32 %v965_v16, 0.0 }
 0x148   :  { %v971_v30 = vadd.f32 %v1775_v44, %v948_v27  ;;  %933 = vst.msk [vmem:[#allocation2 + $0x68] sm:$0xff] %vm19_vm0, %v917_v50  ;;  %v1190_v31 = vpack.c.bf16 %v988_v21, %v988_v21  ;;  %v1180_v32 = vpack.c.bf16 %v978_v22, %v978_v22  ;;  %v989_v33 = vmax.f32 %v973_v23, 0.0 }
 0x149   :  { %v979_v25 = vmax.f32 %v963_v24, 0.0  ;;  %1061 = vst.msk [vmem:[%s1874_s3 + $0x8] sm:$0xf] %vm1058_vm1, %v1182_v28  ;;  %v1188_v35 = vpack.c.bf16 %v986_v39, %v986_v39  ;;  %v1183_v36 = vpack.c.bf16 %v981_v29, %v981_v29 }
 0x14a   :  { %v987_v40 = vmax.f32 %v971_v30, 0.0  ;;  %1069 = vst.msk [vmem:[%s1874_s3 + $0x28] sm:$0xf] %vm1058_vm1, %v1190_v31  ;;  %1059 = vst.msk [vmem:[%s1874_s3] sm:$0xf] %vm1058_vm1, %v1180_v32  ;;  %v1191_v17 = vpack.c.bf16 %v989_v33, %v989_v33  ;;  %v945_v26 = vld [vmem:[#allocation2 + $0x30] sm:$0xff] }
 0x14b   :  { %v1181_v34 = vpack.c.bf16 %v979_v25, %v979_v25  ;;  %1067 = vst.msk [vmem:[%s1874_s3 + $0x20] sm:$0xf] %vm1058_vm1, %v1188_v35  ;;  %1062 = vst.msk [vmem:[%s1874_s3 + $0xc] sm:$0xf] %vm1058_vm1, %v1183_v36  ;;  %v968_v18 = vadd.f32 %v1775_v44, %v945_v26  ;;  %v953_v38 = vld [vmem:[#allocation2 + $0x70] sm:$0xff]  ;;  %v943_v41 = vld [vmem:[#allocation2 + $0x20] sm:$0xff] }
 0x14c   :  { %v1189_v37 = vpack.c.bf16 %v987_v40, %v987_v40  ;;  %1070 = vst.msk [vmem:[%s1874_s3 + $0x2c] sm:$0xf] %vm1058_vm1, %v1191_v17  ;;  %v976_v42 = vadd.f32 %v1775_v44, %v953_v38  ;;  %v966_v43 = vadd.f32 %v1775_v44, %v943_v41  ;;  %v951_v45 = vld [vmem:[#allocation2 + $0x60] sm:$0xff]  ;;  %v946_v46 = vld [vmem:[#allocation2 + $0x38] sm:$0xff] }
 0x14d   :  { %1060 = vst.msk [vmem:[%s1874_s3 + $0x4] sm:$0xf] %vm1058_vm1, %v1181_v34  ;;  %v984_v47 = vmax.f32 %v968_v18, 0.0  ;;  %v974_v48 = vadd.f32 %v1775_v44, %v951_v45  ;;  %v969_v51 = vadd.f32 %v1775_v44, %v946_v46  ;;  %v954_v52 = vld [vmem:[#allocation2 + $0x78] sm:$0xff] }
 0x14e   :  { %1068 = vst.msk [vmem:[%s1874_s3 + $0x24] sm:$0xf] %vm1058_vm1, %v1189_v37  ;;  %v944_v55 = vld [vmem:[#allocation2 + $0x28] sm:$0xff]  ;;  %v992_v3 = vmax.f32 %v976_v42, 0.0  ;;  %v982_v56 = vmax.f32 %v966_v43, 0.0  ;;  %v977_v57 = vadd.f32 %v1775_v44, %v954_v52 }
 0x14f   :  { %v967_v58 = vadd.f32 %v1775_v44, %v944_v55  ;;  %v952_v59 = vld [vmem:[#allocation2 + $0x68] sm:$0xff]  ;;  %v1186_v60 = vpack.c.bf16 %v984_v47, %v984_v47  ;;  %v990_v61 = vmax.f32 %v974_v48, 0.0  ;;  %v985_v62 = vmax.f32 %v969_v51, 0.0 }
 0x150   :  { %v975_v63 = vadd.f32 %v1775_v44, %v952_v59  ;;  %v1194_v0 = vpack.c.bf16 %v992_v3, %v992_v3  ;;  %v1184_v53 = vpack.c.bf16 %v982_v56, %v982_v56  ;;  %v993_v1 = vmax.f32 %v977_v57, 0.0 }
 0x151   :  { %v983_v5 = vmax.f32 %v967_v58, 0.0  ;;  %1065 = vst.msk [vmem:[%s1874_s3 + $0x18] sm:$0xf] %vm1058_vm1, %v1186_v60  ;;  %v1192_v6 = vpack.c.bf16 %v990_v61, %v990_v61  ;;  %v1187_v7 = vpack.c.bf16 %v985_v62, %v985_v62 }
 0x152   :  { %v991_v8 = vmax.f32 %v975_v63, 0.0  ;;  %1073 = vst.msk [vmem:[%s1874_s3 + $0x38] sm:$0xf] %vm1058_vm1, %v1194_v0  ;;  %1063 = vst.msk [vmem:[%s1874_s3 + $0x10] sm:$0xf] %vm1058_vm1, %v1184_v53  ;;  %v1195_v44 = vpack.c.bf16 %v993_v1, %v993_v1 }
 0x153   :  { %v1185_v4 = vpack.c.bf16 %v983_v5, %v983_v5  ;;  %1071 = vst.msk [vmem:[%s1874_s3 + $0x30] sm:$0xf] %vm1058_vm1, %v1192_v6  ;;  %1066 = vst.msk [vmem:[%s1874_s3 + $0x1c] sm:$0xf] %vm1058_vm1, %v1187_v7 }
 0x154   :  { %v1193_v49 = vpack.c.bf16 %v991_v8, %v991_v8  ;;  %1074 = vst.msk [vmem:[%s1874_s3 + $0x3c] sm:$0xf] %vm1058_vm1, %v1195_v44 }
 0x155   :  { %1064 = vst.msk [vmem:[%s1874_s3 + $0x14] sm:$0xf] %vm1058_vm1, %v1185_v4 }
 0x156   :  { %1072 = vst.msk [vmem:[%s1874_s3 + $0x34] sm:$0xf] %vm1058_vm1, %v1193_v49 }

// kernel: ingredient_net_forward.45
= control target key start
LH: loop header
LB: loop body
LE: loop exit
PB: predicated region body
PF: predicated region fallthrough
CT: control target
= control target key end

     0   :  { %v1990_v0 = vmov 0   ;;  %vm576_vm0 = vcmask 154624   ;;  %vm673_vm1 = vcmask 1040384   ;;  %vm674_vm2 = vcmask 1041408   ;;  %s2793_s1 = inlined_call_operand.vmem [shape: bf16[147,64], index: 1, kind: input, shape index: {}]   ;;  %s2794_s0 = inlined_call_operand.vmem [shape: bf16[512,147], index: 0, kind: input, shape index: {}]   ;;  %s2795_s2 = inlined_call_operand.vmem [shape: f32[1,64], index: 2, kind: input, shape index: {}]   ;;  %s2796_s3 = inlined_call_operand.vmem [shape: bf16[512,64], index: 3, kind: output, shape index: {}]  }
   0x1   :  { %680 = vmatprep.subr.bf16.mxu0 %v1990_v0  ;;  %1860 = vmatprep.subr.bf16.mxu1 %v1990_v0  ;;  %v1883_v1 = vld [vmem:[%s2793_s1] sm:$0xff]   ;;  %v1884_v2 = vld [vmem:[%s2793_s1 + $0x8] sm:$0xff]   ;;  %v1885_v3 = vld [vmem:[%s2793_s1 + $0x10] sm:$0xff]   ;;  %v1991_v11 = vmov 65535   ;;  %vm19_vm3 = vcmask 523264   ;;  %v1992_v17 = vmov 0.0  }
   0x2   :  { %681 = vmatpush1.bf16.msra.mxu0 %v1883_v1  ;;  %1870 = vmatpush1.bf16.msra.mxu1 %v1883_v1  ;;  %v1886_v4 = vld [vmem:[%s2793_s1 + $0x18] sm:$0xff]   ;;  %v1895_v5 = vld [vmem:[%s2794_s0 + $0x4] ss:$8 sps:$4 sm:$0xff]   ;;  %v1889_v9 = vld [vmem:[%s2793_s1 + $0x30] sm:$0xff]   ;;  %v675_v12 = vsel %vm673_vm1, 4294967295, %v1991_v11  ;;  %20 = vst.msk [vmem:[#allocation2] sm:$0xff] %vm19_vm3, %v1992_v17 }
   0x3   :  { %682 = vmatprep.subr.bf16.mxu0 %v1990_v0  ;;  %1861 = vmatprep.subr.bf16.mxu1 %v1990_v0  ;;  %v1898_v6 = vld [vmem:[%s2794_s0 + $0x104] ss:$8 sps:$4 sm:$0xff]   ;;  %v1890_v10 = vld [vmem:[%s2793_s1 + $0x38] sm:$0xff]   ;;  %v1892_v14 = vld [vmem:[%s2793_s1 + $0x48] ss:$0 sps:$4 sm:$0x33]  }
   0x4   :  { %1699 = vmatprep.mubr.msk.bf16.mxu0 %vm576_vm0, %v1895_v5  ;;  %v1887_v7 = vld [vmem:[%s2793_s1 + $0x20] sm:$0xff]   ;;  %1715 = vmatprep.mubr.msk.bf16.mxu1 %vm576_vm0, %v1898_v6  ;;  %v1888_v8 = vld [vmem:[%s2793_s1 + $0x28] sm:$0xff]   ;;  %v676_v15 = vsel %vm674_vm2, %v675_v12, 0  ;;  %21 = vst.msk [vmem:[#allocation2 + $0x8] sm:$0xff] %vm19_vm3, %v1992_v17  ;;  %22 = vst.msk [vmem:[#allocation2 + $0x10] sm:$0xff] %vm19_vm3, %v1992_v17  ;;  %vm1556_vm4 = vcmask 519168  }
   0x5   :  { %v1891_v13 = vld [vmem:[%s2793_s1 + $0x40] sm:$0xff]   ;;  %v2051_v16 = vand.u32 %v1892_v14, %v676_v15  ;;  %23 = vst.msk [vmem:[#allocation2 + $0x18] sm:$0xff] %vm19_vm3, %v1992_v17  ;;  %24 = vst.msk [vmem:[#allocation2 + $0x20] sm:$0xff] %vm19_vm3, %v1992_v17  ;;  %v1899_v20 = vld [vmem:[%s2794_s0 + $0x14] ss:$8 sps:$4 sm:$0xff]  }
   0x6   :  { %683 = vmatpush1.bf16.msra.mxu0 %v1884_v2  ;;  %1871 = vmatpush1.bf16.msra.mxu1 %v1884_v2  ;;  %25 = vst.msk [vmem:[#allocation2 + $0x28] sm:$0xff] %vm19_vm3, %v1992_v17  ;;  %26 = vst.msk [vmem:[#allocation2 + $0x30] sm:$0xff] %vm19_vm3, %v1992_v17  ;;  %v1893_v18 = vld [vmem:[%s2794_s0] ss:$8 sps:$4 sm:$0xff]   ;;  %v1901_v21 = vld [vmem:[%s2794_s0 + $0x114] ss:$8 sps:$4 sm:$0xff]  }
   0x7   :  { %684 = vmatprep.subr.bf16.mxu0 %v1990_v0  ;;  %1862 = vmatprep.subr.bf16.mxu1 %v1990_v0  ;;  %27 = vst.msk [vmem:[#allocation2 + $0x38] sm:$0xff] %vm19_vm3, %v1992_v17  ;;  %28 = vst.msk [vmem:[#allocation2 + $0x40] sm:$0xff] %vm19_vm3, %v1992_v17  ;;  %v1896_v19 = vld [vmem:[%s2794_s0 + $0x100] ss:$8 sps:$4 sm:$0xff]   ;;  %v1903_v22 = vld [vmem:[%s2794_s0 + $0x10] ss:$8 sps:$4 sm:$0xff]  }
   0x8   :  { %29 = vst.msk [vmem:[#allocation2 + $0x48] sm:$0xff] %vm19_vm3, %v1992_v17  ;;  %30 = vst.msk [vmem:[#allocation2 + $0x50] sm:$0xff] %vm19_vm3, %v1992_v17  ;;  %v1904_v23 = vld [vmem:[%s2794_s0 + $0x110] ss:$8 sps:$4 sm:$0xff]   ;;  %v1905_v24 = vld [vmem:[%s2794_s0 + $0x24] ss:$8 sps:$4 sm:$0xff]  }
   0x9   :  { %31 = vst.msk [vmem:[#allocation2 + $0x58] sm:$0xff] %vm19_vm3, %v1992_v17  ;;  %32 = vst.msk [vmem:[#allocation2 + $0x60] sm:$0xff] %vm19_vm3, %v1992_v17  ;;  %v1907_v25 = vld [vmem:[%s2794_s0 + $0x124] ss:$8 sps:$4 sm:$0xff]   ;;  %v1909_v26 = vld [vmem:[%s2794_s0 + $0x20] ss:$8 sps:$4 sm:$0xff]  }
   0xa   :  { %685 = vmatpush1.bf16.msra.mxu0 %v1885_v3  ;;  %1872 = vmatpush1.bf16.msra.mxu1 %v1885_v3  ;;  %33 = vst.msk [vmem:[#allocation2 + $0x68] sm:$0xff] %vm19_vm3, %v1992_v17  ;;  %34 = vst.msk [vmem:[#allocation2 + $0x70] sm:$0xff] %vm19_vm3, %v1992_v17  ;;  %v1910_v27 = vld [vmem:[%s2794_s0 + $0x120] ss:$8 sps:$4 sm:$0xff]   ;;  %v1911_v28 = vld [vmem:[%s2794_s0 + $0x34] ss:$8 sps:$4 sm:$0xff]  }
   0xb   :  { %686 = vmatprep.subr.bf16.mxu0 %v1990_v0  ;;  %1863 = vmatprep.subr.bf16.mxu1 %v1990_v0  ;;  %35 = vst.msk [vmem:[#allocation2 + $0x78] sm:$0xff] %vm19_vm3, %v1992_v17  ;;  %36 = vst.msk [vmem:[#allocation2 + $0x80] sm:$0xff] %vm19_vm3, %v1992_v17  ;;  %v1913_v29 = vld [vmem:[%s2794_s0 + $0x134] ss:$8 sps:$4 sm:$0xff]   ;;  %v1915_v30 = vld [vmem:[%s2794_s0 + $0x30] ss:$8 sps:$4 sm:$0xff]  }
   0xc   :  { %37 = vst.msk [vmem:[#allocation2 + $0x88] sm:$0xff] %vm19_vm3, %v1992_v17  ;;  %38 = vst.msk [vmem:[#allocation2 + $0x90] sm:$0xff] %vm19_vm3, %v1992_v17  ;;  %v1916_v31 = vld [vmem:[%s2794_s0 + $0x130] ss:$8 sps:$4 sm:$0xff]   ;;  %v1917_v32 = vld [vmem:[%s2794_s0 + $0x44] ss:$8 sps:$4 sm:$0xff]  }
   0xd   :  { %39 = vst.msk [vmem:[#allocation2 + $0x98] sm:$0xff] %vm19_vm3, %v1992_v17  ;;  %40 = vst.msk [vmem:[#allocation2 + $0xa0] sm:$0xff] %vm19_vm3, %v1992_v17  ;;  %v1919_v33 = vld [vmem:[%s2794_s0 + $0x144] ss:$8 sps:$4 sm:$0xff]   ;;  %v1921_v34 = vld [vmem:[%s2794_s0 + $0x40] ss:$8 sps:$4 sm:$0xff]  }
   0xe   :  { %687 = vmatpush1.bf16.msra.mxu0 %v1886_v4  ;;  %1873 = vmatpush1.bf16.msra.mxu1 %v1886_v4  ;;  %41 = vst.msk [vmem:[#allocation2 + $0xa8] sm:$0xff] %vm19_vm3, %v1992_v17  ;;  %42 = vst.msk [vmem:[#allocation2 + $0xb0] sm:$0xff] %vm19_vm3, %v1992_v17  ;;  %v1922_v35 = vld [vmem:[%s2794_s0 + $0x140] ss:$8 sps:$4 sm:$0xff]   ;;  %v1923_v36 = vld [vmem:[%s2794_s0 + $0x54] ss:$8 sps:$4 sm:$0xff]  }
   0xf   :  { %688 = vmatprep.subr.bf16.mxu0 %v1990_v0  ;;  %1864 = vmatprep.subr.bf16.mxu1 %v1990_v0  ;;  %43 = vst.msk [vmem:[#allocation2 + $0xb8] sm:$0xff] %vm19_vm3, %v1992_v17  ;;  %44 = vst.msk [vmem:[#allocation2 + $0xc0] sm:$0xff] %vm19_vm3, %v1992_v17  ;;  %v1925_v37 = vld [vmem:[%s2794_s0 + $0x154] ss:$8 sps:$4 sm:$0xff]   ;;  %v1927_v38 = vld [vmem:[%s2794_s0 + $0x50] ss:$8 sps:$4 sm:$0xff]  }
  0x10   :  { %45 = vst.msk [vmem:[#allocation2 + $0xc8] sm:$0xff] %vm19_vm3, %v1992_v17  ;;  %46 = vst.msk [vmem:[#allocation2 + $0xd0] sm:$0xff] %vm19_vm3, %v1992_v17  ;;  %v1928_v39 = vld [vmem:[%s2794_s0 + $0x150] ss:$8 sps:$4 sm:$0xff]   ;;  %v1929_v40 = vld [vmem:[%s2794_s0 + $0x64] ss:$8 sps:$4 sm:$0xff]  }
  0x11   :  { %47 = vst.msk [vmem:[#allocation2 + $0xd8] sm:$0xff] %vm19_vm3, %v1992_v17  ;;  %48 = vst.msk [vmem:[#allocation2 + $0xe0] sm:$0xff] %vm19_vm3, %v1992_v17  ;;  %v1931_v41 = vld [vmem:[%s2794_s0 + $0x164] ss:$8 sps:$4 sm:$0xff]   ;;  %v1933_v42 = vld [vmem:[%s2794_s0 + $0x60] ss:$8 sps:$4 sm:$0xff]  }
  0x12   :  { %689 = vmatpush1.bf16.msra.mxu0 %v1887_v7  ;;  %1874 = vmatpush1.bf16.msra.mxu1 %v1887_v7  ;;  %49 = vst.msk [vmem:[#allocation2 + $0xe8] sm:$0xff] %vm19_vm3, %v1992_v17  ;;  %50 = vst.msk [vmem:[#allocation2 + $0xf0] sm:$0xff] %vm19_vm3, %v1992_v17  ;;  %v1934_v43 = vld [vmem:[%s2794_s0 + $0x160] ss:$8 sps:$4 sm:$0xff]   ;;  %v1935_v44 = vld [vmem:[%s2794_s0 + $0x74] ss:$8 sps:$4 sm:$0xff]  }
  0x13   :  { %690 = vmatprep.subr.bf16.mxu0 %v1990_v0  ;;  %1865 = vmatprep.subr.bf16.mxu1 %v1990_v0  ;;  %51 = vst.msk [vmem:[#allocation2 + $0xf8] sm:$0xff] %vm19_vm3, %v1992_v17  ;;  %52 = vst.msk [vmem:[#allocation2 + $0x100] sm:$0xff] %vm19_vm3, %v1992_v17  ;;  %v1937_v45 = vld [vmem:[%s2794_s0 + $0x174] ss:$8 sps:$4 sm:$0xff]   ;;  %v1939_v46 = vld [vmem:[%s2794_s0 + $0x70] ss:$8 sps:$4 sm:$0xff]  }
  0x14   :  { %53 = vst.msk [vmem:[#allocation2 + $0x108] sm:$0xff] %vm19_vm3, %v1992_v17  ;;  %54 = vst.msk [vmem:[#allocation2 + $0x110] sm:$0xff] %vm19_vm3, %v1992_v17  ;;  %v1940_v47 = vld [vmem:[%s2794_s0 + $0x170] ss:$8 sps:$4 sm:$0xff]   ;;  %v1941_v48 = vld [vmem:[%s2794_s0 + $0x84] ss:$8 sps:$4 sm:$0xff]  }
  0x15   :  { %55 = vst.msk [vmem:[#allocation2 + $0x118] sm:$0xff] %vm19_vm3, %v1992_v17  ;;  %56 = vst.msk [vmem:[#allocation2 + $0x120] sm:$0xff] %vm19_vm3, %v1992_v17  ;;  %v1943_v49 = vld [vmem:[%s2794_s0 + $0x184] ss:$8 sps:$4 sm:$0xff]   ;;  %v1945_v50 = vld [vmem:[%s2794_s0 + $0x80] ss:$8 sps:$4 sm:$0xff]  }
  0x16   :  { %691 = vmatpush1.bf16.msra.mxu0 %v1888_v8  ;;  %1875 = vmatpush1.bf16.msra.mxu1 %v1888_v8  ;;  %57 = vst.msk [vmem:[#allocation2 + $0x128] sm:$0xff] %vm19_vm3, %v1992_v17  ;;  %58 = vst.msk [vmem:[#allocation2 + $0x130] sm:$0xff] %vm19_vm3, %v1992_v17  ;;  %v1946_v51 = vld [vmem:[%s2794_s0 + $0x180] ss:$8 sps:$4 sm:$0xff]   ;;  %v1947_v52 = vld [vmem:[%s2794_s0 + $0x94] ss:$8 sps:$4 sm:$0xff]  }
  0x17   :  { %692 = vmatprep.subr.bf16.mxu0 %v1990_v0  ;;  %1866 = vmatprep.subr.bf16.mxu1 %v1990_v0  ;;  %59 = vst.msk [vmem:[#allocation2 + $0x138] sm:$0xff] %vm19_vm3, %v1992_v17  ;;  %60 = vst.msk [vmem:[#allocation2 + $0x140] sm:$0xff] %vm19_vm3, %v1992_v17  ;;  %v1949_v53 = vld [vmem:[%s2794_s0 + $0x194] ss:$8 sps:$4 sm:$0xff]   ;;  %v1951_v54 = vld [vmem:[%s2794_s0 + $0x90] ss:$8 sps:$4 sm:$0xff]  }
  0x18   :  { %61 = vst.msk [vmem:[#allocation2 + $0x148] sm:$0xff] %vm19_vm3, %v1992_v17  ;;  %62 = vst.msk [vmem:[#allocation2 + $0x150] sm:$0xff] %vm19_vm3, %v1992_v17  ;;  %v1952_v55 = vld [vmem:[%s2794_s0 + $0x190] ss:$8 sps:$4 sm:$0xff]   ;;  %v1953_v56 = vld [vmem:[%s2794_s0 + $0xa4] ss:$8 sps:$4 sm:$0xff]  }
  0x19   :  { %63 = vst.msk [vmem:[#allocation2 + $0x158] sm:$0xff] %vm19_vm3, %v1992_v17  ;;  %64 = vst.msk [vmem:[#allocation2 + $0x160] sm:$0xff] %vm19_vm3, %v1992_v17  ;;  %v1955_v57 = vld [vmem:[%s2794_s0 + $0x1a4] ss:$8 sps:$4 sm:$0xff]   ;;  %v1957_v58 = vld [vmem:[%s2794_s0 + $0xa0] ss:$8 sps:$4 sm:$0xff]  }
  0x1a   :  { %693 = vmatpush1.bf16.msra.mxu0 %v1889_v9  ;;  %1876 = vmatpush1.bf16.msra.mxu1 %v1889_v9  ;;  %65 = vst.msk [vmem:[#allocation2 + $0x168] sm:$0xff] %vm19_vm3, %v1992_v17  ;;  %66 = vst.msk [vmem:[#allocation2 + $0x170] sm:$0xff] %vm19_vm3, %v1992_v17  ;;  %v1958_v59 = vld [vmem:[%s2794_s0 + $0x1a0] ss:$8 sps:$4 sm:$0xff]   ;;  %v1959_v60 = vld [vmem:[%s2794_s0 + $0xb4] ss:$8 sps:$4 sm:$0xff]  }
  0x1b   :  { %694 = vmatprep.subr.bf16.mxu0 %v1990_v0  ;;  %1867 = vmatprep.subr.bf16.mxu1 %v1990_v0  ;;  %67 = vst.msk [vmem:[#allocation2 + $0x178] sm:$0xff] %vm19_vm3, %v1992_v17  ;;  %68 = vst.msk [vmem:[#allocation2 + $0x180] sm:$0xff] %vm19_vm3, %v1992_v17  ;;  %v1961_v61 = vld [vmem:[%s2794_s0 + $0x1b4] ss:$8 sps:$4 sm:$0xff]   ;;  %v1963_v62 = vld [vmem:[%s2794_s0 + $0xb0] ss:$8 sps:$4 sm:$0xff]  }
  0x1c   :  { %69 = vst.msk [vmem:[#allocation2 + $0x188] sm:$0xff] %vm19_vm3, %v1992_v17  ;;  %70 = vst.msk [vmem:[#allocation2 + $0x190] sm:$0xff] %vm19_vm3, %v1992_v17  ;;  %v1964_v63 = vld [vmem:[%s2794_s0 + $0x1b0] ss:$8 sps:$4 sm:$0xff]   ;;  %v1967_v1 = vld [vmem:[%s2794_s0 + $0x1c4] ss:$8 sps:$4 sm:$0xff]  }
  0x1d   :  { %71 = vst.msk [vmem:[#allocation2 + $0x198] sm:$0xff] %vm19_vm3, %v1992_v17  ;;  %72 = vst.msk [vmem:[#allocation2 + $0x1a0] sm:$0xff] %vm19_vm3, %v1992_v17  ;;  %v1969_v2 = vld [vmem:[%s2794_s0 + $0xc0] ss:$8 sps:$4 sm:$0xff]   ;;  %v1971_v4 = vld [vmem:[%s2794_s0 + $0xd4] ss:$8 sps:$4 sm:$0xff]  }
  0x1e   :  { %695 = vmatpush1.bf16.msra.mxu0 %v1890_v10  ;;  %1877 = vmatpush1.bf16.msra.mxu1 %v1890_v10  ;;  %73 = vst.msk [vmem:[#allocation2 + $0x1a8] sm:$0xff] %vm19_vm3, %v1992_v17  ;;  %74 = vst.msk [vmem:[#allocation2 + $0x1b0] sm:$0xff] %vm19_vm3, %v1992_v17  ;;  %v1970_v3 = vld [vmem:[%s2794_s0 + $0x1c0] ss:$8 sps:$4 sm:$0xff]   ;;  %v1973_v5 = vld [vmem:[%s2794_s0 + $0x1d4] ss:$8 sps:$4 sm:$0xff]  }
  0x1f   :  { %696 = vmatprep.subr.bf16.mxu0 %v1990_v0  ;;  %1868 = vmatprep.subr.bf16.mxu1 %v1990_v0  ;;  %75 = vst.msk [vmem:[#allocation2 + $0x1b8] sm:$0xff] %vm19_vm3, %v1992_v17  ;;  %76 = vst.msk [vmem:[#allocation2 + $0x1c0] sm:$0xff] %vm19_vm3, %v1992_v17  ;;  %v1975_v6 = vld [vmem:[%s2794_s0 + $0xd0] ss:$8 sps:$4 sm:$0xff]   ;;  %v1977_v8 = vld [vmem:[%s2794_s0 + $0xe4] ss:$8 sps:$4 sm:$0xff]  }
  0x20   :  { %77 = vst.msk [vmem:[#allocation2 + $0x1c8] sm:$0xff] %vm19_vm3, %v1992_v17  ;;  %78 = vst.msk [vmem:[#allocation2 + $0x1d0] sm:$0xff] %vm19_vm3, %v1992_v17  ;;  %v1976_v7 = vld [vmem:[%s2794_s0 + $0x1d0] ss:$8 sps:$4 sm:$0xff]   ;;  %v1979_v9 = vld [vmem:[%s2794_s0 + $0x1e4] ss:$8 sps:$4 sm:$0xff]  }
  0x21   :  { %79 = vst.msk [vmem:[#allocation2 + $0x1d8] sm:$0xff] %vm19_vm3, %v1992_v17  ;;  %80 = vst.msk [vmem:[#allocation2 + $0x1e0] sm:$0xff] %vm19_vm3, %v1992_v17  ;;  %v1981_v10 = vld [vmem:[%s2794_s0 + $0xe0] ss:$8 sps:$4 sm:$0xff]   ;;  %v1983_v12 = vld [vmem:[%s2794_s0 + $0xf4] ss:$8 sps:$4 sm:$0xff]  }
  0x22   :  { %697 = vmatpush1.bf16.msra.mxu0 %v1891_v13  ;;  %1878 = vmatpush1.bf16.msra.mxu1 %v1891_v13  ;;  %81 = vst.msk [vmem:[#allocation2 + $0x1e8] sm:$0xff] %vm19_vm3, %v1992_v17  ;;  %82 = vst.msk [vmem:[#allocation2 + $0x1f0] sm:$0xff] %vm19_vm3, %v1992_v17  ;;  %v1982_v11 = vld [vmem:[%s2794_s0 + $0x1e0] ss:$8 sps:$4 sm:$0xff]   ;;  %v1985_v13 = vld [vmem:[%s2794_s0 + $0x1f4] ss:$8 sps:$4 sm:$0xff]  }
  0x23   :  { %698 = vmatprep.subr.bf16.mxu0 %v1990_v0  ;;  %1869 = vmatprep.subr.bf16.mxu1 %v1990_v0  ;;  %83 = vst.msk [vmem:[#allocation2 + $0x1f8] sm:$0xff] %vm19_vm3, %v1992_v17  ;;  %v1965_v0 = vld [vmem:[%s2794_s0 + $0xc4] ss:$8 sps:$4 sm:$0xff]   ;;  %v1987_v14 = vld [vmem:[%s2794_s0 + $0xf0] ss:$8 sps:$4 sm:$0xff]  }
  0x24   :  { %v1988_v15 = vld [vmem:[%s2794_s0 + $0x1f0] ss:$8 sps:$4 sm:$0xff]   ;;  %v116_v17 = vld [vmem:[#allocation2 + $0x100] sm:$0xff] }
  0x26   :  { %699 = vmatpush1.bf16.msra.mxu0 %v2051_v16  ;;  %1879 = vmatpush1.bf16.msra.mxu1 %v2051_v16  ;;  %v84_v16 = vld [vmem:[#allocation2] sm:$0xff] }
  0x29   :  { %713 = vmatmul.mubr.bf16.vlgmr.msra.gmra.mrb[0].mxu0 %v1893_v18  ;;  %841 = vmatmul.mubr.bf16.vlgmr.msra.gmra.mrb[0].mxu1 %v1896_v19 }
  0x2a   :  { %1700 = vmatprep.mubr.msk.bf16.mxu0 %vm576_vm0, %v1899_v20  ;;  %1716 = vmatprep.mubr.msk.bf16.mxu1 %vm576_vm0, %v1901_v21  ;;  %v85_v20 = vld [vmem:[#allocation2 + $0x8] sm:$0xff] }
  0x2b   :  { %v117_v21 = vld [vmem:[#allocation2 + $0x108] sm:$0xff] }
  0x31   :  { %721 = vmatmul.mubr.bf16.gmra.mrb[4].mxu0 %v1903_v22  ;;  %849 = vmatmul.mubr.bf16.gmra.mrb[4].mxu1 %v1904_v23 }
  0x32   :  { %1701 = vmatprep.mubr.msk.bf16.mxu0 %vm576_vm0, %v1905_v24  ;;  %1717 = vmatprep.mubr.msk.bf16.mxu1 %vm576_vm0, %v1907_v25 }
  0x39   :  { %729 = vmatmul.mubr.bf16.gmra.mrb[8].mxu0 %v1909_v26  ;;  %857 = vmatmul.mubr.bf16.gmra.mrb[8].mxu1 %v1910_v27 }
  0x3a   :  { %1702 = vmatprep.mubr.msk.bf16.mxu0 %vm576_vm0, %v1911_v28  ;;  %1718 = vmatprep.mubr.msk.bf16.mxu1 %vm576_vm0, %v1913_v29 }
  0x41   :  { %737 = vmatmul.mubr.bf16.gmra.mrb[12].mxu0 %v1915_v30  ;;  %865 = vmatmul.mubr.bf16.gmra.mrb[12].mxu1 %v1916_v31 }
  0x42   :  { %1703 = vmatprep.mubr.msk.bf16.mxu0 %vm576_vm0, %v1917_v32  ;;  %1719 = vmatprep.mubr.msk.bf16.mxu1 %vm576_vm0, %v1919_v33  ;;  %v86_v32 = vld [vmem:[#allocation2 + $0x10] sm:$0xff] }
  0x43   :  { %v118_v33 = vld [vmem:[#allocation2 + $0x110] sm:$0xff] }
  0x49   :  { %745 = vmatmul.mubr.bf16.gmra.mrb[16].mxu0 %v1921_v34  ;;  %873 = vmatmul.mubr.bf16.gmra.mrb[16].mxu1 %v1922_v35  ;;  %v2406_v34 = vld [vmem:[%s2795_s2] ss:$0 sm:$0xff] }
  0x4a   :  { %1704 = vmatprep.mubr.msk.bf16.mxu0 %vm576_vm0, %v1923_v36  ;;  %1720 = vmatprep.mubr.msk.bf16.mxu1 %vm576_vm0, %v1925_v37  ;;  %v87_v37 = vld [vmem:[#allocation2 + $0x18] sm:$0xff] }
  0x51   :  { %753 = vmatmul.mubr.bf16.gmra.mrb[20].mxu0 %v1927_v38  ;;  %881 = vmatmul.mubr.bf16.gmra.mrb[20].mxu1 %v1928_v39  ;;  %v119_v38 = vld [vmem:[#allocation2 + $0x118] sm:$0xff] }
  0x52   :  { %1705 = vmatprep.mubr.msk.bf16.mxu0 %vm576_vm0, %v1929_v40  ;;  %1721 = vmatprep.mubr.msk.bf16.mxu1 %vm576_vm0, %v1931_v41 }
  0x59   :  { %761 = vmatmul.mubr.bf16.gmra.mrb[24].mxu0 %v1933_v42  ;;  %889 = vmatmul.mubr.bf16.gmra.mrb[24].mxu1 %v1934_v43 }
  0x5a   :  { %1706 = vmatprep.mubr.msk.bf16.mxu0 %vm576_vm0, %v1935_v44  ;;  %1722 = vmatprep.mubr.msk.bf16.mxu1 %vm576_vm0, %v1937_v45 }
  0x61   :  { %769 = vmatmul.mubr.bf16.gmra.mrb[28].mxu0 %v1939_v46  ;;  %897 = vmatmul.mubr.bf16.gmra.mrb[28].mxu1 %v1940_v47 }
  0x62   :  { %1707 = vmatprep.mubr.msk.bf16.mxu0 %vm576_vm0, %v1941_v48  ;;  %1723 = vmatprep.mubr.msk.bf16.mxu1 %vm576_vm0, %v1943_v49 }
  0x69   :  { %777 = vmatmul.mubr.bf16.gmra.mrb[32].mxu0 %v1945_v50  ;;  %905 = vmatmul.mubr.bf16.gmra.mrb[32].mxu1 %v1946_v51 }
  0x6a   :  { %1708 = vmatprep.mubr.msk.bf16.mxu0 %vm576_vm0, %v1947_v52  ;;  %1724 = vmatprep.mubr.msk.bf16.mxu1 %vm576_vm0, %v1949_v53 }
  0x71   :  { %785 = vmatmul.mubr.bf16.gmra.mrb[36].mxu0 %v1951_v54  ;;  %913 = vmatmul.mubr.bf16.gmra.mrb[36].mxu1 %v1952_v55 }
  0x72   :  { %1709 = vmatprep.mubr.msk.bf16.mxu0 %vm576_vm0, %v1953_v56  ;;  %1725 = vmatprep.mubr.msk.bf16.mxu1 %vm576_vm0, %v1955_v57 }
  0x79   :  { %793 = vmatmul.mubr.bf16.gmra.mrb[40].mxu0 %v1957_v58  ;;  %921 = vmatmul.mubr.bf16.gmra.mrb[40].mxu1 %v1958_v59  ;;  %v88_v59 = vld [vmem:[#allocation2 + $0x20] sm:$0xff] }
  0x7a   :  { %1710 = vmatprep.mubr.msk.bf16.mxu0 %vm576_vm0, %v1959_v60  ;;  %1726 = vmatprep.mubr.msk.bf16.mxu1 %vm576_vm0, %v1961_v61  ;;  %v120_v60 = vld [vmem:[#allocation2 + $0x120] sm:$0xff] }
  0x81   :  { %801 = vmatmul.mubr.bf16.gmra.mrb[44].mxu0 %v1963_v62  ;;  %929 = vmatmul.mubr.bf16.gmra.mrb[44].mxu1 %v1964_v63 }
  0x82   :  { %1711 = vmatprep.mubr.msk.bf16.mxu0 %vm576_vm0, %v1965_v0  ;;  %1727 = vmatprep.mubr.msk.bf16.mxu1 %vm576_vm0, %v1967_v1 }
  0x89   :  { %809 = vmatmul.mubr.bf16.gmra.mrb[48].mxu0 %v1969_v2  ;;  %937 = vmatmul.mubr.bf16.gmra.mrb[48].mxu1 %v1970_v3  ;;  %v89_v3 = vld [vmem:[#allocation2 + $0x28] sm:$0xff] }
  0x8a   :  { %1712 = vmatprep.mubr.msk.bf16.mxu0 %vm576_vm0, %v1971_v4  ;;  %1728 = vmatprep.mubr.msk.bf16.mxu1 %vm576_vm0, %v1973_v5  ;;  %v121_v4 = vld [vmem:[#allocation2 + $0x128] sm:$0xff] }
  0x91   :  { %817 = vmatmul.mubr.bf16.gmra.mrb[52].mxu0 %v1975_v6  ;;  %945 = vmatmul.mubr.bf16.gmra.mrb[52].mxu1 %v1976_v7 }
  0x92   :  { %1713 = vmatprep.mubr.msk.bf16.mxu0 %vm576_vm0, %v1977_v8  ;;  %1729 = vmatprep.mubr.msk.bf16.mxu1 %vm576_vm0, %v1979_v9 }
  0x99   :  { %825 = vmatmul.mubr.bf16.gmra.mrb[56].mxu0 %v1981_v10  ;;  %953 = vmatmul.mubr.bf16.gmra.mrb[56].mxu1 %v1982_v11 }
  0x9a   :  { %1714 = vmatprep.mubr.msk.bf16.mxu0 %vm576_vm0, %v1983_v12  ;;  %1730 = vmatprep.mubr.msk.bf16.mxu1 %vm576_vm0, %v1985_v13 }
  0xa1   :  { %833 = vmatmul.mubr.bf16.gmra.mrb[60].mxu0 %v1987_v14  ;;  %961 = vmatmul.mubr.bf16.gmra.mrb[60].mxu1 %v1988_v15 }
  0xfc   :  { %v714_v18 = vpop.f32.mrb[0].mxu0  ;;  %v842_v19 = vpop.f32.mrb[0].mxu1 }
  0xfd   :  { %v969_v22 = vadd.f32 %v714_v18, %v84_v16  ;;  %v1001_v23 = vadd.f32 %v842_v19, %v116_v17  ;;  %v716_v24 = vpop.f32.mrb[1].mxu0  ;;  %v844_v25 = vpop.f32.mrb[1].mxu1 }
  0xfe   :  { %v717_v26 = vpop.f32.mrb[2].mxu0  ;;  %v845_v27 = vpop.f32.mrb[2].mxu1 }
  0xff   :  { %1034 = vst.msk [vmem:[#allocation2] sm:$0xff] %vm19_vm3, %v969_v22  ;;  %1066 = vst.msk [vmem:[#allocation2 + $0x100] sm:$0xff] %vm19_vm3, %v1001_v23  ;;  %v970_v28 = vadd.f32 %v717_v26, %v85_v20  ;;  %v1002_v29 = vadd.f32 %v845_v27, %v117_v21  ;;  %v719_v30 = vpop.f32.mrb[3].mxu0  ;;  %v847_v31 = vpop.f32.mrb[3].mxu1  ;;  %v90_v27 = vld [vmem:[#allocation2 + $0x30] sm:$0xff] }
 0x101   :  { %1035 = vst.msk [vmem:[#allocation2 + $0x8] sm:$0xff] %vm19_vm3, %v970_v28  ;;  %1067 = vst.msk [vmem:[#allocation2 + $0x108] sm:$0xff] %vm19_vm3, %v1002_v29  ;;  %v122_v28 = vld [vmem:[#allocation2 + $0x130] sm:$0xff] }
 0x104   :  { %v722_v35 = vpop.f32.mrb[4].mxu0  ;;  %v850_v36 = vpop.f32.mrb[4].mxu1 }
 0x105   :  { %v971_v39 = vadd.f32 %v722_v35, %v86_v32  ;;  %v1003_v40 = vadd.f32 %v850_v36, %v118_v33  ;;  %v724_v41 = vpop.f32.mrb[5].mxu0  ;;  %v852_v42 = vpop.f32.mrb[5].mxu1  ;;  %v91_v36 = vld [vmem:[#allocation2 + $0x38] sm:$0xff] }
 0x106   :  { %v1101_v43 = vld [vmem:[#allocation2] sm:$0xff]  ;;  %v725_v45 = vpop.f32.mrb[6].mxu0  ;;  %v853_v46 = vpop.f32.mrb[6].mxu1 }
 0x107   :  { %v1133_v44 = vld [vmem:[#allocation2 + $0x100] sm:$0xff]  ;;  %v1172_v47 = vadd.f32 %v2406_v34, %v1101_v43  ;;  %1036 = vst.msk [vmem:[#allocation2 + $0x10] sm:$0xff] %vm19_vm3, %v971_v39  ;;  %1068 = vst.msk [vmem:[#allocation2 + $0x110] sm:$0xff] %vm19_vm3, %v1003_v40  ;;  %v972_v49 = vadd.f32 %v725_v45, %v87_v37  ;;  %v1004_v50 = vadd.f32 %v853_v46, %v119_v38  ;;  %v727_v51 = vpop.f32.mrb[7].mxu0  ;;  %v855_v52 = vpop.f32.mrb[7].mxu1  ;;  %v123_v37 = vld [vmem:[#allocation2 + $0x138] sm:$0xff] }
 0x108   :  { %v1204_v48 = vadd.f32 %v2406_v34, %v1133_v44  ;;  %v1102_v53 = vld [vmem:[#allocation2 + $0x8] sm:$0xff] }
 0x109   :  { %v1134_v54 = vld [vmem:[#allocation2 + $0x108] sm:$0xff]  ;;  %v1236_v55 = vmax.f32 %v1172_v47, 0.0  ;;  %v1173_v57 = vadd.f32 %v2406_v34, %v1102_v53  ;;  %1037 = vst.msk [vmem:[#allocation2 + $0x18] sm:$0xff] %vm19_vm3, %v972_v49  ;;  %1069 = vst.msk [vmem:[#allocation2 + $0x118] sm:$0xff] %vm19_vm3, %v1004_v50 }
 0x10a   :  { %v1268_v56 = vmax.f32 %v1204_v48, 0.0  ;;  %v1205_v58 = vadd.f32 %v2406_v34, %v1134_v54 }
 0x10b   :  { %v1796_v61 = vpack.c.bf16 %v1236_v55, %v1236_v55  ;;  %v1237_v63 = vmax.f32 %v1173_v57, 0.0 }
 0x10c   :  { %v1828_v62 = vpack.c.bf16 %v1268_v56, %v1268_v56  ;;  %v1269_v0 = vmax.f32 %v1205_v58, 0.0  ;;  %v730_v1 = vpop.f32.mrb[8].mxu0  ;;  %v858_v2 = vpop.f32.mrb[8].mxu1 }
 0x10d   :  { %1557 = vst.msk [vmem:[%s2796_s3] sm:$0xf] %vm1556_vm4, %v1796_v61  ;;  %v1797_v5 = vpack.c.bf16 %v1237_v63, %v1237_v63  ;;  %v973_v7 = vadd.f32 %v730_v1, %v88_v59  ;;  %v1005_v8 = vadd.f32 %v858_v2, %v120_v60  ;;  %v732_v9 = vpop.f32.mrb[9].mxu0  ;;  %v860_v10 = vpop.f32.mrb[9].mxu1  ;;  %v92_v60 = vld [vmem:[#allocation2 + $0x40] sm:$0xff] }
 0x10e   :  { %1589 = vst.msk [vmem:[%s2796_s3 + $0x80] sm:$0xf] %vm1556_vm4, %v1828_v62  ;;  %v1829_v6 = vpack.c.bf16 %v1269_v0, %v1269_v0  ;;  %v1103_v11 = vld [vmem:[#allocation2 + $0x10] sm:$0xff]  ;;  %v733_v13 = vpop.f32.mrb[10].mxu0  ;;  %v861_v14 = vpop.f32.mrb[10].mxu1  ;;  %v124_v61 = vld [vmem:[#allocation2 + $0x140] sm:$0xff] }
 0x10f   :  { %v1135_v12 = vld [vmem:[#allocation2 + $0x110] sm:$0xff]  ;;  %1558 = vst.msk [vmem:[%s2796_s3 + $0x4] sm:$0xf] %vm1556_vm4, %v1797_v5  ;;  %v1174_v15 = vadd.f32 %v2406_v34, %v1103_v11  ;;  %v974_v17 = vadd.f32 %v733_v13, %v89_v3  ;;  %v1006_v18 = vadd.f32 %v861_v14, %v121_v4  ;;  %v735_v19 = vpop.f32.mrb[11].mxu0  ;;  %v863_v20 = vpop.f32.mrb[11].mxu1  ;;  %v93_v4 = vld [vmem:[#allocation2 + $0x48] sm:$0xff] }
 0x110   :  { %1590 = vst.msk [vmem:[%s2796_s3 + $0x84] sm:$0xf] %vm1556_vm4, %v1829_v6  ;;  %v1206_v16 = vadd.f32 %v2406_v34, %v1135_v12  ;;  %v1104_v21 = vld [vmem:[#allocation2 + $0x18] sm:$0xff]  ;;  %v125_v5 = vld [vmem:[#allocation2 + $0x148] sm:$0xff] }
 0x111   :  { %1038 = vst.msk [vmem:[#allocation2 + $0x20] sm:$0xff] %vm19_vm3, %v973_v7  ;;  %1070 = vst.msk [vmem:[#allocation2 + $0x120] sm:$0xff] %vm19_vm3, %v1005_v8  ;;  %v1136_v22 = vld [vmem:[#allocation2 + $0x118] sm:$0xff]  ;;  %v1238_v23 = vmax.f32 %v1174_v15, 0.0  ;;  %v1175_v25 = vadd.f32 %v2406_v34, %v1104_v21 }
 0x112   :  { %v1270_v24 = vmax.f32 %v1206_v16, 0.0  ;;  %v1207_v26 = vadd.f32 %v2406_v34, %v1136_v22  ;;  %1039 = vst.msk [vmem:[#allocation2 + $0x28] sm:$0xff] %vm19_vm3, %v974_v17  ;;  %1071 = vst.msk [vmem:[#allocation2 + $0x128] sm:$0xff] %vm19_vm3, %v1006_v18 }
 0x113   :  { %v1798_v29 = vpack.c.bf16 %v1238_v23, %v1238_v23  ;;  %v1239_v31 = vmax.f32 %v1175_v25, 0.0 }
 0x114   :  { %v1830_v30 = vpack.c.bf16 %v1270_v24, %v1270_v24  ;;  %v1271_v32 = vmax.f32 %v1207_v26, 0.0  ;;  %v738_v33 = vpop.f32.mrb[12].mxu0  ;;  %v866_v35 = vpop.f32.mrb[12].mxu1 }
 0x115   :  { %1559 = vst.msk [vmem:[%s2796_s3 + $0x8] sm:$0xf] %vm1556_vm4, %v1798_v29  ;;  %v1799_v38 = vpack.c.bf16 %v1239_v31, %v1239_v31  ;;  %v975_v40 = vadd.f32 %v738_v33, %v90_v27  ;;  %v1007_v41 = vadd.f32 %v866_v35, %v122_v28  ;;  %v740_v42 = vpop.f32.mrb[13].mxu0  ;;  %v868_v43 = vpop.f32.mrb[13].mxu1  ;;  %v94_v28 = vld [vmem:[#allocation2 + $0x50] sm:$0xff] }
 0x116   :  { %1591 = vst.msk [vmem:[%s2796_s3 + $0x88] sm:$0xf] %vm1556_vm4, %v1830_v30  ;;  %v1831_v39 = vpack.c.bf16 %v1271_v32, %v1271_v32  ;;  %v741_v46 = vpop.f32.mrb[14].mxu0  ;;  %v869_v47 = vpop.f32.mrb[14].mxu1  ;;  %v126_v29 = vld [vmem:[#allocation2 + $0x150] sm:$0xff] }
 0x117   :  { %1560 = vst.msk [vmem:[%s2796_s3 + $0xc] sm:$0xf] %vm1556_vm4, %v1799_v38  ;;  %v976_v50 = vadd.f32 %v741_v46, %v91_v36  ;;  %v1008_v51 = vadd.f32 %v869_v47, %v123_v37  ;;  %v743_v52 = vpop.f32.mrb[15].mxu0  ;;  %v871_v53 = vpop.f32.mrb[15].mxu1  ;;  %v95_v37 = vld [vmem:[#allocation2 + $0x58] sm:$0xff] }
 0x118   :  { %v1105_v44 = vld [vmem:[#allocation2 + $0x20] sm:$0xff]  ;;  %1592 = vst.msk [vmem:[%s2796_s3 + $0x8c] sm:$0xf] %vm1556_vm4, %v1831_v39  ;;  %v127_v38 = vld [vmem:[#allocation2 + $0x158] sm:$0xff] }
 0x119   :  { %v1137_v45 = vld [vmem:[#allocation2 + $0x120] sm:$0xff]  ;;  %v1176_v48 = vadd.f32 %v2406_v34, %v1105_v44  ;;  %1040 = vst.msk [vmem:[#allocation2 + $0x30] sm:$0xff] %vm19_vm3, %v975_v40  ;;  %1072 = vst.msk [vmem:[#allocation2 + $0x130] sm:$0xff] %vm19_vm3, %v1007_v41  ;;  %v1106_v54 = vld [vmem:[#allocation2 + $0x28] sm:$0xff] }
 0x11a   :  { %v1208_v49 = vadd.f32 %v2406_v34, %v1137_v45  ;;  %v1138_v55 = vld [vmem:[#allocation2 + $0x128] sm:$0xff]  ;;  %v1177_v58 = vadd.f32 %v2406_v34, %v1106_v54  ;;  %1041 = vst.msk [vmem:[#allocation2 + $0x38] sm:$0xff] %vm19_vm3, %v976_v50  ;;  %1073 = vst.msk [vmem:[#allocation2 + $0x138] sm:$0xff] %vm19_vm3, %v1008_v51 }
 0x11b   :  { %v1240_v56 = vmax.f32 %v1176_v48, 0.0  ;;  %v1209_v59 = vadd.f32 %v2406_v34, %v1138_v55 }
 0x11c   :  { %v1272_v57 = vmax.f32 %v1208_v49, 0.0  ;;  %v1241_v0 = vmax.f32 %v1177_v58, 0.0  ;;  %v746_v2 = vpop.f32.mrb[16].mxu0  ;;  %v874_v3 = vpop.f32.mrb[16].mxu1 }
 0x11d   :  { %v1800_v62 = vpack.c.bf16 %v1240_v56, %v1240_v56  ;;  %v1273_v1 = vmax.f32 %v1209_v59, 0.0  ;;  %v977_v8 = vadd.f32 %v746_v2, %v92_v60  ;;  %v1009_v9 = vadd.f32 %v874_v3, %v124_v61  ;;  %v748_v10 = vpop.f32.mrb[17].mxu0  ;;  %v876_v11 = vpop.f32.mrb[17].mxu1  ;;  %v96_v61 = vld [vmem:[#allocation2 + $0x60] sm:$0xff] }
 0x11e   :  { %v1832_v63 = vpack.c.bf16 %v1272_v57, %v1272_v57  ;;  %v1801_v6 = vpack.c.bf16 %v1241_v0, %v1241_v0  ;;  %v749_v14 = vpop.f32.mrb[18].mxu0  ;;  %v877_v15 = vpop.f32.mrb[18].mxu1 }
 0x11f   :  { %1561 = vst.msk [vmem:[%s2796_s3 + $0x10] sm:$0xf] %vm1556_vm4, %v1800_v62  ;;  %v1833_v7 = vpack.c.bf16 %v1273_v1, %v1273_v1  ;;  %v978_v18 = vadd.f32 %v749_v14, %v93_v4  ;;  %v1010_v19 = vadd.f32 %v877_v15, %v125_v5  ;;  %v751_v20 = vpop.f32.mrb[19].mxu0  ;;  %v879_v21 = vpop.f32.mrb[19].mxu1  ;;  %v128_v62 = vld [vmem:[#allocation2 + $0x160] sm:$0xff]  ;;  %v97_v5 = vld [vmem:[#allocation2 + $0x68] sm:$0xff] }
 0x120   :  { %1593 = vst.msk [vmem:[%s2796_s3 + $0x90] sm:$0xf] %vm1556_vm4, %v1832_v63  ;;  %v1107_v12 = vld [vmem:[#allocation2 + $0x30] sm:$0xff]  ;;  %1562 = vst.msk [vmem:[%s2796_s3 + $0x14] sm:$0xf] %vm1556_vm4, %v1801_v6  ;;  %v129_v6 = vld [vmem:[#allocation2 + $0x168] sm:$0xff] }
 0x121   :  { %v1139_v13 = vld [vmem:[#allocation2 + $0x130] sm:$0xff]  ;;  %1594 = vst.msk [vmem:[%s2796_s3 + $0x94] sm:$0xf] %vm1556_vm4, %v1833_v7  ;;  %v1178_v16 = vadd.f32 %v2406_v34, %v1107_v12  ;;  %v1108_v22 = vld [vmem:[#allocation2 + $0x38] sm:$0xff] }
 0x122   :  { %v1210_v17 = vadd.f32 %v2406_v34, %v1139_v13  ;;  %1042 = vst.msk [vmem:[#allocation2 + $0x40] sm:$0xff] %vm19_vm3, %v977_v8  ;;  %1074 = vst.msk [vmem:[#allocation2 + $0x140] sm:$0xff] %vm19_vm3, %v1009_v9  ;;  %v1140_v23 = vld [vmem:[#allocation2 + $0x138] sm:$0xff]  ;;  %v1179_v26 = vadd.f32 %v2406_v34, %v1108_v22 }
 0x123   :  { %v1242_v24 = vmax.f32 %v1178_v16, 0.0  ;;  %v1211_v27 = vadd.f32 %v2406_v34, %v1140_v23  ;;  %1043 = vst.msk [vmem:[#allocation2 + $0x48] sm:$0xff] %vm19_vm3, %v978_v18  ;;  %1075 = vst.msk [vmem:[#allocation2 + $0x148] sm:$0xff] %vm19_vm3, %v1010_v19 }
 0x124   :  { %v1274_v25 = vmax.f32 %v1210_v17, 0.0  ;;  %v1243_v32 = vmax.f32 %v1179_v26, 0.0  ;;  %v754_v35 = vpop.f32.mrb[20].mxu0  ;;  %v882_v36 = vpop.f32.mrb[20].mxu1 }
 0x125   :  { %v1802_v30 = vpack.c.bf16 %v1242_v24, %v1242_v24  ;;  %v1275_v33 = vmax.f32 %v1211_v27, 0.0  ;;  %v979_v41 = vadd.f32 %v754_v35, %v94_v28  ;;  %v1011_v42 = vadd.f32 %v882_v36, %v126_v29  ;;  %v756_v43 = vpop.f32.mrb[21].mxu0  ;;  %v884_v44 = vpop.f32.mrb[21].mxu1  ;;  %v98_v29 = vld [vmem:[#allocation2 + $0x70] sm:$0xff] }
 0x126   :  { %v1834_v31 = vpack.c.bf16 %v1274_v25, %v1274_v25  ;;  %v1803_v39 = vpack.c.bf16 %v1243_v32, %v1243_v32  ;;  %v757_v47 = vpop.f32.mrb[22].mxu0  ;;  %v885_v48 = vpop.f32.mrb[22].mxu1 }
 0x127   :  { %1563 = vst.msk [vmem:[%s2796_s3 + $0x18] sm:$0xf] %vm1556_vm4, %v1802_v30  ;;  %v1835_v40 = vpack.c.bf16 %v1275_v33, %v1275_v33  ;;  %v980_v51 = vadd.f32 %v757_v47, %v95_v37  ;;  %v1012_v52 = vadd.f32 %v885_v48, %v127_v38  ;;  %v759_v53 = vpop.f32.mrb[23].mxu0  ;;  %v887_v54 = vpop.f32.mrb[23].mxu1  ;;  %v130_v30 = vld [vmem:[#allocation2 + $0x170] sm:$0xff]  ;;  %v99_v38 = vld [vmem:[#allocation2 + $0x78] sm:$0xff] }
 0x128   :  { %1595 = vst.msk [vmem:[%s2796_s3 + $0x98] sm:$0xf] %vm1556_vm4, %v1834_v31  ;;  %1564 = vst.msk [vmem:[%s2796_s3 + $0x1c] sm:$0xf] %vm1556_vm4, %v1803_v39  ;;  %v131_v39 = vld [vmem:[#allocation2 + $0x178] sm:$0xff] }
 0x129   :  { %v1109_v45 = vld [vmem:[#allocation2 + $0x40] sm:$0xff]  ;;  %1596 = vst.msk [vmem:[%s2796_s3 + $0x9c] sm:$0xf] %vm1556_vm4, %v1835_v40 }
 0x12a   :  { %v1141_v46 = vld [vmem:[#allocation2 + $0x140] sm:$0xff]  ;;  %v1180_v49 = vadd.f32 %v2406_v34, %v1109_v45  ;;  %1044 = vst.msk [vmem:[#allocation2 + $0x50] sm:$0xff] %vm19_vm3, %v979_v41  ;;  %1076 = vst.msk [vmem:[#allocation2 + $0x150] sm:$0xff] %vm19_vm3, %v1011_v42  ;;  %v1110_v55 = vld [vmem:[#allocation2 + $0x48] sm:$0xff] }
 0x12b   :  { %v1212_v50 = vadd.f32 %v2406_v34, %v1141_v46  ;;  %v1142_v56 = vld [vmem:[#allocation2 + $0x148] sm:$0xff]  ;;  %v1181_v59 = vadd.f32 %v2406_v34, %v1110_v55  ;;  %1045 = vst.msk [vmem:[#allocation2 + $0x58] sm:$0xff] %vm19_vm3, %v980_v51  ;;  %1077 = vst.msk [vmem:[#allocation2 + $0x158] sm:$0xff] %vm19_vm3, %v1012_v52 }
 0x12c   :  { %v1244_v57 = vmax.f32 %v1180_v49, 0.0  ;;  %v1213_v60 = vadd.f32 %v2406_v34, %v1142_v56  ;;  %v762_v3 = vpop.f32.mrb[24].mxu0  ;;  %v890_v4 = vpop.f32.mrb[24].mxu1 }
 0x12d   :  { %v1276_v58 = vmax.f32 %v1212_v50, 0.0  ;;  %v1245_v1 = vmax.f32 %v1181_v59, 0.0  ;;  %v981_v9 = vadd.f32 %v762_v3, %v96_v61  ;;  %v1013_v10 = vadd.f32 %v890_v4, %v128_v62  ;;  %v764_v11 = vpop.f32.mrb[25].mxu0  ;;  %v892_v12 = vpop.f32.mrb[25].mxu1  ;;  %v100_v62 = vld [vmem:[#allocation2 + $0x80] sm:$0xff] }
 0x12e   :  { %v1804_v63 = vpack.c.bf16 %v1244_v57, %v1244_v57  ;;  %v1277_v2 = vmax.f32 %v1213_v60, 0.0  ;;  %v765_v15 = vpop.f32.mrb[26].mxu0  ;;  %v893_v16 = vpop.f32.mrb[26].mxu1 }
 0x12f   :  { %v1836_v0 = vpack.c.bf16 %v1276_v58, %v1276_v58  ;;  %v1805_v7 = vpack.c.bf16 %v1245_v1, %v1245_v1  ;;  %1046 = vst.msk [vmem:[#allocation2 + $0x60] sm:$0xff] %vm19_vm3, %v981_v9  ;;  %1078 = vst.msk [vmem:[#allocation2 + $0x160] sm:$0xff] %vm19_vm3, %v1013_v10  ;;  %v982_v19 = vadd.f32 %v765_v15, %v97_v5  ;;  %v767_v21 = vpop.f32.mrb[27].mxu0  ;;  %v895_v22 = vpop.f32.mrb[27].mxu1 }
 0x130   :  { %1565 = vst.msk [vmem:[%s2796_s3 + $0x20] sm:$0xf] %vm1556_vm4, %v1804_v63  ;;  %v1837_v8 = vpack.c.bf16 %v1277_v2, %v1277_v2  ;;  %v1014_v20 = vadd.f32 %v893_v16, %v129_v6  ;;  %v132_v63 = vld [vmem:[#allocation2 + $0x180] sm:$0xff]  ;;  %v101_v6 = vld [vmem:[#allocation2 + $0x88] sm:$0xff] }
 0x131   :  { %1597 = vst.msk [vmem:[%s2796_s3 + $0xa0] sm:$0xf] %vm1556_vm4, %v1836_v0  ;;  %v1111_v13 = vld [vmem:[#allocation2 + $0x50] sm:$0xff]  ;;  %1566 = vst.msk [vmem:[%s2796_s3 + $0x24] sm:$0xf] %vm1556_vm4, %v1805_v7  ;;  %v133_v7 = vld [vmem:[#allocation2 + $0x188] sm:$0xff] }
 0x132   :  { %v1143_v14 = vld [vmem:[#allocation2 + $0x150] sm:$0xff]  ;;  %1598 = vst.msk [vmem:[%s2796_s3 + $0xa4] sm:$0xf] %vm1556_vm4, %v1837_v8  ;;  %v1182_v17 = vadd.f32 %v2406_v34, %v1111_v13  ;;  %v1112_v23 = vld [vmem:[#allocation2 + $0x58] sm:$0xff] }
 0x133   :  { %v1214_v18 = vadd.f32 %v2406_v34, %v1143_v14  ;;  %v1144_v24 = vld [vmem:[#allocation2 + $0x158] sm:$0xff]  ;;  %v1183_v27 = vadd.f32 %v2406_v34, %v1112_v23  ;;  %1047 = vst.msk [vmem:[#allocation2 + $0x68] sm:$0xff] %vm19_vm3, %v982_v19  ;;  %1079 = vst.msk [vmem:[#allocation2 + $0x168] sm:$0xff] %vm19_vm3, %v1014_v20 }
 0x134   :  { %v1246_v25 = vmax.f32 %v1182_v17, 0.0  ;;  %v1215_v28 = vadd.f32 %v2406_v34, %v1144_v24  ;;  %v770_v36 = vpop.f32.mrb[28].mxu0  ;;  %v898_v37 = vpop.f32.mrb[28].mxu1 }
 0x135   :  { %v1278_v26 = vmax.f32 %v1214_v18, 0.0  ;;  %v1247_v33 = vmax.f32 %v1183_v27, 0.0  ;;  %v983_v42 = vadd.f32 %v770_v36, %v98_v29  ;;  %v1015_v43 = vadd.f32 %v898_v37, %v130_v30  ;;  %v772_v44 = vpop.f32.mrb[29].mxu0  ;;  %v900_v45 = vpop.f32.mrb[29].mxu1  ;;  %v102_v30 = vld [vmem:[#allocation2 + $0x90] sm:$0xff] }
 0x136   :  { %v1806_v31 = vpack.c.bf16 %v1246_v25, %v1246_v25  ;;  %v1279_v35 = vmax.f32 %v1215_v28, 0.0  ;;  %v1113_v46 = vld [vmem:[#allocation2 + $0x60] sm:$0xff]  ;;  %v773_v48 = vpop.f32.mrb[30].mxu0  ;;  %v901_v49 = vpop.f32.mrb[30].mxu1 }
 0x137   :  { %v1838_v32 = vpack.c.bf16 %v1278_v26, %v1278_v26  ;;  %v1807_v40 = vpack.c.bf16 %v1247_v33, %v1247_v33  ;;  %v1145_v47 = vld [vmem:[#allocation2 + $0x160] sm:$0xff]  ;;  %v1184_v50 = vadd.f32 %v2406_v34, %v1113_v46  ;;  %1048 = vst.msk [vmem:[#allocation2 + $0x70] sm:$0xff] %vm19_vm3, %v983_v42  ;;  %1080 = vst.msk [vmem:[#allocation2 + $0x170] sm:$0xff] %vm19_vm3, %v1015_v43  ;;  %v775_v54 = vpop.f32.mrb[31].mxu0  ;;  %v903_v55 = vpop.f32.mrb[31].mxu1 }
 0x138   :  { %1567 = vst.msk [vmem:[%s2796_s3 + $0x28] sm:$0xf] %vm1556_vm4, %v1806_v31  ;;  %v1839_v41 = vpack.c.bf16 %v1279_v35, %v1279_v35  ;;  %v1216_v51 = vadd.f32 %v2406_v34, %v1145_v47  ;;  %v984_v52 = vadd.f32 %v773_v48, %v99_v38  ;;  %v1016_v53 = vadd.f32 %v901_v49, %v131_v39  ;;  %v134_v31 = vld [vmem:[#allocation2 + $0x190] sm:$0xff]  ;;  %v103_v39 = vld [vmem:[#allocation2 + $0x98] sm:$0xff] }
 0x139   :  { %1599 = vst.msk [vmem:[%s2796_s3 + $0xa8] sm:$0xf] %vm1556_vm4, %v1838_v32  ;;  %1568 = vst.msk [vmem:[%s2796_s3 + $0x2c] sm:$0xf] %vm1556_vm4, %v1807_v40  ;;  %v1248_v58 = vmax.f32 %v1184_v50, 0.0  ;;  %v135_v40 = vld [vmem:[#allocation2 + $0x198] sm:$0xff] }
 0x13a   :  { %1600 = vst.msk [vmem:[%s2796_s3 + $0xac] sm:$0xf] %vm1556_vm4, %v1839_v41  ;;  %v1114_v56 = vld [vmem:[#allocation2 + $0x68] sm:$0xff]  ;;  %v1280_v59 = vmax.f32 %v1216_v51, 0.0 }
 0x13b   :  { %v1146_v57 = vld [vmem:[#allocation2 + $0x168] sm:$0xff]  ;;  %v1185_v60 = vadd.f32 %v2406_v34, %v1114_v56  ;;  %1049 = vst.msk [vmem:[#allocation2 + $0x78] sm:$0xff] %vm19_vm3, %v984_v52  ;;  %1081 = vst.msk [vmem:[#allocation2 + $0x178] sm:$0xff] %vm19_vm3, %v1016_v53  ;;  %v1808_v0 = vpack.c.bf16 %v1248_v58, %v1248_v58 }
 0x13c   :  { %v1217_v61 = vadd.f32 %v2406_v34, %v1146_v57  ;;  %v1840_v1 = vpack.c.bf16 %v1280_v59, %v1280_v59  ;;  %v778_v4 = vpop.f32.mrb[32].mxu0  ;;  %v906_v5 = vpop.f32.mrb[32].mxu1 }
 0x13d   :  { %v1249_v2 = vmax.f32 %v1185_v60, 0.0  ;;  %1569 = vst.msk [vmem:[%s2796_s3 + $0x30] sm:$0xf] %vm1556_vm4, %v1808_v0  ;;  %v985_v10 = vadd.f32 %v778_v4, %v100_v62  ;;  %v1017_v11 = vadd.f32 %v906_v5, %v132_v63  ;;  %v780_v12 = vpop.f32.mrb[33].mxu0  ;;  %v908_v13 = vpop.f32.mrb[33].mxu1  ;;  %v104_v63 = vld [vmem:[#allocation2 + $0xa0] sm:$0xff] }
 0x13e   :  { %v1281_v3 = vmax.f32 %v1217_v61, 0.0  ;;  %1601 = vst.msk [vmem:[%s2796_s3 + $0xb0] sm:$0xf] %vm1556_vm4, %v1840_v1  ;;  %v1115_v14 = vld [vmem:[#allocation2 + $0x70] sm:$0xff]  ;;  %v781_v16 = vpop.f32.mrb[34].mxu0  ;;  %v909_v17 = vpop.f32.mrb[34].mxu1 }
 0x13f   :  { %v1809_v8 = vpack.c.bf16 %v1249_v2, %v1249_v2  ;;  %v1147_v15 = vld [vmem:[#allocation2 + $0x170] sm:$0xff]  ;;  %v1186_v18 = vadd.f32 %v2406_v34, %v1115_v14  ;;  %1050 = vst.msk [vmem:[#allocation2 + $0x80] sm:$0xff] %vm19_vm3, %v985_v10  ;;  %1082 = vst.msk [vmem:[#allocation2 + $0x180] sm:$0xff] %vm19_vm3, %v1017_v11  ;;  %v986_v20 = vadd.f32 %v781_v16, %v101_v6  ;;  %v783_v22 = vpop.f32.mrb[35].mxu0  ;;  %v911_v23 = vpop.f32.mrb[35].mxu1  ;;  %v136_v0 = vld [vmem:[#allocation2 + $0x1a0] sm:$0xff] }
 0x140   :  { %v1841_v9 = vpack.c.bf16 %v1281_v3, %v1281_v3  ;;  %v1218_v19 = vadd.f32 %v2406_v34, %v1147_v15  ;;  %v1018_v21 = vadd.f32 %v909_v17, %v133_v7  ;;  %v105_v7 = vld [vmem:[#allocation2 + $0xa8] sm:$0xff] }
 0x141   :  { %1570 = vst.msk [vmem:[%s2796_s3 + $0x34] sm:$0xf] %vm1556_vm4, %v1809_v8  ;;  %v1250_v26 = vmax.f32 %v1186_v18, 0.0  ;;  %v137_v8 = vld [vmem:[#allocation2 + $0x1a8] sm:$0xff] }
 0x142   :  { %1602 = vst.msk [vmem:[%s2796_s3 + $0xb4] sm:$0xf] %vm1556_vm4, %v1841_v9  ;;  %v1116_v24 = vld [vmem:[#allocation2 + $0x78] sm:$0xff]  ;;  %v1282_v27 = vmax.f32 %v1218_v19, 0.0 }
 0x143   :  { %v1148_v25 = vld [vmem:[#allocation2 + $0x178] sm:$0xff]  ;;  %v1187_v28 = vadd.f32 %v2406_v34, %v1116_v24  ;;  %1051 = vst.msk [vmem:[#allocation2 + $0x88] sm:$0xff] %vm19_vm3, %v986_v20  ;;  %1083 = vst.msk [vmem:[#allocation2 + $0x188] sm:$0xff] %vm19_vm3, %v1018_v21  ;;  %v1810_v32 = vpack.c.bf16 %v1250_v26, %v1250_v26 }
 0x144   :  { %v1219_v29 = vadd.f32 %v2406_v34, %v1148_v25  ;;  %v1842_v33 = vpack.c.bf16 %v1282_v27, %v1282_v27  ;;  %v786_v37 = vpop.f32.mrb[36].mxu0  ;;  %v914_v38 = vpop.f32.mrb[36].mxu1 }
 0x145   :  { %v1251_v35 = vmax.f32 %v1187_v28, 0.0  ;;  %1571 = vst.msk [vmem:[%s2796_s3 + $0x38] sm:$0xf] %vm1556_vm4, %v1810_v32  ;;  %v987_v43 = vadd.f32 %v786_v37, %v102_v30  ;;  %v1019_v44 = vadd.f32 %v914_v38, %v134_v31  ;;  %v788_v45 = vpop.f32.mrb[37].mxu0  ;;  %v916_v46 = vpop.f32.mrb[37].mxu1  ;;  %v106_v31 = vld [vmem:[#allocation2 + $0xb0] sm:$0xff] }
 0x146   :  { %v1283_v36 = vmax.f32 %v1219_v29, 0.0  ;;  %1603 = vst.msk [vmem:[%s2796_s3 + $0xb8] sm:$0xf] %vm1556_vm4, %v1842_v33  ;;  %v1117_v47 = vld [vmem:[#allocation2 + $0x80] sm:$0xff]  ;;  %v789_v49 = vpop.f32.mrb[38].mxu0  ;;  %v917_v50 = vpop.f32.mrb[38].mxu1 }
 0x147   :  { %v1811_v41 = vpack.c.bf16 %v1251_v35, %v1251_v35  ;;  %v1149_v48 = vld [vmem:[#allocation2 + $0x180] sm:$0xff]  ;;  %v1188_v51 = vadd.f32 %v2406_v34, %v1117_v47  ;;  %1052 = vst.msk [vmem:[#allocation2 + $0x90] sm:$0xff] %vm19_vm3, %v987_v43  ;;  %1084 = vst.msk [vmem:[#allocation2 + $0x190] sm:$0xff] %vm19_vm3, %v1019_v44  ;;  %v988_v53 = vadd.f32 %v789_v49, %v103_v39  ;;  %v791_v55 = vpop.f32.mrb[39].mxu0  ;;  %v919_v56 = vpop.f32.mrb[39].mxu1  ;;  %v138_v32 = vld [vmem:[#allocation2 + $0x1b0] sm:$0xff] }
 0x148   :  { %v1843_v42 = vpack.c.bf16 %v1283_v36, %v1283_v36  ;;  %v1220_v52 = vadd.f32 %v2406_v34, %v1149_v48  ;;  %v1020_v54 = vadd.f32 %v917_v50, %v135_v40  ;;  %v107_v40 = vld [vmem:[#allocation2 + $0xb8] sm:$0xff] }
 0x149   :  { %1572 = vst.msk [vmem:[%s2796_s3 + $0x3c] sm:$0xf] %vm1556_vm4, %v1811_v41  ;;  %v1252_v59 = vmax.f32 %v1188_v51, 0.0  ;;  %v139_v41 = vld [vmem:[#allocation2 + $0x1b8] sm:$0xff] }
 0x14a   :  { %1604 = vst.msk [vmem:[%s2796_s3 + $0xbc] sm:$0xf] %vm1556_vm4, %v1843_v42  ;;  %v1118_v57 = vld [vmem:[#allocation2 + $0x88] sm:$0xff]  ;;  %v1284_v60 = vmax.f32 %v1220_v52, 0.0 }
 0x14b   :  { %v1150_v58 = vld [vmem:[#allocation2 + $0x188] sm:$0xff]  ;;  %v1189_v61 = vadd.f32 %v2406_v34, %v1118_v57  ;;  %1053 = vst.msk [vmem:[#allocation2 + $0x98] sm:$0xff] %vm19_vm3, %v988_v53  ;;  %1085 = vst.msk [vmem:[#allocation2 + $0x198] sm:$0xff] %vm19_vm3, %v1020_v54  ;;  %v1812_v1 = vpack.c.bf16 %v1252_v59, %v1252_v59 }
 0x14c   :  { %v1221_v62 = vadd.f32 %v2406_v34, %v1150_v58  ;;  %v1844_v2 = vpack.c.bf16 %v1284_v60, %v1284_v60  ;;  %v794_v5 = vpop.f32.mrb[40].mxu0  ;;  %v922_v6 = vpop.f32.mrb[40].mxu1 }
 0x14d   :  { %v1253_v3 = vmax.f32 %v1189_v61, 0.0  ;;  %1573 = vst.msk [vmem:[%s2796_s3 + $0x40] sm:$0xf] %vm1556_vm4, %v1812_v1  ;;  %v989_v11 = vadd.f32 %v794_v5, %v104_v63  ;;  %v1021_v12 = vadd.f32 %v922_v6, %v136_v0  ;;  %v796_v13 = vpop.f32.mrb[41].mxu0  ;;  %v924_v14 = vpop.f32.mrb[41].mxu1  ;;  %v108_v0 = vld [vmem:[#allocation2 + $0xc0] sm:$0xff] }
 0x14e   :  { %v1285_v4 = vmax.f32 %v1221_v62, 0.0  ;;  %1605 = vst.msk [vmem:[%s2796_s3 + $0xc0] sm:$0xf] %vm1556_vm4, %v1844_v2  ;;  %v1119_v15 = vld [vmem:[#allocation2 + $0x90] sm:$0xff]  ;;  %v797_v17 = vpop.f32.mrb[42].mxu0  ;;  %v925_v18 = vpop.f32.mrb[42].mxu1 }
 0x14f   :  { %v1813_v9 = vpack.c.bf16 %v1253_v3, %v1253_v3  ;;  %v1151_v16 = vld [vmem:[#allocation2 + $0x190] sm:$0xff]  ;;  %v1190_v19 = vadd.f32 %v2406_v34, %v1119_v15  ;;  %1054 = vst.msk [vmem:[#allocation2 + $0xa0] sm:$0xff] %vm19_vm3, %v989_v11  ;;  %1086 = vst.msk [vmem:[#allocation2 + $0x1a0] sm:$0xff] %vm19_vm3, %v1021_v12  ;;  %v990_v21 = vadd.f32 %v797_v17, %v105_v7  ;;  %v799_v23 = vpop.f32.mrb[43].mxu0  ;;  %v927_v24 = vpop.f32.mrb[43].mxu1  ;;  %v140_v1 = vld [vmem:[#allocation2 + $0x1c0] sm:$0xff] }
 0x150   :  { %v1845_v10 = vpack.c.bf16 %v1285_v4, %v1285_v4  ;;  %v1222_v20 = vadd.f32 %v2406_v34, %v1151_v16  ;;  %v1022_v22 = vadd.f32 %v925_v18, %v137_v8  ;;  %v109_v8 = vld [vmem:[#allocation2 + $0xc8] sm:$0xff] }
 0x151   :  { %1574 = vst.msk [vmem:[%s2796_s3 + $0x44] sm:$0xf] %vm1556_vm4, %v1813_v9  ;;  %v1254_v27 = vmax.f32 %v1190_v19, 0.0  ;;  %v141_v9 = vld [vmem:[#allocation2 + $0x1c8] sm:$0xff] }
 0x152   :  { %1606 = vst.msk [vmem:[%s2796_s3 + $0xc4] sm:$0xf] %vm1556_vm4, %v1845_v10  ;;  %v1120_v25 = vld [vmem:[#allocation2 + $0x98] sm:$0xff]  ;;  %v1286_v28 = vmax.f32 %v1222_v20, 0.0 }
 0x153   :  { %v1152_v26 = vld [vmem:[#allocation2 + $0x198] sm:$0xff]  ;;  %v1191_v29 = vadd.f32 %v2406_v34, %v1120_v25  ;;  %1055 = vst.msk [vmem:[#allocation2 + $0xa8] sm:$0xff] %vm19_vm3, %v990_v21  ;;  %1087 = vst.msk [vmem:[#allocation2 + $0x1a8] sm:$0xff] %vm19_vm3, %v1022_v22  ;;  %v1814_v33 = vpack.c.bf16 %v1254_v27, %v1254_v27 }
 0x154   :  { %v1223_v30 = vadd.f32 %v2406_v34, %v1152_v26  ;;  %v1846_v35 = vpack.c.bf16 %v1286_v28, %v1286_v28  ;;  %v802_v38 = vpop.f32.mrb[44].mxu0  ;;  %v930_v39 = vpop.f32.mrb[44].mxu1 }
 0x155   :  { %v1255_v36 = vmax.f32 %v1191_v29, 0.0  ;;  %1575 = vst.msk [vmem:[%s2796_s3 + $0x48] sm:$0xf] %vm1556_vm4, %v1814_v33  ;;  %v991_v44 = vadd.f32 %v802_v38, %v106_v31  ;;  %v1023_v45 = vadd.f32 %v930_v39, %v138_v32  ;;  %v804_v46 = vpop.f32.mrb[45].mxu0  ;;  %v932_v47 = vpop.f32.mrb[45].mxu1  ;;  %v110_v32 = vld [vmem:[#allocation2 + $0xd0] sm:$0xff] }
 0x156   :  { %v1287_v37 = vmax.f32 %v1223_v30, 0.0  ;;  %1607 = vst.msk [vmem:[%s2796_s3 + $0xc8] sm:$0xf] %vm1556_vm4, %v1846_v35  ;;  %v1121_v48 = vld [vmem:[#allocation2 + $0xa0] sm:$0xff]  ;;  %v805_v50 = vpop.f32.mrb[46].mxu0  ;;  %v933_v51 = vpop.f32.mrb[46].mxu1 }
 0x157   :  { %v1815_v42 = vpack.c.bf16 %v1255_v36, %v1255_v36  ;;  %v1153_v49 = vld [vmem:[#allocation2 + $0x1a0] sm:$0xff]  ;;  %v1192_v52 = vadd.f32 %v2406_v34, %v1121_v48  ;;  %1056 = vst.msk [vmem:[#allocation2 + $0xb0] sm:$0xff] %vm19_vm3, %v991_v44  ;;  %1088 = vst.msk [vmem:[#allocation2 + $0x1b0] sm:$0xff] %vm19_vm3, %v1023_v45  ;;  %v992_v54 = vadd.f32 %v805_v50, %v107_v40  ;;  %v807_v56 = vpop.f32.mrb[47].mxu0  ;;  %v935_v57 = vpop.f32.mrb[47].mxu1  ;;  %v142_v33 = vld [vmem:[#allocation2 + $0x1d0] sm:$0xff] }
 0x158   :  { %v1847_v43 = vpack.c.bf16 %v1287_v37, %v1287_v37  ;;  %v1224_v53 = vadd.f32 %v2406_v34, %v1153_v49  ;;  %v1024_v55 = vadd.f32 %v933_v51, %v139_v41  ;;  %v111_v41 = vld [vmem:[#allocation2 + $0xd8] sm:$0xff] }
 0x159   :  { %1576 = vst.msk [vmem:[%s2796_s3 + $0x4c] sm:$0xf] %vm1556_vm4, %v1815_v42  ;;  %v1256_v60 = vmax.f32 %v1192_v52, 0.0  ;;  %v143_v42 = vld [vmem:[#allocation2 + $0x1d8] sm:$0xff] }
 0x15a   :  { %1608 = vst.msk [vmem:[%s2796_s3 + $0xcc] sm:$0xf] %vm1556_vm4, %v1847_v43  ;;  %v1122_v58 = vld [vmem:[#allocation2 + $0xa8] sm:$0xff]  ;;  %v1288_v61 = vmax.f32 %v1224_v53, 0.0 }
 0x15b   :  { %v1154_v59 = vld [vmem:[#allocation2 + $0x1a8] sm:$0xff]  ;;  %v1193_v62 = vadd.f32 %v2406_v34, %v1122_v58  ;;  %1057 = vst.msk [vmem:[#allocation2 + $0xb8] sm:$0xff] %vm19_vm3, %v992_v54  ;;  %1089 = vst.msk [vmem:[#allocation2 + $0x1b8] sm:$0xff] %vm19_vm3, %v1024_v55  ;;  %v1816_v2 = vpack.c.bf16 %v1256_v60, %v1256_v60 }
 0x15c   :  { %v1225_v63 = vadd.f32 %v2406_v34, %v1154_v59  ;;  %v1848_v3 = vpack.c.bf16 %v1288_v61, %v1288_v61  ;;  %v810_v6 = vpop.f32.mrb[48].mxu0  ;;  %v938_v7 = vpop.f32.mrb[48].mxu1 }
 0x15d   :  { %v1257_v4 = vmax.f32 %v1193_v62, 0.0  ;;  %1577 = vst.msk [vmem:[%s2796_s3 + $0x50] sm:$0xf] %vm1556_vm4, %v1816_v2  ;;  %v993_v12 = vadd.f32 %v810_v6, %v108_v0  ;;  %v1025_v13 = vadd.f32 %v938_v7, %v140_v1  ;;  %v812_v14 = vpop.f32.mrb[49].mxu0  ;;  %v940_v15 = vpop.f32.mrb[49].mxu1  ;;  %v112_v1 = vld [vmem:[#allocation2 + $0xe0] sm:$0xff] }
 0x15e   :  { %v1289_v5 = vmax.f32 %v1225_v63, 0.0  ;;  %1609 = vst.msk [vmem:[%s2796_s3 + $0xd0] sm:$0xf] %vm1556_vm4, %v1848_v3  ;;  %v1123_v16 = vld [vmem:[#allocation2 + $0xb0] sm:$0xff]  ;;  %v813_v18 = vpop.f32.mrb[50].mxu0  ;;  %v941_v19 = vpop.f32.mrb[50].mxu1 }
 0x15f   :  { %v1817_v10 = vpack.c.bf16 %v1257_v4, %v1257_v4  ;;  %v1155_v17 = vld [vmem:[#allocation2 + $0x1b0] sm:$0xff]  ;;  %v1194_v20 = vadd.f32 %v2406_v34, %v1123_v16  ;;  %1058 = vst.msk [vmem:[#allocation2 + $0xc0] sm:$0xff] %vm19_vm3, %v993_v12  ;;  %1090 = vst.msk [vmem:[#allocation2 + $0x1c0] sm:$0xff] %vm19_vm3, %v1025_v13  ;;  %v994_v22 = vadd.f32 %v813_v18, %v109_v8  ;;  %v815_v24 = vpop.f32.mrb[51].mxu0  ;;  %v943_v25 = vpop.f32.mrb[51].mxu1  ;;  %v144_v2 = vld [vmem:[#allocation2 + $0x1e0] sm:$0xff] }
 0x160   :  { %v1849_v11 = vpack.c.bf16 %v1289_v5, %v1289_v5  ;;  %v1226_v21 = vadd.f32 %v2406_v34, %v1155_v17  ;;  %v1026_v23 = vadd.f32 %v941_v19, %v141_v9  ;;  %v113_v9 = vld [vmem:[#allocation2 + $0xe8] sm:$0xff] }
 0x161   :  { %1578 = vst.msk [vmem:[%s2796_s3 + $0x54] sm:$0xf] %vm1556_vm4, %v1817_v10  ;;  %v1258_v28 = vmax.f32 %v1194_v20, 0.0  ;;  %v145_v10 = vld [vmem:[#allocation2 + $0x1e8] sm:$0xff]  ;;  %v2723_v20 = vld [vmem:[%s2795_s2] ss:$0 sm:$0xff] }
 0x162   :  { %1610 = vst.msk [vmem:[%s2796_s3 + $0xd4] sm:$0xf] %vm1556_vm4, %v1849_v11  ;;  %v1124_v26 = vld [vmem:[#allocation2 + $0xb8] sm:$0xff]  ;;  %v1290_v29 = vmax.f32 %v1226_v21, 0.0 }
 0x163   :  { %v1156_v27 = vld [vmem:[#allocation2 + $0x1b8] sm:$0xff]  ;;  %v1195_v30 = vadd.f32 %v2406_v34, %v1124_v26  ;;  %1059 = vst.msk [vmem:[#allocation2 + $0xc8] sm:$0xff] %vm19_vm3, %v994_v22  ;;  %1091 = vst.msk [vmem:[#allocation2 + $0x1c8] sm:$0xff] %vm19_vm3, %v1026_v23  ;;  %v1818_v35 = vpack.c.bf16 %v1258_v28, %v1258_v28 }
 0x164   :  { %v1227_v31 = vadd.f32 %v2406_v34, %v1156_v27  ;;  %v1850_v36 = vpack.c.bf16 %v1290_v29, %v1290_v29  ;;  %v818_v39 = vpop.f32.mrb[52].mxu0  ;;  %v946_v40 = vpop.f32.mrb[52].mxu1 }
 0x165   :  { %v1259_v37 = vmax.f32 %v1195_v30, 0.0  ;;  %1579 = vst.msk [vmem:[%s2796_s3 + $0x58] sm:$0xf] %vm1556_vm4, %v1818_v35  ;;  %v995_v45 = vadd.f32 %v818_v39, %v110_v32  ;;  %v1027_v46 = vadd.f32 %v946_v40, %v142_v33  ;;  %v820_v47 = vpop.f32.mrb[53].mxu0  ;;  %v948_v48 = vpop.f32.mrb[53].mxu1  ;;  %v114_v33 = vld [vmem:[#allocation2 + $0xf0] sm:$0xff] }
 0x166   :  { %v1291_v38 = vmax.f32 %v1227_v31, 0.0  ;;  %1611 = vst.msk [vmem:[%s2796_s3 + $0xd8] sm:$0xf] %vm1556_vm4, %v1850_v36  ;;  %v1125_v49 = vld [vmem:[#allocation2 + $0xc0] sm:$0xff]  ;;  %v821_v51 = vpop.f32.mrb[54].mxu0  ;;  %v949_v52 = vpop.f32.mrb[54].mxu1 }
 0x167   :  { %v1819_v43 = vpack.c.bf16 %v1259_v37, %v1259_v37  ;;  %v1157_v50 = vld [vmem:[#allocation2 + $0x1c0] sm:$0xff]  ;;  %v1196_v53 = vadd.f32 %v2406_v34, %v1125_v49  ;;  %1060 = vst.msk [vmem:[#allocation2 + $0xd0] sm:$0xff] %vm19_vm3, %v995_v45  ;;  %1092 = vst.msk [vmem:[#allocation2 + $0x1d0] sm:$0xff] %vm19_vm3, %v1027_v46  ;;  %v996_v55 = vadd.f32 %v821_v51, %v111_v41  ;;  %v823_v57 = vpop.f32.mrb[55].mxu0  ;;  %v951_v58 = vpop.f32.mrb[55].mxu1  ;;  %v146_v35 = vld [vmem:[#allocation2 + $0x1f0] sm:$0xff] }
 0x168   :  { %v1851_v44 = vpack.c.bf16 %v1291_v38, %v1291_v38  ;;  %v1228_v54 = vadd.f32 %v2406_v34, %v1157_v50  ;;  %v1028_v56 = vadd.f32 %v949_v52, %v143_v42  ;;  %v115_v42 = vld [vmem:[#allocation2 + $0xf8] sm:$0xff] }
 0x169   :  { %1580 = vst.msk [vmem:[%s2796_s3 + $0x5c] sm:$0xf] %vm1556_vm4, %v1819_v43  ;;  %v1260_v61 = vmax.f32 %v1196_v53, 0.0  ;;  %v147_v43 = vld [vmem:[#allocation2 + $0x1f8] sm:$0xff] }
 0x16a   :  { %1612 = vst.msk [vmem:[%s2796_s3 + $0xdc] sm:$0xf] %vm1556_vm4, %v1851_v44  ;;  %v1126_v59 = vld [vmem:[#allocation2 + $0xc8] sm:$0xff]  ;;  %v1292_v62 = vmax.f32 %v1228_v54, 0.0 }
 0x16b   :  { %v1158_v60 = vld [vmem:[#allocation2 + $0x1c8] sm:$0xff]  ;;  %v1197_v63 = vadd.f32 %v2406_v34, %v1126_v59  ;;  %1061 = vst.msk [vmem:[#allocation2 + $0xd8] sm:$0xff] %vm19_vm3, %v996_v55  ;;  %1093 = vst.msk [vmem:[#allocation2 + $0x1d8] sm:$0xff] %vm19_vm3, %v1028_v56  ;;  %v1820_v3 = vpack.c.bf16 %v1260_v61, %v1260_v61 }
 0x16c   :  { %v1229_v0 = vadd.f32 %v2406_v34, %v1158_v60  ;;  %v1852_v4 = vpack.c.bf16 %v1292_v62, %v1292_v62  ;;  %v826_v7 = vpop.f32.mrb[56].mxu0  ;;  %v954_v8 = vpop.f32.mrb[56].mxu1 }
 0x16d   :  { %v1261_v5 = vmax.f32 %v1197_v63, 0.0  ;;  %1581 = vst.msk [vmem:[%s2796_s3 + $0x60] sm:$0xf] %vm1556_vm4, %v1820_v3  ;;  %v997_v12 = vadd.f32 %v826_v7, %v112_v1  ;;  %v1029_v13 = vadd.f32 %v954_v8, %v144_v2  ;;  %v828_v14 = vpop.f32.mrb[57].mxu0  ;;  %v956_v15 = vpop.f32.mrb[57].mxu1 }
 0x16e   :  { %v1293_v6 = vmax.f32 %v1229_v0, 0.0  ;;  %1613 = vst.msk [vmem:[%s2796_s3 + $0xe0] sm:$0xf] %vm1556_vm4, %v1852_v4  ;;  %v1127_v16 = vld [vmem:[#allocation2 + $0xd0] sm:$0xff]  ;;  %v829_v18 = vpop.f32.mrb[58].mxu0  ;;  %v957_v19 = vpop.f32.mrb[58].mxu1 }
 0x16f   :  { %v1821_v34 = vpack.c.bf16 %v1261_v5, %v1261_v5  ;;  %v1159_v17 = vld [vmem:[#allocation2 + $0x1d0] sm:$0xff]  ;;  %v1198_v21 = vadd.f32 %v2723_v20, %v1127_v16  ;;  %1062 = vst.msk [vmem:[#allocation2 + $0xe0] sm:$0xff] %vm19_vm3, %v997_v12  ;;  %1094 = vst.msk [vmem:[#allocation2 + $0x1e0] sm:$0xff] %vm19_vm3, %v1029_v13  ;;  %v998_v23 = vadd.f32 %v829_v18, %v113_v9  ;;  %v831_v25 = vpop.f32.mrb[59].mxu0  ;;  %v959_v26 = vpop.f32.mrb[59].mxu1 }
 0x170   :  { %v1853_v11 = vpack.c.bf16 %v1293_v6, %v1293_v6  ;;  %v1230_v22 = vadd.f32 %v2723_v20, %v1159_v17  ;;  %v1030_v24 = vadd.f32 %v957_v19, %v145_v10 }
 0x171   :  { %1582 = vst.msk [vmem:[%s2796_s3 + $0x64] sm:$0xf] %vm1556_vm4, %v1821_v34  ;;  %v1262_v29 = vmax.f32 %v1198_v21, 0.0 }
 0x172   :  { %1614 = vst.msk [vmem:[%s2796_s3 + $0xe4] sm:$0xf] %vm1556_vm4, %v1853_v11  ;;  %v1128_v27 = vld [vmem:[#allocation2 + $0xd8] sm:$0xff]  ;;  %v1294_v30 = vmax.f32 %v1230_v22, 0.0 }
 0x173   :  { %v1160_v28 = vld [vmem:[#allocation2 + $0x1d8] sm:$0xff]  ;;  %v1199_v31 = vadd.f32 %v2723_v20, %v1128_v27  ;;  %1063 = vst.msk [vmem:[#allocation2 + $0xe8] sm:$0xff] %vm19_vm3, %v998_v23  ;;  %1095 = vst.msk [vmem:[#allocation2 + $0x1e8] sm:$0xff] %vm19_vm3, %v1030_v24  ;;  %v1822_v36 = vpack.c.bf16 %v1262_v29, %v1262_v29 }
 0x174   :  { %v1231_v32 = vadd.f32 %v2723_v20, %v1160_v28  ;;  %v1854_v37 = vpack.c.bf16 %v1294_v30, %v1294_v30  ;;  %v834_v40 = vpop.f32.mrb[60].mxu0  ;;  %v962_v41 = vpop.f32.mrb[60].mxu1 }
 0x175   :  { %v1263_v38 = vmax.f32 %v1199_v31, 0.0  ;;  %1583 = vst.msk [vmem:[%s2796_s3 + $0x68] sm:$0xf] %vm1556_vm4, %v1822_v36  ;;  %v999_v46 = vadd.f32 %v834_v40, %v114_v33  ;;  %v1031_v47 = vadd.f32 %v962_v41, %v146_v35  ;;  %v836_v48 = vpop.f32.mrb[61].mxu0  ;;  %v964_v49 = vpop.f32.mrb[61].mxu1 }
 0x176   :  { %v1295_v39 = vmax.f32 %v1231_v32, 0.0  ;;  %1615 = vst.msk [vmem:[%s2796_s3 + $0xe8] sm:$0xf] %vm1556_vm4, %v1854_v37  ;;  %v1129_v50 = vld [vmem:[#allocation2 + $0xe0] sm:$0xff]  ;;  %v837_v52 = vpop.f32.mrb[62].mxu0  ;;  %v965_v53 = vpop.f32.mrb[62].mxu1 }
 0x177   :  { %v1823_v44 = vpack.c.bf16 %v1263_v38, %v1263_v38  ;;  %v1161_v51 = vld [vmem:[#allocation2 + $0x1e0] sm:$0xff]  ;;  %v1200_v54 = vadd.f32 %v2723_v20, %v1129_v50  ;;  %1064 = vst.msk [vmem:[#allocation2 + $0xf0] sm:$0xff] %vm19_vm3, %v999_v46  ;;  %1096 = vst.msk [vmem:[#allocation2 + $0x1f0] sm:$0xff] %vm19_vm3, %v1031_v47  ;;  %v1000_v56 = vadd.f32 %v837_v52, %v115_v42  ;;  %v839_v58 = vpop.f32.mrb[63].mxu0  ;;  %v967_v59 = vpop.f32.mrb[63].mxu1 }
 0x178   :  { %v1855_v45 = vpack.c.bf16 %v1295_v39, %v1295_v39  ;;  %v1232_v55 = vadd.f32 %v2723_v20, %v1161_v51  ;;  %v1032_v57 = vadd.f32 %v965_v53, %v147_v43 }
 0x179   :  { %1584 = vst.msk [vmem:[%s2796_s3 + $0x6c] sm:$0xf] %vm1556_vm4, %v1823_v44  ;;  %v1264_v62 = vmax.f32 %v1200_v54, 0.0 }
 0x17a   :  { %1616 = vst.msk [vmem:[%s2796_s3 + $0xec] sm:$0xf] %vm1556_vm4, %v1855_v45  ;;  %v1130_v60 = vld [vmem:[#allocation2 + $0xe8] sm:$0xff]  ;;  %v1296_v63 = vmax.f32 %v1232_v55, 0.0 }
 0x17b   :  { %v1162_v61 = vld [vmem:[#allocation2 + $0x1e8] sm:$0xff]  ;;  %v1201_v0 = vadd.f32 %v2723_v20, %v1130_v60  ;;  %1065 = vst.msk [vmem:[#allocation2 + $0xf8] sm:$0xff] %vm19_vm3, %v1000_v56  ;;  %1097 = vst.msk [vmem:[#allocation2 + $0x1f8] sm:$0xff] %vm19_vm3, %v1032_v57  ;;  %v1824_v2 = vpack.c.bf16 %v1264_v62, %v1264_v62 }
 0x17c   :  { %v1233_v1 = vadd.f32 %v2723_v20, %v1162_v61  ;;  %v1856_v3 = vpack.c.bf16 %v1296_v63, %v1296_v63 }
 0x17d   :  { %v1265_v4 = vmax.f32 %v1201_v0, 0.0  ;;  %1585 = vst.msk [vmem:[%s2796_s3 + $0x70] sm:$0xf] %vm1556_vm4, %v1824_v2 }
 0x17e   :  { %v1297_v5 = vmax.f32 %v1233_v1, 0.0  ;;  %1617 = vst.msk [vmem:[%s2796_s3 + $0xf0] sm:$0xf] %vm1556_vm4, %v1856_v3  ;;  %v1131_v8 = vld [vmem:[#allocation2 + $0xf0] sm:$0xff] }
 0x17f   :  { %v1825_v6 = vpack.c.bf16 %v1265_v4, %v1265_v4  ;;  %v1163_v9 = vld [vmem:[#allocation2 + $0x1f0] sm:$0xff]  ;;  %v1202_v10 = vadd.f32 %v2723_v20, %v1131_v8 }
 0x180   :  { %v1857_v7 = vpack.c.bf16 %v1297_v5, %v1297_v5  ;;  %v1234_v34 = vadd.f32 %v2723_v20, %v1163_v9 }
 0x181   :  { %1586 = vst.msk [vmem:[%s2796_s3 + $0x74] sm:$0xf] %vm1556_vm4, %v1825_v6  ;;  %v1266_v13 = vmax.f32 %v1202_v10, 0.0 }
 0x182   :  { %1618 = vst.msk [vmem:[%s2796_s3 + $0xf4] sm:$0xf] %vm1556_vm4, %v1857_v7  ;;  %v1132_v11 = vld [vmem:[#allocation2 + $0xf8] sm:$0xff]  ;;  %v1298_v14 = vmax.f32 %v1234_v34, 0.0 }
 0x183   :  { %v1164_v12 = vld [vmem:[#allocation2 + $0x1f8] sm:$0xff]  ;;  %v1203_v15 = vadd.f32 %v2723_v20, %v1132_v11  ;;  %v1826_v17 = vpack.c.bf16 %v1266_v13, %v1266_v13 }
 0x184   :  { %v1235_v16 = vadd.f32 %v2723_v20, %v1164_v12  ;;  %v1858_v18 = vpack.c.bf16 %v1298_v14, %v1298_v14 }
 0x185   :  { %v1267_v19 = vmax.f32 %v1203_v15, 0.0  ;;  %1587 = vst.msk [vmem:[%s2796_s3 + $0x78] sm:$0xf] %vm1556_vm4, %v1826_v17 }
 0x186   :  { %v1299_v21 = vmax.f32 %v1235_v16, 0.0  ;;  %1619 = vst.msk [vmem:[%s2796_s3 + $0xf8] sm:$0xf] %vm1556_vm4, %v1858_v18 }
 0x187   :  { %v1827_v22 = vpack.c.bf16 %v1267_v19, %v1267_v19 }
 0x188   :  { %v1859_v23 = vpack.c.bf16 %v1299_v21, %v1299_v21 }
 0x189   :  { %1588 = vst.msk [vmem:[%s2796_s3 + $0x7c] sm:$0xf] %vm1556_vm4, %v1827_v22 }
 0x18a   :  { %1620 = vst.msk [vmem:[%s2796_s3 + $0xfc] sm:$0xf] %vm1556_vm4, %v1859_v23 }

// kernel: ingredient_net_forward.51
= control target key start
LH: loop header
LB: loop body
LE: loop exit
PB: predicated region body
PF: predicated region fallthrough
CT: control target
= control target key end

     0   :  { %vm377_vm0 = vcmask 523264   ;;  %s944_s1 = inlined_call_operand.vmem [shape: bf16[576,128], index: 1, kind: input, shape index: {}]   ;;  %s945_s0 = inlined_call_operand.vmem [shape: bf16[32,576], index: 0, kind: input, shape index: {}]   ;;  %s946_s2 = inlined_call_operand.vmem [shape: f32[1,128], index: 2, kind: input, shape index: {}]   ;;  %s947_s3 = inlined_call_operand.vmem [shape: bf16[32,128], index: 3, kind: output, shape index: {}]  }
   0x1   :  { %v727_v0 = vld [vmem:[%s944_s1 + $0x40] sm:$0xff]   ;;  %v731_v4 = vld [vmem:[%s944_s1 + $0x48] sm:$0xff]   ;;  %v735_v8 = vld [vmem:[%s944_s1 + $0x50] sm:$0xff]  }
   0x2   :  { %v728_v1 = vld [vmem:[%s944_s1 + $0xc0] sm:$0xff]   ;;  %653 = vmatprep.subr.bf16.mxu0 %v727_v0  ;;  %v732_v5 = vld [vmem:[%s944_s1 + $0xc8] sm:$0xff]   ;;  %v736_v9 = vld [vmem:[%s944_s1 + $0xd0] sm:$0xff]  }
   0x3   :  { %v729_v2 = vld [vmem:[%s944_s1] sm:$0xff]   ;;  %681 = vmatprep.subr.bf16.mxu1 %v728_v1  ;;  %v733_v6 = vld [vmem:[%s944_s1 + $0x8] sm:$0xff]   ;;  %v737_v10 = vld [vmem:[%s944_s1 + $0x10] sm:$0xff]  }
   0x4   :  { %v730_v3 = vld [vmem:[%s944_s1 + $0x80] sm:$0xff]   ;;  %654 = vmatpush3.bf16.msra.mxu0 %v729_v2  ;;  %v734_v7 = vld [vmem:[%s944_s1 + $0x88] sm:$0xff]   ;;  %v738_v11 = vld [vmem:[%s944_s1 + $0x90] sm:$0xff]  }
   0x5   :  { %682 = vmatpush3.bf16.msra.mxu1 %v730_v3  ;;  %655 = vmatprep.subr.bf16.mxu0 %v731_v4  ;;  %v739_v12 = vld [vmem:[%s944_s1 + $0x58] sm:$0xff]   ;;  %v743_v16 = vld [vmem:[%s944_s1 + $0x60] sm:$0xff]   ;;  %v747_v20 = vld [vmem:[%s944_s1 + $0x68] sm:$0xff]  }
   0x6   :  { %683 = vmatprep.subr.bf16.mxu1 %v732_v5  ;;  %v740_v13 = vld [vmem:[%s944_s1 + $0xd8] sm:$0xff]   ;;  %v744_v17 = vld [vmem:[%s944_s1 + $0xe0] sm:$0xff]   ;;  %v748_v21 = vld [vmem:[%s944_s1 + $0xe8] sm:$0xff]  }
   0x7   :  { %v741_v14 = vld [vmem:[%s944_s1 + $0x18] sm:$0xff]   ;;  %v745_v18 = vld [vmem:[%s944_s1 + $0x20] sm:$0xff]   ;;  %v749_v22 = vld [vmem:[%s944_s1 + $0x28] sm:$0xff]  }
   0x8   :  { %656 = vmatpush3.bf16.msra.mxu0 %v733_v6  ;;  %v742_v15 = vld [vmem:[%s944_s1 + $0x98] sm:$0xff]   ;;  %v746_v19 = vld [vmem:[%s944_s1 + $0xa0] sm:$0xff]   ;;  %v750_v23 = vld [vmem:[%s944_s1 + $0xa8] sm:$0xff]  }
   0x9   :  { %684 = vmatpush3.bf16.msra.mxu1 %v734_v7  ;;  %657 = vmatprep.subr.bf16.mxu0 %v735_v8  ;;  %v751_v24 = vld [vmem:[%s944_s1 + $0x70] sm:$0xff]   ;;  %v755_v28 = vld [vmem:[%s944_s1 + $0x78] sm:$0xff]   ;;  %v764_v35 = vld [vmem:[%s945_s0 + $0xc] ss:$20 sps:$4 sm:$0xff]  }
   0xa   :  { %685 = vmatprep.subr.bf16.mxu1 %v736_v9  ;;  %v752_v25 = vld [vmem:[%s944_s1 + $0xf0] sm:$0xff]   ;;  %v756_v29 = vld [vmem:[%s944_s1 + $0xf8] sm:$0xff]   ;;  %v765_v36 = vld [vmem:[%s944_s1 + $0x100] sm:$0xff]   ;;  %465 = vmatprep.mubr.bf16.mxu1 %v764_v35 }
   0xb   :  { %v753_v26 = vld [vmem:[%s944_s1 + $0x30] sm:$0xff]   ;;  %v757_v30 = vld [vmem:[%s944_s1 + $0x38] sm:$0xff]   ;;  %v766_v37 = vld [vmem:[%s944_s1 + $0x108] sm:$0xff]  }
   0xc   :  { %658 = vmatpush3.bf16.msra.mxu0 %v737_v10  ;;  %v754_v27 = vld [vmem:[%s944_s1 + $0xb0] sm:$0xff]   ;;  %v758_v31 = vld [vmem:[%s944_s1 + $0xb8] sm:$0xff]   ;;  %v767_v38 = vld [vmem:[%s945_s0 + $0x2c] ss:$20 sps:$4 sm:$0xff]  }
   0xd   :  { %686 = vmatpush3.bf16.msra.mxu1 %v738_v11  ;;  %659 = vmatprep.subr.bf16.mxu0 %v739_v12  ;;  %v759_v32 = vld [vmem:[%s945_s0] ss:$20 sps:$4 sm:$0xff]   ;;  %v761_v33 = vld [vmem:[%s945_s0 + $0x4] ss:$20 sps:$4 sm:$0xff]   ;;  %v762_v34 = vld [vmem:[%s945_s0 + $0x8] ss:$20 sps:$4 sm:$0xff]  }
   0xe   :  { %687 = vmatprep.subr.bf16.mxu1 %v740_v13  ;;  %416 = vmatprep.mubr.bf16.mxu0 %v761_v33  ;;  %v769_v39 = vld [vmem:[%s945_s0 + $0x34] ss:$20 sps:$4 sm:$0xff]   ;;  %v772_v42 = vld [vmem:[%s945_s0 + $0x30] ss:$20 sps:$4 sm:$0xff]   ;;  %v774_v44 = vld [vmem:[%s944_s1 + $0x118] sm:$0xff]  }
   0xf   :  { %v771_v40 = vld [vmem:[%s945_s0 + $0x28] ss:$20 sps:$4 sm:$0xff]   ;;  %v773_v41 = vld [vmem:[%s944_s1 + $0x110] sm:$0xff]   ;;  %v776_v45 = vld [vmem:[%s945_s0 + $0x38] ss:$20 sps:$4 sm:$0xff]  }
  0x10   :  { %660 = vmatpush3.bf16.msra.mxu0 %v741_v14  ;;  %v775_v43 = vld [vmem:[%s945_s0 + $0x10] ss:$20 sps:$4 sm:$0xff]   ;;  %v633_v11 = vld [vmem:[%s946_s2] ss:$0 sm:$0xff] }
  0x11   :  { %688 = vmatpush3.bf16.msra.mxu1 %v742_v15  ;;  %661 = vmatprep.subr.bf16.mxu0 %v743_v16 }
  0x12   :  { %689 = vmatprep.subr.bf16.mxu1 %v744_v17 }
  0x14   :  { %662 = vmatpush3.bf16.msra.mxu0 %v745_v18 }
  0x15   :  { %690 = vmatpush3.bf16.msra.mxu1 %v746_v19  ;;  %663 = vmatprep.subr.bf16.mxu0 %v747_v20 }
  0x16   :  { %691 = vmatprep.subr.bf16.mxu1 %v748_v21 }
  0x18   :  { %664 = vmatpush3.bf16.msra.mxu0 %v749_v22 }
  0x19   :  { %692 = vmatpush3.bf16.msra.mxu1 %v750_v23  ;;  %665 = vmatprep.subr.bf16.mxu0 %v751_v24 }
  0x1a   :  { %693 = vmatprep.subr.bf16.mxu1 %v752_v25 }
  0x1c   :  { %666 = vmatpush3.bf16.msra.mxu0 %v753_v26 }
  0x1d   :  { %694 = vmatpush3.bf16.msra.mxu1 %v754_v27  ;;  %667 = vmatprep.subr.bf16.mxu0 %v755_v28 }
  0x1e   :  { %695 = vmatprep.subr.bf16.mxu1 %v756_v29 }
  0x20   :  { %668 = vmatpush3.bf16.msra.mxu0 %v757_v30 }
  0x21   :  { %696 = vmatpush3.bf16.msra.mxu1 %v758_v31  ;;  %715 = vmatprep.subr.bf16.mxu0 %v765_v36 }
  0x23   :  { %417 = vmatmul.mubr.bf16.vlgmr.msra.gmra.mrb[0].mxu0 %v759_v32 }
  0x24   :  { %466 = vmatmul.mubr.bf16.vlgmr.msra.gmra.mrb[0].mxu1 %v762_v34  ;;  %716 = vmatpush3.bf16.msra.mxu0 %v765_v36 }
  0x25   :  { %717 = vmatprep.subr.bf16.mxu0 %v766_v37  ;;  %424 = vmatprep.mubr.bf16.mxu0 %v767_v38 }
  0x26   :  { %473 = vmatprep.mubr.bf16.mxu1 %v769_v39 }
  0x28   :  { %718 = vmatpush3.bf16.msra.mxu0 %v766_v37 }
  0x29   :  { %719 = vmatprep.subr.bf16.mxu0 %v773_v41 }
  0x2b   :  { %425 = vmatmul.mubr.bf16.gmra.mrb[4].mxu0 %v771_v40 }
  0x2c   :  { %474 = vmatmul.mubr.bf16.gmra.mrb[4].mxu1 %v772_v42  ;;  %723 = vmatprep.mubr.msk.bf16.mxu0 %vm377_vm0, %v775_v43 }
  0x2d   :  { %720 = vmatpush3.bf16.msra.mxu0 %v773_v41 }
  0x2e   :  { %721 = vmatprep.subr.bf16.mxu0 %v774_v44 }
  0x31   :  { %722 = vmatpush3.bf16.msra.mxu0 %v774_v44 }
  0x34   :  { %724 = vmatmul.mubr.msk.bf16.vlgmr.msra.gmra.mrb[8].mxu0 %vm377_vm0, %v776_v45 }
  0xf6   :  { %v669_v46 = vpop.f32.mrb[0].mxu0 }
  0xf7   :  { %v697_v47 = vpop.f32.mrb[0].mxu1  ;;  %v670_v48 = vpop.f32.mrb[1].mxu0 }
  0xf8   :  { %v671_v49 = vadd.f32 %v670_v48, %v669_v46  ;;  %v698_v50 = vpop.f32.mrb[1].mxu1  ;;  %v672_v51 = vpop.f32.mrb[2].mxu0 }
  0xf9   :  { %v699_v52 = vadd.f32 %v698_v50, %v697_v47  ;;  %v700_v53 = vpop.f32.mrb[2].mxu1  ;;  %v673_v54 = vpop.f32.mrb[3].mxu0 }
  0xfa   :  { %v674_v55 = vadd.f32 %v673_v54, %v672_v51  ;;  %v701_v56 = vpop.f32.mrb[3].mxu1 }
  0xfb   :  { %v702_v57 = vadd.f32 %v701_v56, %v700_v53  ;;  %v468_v58 = vadd.f32 %v699_v52, %v671_v49 }
  0xfd   :  { %v471_v59 = vadd.f32 %v702_v57, %v674_v55 }
  0xfe   :  { %v675_v60 = vpop.f32.mrb[4].mxu0 }
  0xff   :  { %v703_v61 = vpop.f32.mrb[4].mxu1  ;;  %v676_v62 = vpop.f32.mrb[5].mxu0 }
 0x100   :  { %v677_v63 = vadd.f32 %v676_v62, %v675_v60  ;;  %v704_v0 = vpop.f32.mrb[5].mxu1  ;;  %v678_v1 = vpop.f32.mrb[6].mxu0 }
 0x101   :  { %v705_v2 = vadd.f32 %v704_v0, %v703_v61  ;;  %v706_v3 = vpop.f32.mrb[6].mxu1  ;;  %v679_v4 = vpop.f32.mrb[7].mxu0 }
 0x102   :  { %v680_v5 = vadd.f32 %v679_v4, %v678_v1  ;;  %v707_v6 = vpop.f32.mrb[7].mxu1 }
 0x103   :  { %v708_v7 = vadd.f32 %v707_v6, %v706_v3  ;;  %v476_v8 = vadd.f32 %v705_v2, %v677_v63 }
 0x105   :  { %v479_v9 = vadd.f32 %v708_v7, %v680_v5 }
 0x107   :  { %v725_v10 = vpop.f32.mrb[8].mxu0 }
 0x108   :  { %v525_v12 = vadd.f32 %v725_v10, %v476_v8  ;;  %v516_v13 = vpop.f32.mrb[9].mxu0 }
 0x109   :  { %v517_v14 = vadd.f32 %v516_v13, %v468_v58  ;;  %v726_v15 = vpop.f32.mrb[10].mxu0 }
 0x10a   :  { %v555_v16 = vadd.f32 %v633_v11, %v525_v12  ;;  %v528_v17 = vadd.f32 %v726_v15, %v479_v9  ;;  %v519_v18 = vpop.f32.mrb[11].mxu0 }
 0x10b   :  { %v553_v19 = vadd.f32 %v633_v11, %v517_v14  ;;  %v520_v20 = vadd.f32 %v519_v18, %v471_v59 }
 0x10c   :  { %v556_v21 = vadd.f32 %v633_v11, %v528_v17  ;;  %v559_v23 = vmax.f32 %v555_v16, 0.0 }
 0x10d   :  { %v554_v22 = vadd.f32 %v633_v11, %v520_v20  ;;  %v557_v25 = vmax.f32 %v553_v19, 0.0 }
 0x10e   :  { %v560_v24 = vmax.f32 %v556_v21, 0.0 }
 0x10f   :  { %v558_v26 = vmax.f32 %v554_v22, 0.0 }
 0x110   :  { %v650_v27 = vpack.c.bf16 %v560_v24, %v559_v23 }
 0x111   :  { %v645_v28 = vpack.c.bf16 %v558_v26, %v557_v25 }
 0x112   :  { %652 = vst [vmem:[%s947_s3 + $0x8] sm:$0xff] %v650_v27  }
 0x113   :  { %646 = vst [vmem:[%s947_s3] sm:$0xff] %v645_v28  }

// kernel: ingredient_net_forward.53
= control target key start
LH: loop header
LB: loop body
LE: loop exit
PB: predicated region body
PF: predicated region fallthrough
CT: control target
= control target key end

     0   :  { %s796_s12 = smov 0   ;;  %s798_s13 = smov 0   ;;  %s889_s0 = inlined_call_operand.vmem [shape: bf16[32,1152], index: 0, kind: input, shape index: {}]   ;;  %s890_s1 = inlined_call_operand.vmem [shape: bf16[1152,128], index: 1, kind: input, shape index: {}]   ;;  %s891_s2 = inlined_call_operand.vmem [shape: f32[1,128], index: 2, kind: input, shape index: {}]   ;;  %s892_s3 = inlined_call_operand.vmem [shape: bf16[32,128], index: 3, kind: output, shape index: {}]  }
   0x1   :  { %s800_s14 = smov 0   ;;  %s802_s15 = smov 0  }
   0x2   :  { %s804_s16 = smov 0  }
   0x3 LB: > { %s25_s17 = sadd.s32 1, %s769_s15  ;;  %p48_p1 = scmp.ne.s32.totalorder %s761_s13, %s757_s12  ;;  %s773_s16 = sphi %s804_s16, %s13_s16   ;;  %s769_s15 = sphi %s802_s15, %s896_s15   ;;  %s765_s14 = sphi %s800_s14, %s895_s14   ;;  %s761_s13 = sphi %s798_s13, %s894_s13   ;;  %s757_s12 = sphi %s796_s12, %s893_s12  }
   0x4   : > { %p26_p0 = scmp.ge.s32.totalorder %s25_s17, 9  ;;  %p49_p2 = scmp.eq.s32.totalorder %s773_s16, 0 }
   0x5   : > { %s41_s19 = sadd.s32 1, %s761_s13  ;;  %p611_p5 = scmp.ge.s32.totalorder %s773_s16, 9 }
   0x6   : > { %s898_s17 = smov (%p26_p0, %s25_s17), 0  ;;  %p50_p3 = por %p49_p2, %p48_p1 }
   0x7   : > { %s37_s18 = ssub.s32 %s769_s15, %s898_s17  ;;  %162 = sbr.rel (%p611_p5) target bundleno = 21 (0x15), region = 20 }
   0x8   : > { %p39_p4 = scmp.eq.s32.totalorder %s37_s18, 0 }
   0xa   : > { %s831_s20 = scalar_select %p39_p4, %s761_s13, %s41_s19  }
   0xe   : > { %165 = sbr.rel (!%p50_p3) target bundleno = 21 (0x15), region = 24  ;;  %s167_s21 = sand.u32 (%p50_p3), 1, %s761_s13  }
   0xf   : > { %s613_s22 = sshll.u32 (%p50_p3), %s769_s15, 2  ;;  %s612_s23 = sshll.u32 (%p50_p3), %s167_s21, 4 }
  0x10   : > { %s174_s26 = scalar_lea.vmem (%p50_p3), %s889_s0, %s613_s22  ;;  %s169_s27 = scalar_lea.vmem (%p50_p3), [#allocation3], %s612_s23 }
  0x11   : > { %v190_v0 = vld [vmem:[%s174_s26] sm:$0xf] (%p50_p3)  ;;  %v192_v1 = vld [vmem:[%s174_s26 + $0x24] sm:$0xf] (%p50_p3)  ;;  %v194_v2 = vld [vmem:[%s174_s26 + $0x48] sm:$0xf] (%p50_p3) }
  0x12   : > { %191 = vst [vmem:[%s169_s27] sm:$0xf] (%p50_p3), %v190_v0  ;;  %193 = vst [vmem:[%s169_s27 + $0x4] sm:$0xf] (%p50_p3), %v192_v1  ;;  %v196_v3 = vld [vmem:[%s174_s26 + $0x6c] sm:$0xf] (%p50_p3) }
  0x13   : > { %195 = vst [vmem:[%s169_s27 + $0x8] sm:$0xf] (%p50_p3), %v194_v2  ;;  %197 = vst [vmem:[%s169_s27 + $0xc] sm:$0xf] (%p50_p3), %v196_v3 }
  0x15 PF: > { %p614_p6 = scmp.ge.s32.totalorder %s773_s16, 1  ;;  %p239_p7 = scmp.lt.s32.totalorder %s773_s16, 10 }
  0x17   : > { %p240_p8 = pnand %p614_p6, %p239_p7 }
  0x18   : > { %s246_s28 = sand.u32 (!%p240_p8), 1, %s757_s12   ;;  %s616_s29 = sshll.u32 (!%p240_p8), %s765_s14, 4 }
  0x19   : > { %243 = sbr.rel (%p240_p8) target bundleno = 304 (0x130), region = 69  ;;  %s843_s30 = sshll.u32 (!%p240_p8), %s246_s28, 4 }
  0x1a   : > { %p285_p9 = scmp.lt.s32.totalorder (!%p240_p8), %s616_s29, 143  ;;  %s248_s8 = scalar_lea.vmem (!%p240_p8), [#allocation3], %s843_s30 }
  0x1b   : > { %p618_p10 = scmp.ne.s32.totalorder (!%p240_p8), %s765_s14, 0 }
  0x20   : > { %s900_s29 = smov (!%p285_p9, %s616_s29), 143  ;;  %309 = sbr.rel (%p618_p10) target bundleno = 39 (0x27), region = 77 }
  0x21   : > { %s617_s4 = sshll.u32 %s900_s29, 2  ;;  %v775_v4 = vmov (!%p618_p10), 0.0  }
  0x22   : > { %s848_s7 = scalar_lea.vmem %s890_s1, %s617_s4  ;;  %310 = vst [vmem:[#allocation2] sm:$0xff] (!%p618_p10), %v775_v4  ;;  %311 = vst [vmem:[#allocation2 + $0x8] sm:$0xff] (!%p618_p10), %v775_v4 }
  0x23   : > { %312 = vst [vmem:[#allocation2 + $0x10] sm:$0xff] (!%p618_p10), %v775_v4  ;;  %313 = vst [vmem:[#allocation2 + $0x18] sm:$0xff] (!%p618_p10), %v775_v4 }
  0x27 PF: > { %v725_v5 = vld [vmem:[%s848_s7] sm:$0xff]   ;;  %v726_v6 = vld [vmem:[%s848_s7 + $0x8] sm:$0xff]   ;;  %v727_v7 = vld [vmem:[%s848_s7 + $0x10] sm:$0xff]   ;;  %p629_p11 = scmp.ne.s32.totalorder %s765_s14, 8 }
  0x28   : > { %664 = vmatprep.subr.bf16.mxu0 %v725_v5  ;;  %v728_v8 = vld [vmem:[%s848_s7 + $0x18] sm:$0xff]   ;;  %v733_v9 = vld [vmem:[%s248_s8] sm:$0xff]   ;;  %v730_v11 = vld [vmem:[%s848_s7 + $0x28] sm:$0xff]  }
  0x29   : > { %665 = vmatpush3.bf16.msra.mxu0 %v725_v5  ;;  %680 = vmatprep.mubr.bf16.mxu0 %v733_v9  ;;  %v729_v10 = vld [vmem:[%s848_s7 + $0x20] sm:$0xff]   ;;  %v731_v12 = vld [vmem:[%s848_s7 + $0x30] sm:$0xff]   ;;  %v732_v13 = vld [vmem:[%s848_s7 + $0x38] sm:$0xff]  }
  0x2a   : > { %666 = vmatprep.subr.bf16.mxu0 %v726_v6  ;;  %v734_v14 = vld [vmem:[%s248_s8 + $0x8] sm:$0xff]   ;;  %v316_v15 = vld [vmem:[#allocation2 + $0x10] sm:$0xff]  ;;  %v314_v16 = vld [vmem:[#allocation2] sm:$0xff] }
  0x2b   : > { %v317_v18 = vld [vmem:[#allocation2 + $0x18] sm:$0xff]  ;;  %v315_v21 = vld [vmem:[#allocation2 + $0x8] sm:$0xff]  ;;  %v630_v29 = vld [vmem:[%s891_s2] ss:$0 sm:$0xff] (!%p629_p11) }
  0x2d   : > { %667 = vmatpush3.bf16.msra.mxu0 %v726_v6 }
  0x2e   : > { %668 = vmatprep.subr.bf16.mxu0 %v727_v7 }
  0x31   : > { %669 = vmatpush3.bf16.msra.mxu0 %v727_v7 }
  0x32   : > { %670 = vmatprep.subr.bf16.mxu0 %v728_v8 }
  0x35   : > { %671 = vmatpush3.bf16.msra.mxu0 %v728_v8 }
  0x36   : > { %672 = vmatprep.subr.bf16.mxu0 %v729_v10 }
  0x39   : > { %673 = vmatpush3.bf16.msra.mxu0 %v729_v10 }
  0x3a   : > { %674 = vmatprep.subr.bf16.mxu0 %v730_v11 }
  0x3d   : > { %675 = vmatpush3.bf16.msra.mxu0 %v730_v11 }
  0x3e   : > { %676 = vmatprep.subr.bf16.mxu0 %v731_v12 }
  0x41   : > { %677 = vmatpush3.bf16.msra.mxu0 %v731_v12 }
  0x42   : > { %678 = vmatprep.subr.bf16.mxu0 %v732_v13 }
  0x45   : > { %679 = vmatpush3.bf16.msra.mxu0 %v732_v13 }
  0x48   : > { %681 = vmatmul.mubr.bf16.vlgmr.msra.gmra.mrb[0].mxu0 %v734_v14 }
 0x11b   : > { %v682_v17 = vpop.f32.mrb[0].mxu0  ;;  %458 = sbr.rel (%p629_p11) target bundleno = 304 (0x130), region = 81 }
 0x11c   : > { %v449_v19 = vadd.f32 %v682_v17, %v316_v15  ;;  %v432_v20 = vpop.f32.mrb[1].mxu0 }
 0x11d   : > { %v447_v22 = vadd.f32 %v432_v20, %v314_v16  ;;  %v683_v23 = vpop.f32.mrb[2].mxu0 }
 0x11e   : > { %453 = vst [vmem:[#allocation2 + $0x10] sm:$0xff] %v449_v19  ;;  %v450_v24 = vadd.f32 %v683_v23, %v317_v18  ;;  %v435_v25 = vpop.f32.mrb[3].mxu0 }
 0x11f   : > { %451 = vst [vmem:[#allocation2] sm:$0xff] %v447_v22  ;;  %v448_v26 = vadd.f32 %v435_v25, %v315_v21 }
 0x120   : > { %454 = vst [vmem:[#allocation2 + $0x18] sm:$0xff] %v450_v24 }
 0x121   : > { %452 = vst [vmem:[#allocation2 + $0x8] sm:$0xff] %v448_v26 }
 0x125   : > { %v461_v32 = vld [vmem:[#allocation2 + $0x10] sm:$0xff] }
 0x126   : > { %v459_v27 = vld [vmem:[#allocation2] sm:$0xff]  ;;  %v472_v34 = vadd.f32 %v630_v29, %v461_v32 }
 0x127   : > { %v470_v30 = vadd.f32 %v630_v29, %v459_v27  ;;  %v462_v33 = vld [vmem:[#allocation2 + $0x18] sm:$0xff] }
 0x128   : > { %v460_v28 = vld [vmem:[#allocation2 + $0x8] sm:$0xff]  ;;  %v473_v35 = vadd.f32 %v630_v29, %v462_v33  ;;  %v476_v38 = vmax.f32 %v472_v34, 0.0 }
 0x129   : > { %v471_v31 = vadd.f32 %v630_v29, %v460_v28  ;;  %v474_v36 = vmax.f32 %v470_v30, 0.0 }
 0x12a   : > { %v477_v39 = vmax.f32 %v473_v35, 0.0 }
 0x12b   : > { %v475_v37 = vmax.f32 %v471_v31, 0.0 }
 0x12c   : > { %v651_v41 = vpack.c.bf16 %v477_v39, %v476_v38 }
 0x12d   : > { %v646_v40 = vpack.c.bf16 %v475_v37, %v474_v36 }
 0x12e   : > { %653 = vst [vmem:[%s892_s3 + $0x8] sm:$0xff] %v651_v41  }
 0x12f   : > { %647 = vst [vmem:[%s892_s3] sm:$0xff] %v646_v40  }
 0x130 PF: > { %s13_s16 = sadd.s32 1, %s773_s16   ;;  %s893_s12 = smov %s761_s13 }
 0x131   : > { %p10_p12 = scmp.ge.s32.totalorder %s13_s16, 11   ;;  %s894_s13 = smov %s831_s20 }
 0x132   : > { %s895_s14 = smov %s769_s15  ;;  %s896_s15 = smov %s898_s17 }
 0x133   :  { %12 = sbr.rel (!%p10_p12) target bundleno = 3 (0x3), region = 122 }

// kernel: ingredient_net_forward.52
= control target key start
LH: loop header
LB: loop body
LE: loop exit
PB: predicated region body
PF: predicated region fallthrough
CT: control target
= control target key end

     0   :  { %s901_s15 = smov 0   ;;  %s903_s16 = smov 0   ;;  %s1000_s0 = inlined_call_operand.vmem [shape: bf16[32,1152], index: 0, kind: input, shape index: {}]   ;;  %s1001_s1 = inlined_call_operand.vmem [shape: bf16[1152,128], index: 1, kind: input, shape index: {}]   ;;  %s1002_s2 = inlined_call_operand.vmem [shape: f32[1,128], index: 2, kind: input, shape index: {}]   ;;  %s1003_s3 = inlined_call_operand.vmem [shape: bf16[32,128], index: 3, kind: input, shape index: {}]   ;;  %s1004_s4 = inlined_call_operand.vmem [shape: bf16[32,128], index: 4, kind: output, shape index: {}]  }
   0x1   :  { %s905_s17 = smov 0   ;;  %s907_s18 = smov 0  }
   0x2   :  { %s909_s19 = smov 0  }
   0x3 LB: > { %s26_s20 = sadd.s32 1, %s869_s18  ;;  %p49_p1 = scmp.ne.s32.totalorder %s861_s16, %s857_s15  ;;  %s873_s19 = sphi %s909_s19, %s14_s19   ;;  %s869_s18 = sphi %s907_s18, %s1008_s18   ;;  %s865_s17 = sphi %s905_s17, %s1007_s17   ;;  %s861_s16 = sphi %s903_s16, %s1006_s16   ;;  %s857_s15 = sphi %s901_s15, %s1005_s15  }
   0x4   : > { %p27_p0 = scmp.ge.s32.totalorder %s26_s20, 9  ;;  %p50_p2 = scmp.eq.s32.totalorder %s873_s19, 0 }
   0x5   : > { %s42_s22 = sadd.s32 1, %s861_s16  ;;  %p702_p5 = scmp.ge.s32.totalorder %s873_s19, 9 }
   0x6   : > { %s1010_s20 = smov (%p27_p0, %s26_s20), 0  ;;  %p51_p3 = por %p50_p2, %p49_p1 }
   0x7   : > { %s38_s21 = ssub.s32 %s869_s18, %s1010_s20  ;;  %203 = sbr.rel (%p702_p5) target bundleno = 21 (0x15), region = 24 }
   0x8   : > { %p40_p4 = scmp.eq.s32.totalorder %s38_s21, 0 }
   0xa   : > { %s936_s23 = scalar_select %p40_p4, %s861_s16, %s42_s22  }
   0xe   : > { %206 = sbr.rel (!%p51_p3) target bundleno = 21 (0x15), region = 28  ;;  %s208_s24 = sand.u32 (%p51_p3), 1, %s861_s16  }
   0xf   : > { %s704_s25 = sshll.u32 (%p51_p3), %s869_s18, 2  ;;  %s703_s26 = sshll.u32 (%p51_p3), %s208_s24, 4 }
  0x10   : > { %s215_s29 = scalar_lea.vmem (%p51_p3), %s1000_s0, %s704_s25  ;;  %s210_s30 = scalar_lea.vmem (%p51_p3), [#allocation3], %s703_s26 }
  0x11   : > { %v231_v0 = vld [vmem:[%s215_s29] sm:$0xf] (%p51_p3)  ;;  %v233_v1 = vld [vmem:[%s215_s29 + $0x24] sm:$0xf] (%p51_p3)  ;;  %v235_v2 = vld [vmem:[%s215_s29 + $0x48] sm:$0xf] (%p51_p3) }
  0x12   : > { %232 = vst [vmem:[%s210_s30] sm:$0xf] (%p51_p3), %v231_v0  ;;  %234 = vst [vmem:[%s210_s30 + $0x4] sm:$0xf] (%p51_p3), %v233_v1  ;;  %v237_v3 = vld [vmem:[%s215_s29 + $0x6c] sm:$0xf] (%p51_p3) }
  0x13   : > { %236 = vst [vmem:[%s210_s30 + $0x8] sm:$0xf] (%p51_p3), %v235_v2  ;;  %238 = vst [vmem:[%s210_s30 + $0xc] sm:$0xf] (%p51_p3), %v237_v3 }
  0x15 PF: > { %p705_p6 = scmp.ge.s32.totalorder %s873_s19, 1  ;;  %p280_p7 = scmp.lt.s32.totalorder %s873_s19, 10 }
  0x17   : > { %p281_p8 = pnand %p705_p6, %p280_p7 }
  0x18   : > { %s287_s5 = sand.u32 (!%p281_p8), 1, %s857_s15   ;;  %s707_s6 = sshll.u32 (!%p281_p8), %s865_s17, 4 }
  0x19   : > { %284 = sbr.rel (%p281_p8) target bundleno = 306 (0x132), region = 73  ;;  %s948_s7 = sshll.u32 (!%p281_p8), %s287_s5, 4 }
  0x1a   : > { %p336_p9 = scmp.lt.s32.totalorder (!%p281_p8), %s707_s6, 143  ;;  %s289_s12 = scalar_lea.vmem (!%p281_p8), [#allocation3], %s948_s7 }
  0x1b   : > { %p709_p10 = scmp.ne.s32.totalorder (!%p281_p8), %s865_s17, 0 }
  0x20   : > { %s1012_s6 = smov (!%p336_p9, %s707_s6), 143  ;;  %369 = sbr.rel (%p709_p10) target bundleno = 39 (0x27), region = 81 }
  0x21   : > { %s708_s8 = sshll.u32 %s1012_s6, 2  ;;  %v875_v4 = vmov (!%p709_p10), 0.0  }
  0x22   : > { %s953_s11 = scalar_lea.vmem %s1001_s1, %s708_s8  ;;  %370 = vst [vmem:[#allocation2] sm:$0xff] (!%p709_p10), %v875_v4  ;;  %371 = vst [vmem:[#allocation2 + $0x8] sm:$0xff] (!%p709_p10), %v875_v4 }
  0x23   : > { %372 = vst [vmem:[#allocation2 + $0x10] sm:$0xff] (!%p709_p10), %v875_v4  ;;  %373 = vst [vmem:[#allocation2 + $0x18] sm:$0xff] (!%p709_p10), %v875_v4 }
  0x27 PF: > { %v825_v5 = vld [vmem:[%s953_s11] sm:$0xff]   ;;  %v826_v6 = vld [vmem:[%s953_s11 + $0x8] sm:$0xff]   ;;  %v827_v7 = vld [vmem:[%s953_s11 + $0x10] sm:$0xff]   ;;  %p720_p11 = scmp.ne.s32.totalorder %s865_s17, 8 }
  0x28   : > { %764 = vmatprep.subr.bf16.mxu0 %v825_v5  ;;  %v828_v8 = vld [vmem:[%s953_s11 + $0x18] sm:$0xff]   ;;  %v833_v9 = vld [vmem:[%s289_s12] sm:$0xff]   ;;  %v830_v11 = vld [vmem:[%s953_s11 + $0x28] sm:$0xff]  }
  0x29   : > { %765 = vmatpush3.bf16.msra.mxu0 %v825_v5  ;;  %780 = vmatprep.mubr.bf16.mxu0 %v833_v9  ;;  %v829_v10 = vld [vmem:[%s953_s11 + $0x20] sm:$0xff]   ;;  %v831_v12 = vld [vmem:[%s953_s11 + $0x30] sm:$0xff]   ;;  %v832_v13 = vld [vmem:[%s953_s11 + $0x38] sm:$0xff]  }
  0x2a   : > { %766 = vmatprep.subr.bf16.mxu0 %v826_v6  ;;  %v834_v14 = vld [vmem:[%s289_s12 + $0x8] sm:$0xff]   ;;  %v376_v15 = vld [vmem:[#allocation2 + $0x10] sm:$0xff]  ;;  %v374_v16 = vld [vmem:[#allocation2] sm:$0xff] }
  0x2b   : > { %v377_v18 = vld [vmem:[#allocation2 + $0x18] sm:$0xff]  ;;  %v375_v21 = vld [vmem:[#allocation2 + $0x8] sm:$0xff]  ;;  %v721_v29 = vld [vmem:[%s1002_s2] ss:$0 sm:$0xff] (!%p720_p11) }
  0x2c   : > { %v735_v32 = vld [vmem:[%s1003_s3] sm:$0xff] (!%p720_p11)   ;;  %v752_v39 = vld [vmem:[%s1003_s3 + $0x8] sm:$0xff] (!%p720_p11)  }
  0x2d   : > { %767 = vmatpush3.bf16.msra.mxu0 %v826_v6  ;;  %v736_v35 = vunpack.c.l.bf16 (!%p720_p11), %v735_v32  ;;  %v737_v36 = vunpack.c.h.bf16 (!%p720_p11), %v735_v32  ;;  %v740_v40 = vunpack.c.l.bf16 (!%p720_p11), %v752_v39  ;;  %v741_v41 = vunpack.c.h.bf16 (!%p720_p11), %v752_v39 }
  0x2e   : > { %768 = vmatprep.subr.bf16.mxu0 %v827_v7 }
  0x31   : > { %769 = vmatpush3.bf16.msra.mxu0 %v827_v7 }
  0x32   : > { %770 = vmatprep.subr.bf16.mxu0 %v828_v8 }
  0x35   : > { %771 = vmatpush3.bf16.msra.mxu0 %v828_v8 }
  0x36   : > { %772 = vmatprep.subr.bf16.mxu0 %v829_v10 }
  0x39   : > { %773 = vmatpush3.bf16.msra.mxu0 %v829_v10 }
  0x3a   : > { %774 = vmatprep.subr.bf16.mxu0 %v830_v11 }
  0x3d   : > { %775 = vmatpush3.bf16.msra.mxu0 %v830_v11 }
  0x3e   : > { %776 = vmatprep.subr.bf16.mxu0 %v831_v12 }
  0x41   : > { %777 = vmatpush3.bf16.msra.mxu0 %v831_v12 }
  0x42   : > { %778 = vmatprep.subr.bf16.mxu0 %v832_v13 }
  0x45   : > { %779 = vmatpush3.bf16.msra.mxu0 %v832_v13 }
  0x48   : > { %781 = vmatmul.mubr.bf16.vlgmr.msra.gmra.mrb[0].mxu0 %v834_v14 }
 0x11b   : > { %v782_v17 = vpop.f32.mrb[0].mxu0  ;;  %518 = sbr.rel (%p720_p11) target bundleno = 306 (0x132), region = 85 }
 0x11c   : > { %v509_v19 = vadd.f32 %v782_v17, %v376_v15  ;;  %v492_v20 = vpop.f32.mrb[1].mxu0 }
 0x11d   : > { %v507_v22 = vadd.f32 %v492_v20, %v374_v16  ;;  %v783_v23 = vpop.f32.mrb[2].mxu0 }
 0x11e   : > { %513 = vst [vmem:[#allocation2 + $0x10] sm:$0xff] %v509_v19  ;;  %v510_v24 = vadd.f32 %v783_v23, %v377_v18  ;;  %v495_v25 = vpop.f32.mrb[3].mxu0 }
 0x11f   : > { %511 = vst [vmem:[#allocation2] sm:$0xff] %v507_v22  ;;  %v508_v26 = vadd.f32 %v495_v25, %v375_v21 }
 0x120   : > { %514 = vst [vmem:[#allocation2 + $0x18] sm:$0xff] %v510_v24 }
 0x121   : > { %512 = vst [vmem:[#allocation2 + $0x8] sm:$0xff] %v508_v26 }
 0x125   : > { %v521_v33 = vld [vmem:[#allocation2 + $0x10] sm:$0xff] }
 0x126   : > { %v519_v27 = vld [vmem:[#allocation2] sm:$0xff]  ;;  %v532_v37 = vadd.f32 %v721_v29, %v521_v33 }
 0x127   : > { %v530_v30 = vadd.f32 %v721_v29, %v519_v27  ;;  %v522_v34 = vld [vmem:[#allocation2 + $0x18] sm:$0xff] }
 0x128   : > { %v520_v28 = vld [vmem:[#allocation2 + $0x8] sm:$0xff]  ;;  %v533_v38 = vadd.f32 %v721_v29, %v522_v34  ;;  %v544_v44 = vadd.f32 %v740_v40, %v532_v37 }
 0x129   : > { %v531_v31 = vadd.f32 %v721_v29, %v520_v28  ;;  %v542_v42 = vadd.f32 %v736_v35, %v530_v30 }
 0x12a   : > { %v545_v45 = vadd.f32 %v741_v41, %v533_v38  ;;  %v548_v48 = vmax.f32 %v544_v44, 0.0 }
 0x12b   : > { %v543_v43 = vadd.f32 %v737_v36, %v531_v31  ;;  %v546_v46 = vmax.f32 %v542_v42, 0.0 }
 0x12c   : > { %v549_v49 = vmax.f32 %v545_v45, 0.0 }
 0x12d   : > { %v547_v47 = vmax.f32 %v543_v43, 0.0 }
 0x12e   : > { %v750_v51 = vpack.c.bf16 %v549_v49, %v548_v48 }
 0x12f   : > { %v745_v50 = vpack.c.bf16 %v547_v47, %v546_v46 }
 0x130   : > { %753 = vst [vmem:[%s1004_s4 + $0x8] sm:$0xff] %v750_v51  }
 0x131   : > { %746 = vst [vmem:[%s1004_s4] sm:$0xff] %v745_v50  }
 0x132 PF: > { %s14_s19 = sadd.s32 1, %s873_s19   ;;  %s1005_s15 = smov %s861_s16 }
 0x133   : > { %p11_p12 = scmp.ge.s32.totalorder %s14_s19, 11   ;;  %s1006_s16 = smov %s936_s23 }
 0x134   : > { %s1007_s17 = smov %s869_s18  ;;  %s1008_s18 = smov %s1010_s20 }
 0x135   :  { %13 = sbr.rel (!%p11_p12) target bundleno = 3 (0x3), region = 129 }

// kernel: ingredient_net_forward.50
= control target key start
LH: loop header
LB: loop body
LE: loop exit
PB: predicated region body
PF: predicated region fallthrough
CT: control target
= control target key end

     0   :  { %vm73_vm0 = vcmask 523264   ;;  %s278_s1 = inlined_call_operand.vmem [shape: bf16[64,128], index: 1, kind: input, shape index: {}]   ;;  %s279_s0 = inlined_call_operand.vmem [shape: bf16[32,64], index: 0, kind: input, shape index: {}]   ;;  %s280_s2 = inlined_call_operand.vmem [shape: f32[1,128], index: 2, kind: input, shape index: {}]   ;;  %s281_s3 = inlined_call_operand.vmem [shape: bf16[32,128], index: 3, kind: output, shape index: {}]  }
   0x1   :  { %v225_v0 = vld [vmem:[%s278_s1] sm:$0xff]   ;;  %v226_v1 = vld [vmem:[%s278_s1 + $0x8] sm:$0xff]   ;;  %v227_v2 = vld [vmem:[%s278_s1 + $0x10] sm:$0xff]  }
   0x2   :  { %213 = vmatprep.subr.bf16.mxu0 %v225_v0  ;;  %v229_v3 = vld [vmem:[%s279_s0] sm:$0xff]   ;;  %v228_v4 = vld [vmem:[%s278_s1 + $0x18] sm:$0xff]   ;;  %v230_v5 = vld [vmem:[%s279_s0 + $0x8] sm:$0xff]  }
   0x3   :  { %214 = vmatpush3.bf16.msra.mxu0 %v225_v0  ;;  %221 = vmatprep.mubr.msk.bf16.mxu0 %vm73_vm0, %v229_v3  ;;  %v187_v7 = vld [vmem:[%s280_s2] ss:$0 sm:$0xff] }
   0x4   :  { %215 = vmatprep.subr.bf16.mxu0 %v226_v1 }
   0x7   :  { %216 = vmatpush3.bf16.msra.mxu0 %v226_v1 }
   0x8   :  { %217 = vmatprep.subr.bf16.mxu0 %v227_v2 }
   0xb   :  { %218 = vmatpush3.bf16.msra.mxu0 %v227_v2 }
   0xc   :  { %219 = vmatprep.subr.bf16.mxu0 %v228_v4 }
   0xf   :  { %220 = vmatpush3.bf16.msra.mxu0 %v228_v4 }
  0x12   :  { %222 = vmatmul.mubr.msk.bf16.vlgmr.msra.gmra.mrb[0].mxu0 %vm73_vm0, %v230_v5 }
  0xe5   :  { %v223_v6 = vpop.f32.mrb[0].mxu0 }
  0xe6   :  { %v114_v8 = vpop.f32.mrb[1].mxu0  ;;  %v153_v10 = vadd.f32 %v223_v6, %v187_v7 }
  0xe7   :  { %v224_v9 = vpop.f32.mrb[2].mxu0  ;;  %v151_v13 = vadd.f32 %v187_v7, %v114_v8 }
  0xe8   :  { %v154_v11 = vadd.f32 %v224_v9, %v187_v7  ;;  %v117_v12 = vpop.f32.mrb[3].mxu0 }
  0xe9   :  { %v152_v14 = vadd.f32 %v187_v7, %v117_v12 }
  0xea   :  { %v204_v15 = vpack.c.bf16 %v154_v11, %v153_v10 }
  0xeb   :  { %v199_v16 = vpack.c.bf16 %v152_v14, %v151_v13 }
  0xec   :  { %206 = vst [vmem:[%s281_s3 + $0x8] sm:$0xff] %v204_v15  }
  0xed   :  { %200 = vst [vmem:[%s281_s3] sm:$0xff] %v199_v16  }

// kernel: ingredient_net_forward.56
= control target key start
LH: loop header
LB: loop body
LE: loop exit
PB: predicated region body
PF: predicated region fallthrough
CT: control target
= control target key end

     0   :  { %s701_s12 = smov 0   ;;  %s703_s13 = smov 0   ;;  %s768_s0 = inlined_call_operand.vmem [shape: bf16[8,1152], index: 0, kind: input, shape index: {}]   ;;  %s769_s1 = inlined_call_operand.vmem [shape: bf16[1152,256], index: 1, kind: input, shape index: {}]   ;;  %s770_s2 = inlined_call_operand.vmem [shape: f32[1,256], index: 2, kind: input, shape index: {}]   ;;  %s771_s3 = inlined_call_operand.vmem [shape: bf16[8,256], index: 3, kind: output, shape index: {}]  }
   0x1   :  { %s705_s14 = smov 0  }
   0x2 LB: > { %s25_s15 = sadd.s32 1, %s673_s13  ;;  %p575_p0 = scmp.ge.s32.totalorder %s677_s14, 1  ;;  %s677_s14 = sphi %s705_s14, %s13_s14   ;;  %s673_s13 = sphi %s703_s13, %s773_s13   ;;  %s669_s12 = sphi %s701_s12, %s772_s12  }
   0x3   : > { %p26_p1 = scmp.ge.s32.totalorder %s25_s15, 9  ;;  %p192_p2 = scmp.lt.s32.totalorder %s677_s14, 10 }
   0x5   : > { %s775_s15 = smov (%p26_p1, %s25_s15), 0  ;;  %p193_p3 = pnand %p575_p0, %p192_p2 }
   0x6   : > { %p239_p4 = scmp.lt.s32.totalorder (!%p193_p3), %s669_s12, 8  ;;  %s577_s16 = sshll.u32 (!%p193_p3), %s669_s12, 4 }
   0x7   : > { %196 = sbr.rel (%p193_p3) target bundleno = 285 (0x11d), region = 32  ;;  %p247_p5 = scmp.lt.s32.totalorder (!%p193_p3), %s577_s16, 143 }
   0x8   : > { %p580_p6 = scmp.ne.s32.totalorder (!%p193_p3), %s669_s12, 0 }
   0xe   : > { %s240_s17 = scalar_select %p239_p4, %s669_s12, 8 }
   0xf   : > { %s777_s16 = smov (!%p247_p5, %s577_s16), 143  ;;  %276 = sbr.rel (%p580_p6) target bundleno = 22 (0x16), region = 36 }
  0x10   : > { %s576_s18 = sshll.u32 %s240_s17, 2  ;;  %s603_s22 = sshll.u32 %s777_s16, 3  ;;  %v679_v0 = vmov (!%p580_p6), 0.0  }
  0x11   : > { %s727_s21 = scalar_lea.vmem %s768_s0, %s576_s18  ;;  %s732_s25 = scalar_lea.vmem %s769_s1, %s603_s22  ;;  %277 = vst [vmem:[#allocation2] sm:$0xff] (!%p580_p6), %v679_v0  ;;  %278 = vst [vmem:[#allocation2 + $0x8] sm:$0xff] (!%p580_p6), %v679_v0 }
  0x16 PF: > { %v631_v1 = vld [vmem:[%s732_s25 + $0x4] ss:$8 sps:$4 sm:$0xff]   ;;  %v633_v2 = vld [vmem:[%s732_s25] ss:$8 sps:$4 sm:$0xff]   ;;  %v680_v3 = vmov 0   ;;  %p597_p7 = scmp.ne.s32.totalorder %s669_s12, 8 }
  0x17   : > { %410 = vmatprep.mubr.bf16.mxu0 %v680_v3  ;;  %378 = vmatprep.subr.bf16.mxu0 %v631_v1  ;;  %v634_v4 = vld [vmem:[%s732_s25 + $0x14] ss:$8 sps:$4 sm:$0xff]   ;;  %v636_v5 = vld [vmem:[%s732_s25 + $0x10] ss:$8 sps:$4 sm:$0xff]   ;;  %v637_v6 = vld [vmem:[%s732_s25 + $0x24] ss:$8 sps:$4 sm:$0xff]   ;;  %v431_v27 = vlaneseq (!%p597_p7) }
  0x18   : > { %379 = vmatpush1.bf16.msra.mxu0 %v633_v2  ;;  %v639_v7 = vld [vmem:[%s732_s25 + $0x20] ss:$8 sps:$4 sm:$0xff]   ;;  %v640_v8 = vld [vmem:[%s732_s25 + $0x34] ss:$8 sps:$4 sm:$0xff]   ;;  %v642_v9 = vld [vmem:[%s732_s25 + $0x30] ss:$8 sps:$4 sm:$0xff]  }
  0x19   : > { %380 = vmatprep.subr.bf16.mxu0 %v634_v4  ;;  %v643_v10 = vld [vmem:[%s732_s25 + $0x44] ss:$8 sps:$4 sm:$0xff]   ;;  %v645_v11 = vld [vmem:[%s732_s25 + $0x40] ss:$8 sps:$4 sm:$0xff]   ;;  %v646_v12 = vld [vmem:[%s732_s25 + $0x54] ss:$8 sps:$4 sm:$0xff]  }
  0x1a   : > { %v648_v13 = vld [vmem:[%s732_s25 + $0x50] ss:$8 sps:$4 sm:$0xff]   ;;  %v649_v14 = vld [vmem:[%s732_s25 + $0x64] ss:$8 sps:$4 sm:$0xff]   ;;  %v651_v15 = vld [vmem:[%s732_s25 + $0x60] ss:$8 sps:$4 sm:$0xff]  }
  0x1b   : > { %v652_v16 = vld [vmem:[%s732_s25 + $0x74] ss:$8 sps:$4 sm:$0xff]   ;;  %v654_v17 = vld [vmem:[%s732_s25 + $0x70] ss:$8 sps:$4 sm:$0xff]   ;;  %v281_v18 = vld [vmem:[%s727_s21] sm:$0xf] }
  0x1c   : > { %381 = vmatpush1.bf16.msra.mxu0 %v636_v5  ;;  %v279_v19 = vld [vmem:[#allocation2] sm:$0xff]  ;;  %v280_v20 = vld [vmem:[#allocation2 + $0x8] sm:$0xff]  ;;  %v432_v28 = vshrl.u32 (!%p597_p7), %v431_v27, 7 }
  0x1d   : > { %382 = vmatprep.subr.bf16.mxu0 %v637_v6  ;;  %v429_v29 = vld [vmem:[%s770_s2] sm:$0x3] (!%p597_p7) }
  0x1e   : > { %v433_v30 = vsub.s32 (!%p597_p7), 0, %v432_v28  ;;  %v437_v31 = vsub.s32 (!%p597_p7), 1, %v432_v28 }
  0x20   : > { %383 = vmatpush1.bf16.msra.mxu0 %v639_v7  ;;  %v434_v34 = vrot.slane (!%p597_p7), %v429_v29, %v433_v30  ;;  %v438_v35 = vrot.slane (!%p597_p7), %v429_v29, %v437_v31 }
  0x21   : > { %384 = vmatprep.subr.bf16.mxu0 %v640_v8 }
  0x24   : > { %385 = vmatpush1.bf16.msra.mxu0 %v642_v9 }
  0x25   : > { %386 = vmatprep.subr.bf16.mxu0 %v643_v10 }
  0x28   : > { %387 = vmatpush1.bf16.msra.mxu0 %v645_v11 }
  0x29   : > { %388 = vmatprep.subr.bf16.mxu0 %v646_v12 }
  0x2c   : > { %389 = vmatpush1.bf16.msra.mxu0 %v648_v13 }
  0x2d   : > { %390 = vmatprep.subr.bf16.mxu0 %v649_v14 }
  0x30   : > { %391 = vmatpush1.bf16.msra.mxu0 %v651_v15 }
  0x31   : > { %392 = vmatprep.subr.bf16.mxu0 %v652_v16 }
  0x34   : > { %393 = vmatpush1.bf16.msra.mxu0 %v654_v17 }
  0x37   : > { %411 = vmatmul.mubr.bf16.vlgmr.msra.gmra.mrb[0].mxu0 %v281_v18 }
 0x108   : > { %426 = sbr.rel (%p597_p7) target bundleno = 285 (0x11d), region = 40 }
 0x10a   : > { %v412_v21 = vpop.f32.mrb[0].mxu0 }
 0x10b   : > { %v419_v22 = vadd.f32 %v412_v21, %v279_v19  ;;  %v414_v23 = vpop.f32.mrb[1].mxu0 }
 0x10c   : > { %v420_v24 = vadd.f32 %v414_v23, %v280_v20  ;;  %v416_v25 = vpop.f32.mrb[2].mxu0 }
 0x10d   : > { %421 = vst [vmem:[#allocation2] sm:$0xff] %v419_v22  ;;  %v417_v26 = vpop.f32.mrb[3].mxu0 }
 0x10e   : > { %422 = vst [vmem:[#allocation2 + $0x8] sm:$0xff] %v420_v24 }
 0x114   : > { %v427_v32 = vld [vmem:[#allocation2] sm:$0xff] }
 0x115   : > { %v428_v33 = vld [vmem:[#allocation2 + $0x8] sm:$0xff]  ;;  %v441_v36 = vadd.f32 %v434_v34, %v427_v32 }
 0x116   : > { %v442_v37 = vadd.f32 %v438_v35, %v428_v33 }
 0x117   : > { %v443_v38 = vmax.f32 %v441_v36, 0.0 }
 0x118   : > { %v444_v39 = vmax.f32 %v442_v37, 0.0 }
 0x11a   : > { %v604_v40 = vpack.c.bf16 %v444_v39, %v443_v38 }
 0x11c   : > { %453 = vst [vmem:[%s771_s3] sm:$0xff] %v604_v40 }
 0x11d PF: > { %s13_s14 = sadd.s32 1, %s677_s14   ;;  %s772_s12 = smov %s673_s13 }
 0x11e   : > { %p10_p8 = scmp.ge.s32.totalorder %s13_s14, 11   ;;  %s773_s13 = smov %s775_s15 }
 0x120   :  { %12 = sbr.rel (!%p10_p8) target bundleno = 2 (0x2), region = 76 }

// kernel: ingredient_net_forward.55
= control target key start
LH: loop header
LB: loop body
LE: loop exit
PB: predicated region body
PF: predicated region fallthrough
CT: control target
= control target key end

     0   :  { %v240_v1 = vmov 0   ;;  %v172_v18 = vlaneseq  ;;  %s318_s1 = inlined_call_operand.vmem [shape: bf16[128,256], index: 1, kind: input, shape index: {}]   ;;  %s319_s0 = inlined_call_operand.vmem [shape: bf16[8,128], index: 0, kind: input, shape index: {}]   ;;  %s320_s2 = inlined_call_operand.vmem [shape: f32[1,256], index: 2, kind: input, shape index: {}]   ;;  %s321_s3 = inlined_call_operand.vmem [shape: bf16[8,256], index: 3, kind: output, shape index: {}]  }
   0x1   :  { %v216_v0 = vld [vmem:[%s318_s1 + $0x4] ss:$8 sps:$4 sm:$0xff]   ;;  %152 = vmatprep.mubr.bf16.mxu0 %v240_v1  ;;  %v218_v2 = vld [vmem:[%s318_s1] ss:$8 sps:$4 sm:$0xff]   ;;  %v219_v3 = vld [vmem:[%s318_s1 + $0x14] ss:$8 sps:$4 sm:$0xff]  }
   0x2   :  { %120 = vmatprep.subr.bf16.mxu0 %v216_v0  ;;  %v221_v4 = vld [vmem:[%s318_s1 + $0x10] ss:$8 sps:$4 sm:$0xff]   ;;  %v222_v5 = vld [vmem:[%s318_s1 + $0x24] ss:$8 sps:$4 sm:$0xff]   ;;  %v224_v6 = vld [vmem:[%s318_s1 + $0x20] ss:$8 sps:$4 sm:$0xff]  }
   0x3   :  { %121 = vmatpush1.bf16.msra.mxu0 %v218_v2  ;;  %v225_v7 = vld [vmem:[%s318_s1 + $0x34] ss:$8 sps:$4 sm:$0xff]   ;;  %v227_v8 = vld [vmem:[%s318_s1 + $0x30] ss:$8 sps:$4 sm:$0xff]   ;;  %v228_v9 = vld [vmem:[%s318_s1 + $0x44] ss:$8 sps:$4 sm:$0xff]  }
   0x4   :  { %122 = vmatprep.subr.bf16.mxu0 %v219_v3  ;;  %v230_v10 = vld [vmem:[%s318_s1 + $0x40] ss:$8 sps:$4 sm:$0xff]   ;;  %v231_v11 = vld [vmem:[%s318_s1 + $0x54] ss:$8 sps:$4 sm:$0xff]   ;;  %v233_v12 = vld [vmem:[%s318_s1 + $0x50] ss:$8 sps:$4 sm:$0xff]  }
   0x5   :  { %v234_v13 = vld [vmem:[%s318_s1 + $0x64] ss:$8 sps:$4 sm:$0xff]   ;;  %v236_v14 = vld [vmem:[%s318_s1 + $0x60] ss:$8 sps:$4 sm:$0xff]   ;;  %v237_v15 = vld [vmem:[%s318_s1 + $0x74] ss:$8 sps:$4 sm:$0xff]  }
   0x6   :  { %v239_v16 = vld [vmem:[%s318_s1 + $0x70] ss:$8 sps:$4 sm:$0xff]   ;;  %v23_v17 = vld [vmem:[%s319_s0] sm:$0xf]  ;;  %v173_v19 = vshrl.u32 %v172_v18, 7 }
   0x7   :  { %123 = vmatpush1.bf16.msra.mxu0 %v221_v4  ;;  %v170_v21 = vld [vmem:[%s320_s2] sm:$0x3] }
   0x8   :  { %124 = vmatprep.subr.bf16.mxu0 %v222_v5  ;;  %v174_v20 = vsub.s32 0, %v173_v19  ;;  %v178_v22 = vsub.s32 1, %v173_v19 }
   0xa   :  { %v175_v23 = vrot.slane %v170_v21, %v174_v20  ;;  %v179_v24 = vrot.slane %v170_v21, %v178_v22 }
   0xb   :  { %125 = vmatpush1.bf16.msra.mxu0 %v224_v6 }
   0xc   :  { %126 = vmatprep.subr.bf16.mxu0 %v225_v7 }
   0xf   :  { %127 = vmatpush1.bf16.msra.mxu0 %v227_v8 }
  0x10   :  { %128 = vmatprep.subr.bf16.mxu0 %v228_v9 }
  0x13   :  { %129 = vmatpush1.bf16.msra.mxu0 %v230_v10 }
  0x14   :  { %130 = vmatprep.subr.bf16.mxu0 %v231_v11 }
  0x17   :  { %131 = vmatpush1.bf16.msra.mxu0 %v233_v12 }
  0x18   :  { %132 = vmatprep.subr.bf16.mxu0 %v234_v13 }
  0x1b   :  { %133 = vmatpush1.bf16.msra.mxu0 %v236_v14 }
  0x1c   :  { %134 = vmatprep.subr.bf16.mxu0 %v237_v15 }
  0x1f   :  { %135 = vmatpush1.bf16.msra.mxu0 %v239_v16 }
  0x22   :  { %153 = vmatmul.mubr.bf16.vlgmr.msra.gmra.mrb[0].mxu0 %v23_v17 }
  0xf5   :  { %v154_v25 = vpop.f32.mrb[0].mxu0 }
  0xf6   :  { %v182_v26 = vadd.f32 %v175_v23, %v154_v25  ;;  %v156_v27 = vpop.f32.mrb[1].mxu0 }
  0xf7   :  { %v183_v28 = vadd.f32 %v179_v24, %v156_v27  ;;  %v158_v29 = vpop.f32.mrb[2].mxu0 }
  0xf8   :  { %v159_v30 = vpop.f32.mrb[3].mxu0 }
  0xf9   :  { %v214_v31 = vpack.c.bf16 %v183_v28, %v182_v26 }
  0xfb   :  { %192 = vst [vmem:[%s321_s3] sm:$0xff] %v214_v31 }

// kernel: ingredient_net_forward.57
= control target key start
LH: loop header
LB: loop body
LE: loop exit
PB: predicated region body
PF: predicated region fallthrough
CT: control target
= control target key end

     0   :  { %s946_s15 = smov 0   ;;  %s948_s16 = smov 0   ;;  %s1031_s0 = inlined_call_operand.vmem [shape: bf16[8,2304], index: 0, kind: input, shape index: {}]   ;;  %s1032_s1 = inlined_call_operand.vmem [shape: bf16[2304,256], index: 1, kind: input, shape index: {}]   ;;  %s1033_s2 = inlined_call_operand.vmem [shape: f32[1,256], index: 2, kind: input, shape index: {}]   ;;  %s1034_s3 = inlined_call_operand.vmem [shape: bf16[8,256], index: 3, kind: input, shape index: {}]   ;;  %s1035_s4 = inlined_call_operand.vmem [shape: bf16[8,256], index: 4, kind: output, shape index: {}]  }
   0x1   :  { %s950_s17 = smov 0  }
   0x2 LB: > { %s26_s18 = sadd.s32 1, %s914_s16  ;;  %p772_p0 = scmp.ge.s32.totalorder %s918_s17, 1  ;;  %s918_s17 = sphi %s950_s17, %s14_s17   ;;  %s914_s16 = sphi %s948_s16, %s1037_s16   ;;  %s910_s15 = sphi %s946_s15, %s1036_s15  }
   0x3   : > { %p27_p1 = scmp.ge.s32.totalorder %s26_s18, 9  ;;  %p236_p2 = scmp.lt.s32.totalorder %s918_s17, 10 }
   0x5   : > { %s1039_s18 = smov (%p27_p1, %s26_s18), 0  ;;  %p237_p3 = pnand %p772_p0, %p236_p2 }
   0x6   : > { %s773_s19 = sshll.u32 (!%p237_p3), %s910_s15, 1  ;;  %s775_s20 = sshll.u32 (!%p237_p3), %s910_s15, 5 }
   0x7   : > { %240 = sbr.rel (%p237_p3) target bundleno = 321 (0x141), region = 36  ;;  %p296_p4 = scmp.lt.s32.totalorder (!%p237_p3), %s773_s19, 17 }
   0x8   : > { %p305_p5 = scmp.lt.s32.totalorder (!%p237_p3), %s775_s20, 287  ;;  %p778_p6 = scmp.ne.s32.totalorder (!%p237_p3), %s910_s15, 0 }
   0xe   : > { %s1041_s19 = smov (!%p296_p4, %s773_s19), 17  ;;  %s1043_s20 = smov (!%p305_p5, %s775_s20), 287 }
   0xf   : > { %s774_s21 = sshll.u32 %s1041_s19, 2  ;;  %s819_s25 = sshll.u32 %s1043_s20, 3  ;;  %v920_v0 = vmov (!%p778_p6), 0.0  }
  0x10   : > { %s971_s24 = scalar_lea.vmem %s1031_s0, %s774_s21  ;;  %s976_s28 = scalar_lea.vmem %s1032_s1, %s819_s25  ;;  %344 = vst [vmem:[#allocation2] sm:$0xff] (!%p778_p6), %v920_v0  ;;  %345 = vst [vmem:[#allocation2 + $0x8] sm:$0xff] (!%p778_p6), %v920_v0 }
  0x11   : > { %343 = sbr.rel (%p778_p6) target bundleno = 24 (0x18), region = 40 }
  0x18 PF: > { %v846_v1 = vld [vmem:[%s976_s28 + $0x4] ss:$8 sps:$4 sm:$0xff]   ;;  %v848_v2 = vld [vmem:[%s976_s28] ss:$8 sps:$4 sm:$0xff]   ;;  %v849_v3 = vld [vmem:[%s976_s28 + $0x14] ss:$8 sps:$4 sm:$0xff]  }
  0x19   : > { %548 = vmatprep.subr.bf16.mxu0 %v846_v1  ;;  %v851_v4 = vld [vmem:[%s976_s28 + $0x10] ss:$8 sps:$4 sm:$0xff]   ;;  %v852_v5 = vld [vmem:[%s976_s28 + $0x24] ss:$8 sps:$4 sm:$0xff]   ;;  %v854_v6 = vld [vmem:[%s976_s28 + $0x20] ss:$8 sps:$4 sm:$0xff]  }
  0x1a   : > { %549 = vmatpush1.bf16.msra.mxu0 %v848_v2  ;;  %v855_v7 = vld [vmem:[%s976_s28 + $0x34] ss:$8 sps:$4 sm:$0xff]   ;;  %v857_v8 = vld [vmem:[%s976_s28 + $0x30] ss:$8 sps:$4 sm:$0xff]   ;;  %v858_v9 = vld [vmem:[%s976_s28 + $0x44] ss:$8 sps:$4 sm:$0xff]  }
  0x1b   : > { %550 = vmatprep.subr.bf16.mxu0 %v849_v3  ;;  %v860_v10 = vld [vmem:[%s976_s28 + $0x40] ss:$8 sps:$4 sm:$0xff]   ;;  %v861_v11 = vld [vmem:[%s976_s28 + $0x54] ss:$8 sps:$4 sm:$0xff]   ;;  %v863_v12 = vld [vmem:[%s976_s28 + $0x50] ss:$8 sps:$4 sm:$0xff]  }
  0x1c   : > { %v864_v13 = vld [vmem:[%s976_s28 + $0x64] ss:$8 sps:$4 sm:$0xff]   ;;  %v866_v16 = vld [vmem:[%s976_s28 + $0x60] ss:$8 sps:$4 sm:$0xff]   ;;  %v867_v17 = vld [vmem:[%s976_s28 + $0x74] ss:$8 sps:$4 sm:$0xff]  }
  0x1d   : > { %v348_v14 = vld [vmem:[%s971_s24] sm:$0xff]  ;;  %v869_v18 = vld [vmem:[%s976_s28 + $0x70] ss:$8 sps:$4 sm:$0xff]   ;;  %v873_v21 = vld [vmem:[%s976_s28 + $0x94] ss:$8 sps:$4 sm:$0xff]   ;;  %p813_p7 = scmp.ne.s32.totalorder %s910_s15, 8 }
  0x1e   : > { %551 = vmatpush1.bf16.msra.mxu0 %v851_v4  ;;  %v780_v15 = vcombine.high %v348_v14, %v348_v14  ;;  %v870_v19 = vld [vmem:[%s976_s28 + $0x84] ss:$8 sps:$4 sm:$0xff]   ;;  %v872_v20 = vld [vmem:[%s976_s28 + $0x80] ss:$8 sps:$4 sm:$0xff]   ;;  %v875_v22 = vld [vmem:[%s976_s28 + $0x90] ss:$8 sps:$4 sm:$0xff]   ;;  %v779_v35 = vcombine.low %v348_v14, %v348_v14  ;;  %v601_v44 = vlaneseq (!%p813_p7) }
  0x1f   : > { %552 = vmatprep.subr.bf16.mxu0 %v852_v5  ;;  %v876_v23 = vld [vmem:[%s976_s28 + $0xa4] ss:$8 sps:$4 sm:$0xff]   ;;  %v878_v24 = vld [vmem:[%s976_s28 + $0xa0] ss:$8 sps:$4 sm:$0xff]   ;;  %v879_v25 = vld [vmem:[%s976_s28 + $0xb4] ss:$8 sps:$4 sm:$0xff]  }
  0x20   : > { %580 = vmatprep.mubr.bf16.mxu0 %v780_v15  ;;  %v881_v26 = vld [vmem:[%s976_s28 + $0xb0] ss:$8 sps:$4 sm:$0xff]   ;;  %v882_v27 = vld [vmem:[%s976_s28 + $0xc4] ss:$8 sps:$4 sm:$0xff]   ;;  %v884_v28 = vld [vmem:[%s976_s28 + $0xc0] ss:$8 sps:$4 sm:$0xff]  }
  0x21   : > { %v885_v29 = vld [vmem:[%s976_s28 + $0xd4] ss:$8 sps:$4 sm:$0xff]   ;;  %v887_v30 = vld [vmem:[%s976_s28 + $0xd0] ss:$8 sps:$4 sm:$0xff]   ;;  %v888_v31 = vld [vmem:[%s976_s28 + $0xe4] ss:$8 sps:$4 sm:$0xff]  }
  0x22   : > { %553 = vmatpush1.bf16.msra.mxu0 %v854_v6  ;;  %v890_v32 = vld [vmem:[%s976_s28 + $0xe0] ss:$8 sps:$4 sm:$0xff]   ;;  %v891_v33 = vld [vmem:[%s976_s28 + $0xf4] ss:$8 sps:$4 sm:$0xff]   ;;  %v893_v34 = vld [vmem:[%s976_s28 + $0xf0] ss:$8 sps:$4 sm:$0xff]  }
  0x23   : > { %554 = vmatprep.subr.bf16.mxu0 %v855_v7  ;;  %v346_v36 = vld [vmem:[#allocation2] sm:$0xff]  ;;  %v347_v37 = vld [vmem:[#allocation2 + $0x8] sm:$0xff]  ;;  %v602_v45 = vshrl.u32 (!%p813_p7), %v601_v44, 7 }
  0x24   : > { %v599_v46 = vld [vmem:[%s1033_s2] sm:$0x3] (!%p813_p7) }
  0x25   : > { %v613_v47 = vld [vmem:[%s1034_s3] sm:$0xff] (!%p813_p7)  ;;  %v603_v48 = vsub.s32 (!%p813_p7), 0, %v602_v45  ;;  %v607_v49 = vsub.s32 (!%p813_p7), 1, %v602_v45 }
  0x26   : > { %555 = vmatpush1.bf16.msra.mxu0 %v857_v8  ;;  %v614_v54 = vunpack.c.l.bf16 (!%p813_p7), %v613_v47  ;;  %v615_v55 = vunpack.c.h.bf16 (!%p813_p7), %v613_v47 }
  0x27   : > { %556 = vmatprep.subr.bf16.mxu0 %v858_v9  ;;  %v604_v52 = vrot.slane (!%p813_p7), %v599_v46, %v603_v48  ;;  %v608_v53 = vrot.slane (!%p813_p7), %v599_v46, %v607_v49 }
  0x2a   : > { %557 = vmatpush1.bf16.msra.mxu0 %v860_v10 }
  0x2b   : > { %558 = vmatprep.subr.bf16.mxu0 %v861_v11 }
  0x2e   : > { %559 = vmatpush1.bf16.msra.mxu0 %v863_v12 }
  0x2f   : > { %560 = vmatprep.subr.bf16.mxu0 %v864_v13 }
  0x32   : > { %561 = vmatpush1.bf16.msra.mxu0 %v866_v16 }
  0x33   : > { %562 = vmatprep.subr.bf16.mxu0 %v867_v17 }
  0x36   : > { %563 = vmatpush1.bf16.msra.mxu0 %v869_v18 }
  0x37   : > { %564 = vmatprep.subr.bf16.mxu0 %v870_v19 }
  0x3a   : > { %565 = vmatpush1.bf16.msra.mxu0 %v872_v20 }
  0x3b   : > { %566 = vmatprep.subr.bf16.mxu0 %v873_v21 }
  0x3e   : > { %567 = vmatpush1.bf16.msra.mxu0 %v875_v22 }
  0x3f   : > { %568 = vmatprep.subr.bf16.mxu0 %v876_v23 }
  0x42   : > { %569 = vmatpush1.bf16.msra.mxu0 %v878_v24 }
  0x43   : > { %570 = vmatprep.subr.bf16.mxu0 %v879_v25 }
  0x46   : > { %571 = vmatpush1.bf16.msra.mxu0 %v881_v26 }
  0x47   : > { %572 = vmatprep.subr.bf16.mxu0 %v882_v27 }
  0x4a   : > { %573 = vmatpush1.bf16.msra.mxu0 %v884_v28 }
  0x4b   : > { %574 = vmatprep.subr.bf16.mxu0 %v885_v29 }
  0x4e   : > { %575 = vmatpush1.bf16.msra.mxu0 %v887_v30 }
  0x4f   : > { %576 = vmatprep.subr.bf16.mxu0 %v888_v31 }
  0x52   : > { %577 = vmatpush1.bf16.msra.mxu0 %v890_v32 }
  0x53   : > { %578 = vmatprep.subr.bf16.mxu0 %v891_v33 }
  0x56   : > { %579 = vmatpush1.bf16.msra.mxu0 %v893_v34 }
  0x59   : > { %581 = vmatmul.mubr.bf16.vlgmr.msra.gmra.mrb[0].mxu0 %v779_v35 }
 0x12a   : > { %596 = sbr.rel (%p813_p7) target bundleno = 321 (0x141), region = 44 }
 0x12c   : > { %v582_v38 = vpop.f32.mrb[0].mxu0 }
 0x12d   : > { %v589_v39 = vadd.f32 %v582_v38, %v346_v36  ;;  %v584_v40 = vpop.f32.mrb[1].mxu0 }
 0x12e   : > { %v590_v41 = vadd.f32 %v584_v40, %v347_v37  ;;  %v586_v42 = vpop.f32.mrb[2].mxu0 }
 0x12f   : > { %591 = vst [vmem:[#allocation2] sm:$0xff] %v589_v39  ;;  %v587_v43 = vpop.f32.mrb[3].mxu0 }
 0x130   : > { %592 = vst [vmem:[#allocation2 + $0x8] sm:$0xff] %v590_v41 }
 0x136   : > { %v597_v50 = vld [vmem:[#allocation2] sm:$0xff] }
 0x137   : > { %v598_v51 = vld [vmem:[#allocation2 + $0x8] sm:$0xff]  ;;  %v611_v56 = vadd.f32 %v604_v52, %v597_v50 }
 0x138   : > { %v612_v57 = vadd.f32 %v608_v53, %v598_v51 }
 0x139   : > { %v616_v58 = vadd.f32 %v614_v54, %v611_v56 }
 0x13a   : > { %v617_v59 = vadd.f32 %v615_v55, %v612_v57 }
 0x13b   : > { %v618_v60 = vmax.f32 %v616_v58, 0.0 }
 0x13c   : > { %v619_v61 = vmax.f32 %v617_v59, 0.0 }
 0x13e   : > { %v820_v62 = vpack.c.bf16 %v619_v61, %v618_v60 }
 0x140   : > { %628 = vst [vmem:[%s1035_s4] sm:$0xff] %v820_v62 }
 0x141 PF: > { %s14_s17 = sadd.s32 1, %s918_s17   ;;  %s1036_s15 = smov %s914_s16 }
 0x142   : > { %p11_p8 = scmp.ge.s32.totalorder %s14_s17, 11   ;;  %s1037_s16 = smov %s1039_s18 }
 0x144   :  { %13 = sbr.rel (!%p11_p8) target bundleno = 2 (0x2), region = 83 }

// kernel: ingredient_net_forward.58
= control target key start
LH: loop header
LB: loop body
LE: loop exit
PB: predicated region body
PF: predicated region fallthrough
CT: control target
= control target key end

     0   :  { %s851_s12 = smov 0   ;;  %s853_s13 = smov 0   ;;  %s933_s0 = inlined_call_operand.vmem [shape: bf16[8,2304], index: 0, kind: input, shape index: {}]   ;;  %s934_s1 = inlined_call_operand.vmem [shape: bf16[2304,256], index: 1, kind: input, shape index: {}]   ;;  %s935_s2 = inlined_call_operand.vmem [shape: f32[1,256], index: 2, kind: input, shape index: {}]   ;;  %s936_s3 = inlined_call_operand.vmem [shape: bf16[8,256], index: 3, kind: output, shape index: {}]  }
   0x1   :  { %s855_s14 = smov 0  }
   0x2 LB: > { %s25_s15 = sadd.s32 1, %s824_s13  ;;  %p682_p0 = scmp.ge.s32.totalorder %s828_s14, 1  ;;  %s828_s14 = sphi %s855_s14, %s13_s14   ;;  %s824_s13 = sphi %s853_s13, %s938_s13   ;;  %s820_s12 = sphi %s851_s12, %s937_s12  }
   0x3   : > { %p26_p1 = scmp.ge.s32.totalorder %s25_s15, 9  ;;  %p194_p2 = scmp.lt.s32.totalorder %s828_s14, 10 }
   0x5   : > { %s940_s15 = smov (%p26_p1, %s25_s15), 0  ;;  %p195_p3 = pnand %p682_p0, %p194_p2 }
   0x6   : > { %s683_s16 = sshll.u32 (!%p195_p3), %s820_s12, 1  ;;  %s685_s17 = sshll.u32 (!%p195_p3), %s820_s12, 5 }
   0x7   : > { %198 = sbr.rel (%p195_p3) target bundleno = 319 (0x13f), region = 32  ;;  %p243_p4 = scmp.lt.s32.totalorder (!%p195_p3), %s683_s16, 17 }
   0x8   : > { %p252_p5 = scmp.lt.s32.totalorder (!%p195_p3), %s685_s17, 287  ;;  %p688_p6 = scmp.ne.s32.totalorder (!%p195_p3), %s820_s12, 0 }
   0xe   : > { %s942_s16 = smov (!%p243_p4, %s683_s16), 17  ;;  %s944_s17 = smov (!%p252_p5, %s685_s17), 287 }
   0xf   : > { %s684_s18 = sshll.u32 %s942_s16, 2  ;;  %s729_s22 = sshll.u32 %s944_s17, 3  ;;  %v830_v0 = vmov (!%p688_p6), 0.0  }
  0x10   : > { %s876_s21 = scalar_lea.vmem %s933_s0, %s684_s18  ;;  %s881_s25 = scalar_lea.vmem %s934_s1, %s729_s22  ;;  %281 = vst [vmem:[#allocation2] sm:$0xff] (!%p688_p6), %v830_v0  ;;  %282 = vst [vmem:[#allocation2 + $0x8] sm:$0xff] (!%p688_p6), %v830_v0 }
  0x11   : > { %280 = sbr.rel (%p688_p6) target bundleno = 24 (0x18), region = 36 }
  0x18 PF: > { %v756_v1 = vld [vmem:[%s881_s25 + $0x4] ss:$8 sps:$4 sm:$0xff]   ;;  %v758_v2 = vld [vmem:[%s881_s25] ss:$8 sps:$4 sm:$0xff]   ;;  %v759_v3 = vld [vmem:[%s881_s25 + $0x14] ss:$8 sps:$4 sm:$0xff]  }
  0x19   : > { %485 = vmatprep.subr.bf16.mxu0 %v756_v1  ;;  %v761_v4 = vld [vmem:[%s881_s25 + $0x10] ss:$8 sps:$4 sm:$0xff]   ;;  %v762_v5 = vld [vmem:[%s881_s25 + $0x24] ss:$8 sps:$4 sm:$0xff]   ;;  %v764_v6 = vld [vmem:[%s881_s25 + $0x20] ss:$8 sps:$4 sm:$0xff]  }
  0x1a   : > { %486 = vmatpush1.bf16.msra.mxu0 %v758_v2  ;;  %v765_v7 = vld [vmem:[%s881_s25 + $0x34] ss:$8 sps:$4 sm:$0xff]   ;;  %v767_v8 = vld [vmem:[%s881_s25 + $0x30] ss:$8 sps:$4 sm:$0xff]   ;;  %v768_v9 = vld [vmem:[%s881_s25 + $0x44] ss:$8 sps:$4 sm:$0xff]  }
  0x1b   : > { %487 = vmatprep.subr.bf16.mxu0 %v759_v3  ;;  %v770_v10 = vld [vmem:[%s881_s25 + $0x40] ss:$8 sps:$4 sm:$0xff]   ;;  %v771_v11 = vld [vmem:[%s881_s25 + $0x54] ss:$8 sps:$4 sm:$0xff]   ;;  %v773_v12 = vld [vmem:[%s881_s25 + $0x50] ss:$8 sps:$4 sm:$0xff]  }
  0x1c   : > { %v774_v13 = vld [vmem:[%s881_s25 + $0x64] ss:$8 sps:$4 sm:$0xff]   ;;  %v776_v16 = vld [vmem:[%s881_s25 + $0x60] ss:$8 sps:$4 sm:$0xff]   ;;  %v777_v17 = vld [vmem:[%s881_s25 + $0x74] ss:$8 sps:$4 sm:$0xff]  }
  0x1d   : > { %v285_v14 = vld [vmem:[%s876_s21] sm:$0xff]  ;;  %v779_v18 = vld [vmem:[%s881_s25 + $0x70] ss:$8 sps:$4 sm:$0xff]   ;;  %v783_v21 = vld [vmem:[%s881_s25 + $0x94] ss:$8 sps:$4 sm:$0xff]   ;;  %p723_p7 = scmp.ne.s32.totalorder %s820_s12, 8 }
  0x1e   : > { %488 = vmatpush1.bf16.msra.mxu0 %v761_v4  ;;  %v690_v15 = vcombine.high %v285_v14, %v285_v14  ;;  %v780_v19 = vld [vmem:[%s881_s25 + $0x84] ss:$8 sps:$4 sm:$0xff]   ;;  %v782_v20 = vld [vmem:[%s881_s25 + $0x80] ss:$8 sps:$4 sm:$0xff]   ;;  %v785_v22 = vld [vmem:[%s881_s25 + $0x90] ss:$8 sps:$4 sm:$0xff]   ;;  %v689_v35 = vcombine.low %v285_v14, %v285_v14  ;;  %v538_v44 = vlaneseq (!%p723_p7) }
  0x1f   : > { %489 = vmatprep.subr.bf16.mxu0 %v762_v5  ;;  %v786_v23 = vld [vmem:[%s881_s25 + $0xa4] ss:$8 sps:$4 sm:$0xff]   ;;  %v788_v24 = vld [vmem:[%s881_s25 + $0xa0] ss:$8 sps:$4 sm:$0xff]   ;;  %v789_v25 = vld [vmem:[%s881_s25 + $0xb4] ss:$8 sps:$4 sm:$0xff]  }
  0x20   : > { %517 = vmatprep.mubr.bf16.mxu0 %v690_v15  ;;  %v791_v26 = vld [vmem:[%s881_s25 + $0xb0] ss:$8 sps:$4 sm:$0xff]   ;;  %v792_v27 = vld [vmem:[%s881_s25 + $0xc4] ss:$8 sps:$4 sm:$0xff]   ;;  %v794_v28 = vld [vmem:[%s881_s25 + $0xc0] ss:$8 sps:$4 sm:$0xff]  }
  0x21   : > { %v795_v29 = vld [vmem:[%s881_s25 + $0xd4] ss:$8 sps:$4 sm:$0xff]   ;;  %v797_v30 = vld [vmem:[%s881_s25 + $0xd0] ss:$8 sps:$4 sm:$0xff]   ;;  %v798_v31 = vld [vmem:[%s881_s25 + $0xe4] ss:$8 sps:$4 sm:$0xff]  }
  0x22   : > { %490 = vmatpush1.bf16.msra.mxu0 %v764_v6  ;;  %v800_v32 = vld [vmem:[%s881_s25 + $0xe0] ss:$8 sps:$4 sm:$0xff]   ;;  %v801_v33 = vld [vmem:[%s881_s25 + $0xf4] ss:$8 sps:$4 sm:$0xff]   ;;  %v803_v34 = vld [vmem:[%s881_s25 + $0xf0] ss:$8 sps:$4 sm:$0xff]  }
  0x23   : > { %491 = vmatprep.subr.bf16.mxu0 %v765_v7  ;;  %v283_v36 = vld [vmem:[#allocation2] sm:$0xff]  ;;  %v284_v37 = vld [vmem:[#allocation2 + $0x8] sm:$0xff]  ;;  %v539_v45 = vshrl.u32 (!%p723_p7), %v538_v44, 7 }
  0x24   : > { %v536_v46 = vld [vmem:[%s935_s2] sm:$0x3] (!%p723_p7) }
  0x25   : > { %v540_v47 = vsub.s32 (!%p723_p7), 0, %v539_v45  ;;  %v544_v48 = vsub.s32 (!%p723_p7), 1, %v539_v45 }
  0x26   : > { %492 = vmatpush1.bf16.msra.mxu0 %v767_v8 }
  0x27   : > { %493 = vmatprep.subr.bf16.mxu0 %v768_v9  ;;  %v541_v51 = vrot.slane (!%p723_p7), %v536_v46, %v540_v47  ;;  %v545_v52 = vrot.slane (!%p723_p7), %v536_v46, %v544_v48 }
  0x2a   : > { %494 = vmatpush1.bf16.msra.mxu0 %v770_v10 }
  0x2b   : > { %495 = vmatprep.subr.bf16.mxu0 %v771_v11 }
  0x2e   : > { %496 = vmatpush1.bf16.msra.mxu0 %v773_v12 }
  0x2f   : > { %497 = vmatprep.subr.bf16.mxu0 %v774_v13 }
  0x32   : > { %498 = vmatpush1.bf16.msra.mxu0 %v776_v16 }
  0x33   : > { %499 = vmatprep.subr.bf16.mxu0 %v777_v17 }
  0x36   : > { %500 = vmatpush1.bf16.msra.mxu0 %v779_v18 }
  0x37   : > { %501 = vmatprep.subr.bf16.mxu0 %v780_v19 }
  0x3a   : > { %502 = vmatpush1.bf16.msra.mxu0 %v782_v20 }
  0x3b   : > { %503 = vmatprep.subr.bf16.mxu0 %v783_v21 }
  0x3e   : > { %504 = vmatpush1.bf16.msra.mxu0 %v785_v22 }
  0x3f   : > { %505 = vmatprep.subr.bf16.mxu0 %v786_v23 }
  0x42   : > { %506 = vmatpush1.bf16.msra.mxu0 %v788_v24 }
  0x43   : > { %507 = vmatprep.subr.bf16.mxu0 %v789_v25 }
  0x46   : > { %508 = vmatpush1.bf16.msra.mxu0 %v791_v26 }
  0x47   : > { %509 = vmatprep.subr.bf16.mxu0 %v792_v27 }
  0x4a   : > { %510 = vmatpush1.bf16.msra.mxu0 %v794_v28 }
  0x4b   : > { %511 = vmatprep.subr.bf16.mxu0 %v795_v29 }
  0x4e   : > { %512 = vmatpush1.bf16.msra.mxu0 %v797_v30 }
  0x4f   : > { %513 = vmatprep.subr.bf16.mxu0 %v798_v31 }
  0x52   : > { %514 = vmatpush1.bf16.msra.mxu0 %v800_v32 }
  0x53   : > { %515 = vmatprep.subr.bf16.mxu0 %v801_v33 }
  0x56   : > { %516 = vmatpush1.bf16.msra.mxu0 %v803_v34 }
  0x59   : > { %518 = vmatmul.mubr.bf16.vlgmr.msra.gmra.mrb[0].mxu0 %v689_v35 }
 0x12a   : > { %533 = sbr.rel (%p723_p7) target bundleno = 319 (0x13f), region = 40 }
 0x12c   : > { %v519_v38 = vpop.f32.mrb[0].mxu0 }
 0x12d   : > { %v526_v39 = vadd.f32 %v519_v38, %v283_v36  ;;  %v521_v40 = vpop.f32.mrb[1].mxu0 }
 0x12e   : > { %v527_v41 = vadd.f32 %v521_v40, %v284_v37  ;;  %v523_v42 = vpop.f32.mrb[2].mxu0 }
 0x12f   : > { %528 = vst [vmem:[#allocation2] sm:$0xff] %v526_v39  ;;  %v524_v43 = vpop.f32.mrb[3].mxu0 }
 0x130   : > { %529 = vst [vmem:[#allocation2 + $0x8] sm:$0xff] %v527_v41 }
 0x136   : > { %v534_v49 = vld [vmem:[#allocation2] sm:$0xff] }
 0x137   : > { %v535_v50 = vld [vmem:[#allocation2 + $0x8] sm:$0xff]  ;;  %v548_v53 = vadd.f32 %v541_v51, %v534_v49 }
 0x138   : > { %v549_v54 = vadd.f32 %v545_v52, %v535_v50 }
 0x139   : > { %v550_v55 = vmax.f32 %v548_v53, 0.0 }
 0x13a   : > { %v551_v56 = vmax.f32 %v549_v54, 0.0 }
 0x13c   : > { %v730_v57 = vpack.c.bf16 %v551_v56, %v550_v55 }
 0x13e   : > { %560 = vst [vmem:[%s936_s3] sm:$0xff] %v730_v57 }
 0x13f PF: > { %s13_s14 = sadd.s32 1, %s828_s14   ;;  %s937_s12 = smov %s824_s13 }
 0x140   : > { %p10_p8 = scmp.ge.s32.totalorder %s13_s14, 11   ;;  %s938_s13 = smov %s940_s15 }
 0x142   :  { %12 = sbr.rel (!%p10_p8) target bundleno = 2 (0x2), region = 76 }

// kernel: ingredient_net_forward.61
= control target key start
LH: loop header
LB: loop body
LE: loop exit
PB: predicated region body
PF: predicated region fallthrough
CT: control target
= control target key end

     0   :  { %s1255_s12 = smov 0   ;;  %s1257_s13 = smov 0   ;;  %s1388_s0 = inlined_call_operand.vmem [shape: bf16[2,2304], index: 0, kind: input, shape index: {}]   ;;  %s1389_s1 = inlined_call_operand.vmem [shape: bf16[2304,512], index: 1, kind: input, shape index: {}]   ;;  %s1390_s2 = inlined_call_operand.vmem [shape: f32[1,512], index: 2, kind: input, shape index: {}]   ;;  %s1391_s3 = inlined_call_operand.vmem [shape: bf16[2,512], index: 3, kind: output, shape index: {}]  }
   0x1   :  { %s1259_s14 = smov 0  }
   0x2 LB: > { %s25_s15 = sadd.s32 1, %s1226_s13  ;;  %p1005_p0 = scmp.ge.s32.totalorder %s1230_s14, 1  ;;  %s1230_s14 = sphi %s1259_s14, %s13_s14   ;;  %s1226_s13 = sphi %s1257_s13, %s1393_s13   ;;  %s1222_s12 = sphi %s1255_s12, %s1392_s12  }
   0x3   : > { %p26_p1 = scmp.ge.s32.totalorder %s25_s15, 9  ;;  %p193_p2 = scmp.lt.s32.totalorder %s1230_s14, 10 }
   0x5   : > { %s1395_s15 = smov (%p26_p1, %s25_s15), 0  ;;  %p194_p3 = pnand %p1005_p0, %p193_p2 }
   0x6   : > { %s1006_s16 = sshll.u32 (!%p194_p3), %s1222_s12, 1  ;;  %s1007_s17 = sshll.u32 (!%p194_p3), %s1222_s12, 5 }
   0x7   : > { %197 = sbr.rel (%p194_p3) target bundleno = 334 (0x14e), region = 32  ;;  %p240_p4 = scmp.lt.s32.totalorder (!%p194_p3), %s1006_s16, 17 }
   0x8   : > { %p248_p5 = scmp.lt.s32.totalorder (!%p194_p3), %s1007_s17, 287  ;;  %p1010_p6 = scmp.ne.s32.totalorder (!%p194_p3), %s1222_s12, 0 }
   0xe   : > { %s1397_s16 = smov (!%p240_p4, %s1006_s16), 17  ;;  %s1399_s17 = smov (!%p248_p5, %s1007_s17), 287 }
   0xf   : > { %s244_s20 = scalar_lea.vmem %s1388_s0, %s1397_s16  ;;  %s1084_s21 = sshll.u32 %s1399_s17, 4  ;;  %v1232_v0 = vmov (!%p1010_p6), 0.0  }
  0x10   : > { %s1286_s24 = scalar_lea.vmem %s1389_s1, %s1084_s21  ;;  %275 = sbr.rel (%p1010_p6) target bundleno = 23 (0x17), region = 36  ;;  %276 = vst [vmem:[#allocation2] sm:$0xff] (!%p1010_p6), %v1232_v0 }
  0x17 PF: > { %v1112_v1 = vld [vmem:[%s1286_s24 + $0x4] ss:$16 sps:$4 sm:$0xff]   ;;  %v1114_v2 = vld [vmem:[%s1286_s24 + $0xc] ss:$16 sps:$4 sm:$0xff]   ;;  %v1116_v3 = vld [vmem:[%s1286_s24] ss:$16 sps:$4 sm:$0xff]   ;;  %v355_v41 = vlaneseq }
  0x18   : > { %688 = vmatprep.subr.bf16.mxu0 %v1112_v1  ;;  %v1117_v4 = vld [vmem:[%s1286_s24 + $0x8] ss:$16 sps:$4 sm:$0xff]   ;;  %729 = vmatprep.subr.bf16.mxu1 %v1114_v2  ;;  %v1118_v5 = vld [vmem:[%s1286_s24 + $0x24] ss:$16 sps:$4 sm:$0xff]   ;;  %v1120_v6 = vld [vmem:[%s1286_s24 + $0x2c] ss:$16 sps:$4 sm:$0xff]  }
  0x19   : > { %689 = vmatpush1.bf16.msra.mxu0 %v1116_v3  ;;  %730 = vmatpush1.bf16.msra.mxu1 %v1117_v4  ;;  %v1122_v7 = vld [vmem:[%s1286_s24 + $0x20] ss:$16 sps:$4 sm:$0xff]   ;;  %v1123_v8 = vld [vmem:[%s1286_s24 + $0x28] ss:$16 sps:$4 sm:$0xff]   ;;  %v1124_v9 = vld [vmem:[%s1286_s24 + $0x44] ss:$16 sps:$4 sm:$0xff]  }
  0x1a   : > { %690 = vmatprep.subr.bf16.mxu0 %v1118_v5  ;;  %731 = vmatprep.subr.bf16.mxu1 %v1120_v6  ;;  %v1126_v10 = vld [vmem:[%s1286_s24 + $0x4c] ss:$16 sps:$4 sm:$0xff]   ;;  %v1128_v11 = vld [vmem:[%s1286_s24 + $0x40] ss:$16 sps:$4 sm:$0xff]   ;;  %v1129_v12 = vld [vmem:[%s1286_s24 + $0x48] ss:$16 sps:$4 sm:$0xff]  }
  0x1b   : > { %v1130_v13 = vld [vmem:[%s1286_s24 + $0x64] ss:$16 sps:$4 sm:$0xff]   ;;  %v1132_v14 = vld [vmem:[%s1286_s24 + $0x6c] ss:$16 sps:$4 sm:$0xff]   ;;  %v1134_v15 = vld [vmem:[%s1286_s24 + $0x60] ss:$16 sps:$4 sm:$0xff]  }
  0x1c   : > { %v1135_v16 = vld [vmem:[%s1286_s24 + $0x68] ss:$16 sps:$4 sm:$0xff]   ;;  %v1136_v17 = vld [vmem:[%s1286_s24 + $0x84] ss:$16 sps:$4 sm:$0xff]   ;;  %v1138_v18 = vld [vmem:[%s1286_s24 + $0x8c] ss:$16 sps:$4 sm:$0xff]  }
  0x1d   : > { %691 = vmatpush1.bf16.msra.mxu0 %v1122_v7  ;;  %732 = vmatpush1.bf16.msra.mxu1 %v1123_v8  ;;  %v1140_v19 = vld [vmem:[%s1286_s24 + $0x80] ss:$16 sps:$4 sm:$0xff]   ;;  %v1141_v20 = vld [vmem:[%s1286_s24 + $0x88] ss:$16 sps:$4 sm:$0xff]   ;;  %v1142_v21 = vld [vmem:[%s1286_s24 + $0xa4] ss:$16 sps:$4 sm:$0xff]  }
  0x1e   : > { %692 = vmatprep.subr.bf16.mxu0 %v1124_v9  ;;  %733 = vmatprep.subr.bf16.mxu1 %v1126_v10  ;;  %v1144_v22 = vld [vmem:[%s1286_s24 + $0xac] ss:$16 sps:$4 sm:$0xff]   ;;  %v1146_v23 = vld [vmem:[%s1286_s24 + $0xa0] ss:$16 sps:$4 sm:$0xff]   ;;  %v1147_v24 = vld [vmem:[%s1286_s24 + $0xa8] ss:$16 sps:$4 sm:$0xff]  }
  0x1f   : > { %v1148_v25 = vld [vmem:[%s1286_s24 + $0xc4] ss:$16 sps:$4 sm:$0xff]   ;;  %v1150_v26 = vld [vmem:[%s1286_s24 + $0xcc] ss:$16 sps:$4 sm:$0xff]   ;;  %v1152_v27 = vld [vmem:[%s1286_s24 + $0xc0] ss:$16 sps:$4 sm:$0xff]  }
  0x20   : > { %v1153_v28 = vld [vmem:[%s1286_s24 + $0xc8] ss:$16 sps:$4 sm:$0xff]   ;;  %v1154_v29 = vld [vmem:[%s1286_s24 + $0xe4] ss:$16 sps:$4 sm:$0xff]   ;;  %v1156_v30 = vld [vmem:[%s1286_s24 + $0xec] ss:$16 sps:$4 sm:$0xff]  }
  0x21   : > { %693 = vmatpush1.bf16.msra.mxu0 %v1128_v11  ;;  %734 = vmatpush1.bf16.msra.mxu1 %v1129_v12  ;;  %v1158_v31 = vld [vmem:[%s1286_s24 + $0xe0] ss:$16 sps:$4 sm:$0xff]   ;;  %v1159_v32 = vld [vmem:[%s1286_s24 + $0xe8] ss:$16 sps:$4 sm:$0xff]   ;;  %v1160_v33 = vld [vmem:[%s1286_s24 + $0x104] ss:$16 sps:$4 sm:$0xff]  }
  0x22   : > { %694 = vmatprep.subr.bf16.mxu0 %v1130_v13  ;;  %735 = vmatprep.subr.bf16.mxu1 %v1132_v14  ;;  %v1162_v34 = vld [vmem:[%s1286_s24 + $0x10c] ss:$16 sps:$4 sm:$0xff]   ;;  %v1164_v35 = vld [vmem:[%s1286_s24 + $0x100] ss:$16 sps:$4 sm:$0xff]   ;;  %v1165_v36 = vld [vmem:[%s1286_s24 + $0x108] ss:$16 sps:$4 sm:$0xff]  }
  0x23   : > { %v1166_v37 = vld [vmem:[%s1286_s24 + $0x124] ss:$16 sps:$4 sm:$0xff]   ;;  %v1168_v38 = vld [vmem:[%s1286_s24 + $0x12c] ss:$16 sps:$4 sm:$0xff]   ;;  %v1233_v39 = vmov 1966171168  }
  0x24   : > { %v353_v40 = vunpack.c.l.s4 %v1233_v39  ;;  %v1170_v42 = vld [vmem:[%s1286_s24 + $0x120] ss:$16 sps:$4 sm:$0xff]   ;;  %v1171_v43 = vld [vmem:[%s1286_s24 + $0x128] ss:$16 sps:$4 sm:$0xff]   ;;  %v1172_v44 = vld [vmem:[%s1286_s24 + $0x144] ss:$16 sps:$4 sm:$0xff]  }
  0x25   : > { %695 = vmatpush1.bf16.msra.mxu0 %v1134_v15  ;;  %736 = vmatpush1.bf16.msra.mxu1 %v1135_v16  ;;  %v1174_v45 = vld [vmem:[%s1286_s24 + $0x14c] ss:$16 sps:$4 sm:$0xff]   ;;  %v1331_v47 = vshrl.u32 %v355_v41, 7  ;;  %v1176_v48 = vld [vmem:[%s1286_s24 + $0x140] ss:$16 sps:$4 sm:$0xff]   ;;  %p1076_p7 = scmp.ne.s32.totalorder %s1222_s12, 8 }
  0x26   : > { %696 = vmatprep.subr.bf16.mxu0 %v1136_v17  ;;  %737 = vmatprep.subr.bf16.mxu1 %v1138_v18  ;;  %v354_v46 = vunpack.c.0.s8 %v353_v40  ;;  %v1177_v49 = vld [vmem:[%s1286_s24 + $0x148] ss:$16 sps:$4 sm:$0xff]   ;;  %v1178_v50 = vld [vmem:[%s1286_s24 + $0x164] ss:$16 sps:$4 sm:$0xff]   ;;  %v1180_v51 = vld [vmem:[%s1286_s24 + $0x16c] ss:$16 sps:$4 sm:$0xff]  }
  0x27   : > { %v1011_v53 = vld.sshfl [vmem:[%s244_s20] sm:$0x11 pattern:$0x75316420]  ;;  %v1183_v55 = vld [vmem:[%s1286_s24 + $0x168] ss:$16 sps:$4 sm:$0xff]  }
  0x28   : > { %v1338_v52 = vsub.s32 %v354_v46, %v1331_v47  ;;  %v1182_v54 = vld [vmem:[%s1286_s24 + $0x160] ss:$16 sps:$4 sm:$0xff]   ;;  %v351_v56 = vcombine.high %v1011_v53, %v1011_v53  ;;  %v1184_v57 = vld [vmem:[%s1286_s24 + $0x184] ss:$16 sps:$4 sm:$0xff]   ;;  %v1186_v58 = vld [vmem:[%s1286_s24 + $0x18c] ss:$16 sps:$4 sm:$0xff]  }
  0x29   : > { %697 = vmatpush1.bf16.msra.mxu0 %v1140_v19  ;;  %738 = vmatpush1.bf16.msra.mxu1 %v1141_v20  ;;  %v1188_v60 = vld [vmem:[%s1286_s24 + $0x180] ss:$16 sps:$4 sm:$0xff]   ;;  %v1189_v61 = vld [vmem:[%s1286_s24 + $0x188] ss:$16 sps:$4 sm:$0xff]   ;;  %v1190_v62 = vld [vmem:[%s1286_s24 + $0x1a4] ss:$16 sps:$4 sm:$0xff]  }
  0x2a   : > { %698 = vmatprep.subr.bf16.mxu0 %v1142_v21  ;;  %739 = vmatprep.subr.bf16.mxu1 %v1144_v22  ;;  %v365_v59 = vrot.slane %v351_v56, %v1338_v52  ;;  %v1192_v63 = vld [vmem:[%s1286_s24 + $0x1ac] ss:$16 sps:$4 sm:$0xff]   ;;  %v1194_v0 = vld [vmem:[%s1286_s24 + $0x1a0] ss:$16 sps:$4 sm:$0xff]   ;;  %v1195_v1 = vld [vmem:[%s1286_s24 + $0x1a8] ss:$16 sps:$4 sm:$0xff]   ;;  %v358_v10 = vrot.slane %v1011_v53, %v1338_v52 }
  0x2b   : > { %v1196_v2 = vld [vmem:[%s1286_s24 + $0x1c4] ss:$16 sps:$4 sm:$0xff]   ;;  %v1198_v3 = vld [vmem:[%s1286_s24 + $0x1cc] ss:$16 sps:$4 sm:$0xff]   ;;  %v1200_v4 = vld [vmem:[%s1286_s24 + $0x1c0] ss:$16 sps:$4 sm:$0xff]  }
  0x2c   : > { %720 = vmatprep.mubr.bf16.mxu0 %v365_v59  ;;  %761 = vmatprep.mubr.bf16.mxu1 %v365_v59  ;;  %v1201_v5 = vld [vmem:[%s1286_s24 + $0x1c8] ss:$16 sps:$4 sm:$0xff]   ;;  %v1202_v6 = vld [vmem:[%s1286_s24 + $0x1e4] ss:$16 sps:$4 sm:$0xff]   ;;  %v1204_v7 = vld [vmem:[%s1286_s24 + $0x1ec] ss:$16 sps:$4 sm:$0xff]  }
  0x2d   : > { %699 = vmatpush1.bf16.msra.mxu0 %v1146_v23  ;;  %740 = vmatpush1.bf16.msra.mxu1 %v1147_v24  ;;  %v1206_v8 = vld [vmem:[%s1286_s24 + $0x1e0] ss:$16 sps:$4 sm:$0xff]   ;;  %v1207_v9 = vld [vmem:[%s1286_s24 + $0x1e8] ss:$16 sps:$4 sm:$0xff]   ;;  %v1234_v11 = vmov 1983009808  }
  0x2e   : > { %700 = vmatprep.subr.bf16.mxu0 %v1148_v25  ;;  %741 = vmatprep.subr.bf16.mxu1 %v1150_v26  ;;  %v777_v12 = vunpack.c.l.s4 %v1234_v11 }
  0x30   : > { %v778_v13 = vunpack.c.0.s8 %v777_v12 }
  0x31   : > { %701 = vmatpush1.bf16.msra.mxu0 %v1152_v27  ;;  %742 = vmatpush1.bf16.msra.mxu1 %v1153_v28  ;;  %v277_v27 = vld [vmem:[#allocation2] sm:$0xff] }
  0x32   : > { %702 = vmatprep.subr.bf16.mxu0 %v1154_v29  ;;  %743 = vmatprep.subr.bf16.mxu1 %v1156_v30  ;;  %v781_v16 = vsub.s32 %v778_v13, %v1331_v47  ;;  %v799_v30 = vld [vmem:[%s1390_s2] sm:$0xf] (!%p1076_p7) }
  0x35   : > { %703 = vmatpush1.bf16.msra.mxu0 %v1158_v31  ;;  %744 = vmatpush1.bf16.msra.mxu1 %v1159_v32  ;;  %v803_v31 = vsub.s32 (!%p1076_p7), 0, %v1331_v47  ;;  %v807_v32 = vsub.s32 (!%p1076_p7), 1, %v1331_v47 }
  0x36   : > { %704 = vmatprep.subr.bf16.mxu0 %v1160_v33  ;;  %745 = vmatprep.subr.bf16.mxu1 %v1162_v34  ;;  %v811_v33 = vsub.s32 (!%p1076_p7), 2, %v1331_v47  ;;  %v815_v34 = vsub.s32 (!%p1076_p7), 3, %v1331_v47 }
  0x39   : > { %705 = vmatpush1.bf16.msra.mxu0 %v1164_v35  ;;  %746 = vmatpush1.bf16.msra.mxu1 %v1165_v36  ;;  %v804_v35 = vrot.slane (!%p1076_p7), %v799_v30, %v803_v31  ;;  %v808_v36 = vrot.slane (!%p1076_p7), %v799_v30, %v807_v32 }
  0x3a   : > { %706 = vmatprep.subr.bf16.mxu0 %v1166_v37  ;;  %747 = vmatprep.subr.bf16.mxu1 %v1168_v38  ;;  %v812_v37 = vrot.slane (!%p1076_p7), %v799_v30, %v811_v33  ;;  %v816_v38 = vrot.slane (!%p1076_p7), %v799_v30, %v815_v34 }
  0x3b   : > { %v817_v39 = vcombine.low (!%p1076_p7), %v804_v35, %v808_v36 }
  0x3c   : > { %v818_v40 = vcombine.low (!%p1076_p7), %v812_v37, %v816_v38 }
  0x3d   : > { %707 = vmatpush1.bf16.msra.mxu0 %v1170_v42  ;;  %748 = vmatpush1.bf16.msra.mxu1 %v1171_v43  ;;  %v825_v41 = vrot.slane (!%p1076_p7), %v817_v39, %v781_v16 }
  0x3e   : > { %708 = vmatprep.subr.bf16.mxu0 %v1172_v44  ;;  %749 = vmatprep.subr.bf16.mxu1 %v1174_v45  ;;  %v832_v42 = vrot.slane (!%p1076_p7), %v818_v40, %v781_v16 }
  0x40   : > { %v833_v44 = vcombine.low (!%p1076_p7), %v825_v41, %v832_v42 }
  0x41   : > { %709 = vmatpush1.bf16.msra.mxu0 %v1176_v48  ;;  %750 = vmatpush1.bf16.msra.mxu1 %v1177_v49 }
  0x42   : > { %710 = vmatprep.subr.bf16.mxu0 %v1178_v50  ;;  %751 = vmatprep.subr.bf16.mxu1 %v1180_v51 }
  0x45   : > { %711 = vmatpush1.bf16.msra.mxu0 %v1182_v54  ;;  %752 = vmatpush1.bf16.msra.mxu1 %v1183_v55 }
  0x46   : > { %712 = vmatprep.subr.bf16.mxu0 %v1184_v57  ;;  %753 = vmatprep.subr.bf16.mxu1 %v1186_v58 }
  0x49   : > { %713 = vmatpush1.bf16.msra.mxu0 %v1188_v60  ;;  %754 = vmatpush1.bf16.msra.mxu1 %v1189_v61 }
  0x4a   : > { %714 = vmatprep.subr.bf16.mxu0 %v1190_v62  ;;  %755 = vmatprep.subr.bf16.mxu1 %v1192_v63 }
  0x4d   : > { %715 = vmatpush1.bf16.msra.mxu0 %v1194_v0  ;;  %756 = vmatpush1.bf16.msra.mxu1 %v1195_v1 }
  0x4e   : > { %716 = vmatprep.subr.bf16.mxu0 %v1196_v2  ;;  %757 = vmatprep.subr.bf16.mxu1 %v1198_v3 }
  0x51   : > { %717 = vmatpush1.bf16.msra.mxu0 %v1200_v4  ;;  %758 = vmatpush1.bf16.msra.mxu1 %v1201_v5 }
  0x52   : > { %718 = vmatprep.subr.bf16.mxu0 %v1202_v6  ;;  %759 = vmatprep.subr.bf16.mxu1 %v1204_v7 }
  0x55   : > { %719 = vmatpush1.bf16.msra.mxu0 %v1206_v8  ;;  %760 = vmatpush1.bf16.msra.mxu1 %v1207_v9 }
  0x58   : > { %721 = vmatmul.mubr.bf16.vlgmr.msra.gmra.mrb[0].mxu0 %v358_v10  ;;  %762 = vmatmul.mubr.bf16.vlgmr.msra.gmra.mrb[0].mxu1 %v358_v10 }
 0x12b   : > { %v722_v14 = vpop.f32.mrb[0].mxu0  ;;  %v763_v15 = vpop.f32.mrb[0].mxu1 }
 0x12c   : > { %v724_v17 = vpop.f32.mrb[1].mxu0  ;;  %v765_v18 = vpop.f32.mrb[1].mxu1 }
 0x12d   : > { %v774_v19 = vcombine.low %v722_v14, %v724_v17  ;;  %v775_v20 = vcombine.low %v763_v15, %v765_v18  ;;  %v726_v21 = vpop.f32.mrb[2].mxu0  ;;  %v767_v22 = vpop.f32.mrb[2].mxu1 }
 0x12e   : > { %v727_v23 = vpop.f32.mrb[3].mxu0  ;;  %v768_v24 = vpop.f32.mrb[3].mxu1 }
 0x12f   : > { %v782_v25 = vrot.slane %v774_v19, %v781_v16  ;;  %v789_v26 = vrot.slane %v775_v20, %v781_v16  ;;  %797 = sbr.rel (%p1076_p7) target bundleno = 334 (0x14e), region = 40 }
 0x131   : > { %v790_v28 = vcombine.low %v782_v25, %v789_v26 }
 0x133   : > { %v792_v29 = vadd.f32 %v790_v28, %v277_v27 }
 0x135   : > { %793 = vst [vmem:[#allocation2] sm:$0xff] %v792_v29 }
 0x13c   : > { %v798_v43 = vld [vmem:[#allocation2] sm:$0xff] }
 0x13d   : > { %v835_v45 = vadd.f32 %v833_v44, %v798_v43 }
 0x13f   : > { %v836_v46 = vmax.f32 %v835_v45, 0.0 }
 0x141   : > { %v838_v48 = vcombine.high %v836_v46, %v836_v46  ;;  %v845_v49 = vrot.slane %v836_v46, %v781_v16 }
 0x143   : > { %v852_v50 = vrot.slane %v838_v48, %v781_v16  ;;  %v853_v51 = vcombine.high %v845_v49, %v845_v49 }
 0x145   : > { %v854_v53 = vcombine.high %v852_v50, %v852_v50  ;;  %v1077_v54 = vpack.c.bf16 %v853_v51, %v845_v49 }
 0x147   : > { %v1078_v55 = vpack.c.bf16 %v854_v53, %v852_v50  ;;  %v875_v47 = vrot.slane %v1077_v54, %v1338_v52 }
 0x149   : > { %v882_v56 = vrot.slane %v1078_v55, %v1338_v52 }
 0x14b   : > { %v883_v57 = vcombine.low %v875_v47, %v882_v56 }
 0x14d   : > { %1079 = vst.sshfl [vmem:[%s1391_s3] sm:$0x55 pattern:$0x73625140] %v883_v57 }
 0x14e PF: > { %s13_s14 = sadd.s32 1, %s1230_s14   ;;  %s1392_s12 = smov %s1226_s13 }
 0x14f   : > { %p10_p8 = scmp.ge.s32.totalorder %s13_s14, 11   ;;  %s1393_s13 = smov %s1395_s15 }
 0x151   :  { %12 = sbr.rel (!%p10_p8) target bundleno = 2 (0x2), region = 76 }

// kernel: ingredient_net_forward.60
= control target key start
LH: loop header
LB: loop body
LE: loop exit
PB: predicated region body
PF: predicated region fallthrough
CT: control target
= control target key end

     0   :  { %v803_v38 = vmov 1966171168   ;;  %v97_v40 = vlaneseq  ;;  %s1040_s1 = inlined_call_operand.vmem [shape: bf16[256,512], index: 1, kind: input, shape index: {}]   ;;  %s1041_s0 = inlined_call_operand.vmem [shape: bf16[2,256], index: 0, kind: input, shape index: {}]   ;;  %s1042_s2 = inlined_call_operand.vmem [shape: f32[1,512], index: 2, kind: input, shape index: {}]   ;;  %s1043_s3 = inlined_call_operand.vmem [shape: bf16[2,512], index: 3, kind: output, shape index: {}]  }
   0x1   :  { %v707_v0 = vld [vmem:[%s1040_s1 + $0x4] ss:$16 sps:$4 sm:$0xff]   ;;  %v709_v1 = vld [vmem:[%s1040_s1 + $0xc] ss:$16 sps:$4 sm:$0xff]   ;;  %v711_v2 = vld [vmem:[%s1040_s1] ss:$16 sps:$4 sm:$0xff]   ;;  %v95_v39 = vunpack.c.l.s4 %v803_v38 }
   0x2   :  { %430 = vmatprep.subr.bf16.mxu0 %v707_v0  ;;  %v712_v3 = vld [vmem:[%s1040_s1 + $0x8] ss:$16 sps:$4 sm:$0xff]   ;;  %471 = vmatprep.subr.bf16.mxu1 %v709_v1  ;;  %v713_v4 = vld [vmem:[%s1040_s1 + $0x24] ss:$16 sps:$4 sm:$0xff]   ;;  %v715_v5 = vld [vmem:[%s1040_s1 + $0x2c] ss:$16 sps:$4 sm:$0xff]  }
   0x3   :  { %431 = vmatpush1.bf16.msra.mxu0 %v711_v2  ;;  %472 = vmatpush1.bf16.msra.mxu1 %v712_v3  ;;  %v717_v6 = vld [vmem:[%s1040_s1 + $0x20] ss:$16 sps:$4 sm:$0xff]   ;;  %v718_v7 = vld [vmem:[%s1040_s1 + $0x28] ss:$16 sps:$4 sm:$0xff]   ;;  %v719_v8 = vld [vmem:[%s1040_s1 + $0x44] ss:$16 sps:$4 sm:$0xff]   ;;  %v96_v45 = vunpack.c.0.s8 %v95_v39 }
   0x4   :  { %432 = vmatprep.subr.bf16.mxu0 %v713_v4  ;;  %473 = vmatprep.subr.bf16.mxu1 %v715_v5  ;;  %v721_v9 = vld [vmem:[%s1040_s1 + $0x4c] ss:$16 sps:$4 sm:$0xff]   ;;  %v723_v10 = vld [vmem:[%s1040_s1 + $0x40] ss:$16 sps:$4 sm:$0xff]   ;;  %v724_v11 = vld [vmem:[%s1040_s1 + $0x48] ss:$16 sps:$4 sm:$0xff]  }
   0x5   :  { %v725_v12 = vld [vmem:[%s1040_s1 + $0x64] ss:$16 sps:$4 sm:$0xff]   ;;  %v727_v13 = vld [vmem:[%s1040_s1 + $0x6c] ss:$16 sps:$4 sm:$0xff]   ;;  %v729_v14 = vld [vmem:[%s1040_s1 + $0x60] ss:$16 sps:$4 sm:$0xff]  }
   0x6   :  { %v730_v15 = vld [vmem:[%s1040_s1 + $0x68] ss:$16 sps:$4 sm:$0xff]   ;;  %v731_v16 = vld [vmem:[%s1040_s1 + $0x84] ss:$16 sps:$4 sm:$0xff]   ;;  %v733_v17 = vld [vmem:[%s1040_s1 + $0x8c] ss:$16 sps:$4 sm:$0xff]  }
   0x7   :  { %433 = vmatpush1.bf16.msra.mxu0 %v717_v6  ;;  %474 = vmatpush1.bf16.msra.mxu1 %v718_v7  ;;  %v735_v18 = vld [vmem:[%s1040_s1 + $0x80] ss:$16 sps:$4 sm:$0xff]   ;;  %v736_v19 = vld [vmem:[%s1040_s1 + $0x88] ss:$16 sps:$4 sm:$0xff]   ;;  %v737_v20 = vld [vmem:[%s1040_s1 + $0xa4] ss:$16 sps:$4 sm:$0xff]  }
   0x8   :  { %434 = vmatprep.subr.bf16.mxu0 %v719_v8  ;;  %475 = vmatprep.subr.bf16.mxu1 %v721_v9  ;;  %v739_v21 = vld [vmem:[%s1040_s1 + $0xac] ss:$16 sps:$4 sm:$0xff]   ;;  %v741_v22 = vld [vmem:[%s1040_s1 + $0xa0] ss:$16 sps:$4 sm:$0xff]   ;;  %v742_v23 = vld [vmem:[%s1040_s1 + $0xa8] ss:$16 sps:$4 sm:$0xff]  }
   0x9   :  { %v743_v24 = vld [vmem:[%s1040_s1 + $0xc4] ss:$16 sps:$4 sm:$0xff]   ;;  %v745_v25 = vld [vmem:[%s1040_s1 + $0xcc] ss:$16 sps:$4 sm:$0xff]   ;;  %v747_v26 = vld [vmem:[%s1040_s1 + $0xc0] ss:$16 sps:$4 sm:$0xff]  }
   0xa   :  { %v748_v27 = vld [vmem:[%s1040_s1 + $0xc8] ss:$16 sps:$4 sm:$0xff]   ;;  %v749_v28 = vld [vmem:[%s1040_s1 + $0xe4] ss:$16 sps:$4 sm:$0xff]   ;;  %v751_v29 = vld [vmem:[%s1040_s1 + $0xec] ss:$16 sps:$4 sm:$0xff]  }
   0xb   :  { %435 = vmatpush1.bf16.msra.mxu0 %v723_v10  ;;  %476 = vmatpush1.bf16.msra.mxu1 %v724_v11  ;;  %v753_v30 = vld [vmem:[%s1040_s1 + $0xe0] ss:$16 sps:$4 sm:$0xff]   ;;  %v754_v31 = vld [vmem:[%s1040_s1 + $0xe8] ss:$16 sps:$4 sm:$0xff]   ;;  %v755_v32 = vld [vmem:[%s1040_s1 + $0x104] ss:$16 sps:$4 sm:$0xff]  }
   0xc   :  { %436 = vmatprep.subr.bf16.mxu0 %v725_v12  ;;  %477 = vmatprep.subr.bf16.mxu1 %v727_v13  ;;  %v757_v33 = vld [vmem:[%s1040_s1 + $0x10c] ss:$16 sps:$4 sm:$0xff]   ;;  %v759_v34 = vld [vmem:[%s1040_s1 + $0x100] ss:$16 sps:$4 sm:$0xff]   ;;  %v760_v35 = vld [vmem:[%s1040_s1 + $0x108] ss:$16 sps:$4 sm:$0xff]  }
   0xd   :  { %v761_v36 = vld [vmem:[%s1040_s1 + $0x124] ss:$16 sps:$4 sm:$0xff]   ;;  %v763_v37 = vld [vmem:[%s1040_s1 + $0x12c] ss:$16 sps:$4 sm:$0xff]   ;;  %v765_v41 = vld [vmem:[%s1040_s1 + $0x120] ss:$16 sps:$4 sm:$0xff]  }
   0xe   :  { %v766_v42 = vld [vmem:[%s1040_s1 + $0x128] ss:$16 sps:$4 sm:$0xff]   ;;  %v767_v43 = vld [vmem:[%s1040_s1 + $0x144] ss:$16 sps:$4 sm:$0xff]   ;;  %v769_v44 = vld [vmem:[%s1040_s1 + $0x14c] ss:$16 sps:$4 sm:$0xff]  }
   0xf   :  { %437 = vmatpush1.bf16.msra.mxu0 %v729_v14  ;;  %478 = vmatpush1.bf16.msra.mxu1 %v730_v15  ;;  %v951_v46 = vshrl.u32 %v97_v40, 7  ;;  %v771_v47 = vld [vmem:[%s1040_s1 + $0x140] ss:$16 sps:$4 sm:$0xff]   ;;  %v772_v48 = vld [vmem:[%s1040_s1 + $0x148] ss:$16 sps:$4 sm:$0xff]  }
  0x10   :  { %438 = vmatprep.subr.bf16.mxu0 %v731_v16  ;;  %479 = vmatprep.subr.bf16.mxu1 %v733_v17  ;;  %v773_v49 = vld [vmem:[%s1040_s1 + $0x164] ss:$16 sps:$4 sm:$0xff]   ;;  %v775_v50 = vld [vmem:[%s1040_s1 + $0x16c] ss:$16 sps:$4 sm:$0xff]   ;;  %v777_v53 = vld [vmem:[%s1040_s1 + $0x160] ss:$16 sps:$4 sm:$0xff]  }
  0x11   :  { %v966_v51 = vsub.s32 %v96_v45, %v951_v46  ;;  %v637_v52 = vld.sshfl [vmem:[%s1041_s0] sm:$0x11 pattern:$0x75316420]  ;;  %v778_v54 = vld [vmem:[%s1040_s1 + $0x168] ss:$16 sps:$4 sm:$0xff]  }
  0x12   :  { %v93_v55 = vcombine.high %v637_v52, %v637_v52  ;;  %v779_v56 = vld [vmem:[%s1040_s1 + $0x184] ss:$16 sps:$4 sm:$0xff]   ;;  %v781_v57 = vld [vmem:[%s1040_s1 + $0x18c] ss:$16 sps:$4 sm:$0xff]   ;;  %v783_v59 = vld [vmem:[%s1040_s1 + $0x180] ss:$16 sps:$4 sm:$0xff]  }
  0x13   :  { %439 = vmatpush1.bf16.msra.mxu0 %v735_v18  ;;  %480 = vmatpush1.bf16.msra.mxu1 %v736_v19  ;;  %v784_v60 = vld [vmem:[%s1040_s1 + $0x188] ss:$16 sps:$4 sm:$0xff]   ;;  %v785_v61 = vld [vmem:[%s1040_s1 + $0x1a4] ss:$16 sps:$4 sm:$0xff]   ;;  %v787_v62 = vld [vmem:[%s1040_s1 + $0x1ac] ss:$16 sps:$4 sm:$0xff]   ;;  %v100_v9 = vrot.slane %v637_v52, %v966_v51 }
  0x14   :  { %440 = vmatprep.subr.bf16.mxu0 %v737_v20  ;;  %481 = vmatprep.subr.bf16.mxu1 %v739_v21  ;;  %v107_v58 = vrot.slane %v93_v55, %v966_v51  ;;  %v789_v63 = vld [vmem:[%s1040_s1 + $0x1a0] ss:$16 sps:$4 sm:$0xff]   ;;  %v790_v0 = vld [vmem:[%s1040_s1 + $0x1a8] ss:$16 sps:$4 sm:$0xff]   ;;  %v791_v1 = vld [vmem:[%s1040_s1 + $0x1c4] ss:$16 sps:$4 sm:$0xff]  }
  0x15   :  { %v793_v2 = vld [vmem:[%s1040_s1 + $0x1cc] ss:$16 sps:$4 sm:$0xff]   ;;  %v795_v3 = vld [vmem:[%s1040_s1 + $0x1c0] ss:$16 sps:$4 sm:$0xff]   ;;  %v796_v4 = vld [vmem:[%s1040_s1 + $0x1c8] ss:$16 sps:$4 sm:$0xff]  }
  0x16   :  { %462 = vmatprep.mubr.bf16.mxu0 %v107_v58  ;;  %503 = vmatprep.mubr.bf16.mxu1 %v107_v58  ;;  %v797_v5 = vld [vmem:[%s1040_s1 + $0x1e4] ss:$16 sps:$4 sm:$0xff]   ;;  %v799_v6 = vld [vmem:[%s1040_s1 + $0x1ec] ss:$16 sps:$4 sm:$0xff]   ;;  %v801_v7 = vld [vmem:[%s1040_s1 + $0x1e0] ss:$16 sps:$4 sm:$0xff]  }
  0x17   :  { %441 = vmatpush1.bf16.msra.mxu0 %v741_v22  ;;  %482 = vmatpush1.bf16.msra.mxu1 %v742_v23  ;;  %v802_v8 = vld [vmem:[%s1040_s1 + $0x1e8] ss:$16 sps:$4 sm:$0xff]   ;;  %v804_v10 = vmov 1983009808   ;;  %v544_v12 = vsub.s32 0, %v951_v46  ;;  %v548_v13 = vsub.s32 1, %v951_v46 }
  0x18   :  { %442 = vmatprep.subr.bf16.mxu0 %v743_v24  ;;  %483 = vmatprep.subr.bf16.mxu1 %v745_v25  ;;  %v519_v11 = vunpack.c.l.s4 %v804_v10  ;;  %v552_v14 = vsub.s32 2, %v951_v46  ;;  %v556_v15 = vsub.s32 3, %v951_v46  ;;  %v540_v16 = vld [vmem:[%s1042_s2] sm:$0xf] }
  0x19   :  { %v545_v18 = vrot.slane %v540_v16, %v544_v12  ;;  %v549_v19 = vrot.slane %v540_v16, %v548_v13 }
  0x1a   :  { %v520_v17 = vunpack.c.0.s8 %v519_v11  ;;  %v553_v20 = vrot.slane %v540_v16, %v552_v14  ;;  %v557_v21 = vrot.slane %v540_v16, %v556_v15 }
  0x1b   :  { %443 = vmatpush1.bf16.msra.mxu0 %v747_v26  ;;  %484 = vmatpush1.bf16.msra.mxu1 %v748_v27  ;;  %v558_v23 = vcombine.low %v545_v18, %v549_v19 }
  0x1c   :  { %444 = vmatprep.subr.bf16.mxu0 %v749_v28  ;;  %485 = vmatprep.subr.bf16.mxu1 %v751_v29  ;;  %v523_v22 = vsub.s32 %v520_v17, %v951_v46  ;;  %v559_v24 = vcombine.low %v553_v20, %v557_v21 }
  0x1e   :  { %v566_v27 = vrot.slane %v558_v23, %v523_v22  ;;  %v573_v28 = vrot.slane %v559_v24, %v523_v22 }
  0x1f   :  { %445 = vmatpush1.bf16.msra.mxu0 %v753_v30  ;;  %486 = vmatpush1.bf16.msra.mxu1 %v754_v31 }
  0x20   :  { %446 = vmatprep.subr.bf16.mxu0 %v755_v32  ;;  %487 = vmatprep.subr.bf16.mxu1 %v757_v33  ;;  %v574_v39 = vcombine.low %v566_v27, %v573_v28 }
  0x23   :  { %447 = vmatpush1.bf16.msra.mxu0 %v759_v34  ;;  %488 = vmatpush1.bf16.msra.mxu1 %v760_v35 }
  0x24   :  { %448 = vmatprep.subr.bf16.mxu0 %v761_v36  ;;  %489 = vmatprep.subr.bf16.mxu1 %v763_v37 }
  0x27   :  { %449 = vmatpush1.bf16.msra.mxu0 %v765_v41  ;;  %490 = vmatpush1.bf16.msra.mxu1 %v766_v42 }
  0x28   :  { %450 = vmatprep.subr.bf16.mxu0 %v767_v43  ;;  %491 = vmatprep.subr.bf16.mxu1 %v769_v44 }
  0x2b   :  { %451 = vmatpush1.bf16.msra.mxu0 %v771_v47  ;;  %492 = vmatpush1.bf16.msra.mxu1 %v772_v48 }
  0x2c   :  { %452 = vmatprep.subr.bf16.mxu0 %v773_v49  ;;  %493 = vmatprep.subr.bf16.mxu1 %v775_v50 }
  0x2f   :  { %453 = vmatpush1.bf16.msra.mxu0 %v777_v53  ;;  %494 = vmatpush1.bf16.msra.mxu1 %v778_v54 }
  0x30   :  { %454 = vmatprep.subr.bf16.mxu0 %v779_v56  ;;  %495 = vmatprep.subr.bf16.mxu1 %v781_v57 }
  0x33   :  { %455 = vmatpush1.bf16.msra.mxu0 %v783_v59  ;;  %496 = vmatpush1.bf16.msra.mxu1 %v784_v60 }
  0x34   :  { %456 = vmatprep.subr.bf16.mxu0 %v785_v61  ;;  %497 = vmatprep.subr.bf16.mxu1 %v787_v62 }
  0x37   :  { %457 = vmatpush1.bf16.msra.mxu0 %v789_v63  ;;  %498 = vmatpush1.bf16.msra.mxu1 %v790_v0 }
  0x38   :  { %458 = vmatprep.subr.bf16.mxu0 %v791_v1  ;;  %499 = vmatprep.subr.bf16.mxu1 %v793_v2 }
  0x3b   :  { %459 = vmatpush1.bf16.msra.mxu0 %v795_v3  ;;  %500 = vmatpush1.bf16.msra.mxu1 %v796_v4 }
  0x3c   :  { %460 = vmatprep.subr.bf16.mxu0 %v797_v5  ;;  %501 = vmatprep.subr.bf16.mxu1 %v799_v6 }
  0x3f   :  { %461 = vmatpush1.bf16.msra.mxu0 %v801_v7  ;;  %502 = vmatpush1.bf16.msra.mxu1 %v802_v8 }
  0x42   :  { %463 = vmatmul.mubr.bf16.vlgmr.msra.gmra.mrb[0].mxu0 %v100_v9  ;;  %504 = vmatmul.mubr.bf16.vlgmr.msra.gmra.mrb[0].mxu1 %v100_v9 }
 0x115   :  { %v464_v25 = vpop.f32.mrb[0].mxu0  ;;  %v505_v26 = vpop.f32.mrb[0].mxu1 }
 0x116   :  { %v466_v29 = vpop.f32.mrb[1].mxu0  ;;  %v507_v30 = vpop.f32.mrb[1].mxu1 }
 0x117   :  { %v516_v31 = vcombine.low %v464_v25, %v466_v29  ;;  %v517_v32 = vcombine.low %v505_v26, %v507_v30  ;;  %v468_v33 = vpop.f32.mrb[2].mxu0  ;;  %v509_v34 = vpop.f32.mrb[2].mxu1 }
 0x118   :  { %v469_v35 = vpop.f32.mrb[3].mxu0  ;;  %v510_v36 = vpop.f32.mrb[3].mxu1 }
 0x119   :  { %v524_v37 = vrot.slane %v516_v31, %v523_v22  ;;  %v531_v38 = vrot.slane %v517_v32, %v523_v22 }
 0x11b   :  { %v532_v40 = vcombine.low %v524_v37, %v531_v38 }
 0x11d   :  { %v576_v41 = vadd.f32 %v574_v39, %v532_v40 }
 0x11f   :  { %v578_v42 = vcombine.high %v576_v41, %v576_v41  ;;  %v585_v43 = vrot.slane %v576_v41, %v523_v22 }
 0x121   :  { %v592_v44 = vrot.slane %v578_v42, %v523_v22  ;;  %v593_v45 = vcombine.high %v585_v43, %v585_v43 }
 0x123   :  { %v594_v46 = vcombine.high %v592_v44, %v592_v44  ;;  %v702_v47 = vpack.c.bf16 %v593_v45, %v585_v43 }
 0x125   :  { %v703_v48 = vpack.c.bf16 %v594_v46, %v592_v44  ;;  %v615_v49 = vrot.slane %v702_v47, %v966_v51 }
 0x127   :  { %v622_v50 = vrot.slane %v703_v48, %v966_v51 }
 0x129   :  { %v623_v52 = vcombine.low %v615_v49, %v622_v50 }
 0x12b   :  { %704 = vst.sshfl [vmem:[%s1043_s3] sm:$0x55 pattern:$0x73625140] %v623_v52 }

// kernel: ingredient_net_forward.63
= control target key start
LH: loop header
LB: loop body
LE: loop exit
PB: predicated region body
PF: predicated region fallthrough
CT: control target
= control target key end

     0   :  { %s1255_s12 = smov 0   ;;  %s1257_s13 = smov 0   ;;  %s1388_s0 = inlined_call_operand.vmem [shape: bf16[2,4608], index: 0, kind: input, shape index: {}]   ;;  %s1389_s1 = inlined_call_operand.vmem [shape: bf16[4608,512], index: 1, kind: input, shape index: {}]   ;;  %s1390_s2 = inlined_call_operand.vmem [shape: f32[1,512], index: 2, kind: input, shape index: {}]   ;;  %s1391_s3 = inlined_call_operand.vmem [shape: bf16[2,512], index: 3, kind: output, shape index: {}]  }
   0x1   :  { %s1259_s14 = smov 0  }
   0x2 LB: > { %s25_s15 = sadd.s32 1, %s1226_s13  ;;  %p1005_p0 = scmp.ge.s32.totalorder %s1230_s14, 1  ;;  %s1230_s14 = sphi %s1259_s14, %s13_s14   ;;  %s1226_s13 = sphi %s1257_s13, %s1393_s13   ;;  %s1222_s12 = sphi %s1255_s12, %s1392_s12  }
   0x3   : > { %p26_p1 = scmp.ge.s32.totalorder %s25_s15, 18  ;;  %p193_p2 = scmp.lt.s32.totalorder %s1230_s14, 19 }
   0x5   : > { %s1395_s15 = smov (%p26_p1, %s25_s15), 0  ;;  %p194_p3 = pnand %p1005_p0, %p193_p2 }
   0x6   : > { %s1006_s16 = sshll.u32 (!%p194_p3), %s1222_s12, 1  ;;  %s1007_s17 = sshll.u32 (!%p194_p3), %s1222_s12, 5 }
   0x7   : > { %197 = sbr.rel (%p194_p3) target bundleno = 334 (0x14e), region = 32  ;;  %p240_p4 = scmp.lt.s32.totalorder (!%p194_p3), %s1006_s16, 35 }
   0x8   : > { %p248_p5 = scmp.lt.s32.totalorder (!%p194_p3), %s1007_s17, 575  ;;  %p1010_p6 = scmp.ne.s32.totalorder (!%p194_p3), %s1222_s12, 0 }
   0xe   : > { %s1397_s16 = smov (!%p240_p4, %s1006_s16), 35  ;;  %s1399_s17 = smov (!%p248_p5, %s1007_s17), 575 }
   0xf   : > { %s244_s20 = scalar_lea.vmem %s1388_s0, %s1397_s16  ;;  %s1084_s21 = sshll.u32 %s1399_s17, 4  ;;  %v1232_v0 = vmov (!%p1010_p6), 0.0  }
  0x10   : > { %s1286_s24 = scalar_lea.vmem %s1389_s1, %s1084_s21  ;;  %275 = sbr.rel (%p1010_p6) target bundleno = 23 (0x17), region = 36  ;;  %276 = vst [vmem:[#allocation2] sm:$0xff] (!%p1010_p6), %v1232_v0 }
  0x17 PF: > { %v1112_v1 = vld [vmem:[%s1286_s24 + $0x4] ss:$16 sps:$4 sm:$0xff]   ;;  %v1114_v2 = vld [vmem:[%s1286_s24 + $0xc] ss:$16 sps:$4 sm:$0xff]   ;;  %v1116_v3 = vld [vmem:[%s1286_s24] ss:$16 sps:$4 sm:$0xff]   ;;  %v355_v41 = vlaneseq }
  0x18   : > { %688 = vmatprep.subr.bf16.mxu0 %v1112_v1  ;;  %v1117_v4 = vld [vmem:[%s1286_s24 + $0x8] ss:$16 sps:$4 sm:$0xff]   ;;  %729 = vmatprep.subr.bf16.mxu1 %v1114_v2  ;;  %v1118_v5 = vld [vmem:[%s1286_s24 + $0x24] ss:$16 sps:$4 sm:$0xff]   ;;  %v1120_v6 = vld [vmem:[%s1286_s24 + $0x2c] ss:$16 sps:$4 sm:$0xff]  }
  0x19   : > { %689 = vmatpush1.bf16.msra.mxu0 %v1116_v3  ;;  %730 = vmatpush1.bf16.msra.mxu1 %v1117_v4  ;;  %v1122_v7 = vld [vmem:[%s1286_s24 + $0x20] ss:$16 sps:$4 sm:$0xff]   ;;  %v1123_v8 = vld [vmem:[%s1286_s24 + $0x28] ss:$16 sps:$4 sm:$0xff]   ;;  %v1124_v9 = vld [vmem:[%s1286_s24 + $0x44] ss:$16 sps:$4 sm:$0xff]  }
  0x1a   : > { %690 = vmatprep.subr.bf16.mxu0 %v1118_v5  ;;  %731 = vmatprep.subr.bf16.mxu1 %v1120_v6  ;;  %v1126_v10 = vld [vmem:[%s1286_s24 + $0x4c] ss:$16 sps:$4 sm:$0xff]   ;;  %v1128_v11 = vld [vmem:[%s1286_s24 + $0x40] ss:$16 sps:$4 sm:$0xff]   ;;  %v1129_v12 = vld [vmem:[%s1286_s24 + $0x48] ss:$16 sps:$4 sm:$0xff]  }
  0x1b   : > { %v1130_v13 = vld [vmem:[%s1286_s24 + $0x64] ss:$16 sps:$4 sm:$0xff]   ;;  %v1132_v14 = vld [vmem:[%s1286_s24 + $0x6c] ss:$16 sps:$4 sm:$0xff]   ;;  %v1134_v15 = vld [vmem:[%s1286_s24 + $0x60] ss:$16 sps:$4 sm:$0xff]  }
  0x1c   : > { %v1135_v16 = vld [vmem:[%s1286_s24 + $0x68] ss:$16 sps:$4 sm:$0xff]   ;;  %v1136_v17 = vld [vmem:[%s1286_s24 + $0x84] ss:$16 sps:$4 sm:$0xff]   ;;  %v1138_v18 = vld [vmem:[%s1286_s24 + $0x8c] ss:$16 sps:$4 sm:$0xff]  }
  0x1d   : > { %691 = vmatpush1.bf16.msra.mxu0 %v1122_v7  ;;  %732 = vmatpush1.bf16.msra.mxu1 %v1123_v8  ;;  %v1140_v19 = vld [vmem:[%s1286_s24 + $0x80] ss:$16 sps:$4 sm:$0xff]   ;;  %v1141_v20 = vld [vmem:[%s1286_s24 + $0x88] ss:$16 sps:$4 sm:$0xff]   ;;  %v1142_v21 = vld [vmem:[%s1286_s24 + $0xa4] ss:$16 sps:$4 sm:$0xff]  }
  0x1e   : > { %692 = vmatprep.subr.bf16.mxu0 %v1124_v9  ;;  %733 = vmatprep.subr.bf16.mxu1 %v1126_v10  ;;  %v1144_v22 = vld [vmem:[%s1286_s24 + $0xac] ss:$16 sps:$4 sm:$0xff]   ;;  %v1146_v23 = vld [vmem:[%s1286_s24 + $0xa0] ss:$16 sps:$4 sm:$0xff]   ;;  %v1147_v24 = vld [vmem:[%s1286_s24 + $0xa8] ss:$16 sps:$4 sm:$0xff]  }
  0x1f   : > { %v1148_v25 = vld [vmem:[%s1286_s24 + $0xc4] ss:$16 sps:$4 sm:$0xff]   ;;  %v1150_v26 = vld [vmem:[%s1286_s24 + $0xcc] ss:$16 sps:$4 sm:$0xff]   ;;  %v1152_v27 = vld [vmem:[%s1286_s24 + $0xc0] ss:$16 sps:$4 sm:$0xff]  }
  0x20   : > { %v1153_v28 = vld [vmem:[%s1286_s24 + $0xc8] ss:$16 sps:$4 sm:$0xff]   ;;  %v1154_v29 = vld [vmem:[%s1286_s24 + $0xe4] ss:$16 sps:$4 sm:$0xff]   ;;  %v1156_v30 = vld [vmem:[%s1286_s24 + $0xec] ss:$16 sps:$4 sm:$0xff]  }
  0x21   : > { %693 = vmatpush1.bf16.msra.mxu0 %v1128_v11  ;;  %734 = vmatpush1.bf16.msra.mxu1 %v1129_v12  ;;  %v1158_v31 = vld [vmem:[%s1286_s24 + $0xe0] ss:$16 sps:$4 sm:$0xff]   ;;  %v1159_v32 = vld [vmem:[%s1286_s24 + $0xe8] ss:$16 sps:$4 sm:$0xff]   ;;  %v1160_v33 = vld [vmem:[%s1286_s24 + $0x104] ss:$16 sps:$4 sm:$0xff]  }
  0x22   : > { %694 = vmatprep.subr.bf16.mxu0 %v1130_v13  ;;  %735 = vmatprep.subr.bf16.mxu1 %v1132_v14  ;;  %v1162_v34 = vld [vmem:[%s1286_s24 + $0x10c] ss:$16 sps:$4 sm:$0xff]   ;;  %v1164_v35 = vld [vmem:[%s1286_s24 + $0x100] ss:$16 sps:$4 sm:$0xff]   ;;  %v1165_v36 = vld [vmem:[%s1286_s24 + $0x108] ss:$16 sps:$4 sm:$0xff]  }
  0x23   : > { %v1166_v37 = vld [vmem:[%s1286_s24 + $0x124] ss:$16 sps:$4 sm:$0xff]   ;;  %v1168_v38 = vld [vmem:[%s1286_s24 + $0x12c] ss:$16 sps:$4 sm:$0xff]   ;;  %v1233_v39 = vmov 1966171168  }
  0x24   : > { %v353_v40 = vunpack.c.l.s4 %v1233_v39  ;;  %v1170_v42 = vld [vmem:[%s1286_s24 + $0x120] ss:$16 sps:$4 sm:$0xff]   ;;  %v1171_v43 = vld [vmem:[%s1286_s24 + $0x128] ss:$16 sps:$4 sm:$0xff]   ;;  %v1172_v44 = vld [vmem:[%s1286_s24 + $0x144] ss:$16 sps:$4 sm:$0xff]  }
  0x25   : > { %695 = vmatpush1.bf16.msra.mxu0 %v1134_v15  ;;  %736 = vmatpush1.bf16.msra.mxu1 %v1135_v16  ;;  %v1174_v45 = vld [vmem:[%s1286_s24 + $0x14c] ss:$16 sps:$4 sm:$0xff]   ;;  %v1331_v47 = vshrl.u32 %v355_v41, 7  ;;  %v1176_v48 = vld [vmem:[%s1286_s24 + $0x140] ss:$16 sps:$4 sm:$0xff]   ;;  %p1076_p7 = scmp.ne.s32.totalorder %s1222_s12, 17 }
  0x26   : > { %696 = vmatprep.subr.bf16.mxu0 %v1136_v17  ;;  %737 = vmatprep.subr.bf16.mxu1 %v1138_v18  ;;  %v354_v46 = vunpack.c.0.s8 %v353_v40  ;;  %v1177_v49 = vld [vmem:[%s1286_s24 + $0x148] ss:$16 sps:$4 sm:$0xff]   ;;  %v1178_v50 = vld [vmem:[%s1286_s24 + $0x164] ss:$16 sps:$4 sm:$0xff]   ;;  %v1180_v51 = vld [vmem:[%s1286_s24 + $0x16c] ss:$16 sps:$4 sm:$0xff]  }
  0x27   : > { %v1011_v53 = vld.sshfl [vmem:[%s244_s20] sm:$0x11 pattern:$0x75316420]  ;;  %v1183_v55 = vld [vmem:[%s1286_s24 + $0x168] ss:$16 sps:$4 sm:$0xff]  }
  0x28   : > { %v1338_v52 = vsub.s32 %v354_v46, %v1331_v47  ;;  %v1182_v54 = vld [vmem:[%s1286_s24 + $0x160] ss:$16 sps:$4 sm:$0xff]   ;;  %v351_v56 = vcombine.high %v1011_v53, %v1011_v53  ;;  %v1184_v57 = vld [vmem:[%s1286_s24 + $0x184] ss:$16 sps:$4 sm:$0xff]   ;;  %v1186_v58 = vld [vmem:[%s1286_s24 + $0x18c] ss:$16 sps:$4 sm:$0xff]  }
  0x29   : > { %697 = vmatpush1.bf16.msra.mxu0 %v1140_v19  ;;  %738 = vmatpush1.bf16.msra.mxu1 %v1141_v20  ;;  %v1188_v60 = vld [vmem:[%s1286_s24 + $0x180] ss:$16 sps:$4 sm:$0xff]   ;;  %v1189_v61 = vld [vmem:[%s1286_s24 + $0x188] ss:$16 sps:$4 sm:$0xff]   ;;  %v1190_v62 = vld [vmem:[%s1286_s24 + $0x1a4] ss:$16 sps:$4 sm:$0xff]  }
  0x2a   : > { %698 = vmatprep.subr.bf16.mxu0 %v1142_v21  ;;  %739 = vmatprep.subr.bf16.mxu1 %v1144_v22  ;;  %v365_v59 = vrot.slane %v351_v56, %v1338_v52  ;;  %v1192_v63 = vld [vmem:[%s1286_s24 + $0x1ac] ss:$16 sps:$4 sm:$0xff]   ;;  %v1194_v0 = vld [vmem:[%s1286_s24 + $0x1a0] ss:$16 sps:$4 sm:$0xff]   ;;  %v1195_v1 = vld [vmem:[%s1286_s24 + $0x1a8] ss:$16 sps:$4 sm:$0xff]   ;;  %v358_v10 = vrot.slane %v1011_v53, %v1338_v52 }
  0x2b   : > { %v1196_v2 = vld [vmem:[%s1286_s24 + $0x1c4] ss:$16 sps:$4 sm:$0xff]   ;;  %v1198_v3 = vld [vmem:[%s1286_s24 + $0x1cc] ss:$16 sps:$4 sm:$0xff]   ;;  %v1200_v4 = vld [vmem:[%s1286_s24 + $0x1c0] ss:$16 sps:$4 sm:$0xff]  }
  0x2c   : > { %720 = vmatprep.mubr.bf16.mxu0 %v365_v59  ;;  %761 = vmatprep.mubr.bf16.mxu1 %v365_v59  ;;  %v1201_v5 = vld [vmem:[%s1286_s24 + $0x1c8] ss:$16 sps:$4 sm:$0xff]   ;;  %v1202_v6 = vld [vmem:[%s1286_s24 + $0x1e4] ss:$16 sps:$4 sm:$0xff]   ;;  %v1204_v7 = vld [vmem:[%s1286_s24 + $0x1ec] ss:$16 sps:$4 sm:$0xff]  }
  0x2d   : > { %699 = vmatpush1.bf16.msra.mxu0 %v1146_v23  ;;  %740 = vmatpush1.bf16.msra.mxu1 %v1147_v24  ;;  %v1206_v8 = vld [vmem:[%s1286_s24 + $0x1e0] ss:$16 sps:$4 sm:$0xff]   ;;  %v1207_v9 = vld [vmem:[%s1286_s24 + $0x1e8] ss:$16 sps:$4 sm:$0xff]   ;;  %v1234_v11 = vmov 1983009808  }
  0x2e   : > { %700 = vmatprep.subr.bf16.mxu0 %v1148_v25  ;;  %741 = vmatprep.subr.bf16.mxu1 %v1150_v26  ;;  %v777_v12 = vunpack.c.l.s4 %v1234_v11 }
  0x30   : > { %v778_v13 = vunpack.c.0.s8 %v777_v12 }
  0x31   : > { %701 = vmatpush1.bf16.msra.mxu0 %v1152_v27  ;;  %742 = vmatpush1.bf16.msra.mxu1 %v1153_v28  ;;  %v277_v27 = vld [vmem:[#allocation2] sm:$0xff] }
  0x32   : > { %702 = vmatprep.subr.bf16.mxu0 %v1154_v29  ;;  %743 = vmatprep.subr.bf16.mxu1 %v1156_v30  ;;  %v781_v16 = vsub.s32 %v778_v13, %v1331_v47  ;;  %v799_v30 = vld [vmem:[%s1390_s2] sm:$0xf] (!%p1076_p7) }
  0x35   : > { %703 = vmatpush1.bf16.msra.mxu0 %v1158_v31  ;;  %744 = vmatpush1.bf16.msra.mxu1 %v1159_v32  ;;  %v803_v31 = vsub.s32 (!%p1076_p7), 0, %v1331_v47  ;;  %v807_v32 = vsub.s32 (!%p1076_p7), 1, %v1331_v47 }
  0x36   : > { %704 = vmatprep.subr.bf16.mxu0 %v1160_v33  ;;  %745 = vmatprep.subr.bf16.mxu1 %v1162_v34  ;;  %v811_v33 = vsub.s32 (!%p1076_p7), 2, %v1331_v47  ;;  %v815_v34 = vsub.s32 (!%p1076_p7), 3, %v1331_v47 }
  0x39   : > { %705 = vmatpush1.bf16.msra.mxu0 %v1164_v35  ;;  %746 = vmatpush1.bf16.msra.mxu1 %v1165_v36  ;;  %v804_v35 = vrot.slane (!%p1076_p7), %v799_v30, %v803_v31  ;;  %v808_v36 = vrot.slane (!%p1076_p7), %v799_v30, %v807_v32 }
  0x3a   : > { %706 = vmatprep.subr.bf16.mxu0 %v1166_v37  ;;  %747 = vmatprep.subr.bf16.mxu1 %v1168_v38  ;;  %v812_v37 = vrot.slane (!%p1076_p7), %v799_v30, %v811_v33  ;;  %v816_v38 = vrot.slane (!%p1076_p7), %v799_v30, %v815_v34 }
  0x3b   : > { %v817_v39 = vcombine.low (!%p1076_p7), %v804_v35, %v808_v36 }
  0x3c   : > { %v818_v40 = vcombine.low (!%p1076_p7), %v812_v37, %v816_v38 }
  0x3d   : > { %707 = vmatpush1.bf16.msra.mxu0 %v1170_v42  ;;  %748 = vmatpush1.bf16.msra.mxu1 %v1171_v43  ;;  %v825_v41 = vrot.slane (!%p1076_p7), %v817_v39, %v781_v16 }
  0x3e   : > { %708 = vmatprep.subr.bf16.mxu0 %v1172_v44  ;;  %749 = vmatprep.subr.bf16.mxu1 %v1174_v45  ;;  %v832_v42 = vrot.slane (!%p1076_p7), %v818_v40, %v781_v16 }
  0x40   : > { %v833_v44 = vcombine.low (!%p1076_p7), %v825_v41, %v832_v42 }
  0x41   : > { %709 = vmatpush1.bf16.msra.mxu0 %v1176_v48  ;;  %750 = vmatpush1.bf16.msra.mxu1 %v1177_v49 }
  0x42   : > { %710 = vmatprep.subr.bf16.mxu0 %v1178_v50  ;;  %751 = vmatprep.subr.bf16.mxu1 %v1180_v51 }
  0x45   : > { %711 = vmatpush1.bf16.msra.mxu0 %v1182_v54  ;;  %752 = vmatpush1.bf16.msra.mxu1 %v1183_v55 }
  0x46   : > { %712 = vmatprep.subr.bf16.mxu0 %v1184_v57  ;;  %753 = vmatprep.subr.bf16.mxu1 %v1186_v58 }
  0x49   : > { %713 = vmatpush1.bf16.msra.mxu0 %v1188_v60  ;;  %754 = vmatpush1.bf16.msra.mxu1 %v1189_v61 }
  0x4a   : > { %714 = vmatprep.subr.bf16.mxu0 %v1190_v62  ;;  %755 = vmatprep.subr.bf16.mxu1 %v1192_v63 }
  0x4d   : > { %715 = vmatpush1.bf16.msra.mxu0 %v1194_v0  ;;  %756 = vmatpush1.bf16.msra.mxu1 %v1195_v1 }
  0x4e   : > { %716 = vmatprep.subr.bf16.mxu0 %v1196_v2  ;;  %757 = vmatprep.subr.bf16.mxu1 %v1198_v3 }
  0x51   : > { %717 = vmatpush1.bf16.msra.mxu0 %v1200_v4  ;;  %758 = vmatpush1.bf16.msra.mxu1 %v1201_v5 }
  0x52   : > { %718 = vmatprep.subr.bf16.mxu0 %v1202_v6  ;;  %759 = vmatprep.subr.bf16.mxu1 %v1204_v7 }
  0x55   : > { %719 = vmatpush1.bf16.msra.mxu0 %v1206_v8  ;;  %760 = vmatpush1.bf16.msra.mxu1 %v1207_v9 }
  0x58   : > { %721 = vmatmul.mubr.bf16.vlgmr.msra.gmra.mrb[0].mxu0 %v358_v10  ;;  %762 = vmatmul.mubr.bf16.vlgmr.msra.gmra.mrb[0].mxu1 %v358_v10 }
 0x12b   : > { %v722_v14 = vpop.f32.mrb[0].mxu0  ;;  %v763_v15 = vpop.f32.mrb[0].mxu1 }
 0x12c   : > { %v724_v17 = vpop.f32.mrb[1].mxu0  ;;  %v765_v18 = vpop.f32.mrb[1].mxu1 }
 0x12d   : > { %v774_v19 = vcombine.low %v722_v14, %v724_v17  ;;  %v775_v20 = vcombine.low %v763_v15, %v765_v18  ;;  %v726_v21 = vpop.f32.mrb[2].mxu0  ;;  %v767_v22 = vpop.f32.mrb[2].mxu1 }
 0x12e   : > { %v727_v23 = vpop.f32.mrb[3].mxu0  ;;  %v768_v24 = vpop.f32.mrb[3].mxu1 }
 0x12f   : > { %v782_v25 = vrot.slane %v774_v19, %v781_v16  ;;  %v789_v26 = vrot.slane %v775_v20, %v781_v16  ;;  %797 = sbr.rel (%p1076_p7) target bundleno = 334 (0x14e), region = 40 }
 0x131   : > { %v790_v28 = vcombine.low %v782_v25, %v789_v26 }
 0x133   : > { %v792_v29 = vadd.f32 %v790_v28, %v277_v27 }
 0x135   : > { %793 = vst [vmem:[#allocation2] sm:$0xff] %v792_v29 }
 0x13c   : > { %v798_v43 = vld [vmem:[#allocation2] sm:$0xff] }
 0x13d   : > { %v835_v45 = vadd.f32 %v833_v44, %v798_v43 }
 0x13f   : > { %v836_v46 = vmax.f32 %v835_v45, 0.0 }
 0x141   : > { %v838_v48 = vcombine.high %v836_v46, %v836_v46  ;;  %v845_v49 = vrot.slane %v836_v46, %v781_v16 }
 0x143   : > { %v852_v50 = vrot.slane %v838_v48, %v781_v16  ;;  %v853_v51 = vcombine.high %v845_v49, %v845_v49 }
 0x145   : > { %v854_v53 = vcombine.high %v852_v50, %v852_v50  ;;  %v1077_v54 = vpack.c.bf16 %v853_v51, %v845_v49 }
 0x147   : > { %v1078_v55 = vpack.c.bf16 %v854_v53, %v852_v50  ;;  %v875_v47 = vrot.slane %v1077_v54, %v1338_v52 }
 0x149   : > { %v882_v56 = vrot.slane %v1078_v55, %v1338_v52 }
 0x14b   : > { %v883_v57 = vcombine.low %v875_v47, %v882_v56 }
 0x14d   : > { %1079 = vst.sshfl [vmem:[%s1391_s3] sm:$0x55 pattern:$0x73625140] %v883_v57 }
 0x14e PF: > { %s13_s14 = sadd.s32 1, %s1230_s14   ;;  %s1392_s12 = smov %s1226_s13 }
 0x14f   : > { %p10_p8 = scmp.ge.s32.totalorder %s13_s14, 20   ;;  %s1393_s13 = smov %s1395_s15 }
 0x151   :  { %12 = sbr.rel (!%p10_p8) target bundleno = 2 (0x2), region = 76 }

// kernel: ingredient_net_forward.62
= control target key start
LH: loop header
LB: loop body
LE: loop exit
PB: predicated region body
PF: predicated region fallthrough
CT: control target
= control target key end

     0   :  { %s1342_s15 = smov 0   ;;  %s1344_s16 = smov 0   ;;  %s1478_s0 = inlined_call_operand.vmem [shape: bf16[2,4608], index: 0, kind: input, shape index: {}]   ;;  %s1479_s1 = inlined_call_operand.vmem [shape: bf16[4608,512], index: 1, kind: input, shape index: {}]   ;;  %s1480_s2 = inlined_call_operand.vmem [shape: f32[1,512], index: 2, kind: input, shape index: {}]   ;;  %s1481_s3 = inlined_call_operand.vmem [shape: bf16[2,512], index: 3, kind: input, shape index: {}]   ;;  %s1482_s4 = inlined_call_operand.vmem [shape: bf16[2,512], index: 4, kind: output, shape index: {}]  }
   0x1   :  { %s1346_s17 = smov 0  }
   0x2 LB: > { %s26_s18 = sadd.s32 1, %s1308_s16  ;;  %p1087_p0 = scmp.ge.s32.totalorder %s1312_s17, 1  ;;  %s1312_s17 = sphi %s1346_s17, %s14_s17   ;;  %s1308_s16 = sphi %s1344_s16, %s1484_s16   ;;  %s1304_s15 = sphi %s1342_s15, %s1483_s15  }
   0x3   : > { %p27_p1 = scmp.ge.s32.totalorder %s26_s18, 18  ;;  %p234_p2 = scmp.lt.s32.totalorder %s1312_s17, 19 }
   0x5   : > { %s1486_s18 = smov (%p27_p1, %s26_s18), 0  ;;  %p235_p3 = pnand %p1087_p0, %p234_p2 }
   0x6   : > { %s1088_s19 = sshll.u32 (!%p235_p3), %s1304_s15, 1  ;;  %s1089_s20 = sshll.u32 (!%p235_p3), %s1304_s15, 5 }
   0x7   : > { %238 = sbr.rel (%p235_p3) target bundleno = 336 (0x150), region = 36  ;;  %p291_p4 = scmp.lt.s32.totalorder (!%p235_p3), %s1088_s19, 35 }
   0x8   : > { %p299_p5 = scmp.lt.s32.totalorder (!%p235_p3), %s1089_s20, 575  ;;  %p1092_p6 = scmp.ne.s32.totalorder (!%p235_p3), %s1304_s15, 0 }
   0xe   : > { %s1488_s19 = smov (!%p291_p4, %s1088_s19), 35  ;;  %s1490_s20 = smov (!%p299_p5, %s1089_s20), 575 }
   0xf   : > { %s295_s23 = scalar_lea.vmem %s1478_s0, %s1488_s19  ;;  %s1166_s24 = sshll.u32 %s1490_s20, 4  ;;  %v1314_v0 = vmov (!%p1092_p6), 0.0  }
  0x10   : > { %s1373_s27 = scalar_lea.vmem %s1479_s1, %s1166_s24  ;;  %335 = sbr.rel (%p1092_p6) target bundleno = 23 (0x17), region = 40  ;;  %336 = vst [vmem:[#allocation2] sm:$0xff] (!%p1092_p6), %v1314_v0 }
  0x17 PF: > { %v1194_v1 = vld [vmem:[%s1373_s27 + $0x4] ss:$16 sps:$4 sm:$0xff]   ;;  %v1196_v2 = vld [vmem:[%s1373_s27 + $0xc] ss:$16 sps:$4 sm:$0xff]   ;;  %v1198_v3 = vld [vmem:[%s1373_s27] ss:$16 sps:$4 sm:$0xff]   ;;  %v415_v41 = vlaneseq }
  0x18   : > { %748 = vmatprep.subr.bf16.mxu0 %v1194_v1  ;;  %v1199_v4 = vld [vmem:[%s1373_s27 + $0x8] ss:$16 sps:$4 sm:$0xff]   ;;  %789 = vmatprep.subr.bf16.mxu1 %v1196_v2  ;;  %v1200_v5 = vld [vmem:[%s1373_s27 + $0x24] ss:$16 sps:$4 sm:$0xff]   ;;  %v1202_v6 = vld [vmem:[%s1373_s27 + $0x2c] ss:$16 sps:$4 sm:$0xff]  }
  0x19   : > { %749 = vmatpush1.bf16.msra.mxu0 %v1198_v3  ;;  %790 = vmatpush1.bf16.msra.mxu1 %v1199_v4  ;;  %v1204_v7 = vld [vmem:[%s1373_s27 + $0x20] ss:$16 sps:$4 sm:$0xff]   ;;  %v1205_v8 = vld [vmem:[%s1373_s27 + $0x28] ss:$16 sps:$4 sm:$0xff]   ;;  %v1206_v9 = vld [vmem:[%s1373_s27 + $0x44] ss:$16 sps:$4 sm:$0xff]  }
  0x1a   : > { %750 = vmatprep.subr.bf16.mxu0 %v1200_v5  ;;  %791 = vmatprep.subr.bf16.mxu1 %v1202_v6  ;;  %v1208_v10 = vld [vmem:[%s1373_s27 + $0x4c] ss:$16 sps:$4 sm:$0xff]   ;;  %v1210_v11 = vld [vmem:[%s1373_s27 + $0x40] ss:$16 sps:$4 sm:$0xff]   ;;  %v1211_v12 = vld [vmem:[%s1373_s27 + $0x48] ss:$16 sps:$4 sm:$0xff]  }
  0x1b   : > { %v1212_v13 = vld [vmem:[%s1373_s27 + $0x64] ss:$16 sps:$4 sm:$0xff]   ;;  %v1214_v14 = vld [vmem:[%s1373_s27 + $0x6c] ss:$16 sps:$4 sm:$0xff]   ;;  %v1216_v15 = vld [vmem:[%s1373_s27 + $0x60] ss:$16 sps:$4 sm:$0xff]  }
  0x1c   : > { %v1217_v16 = vld [vmem:[%s1373_s27 + $0x68] ss:$16 sps:$4 sm:$0xff]   ;;  %v1218_v17 = vld [vmem:[%s1373_s27 + $0x84] ss:$16 sps:$4 sm:$0xff]   ;;  %v1220_v18 = vld [vmem:[%s1373_s27 + $0x8c] ss:$16 sps:$4 sm:$0xff]  }
  0x1d   : > { %751 = vmatpush1.bf16.msra.mxu0 %v1204_v7  ;;  %792 = vmatpush1.bf16.msra.mxu1 %v1205_v8  ;;  %v1222_v19 = vld [vmem:[%s1373_s27 + $0x80] ss:$16 sps:$4 sm:$0xff]   ;;  %v1223_v20 = vld [vmem:[%s1373_s27 + $0x88] ss:$16 sps:$4 sm:$0xff]   ;;  %v1224_v21 = vld [vmem:[%s1373_s27 + $0xa4] ss:$16 sps:$4 sm:$0xff]  }
  0x1e   : > { %752 = vmatprep.subr.bf16.mxu0 %v1206_v9  ;;  %793 = vmatprep.subr.bf16.mxu1 %v1208_v10  ;;  %v1226_v22 = vld [vmem:[%s1373_s27 + $0xac] ss:$16 sps:$4 sm:$0xff]   ;;  %v1228_v23 = vld [vmem:[%s1373_s27 + $0xa0] ss:$16 sps:$4 sm:$0xff]   ;;  %v1229_v24 = vld [vmem:[%s1373_s27 + $0xa8] ss:$16 sps:$4 sm:$0xff]  }
  0x1f   : > { %v1230_v25 = vld [vmem:[%s1373_s27 + $0xc4] ss:$16 sps:$4 sm:$0xff]   ;;  %v1232_v26 = vld [vmem:[%s1373_s27 + $0xcc] ss:$16 sps:$4 sm:$0xff]   ;;  %v1234_v27 = vld [vmem:[%s1373_s27 + $0xc0] ss:$16 sps:$4 sm:$0xff]  }
  0x20   : > { %v1235_v28 = vld [vmem:[%s1373_s27 + $0xc8] ss:$16 sps:$4 sm:$0xff]   ;;  %v1236_v29 = vld [vmem:[%s1373_s27 + $0xe4] ss:$16 sps:$4 sm:$0xff]   ;;  %v1238_v30 = vld [vmem:[%s1373_s27 + $0xec] ss:$16 sps:$4 sm:$0xff]  }
  0x21   : > { %753 = vmatpush1.bf16.msra.mxu0 %v1210_v11  ;;  %794 = vmatpush1.bf16.msra.mxu1 %v1211_v12  ;;  %v1240_v31 = vld [vmem:[%s1373_s27 + $0xe0] ss:$16 sps:$4 sm:$0xff]   ;;  %v1241_v32 = vld [vmem:[%s1373_s27 + $0xe8] ss:$16 sps:$4 sm:$0xff]   ;;  %v1242_v33 = vld [vmem:[%s1373_s27 + $0x104] ss:$16 sps:$4 sm:$0xff]  }
  0x22   : > { %754 = vmatprep.subr.bf16.mxu0 %v1212_v13  ;;  %795 = vmatprep.subr.bf16.mxu1 %v1214_v14  ;;  %v1244_v34 = vld [vmem:[%s1373_s27 + $0x10c] ss:$16 sps:$4 sm:$0xff]   ;;  %v1246_v35 = vld [vmem:[%s1373_s27 + $0x100] ss:$16 sps:$4 sm:$0xff]   ;;  %v1247_v36 = vld [vmem:[%s1373_s27 + $0x108] ss:$16 sps:$4 sm:$0xff]  }
  0x23   : > { %v1248_v37 = vld [vmem:[%s1373_s27 + $0x124] ss:$16 sps:$4 sm:$0xff]   ;;  %v1250_v38 = vld [vmem:[%s1373_s27 + $0x12c] ss:$16 sps:$4 sm:$0xff]   ;;  %v1315_v39 = vmov 1966171168  }
  0x24   : > { %v413_v40 = vunpack.c.l.s4 %v1315_v39  ;;  %v1252_v42 = vld [vmem:[%s1373_s27 + $0x120] ss:$16 sps:$4 sm:$0xff]   ;;  %v1253_v43 = vld [vmem:[%s1373_s27 + $0x128] ss:$16 sps:$4 sm:$0xff]   ;;  %v1254_v44 = vld [vmem:[%s1373_s27 + $0x144] ss:$16 sps:$4 sm:$0xff]  }
  0x25   : > { %755 = vmatpush1.bf16.msra.mxu0 %v1216_v15  ;;  %796 = vmatpush1.bf16.msra.mxu1 %v1217_v16  ;;  %v1256_v45 = vld [vmem:[%s1373_s27 + $0x14c] ss:$16 sps:$4 sm:$0xff]   ;;  %v1418_v47 = vshrl.u32 %v415_v41, 7  ;;  %v1258_v48 = vld [vmem:[%s1373_s27 + $0x140] ss:$16 sps:$4 sm:$0xff]   ;;  %p1158_p7 = scmp.ne.s32.totalorder %s1304_s15, 17 }
  0x26   : > { %756 = vmatprep.subr.bf16.mxu0 %v1218_v17  ;;  %797 = vmatprep.subr.bf16.mxu1 %v1220_v18  ;;  %v414_v46 = vunpack.c.0.s8 %v413_v40  ;;  %v1259_v49 = vld [vmem:[%s1373_s27 + $0x148] ss:$16 sps:$4 sm:$0xff]   ;;  %v1260_v50 = vld [vmem:[%s1373_s27 + $0x164] ss:$16 sps:$4 sm:$0xff]   ;;  %v1262_v51 = vld [vmem:[%s1373_s27 + $0x16c] ss:$16 sps:$4 sm:$0xff]  }
  0x27   : > { %v1093_v53 = vld.sshfl [vmem:[%s295_s23] sm:$0x11 pattern:$0x75316420]  ;;  %v1265_v55 = vld [vmem:[%s1373_s27 + $0x168] ss:$16 sps:$4 sm:$0xff]  }
  0x28   : > { %v1425_v52 = vsub.s32 %v414_v46, %v1418_v47  ;;  %v1264_v54 = vld [vmem:[%s1373_s27 + $0x160] ss:$16 sps:$4 sm:$0xff]   ;;  %v411_v56 = vcombine.high %v1093_v53, %v1093_v53  ;;  %v1266_v57 = vld [vmem:[%s1373_s27 + $0x184] ss:$16 sps:$4 sm:$0xff]   ;;  %v1268_v58 = vld [vmem:[%s1373_s27 + $0x18c] ss:$16 sps:$4 sm:$0xff]  }
  0x29   : > { %757 = vmatpush1.bf16.msra.mxu0 %v1222_v19  ;;  %798 = vmatpush1.bf16.msra.mxu1 %v1223_v20  ;;  %v1270_v60 = vld [vmem:[%s1373_s27 + $0x180] ss:$16 sps:$4 sm:$0xff]   ;;  %v1271_v61 = vld [vmem:[%s1373_s27 + $0x188] ss:$16 sps:$4 sm:$0xff]   ;;  %v1272_v62 = vld [vmem:[%s1373_s27 + $0x1a4] ss:$16 sps:$4 sm:$0xff]  }
  0x2a   : > { %758 = vmatprep.subr.bf16.mxu0 %v1224_v21  ;;  %799 = vmatprep.subr.bf16.mxu1 %v1226_v22  ;;  %v425_v59 = vrot.slane %v411_v56, %v1425_v52  ;;  %v1274_v63 = vld [vmem:[%s1373_s27 + $0x1ac] ss:$16 sps:$4 sm:$0xff]   ;;  %v1276_v0 = vld [vmem:[%s1373_s27 + $0x1a0] ss:$16 sps:$4 sm:$0xff]   ;;  %v1277_v1 = vld [vmem:[%s1373_s27 + $0x1a8] ss:$16 sps:$4 sm:$0xff]   ;;  %v418_v10 = vrot.slane %v1093_v53, %v1425_v52 }
  0x2b   : > { %v1278_v2 = vld [vmem:[%s1373_s27 + $0x1c4] ss:$16 sps:$4 sm:$0xff]   ;;  %v1280_v3 = vld [vmem:[%s1373_s27 + $0x1cc] ss:$16 sps:$4 sm:$0xff]   ;;  %v1282_v4 = vld [vmem:[%s1373_s27 + $0x1c0] ss:$16 sps:$4 sm:$0xff]  }
  0x2c   : > { %780 = vmatprep.mubr.bf16.mxu0 %v425_v59  ;;  %821 = vmatprep.mubr.bf16.mxu1 %v425_v59  ;;  %v1283_v5 = vld [vmem:[%s1373_s27 + $0x1c8] ss:$16 sps:$4 sm:$0xff]   ;;  %v1284_v6 = vld [vmem:[%s1373_s27 + $0x1e4] ss:$16 sps:$4 sm:$0xff]   ;;  %v1286_v7 = vld [vmem:[%s1373_s27 + $0x1ec] ss:$16 sps:$4 sm:$0xff]  }
  0x2d   : > { %759 = vmatpush1.bf16.msra.mxu0 %v1228_v23  ;;  %800 = vmatpush1.bf16.msra.mxu1 %v1229_v24  ;;  %v1288_v8 = vld [vmem:[%s1373_s27 + $0x1e0] ss:$16 sps:$4 sm:$0xff]   ;;  %v1289_v9 = vld [vmem:[%s1373_s27 + $0x1e8] ss:$16 sps:$4 sm:$0xff]   ;;  %v1316_v11 = vmov 1983009808  }
  0x2e   : > { %760 = vmatprep.subr.bf16.mxu0 %v1230_v25  ;;  %801 = vmatprep.subr.bf16.mxu1 %v1232_v26  ;;  %v837_v12 = vunpack.c.l.s4 %v1316_v11 }
  0x30   : > { %v838_v13 = vunpack.c.0.s8 %v837_v12 }
  0x31   : > { %761 = vmatpush1.bf16.msra.mxu0 %v1234_v27  ;;  %802 = vmatpush1.bf16.msra.mxu1 %v1235_v28  ;;  %v337_v27 = vld [vmem:[#allocation2] sm:$0xff] }
  0x32   : > { %762 = vmatprep.subr.bf16.mxu0 %v1236_v29  ;;  %803 = vmatprep.subr.bf16.mxu1 %v1238_v30  ;;  %v841_v16 = vsub.s32 %v838_v13, %v1418_v47  ;;  %v859_v30 = vld [vmem:[%s1480_s2] sm:$0xf] (!%p1158_p7) }
  0x35   : > { %763 = vmatpush1.bf16.msra.mxu0 %v1240_v31  ;;  %804 = vmatpush1.bf16.msra.mxu1 %v1241_v32  ;;  %v863_v31 = vsub.s32 (!%p1158_p7), 0, %v1418_v47  ;;  %v867_v32 = vsub.s32 (!%p1158_p7), 1, %v1418_v47 }
  0x36   : > { %764 = vmatprep.subr.bf16.mxu0 %v1242_v33  ;;  %805 = vmatprep.subr.bf16.mxu1 %v1244_v34  ;;  %v871_v33 = vsub.s32 (!%p1158_p7), 2, %v1418_v47  ;;  %v875_v34 = vsub.s32 (!%p1158_p7), 3, %v1418_v47 }
  0x39   : > { %765 = vmatpush1.bf16.msra.mxu0 %v1246_v35  ;;  %806 = vmatpush1.bf16.msra.mxu1 %v1247_v36  ;;  %v864_v35 = vrot.slane (!%p1158_p7), %v859_v30, %v863_v31  ;;  %v868_v36 = vrot.slane (!%p1158_p7), %v859_v30, %v867_v32 }
  0x3a   : > { %766 = vmatprep.subr.bf16.mxu0 %v1248_v37  ;;  %807 = vmatprep.subr.bf16.mxu1 %v1250_v38  ;;  %v872_v37 = vrot.slane (!%p1158_p7), %v859_v30, %v871_v33  ;;  %v876_v38 = vrot.slane (!%p1158_p7), %v859_v30, %v875_v34 }
  0x3b   : > { %v877_v39 = vcombine.low (!%p1158_p7), %v864_v35, %v868_v36 }
  0x3c   : > { %v878_v40 = vcombine.low (!%p1158_p7), %v872_v37, %v876_v38 }
  0x3d   : > { %767 = vmatpush1.bf16.msra.mxu0 %v1252_v42  ;;  %808 = vmatpush1.bf16.msra.mxu1 %v1253_v43  ;;  %v885_v41 = vrot.slane (!%p1158_p7), %v877_v39, %v841_v16  ;;  %v896_v42 = vld [vmem:[%s1481_s3] sm:$0xf] (!%p1158_p7) }
  0x3e   : > { %768 = vmatprep.subr.bf16.mxu0 %v1254_v44  ;;  %809 = vmatprep.subr.bf16.mxu1 %v1256_v45  ;;  %v892_v43 = vrot.slane (!%p1158_p7), %v878_v40, %v841_v16  ;;  %v897_v46 = vunpack.c.l.bf16 (!%p1158_p7), %v896_v42 }
  0x40   : > { %v893_v45 = vcombine.low (!%p1158_p7), %v885_v41, %v892_v43 }
  0x41   : > { %769 = vmatpush1.bf16.msra.mxu0 %v1258_v48  ;;  %810 = vmatpush1.bf16.msra.mxu1 %v1259_v49 }
  0x42   : > { %770 = vmatprep.subr.bf16.mxu0 %v1260_v50  ;;  %811 = vmatprep.subr.bf16.mxu1 %v1262_v51 }
  0x45   : > { %771 = vmatpush1.bf16.msra.mxu0 %v1264_v54  ;;  %812 = vmatpush1.bf16.msra.mxu1 %v1265_v55 }
  0x46   : > { %772 = vmatprep.subr.bf16.mxu0 %v1266_v57  ;;  %813 = vmatprep.subr.bf16.mxu1 %v1268_v58 }
  0x49   : > { %773 = vmatpush1.bf16.msra.mxu0 %v1270_v60  ;;  %814 = vmatpush1.bf16.msra.mxu1 %v1271_v61 }
  0x4a   : > { %774 = vmatprep.subr.bf16.mxu0 %v1272_v62  ;;  %815 = vmatprep.subr.bf16.mxu1 %v1274_v63 }
  0x4d   : > { %775 = vmatpush1.bf16.msra.mxu0 %v1276_v0  ;;  %816 = vmatpush1.bf16.msra.mxu1 %v1277_v1 }
  0x4e   : > { %776 = vmatprep.subr.bf16.mxu0 %v1278_v2  ;;  %817 = vmatprep.subr.bf16.mxu1 %v1280_v3 }
  0x51   : > { %777 = vmatpush1.bf16.msra.mxu0 %v1282_v4  ;;  %818 = vmatpush1.bf16.msra.mxu1 %v1283_v5 }
  0x52   : > { %778 = vmatprep.subr.bf16.mxu0 %v1284_v6  ;;  %819 = vmatprep.subr.bf16.mxu1 %v1286_v7 }
  0x55   : > { %779 = vmatpush1.bf16.msra.mxu0 %v1288_v8  ;;  %820 = vmatpush1.bf16.msra.mxu1 %v1289_v9 }
  0x58   : > { %781 = vmatmul.mubr.bf16.vlgmr.msra.gmra.mrb[0].mxu0 %v418_v10  ;;  %822 = vmatmul.mubr.bf16.vlgmr.msra.gmra.mrb[0].mxu1 %v418_v10 }
 0x12b   : > { %v782_v14 = vpop.f32.mrb[0].mxu0  ;;  %v823_v15 = vpop.f32.mrb[0].mxu1 }
 0x12c   : > { %v784_v17 = vpop.f32.mrb[1].mxu0  ;;  %v825_v18 = vpop.f32.mrb[1].mxu1 }
 0x12d   : > { %v834_v19 = vcombine.low %v782_v14, %v784_v17  ;;  %v835_v20 = vcombine.low %v823_v15, %v825_v18  ;;  %v786_v21 = vpop.f32.mrb[2].mxu0  ;;  %v827_v22 = vpop.f32.mrb[2].mxu1 }
 0x12e   : > { %v787_v23 = vpop.f32.mrb[3].mxu0  ;;  %v828_v24 = vpop.f32.mrb[3].mxu1 }
 0x12f   : > { %v842_v25 = vrot.slane %v834_v19, %v841_v16  ;;  %v849_v26 = vrot.slane %v835_v20, %v841_v16  ;;  %857 = sbr.rel (%p1158_p7) target bundleno = 336 (0x150), region = 44 }
 0x131   : > { %v850_v28 = vcombine.low %v842_v25, %v849_v26 }
 0x133   : > { %v852_v29 = vadd.f32 %v850_v28, %v337_v27 }
 0x135   : > { %853 = vst [vmem:[#allocation2] sm:$0xff] %v852_v29 }
 0x13c   : > { %v858_v44 = vld [vmem:[#allocation2] sm:$0xff] }
 0x13d   : > { %v895_v48 = vadd.f32 %v893_v45, %v858_v44 }
 0x13f   : > { %v898_v49 = vadd.f32 %v897_v46, %v895_v48 }
 0x141   : > { %v899_v50 = vmax.f32 %v898_v49, 0.0 }
 0x143   : > { %v901_v51 = vcombine.high %v899_v50, %v899_v50  ;;  %v908_v47 = vrot.slane %v899_v50, %v841_v16 }
 0x145   : > { %v915_v53 = vrot.slane %v901_v51, %v841_v16  ;;  %v916_v54 = vcombine.high %v908_v47, %v908_v47 }
 0x147   : > { %v917_v55 = vcombine.high %v915_v53, %v915_v53  ;;  %v1159_v56 = vpack.c.bf16 %v916_v54, %v908_v47 }
 0x149   : > { %v1160_v57 = vpack.c.bf16 %v917_v55, %v915_v53  ;;  %v938_v58 = vrot.slane %v1159_v56, %v1425_v52 }
 0x14b   : > { %v945_v59 = vrot.slane %v1160_v57, %v1425_v52 }
 0x14d   : > { %v946_v60 = vcombine.low %v938_v58, %v945_v59 }
 0x14f   : > { %1161 = vst.sshfl [vmem:[%s1482_s4] sm:$0x55 pattern:$0x73625140] %v946_v60 }
 0x150 PF: > { %s14_s17 = sadd.s32 1, %s1312_s17   ;;  %s1483_s15 = smov %s1308_s16 }
 0x151   : > { %p11_p8 = scmp.ge.s32.totalorder %s14_s17, 20   ;;  %s1484_s16 = smov %s1486_s18 }
 0x153   :  { %13 = sbr.rel (!%p11_p8) target bundleno = 2 (0x2), region = 83 }

// kernel: ingredient_net_forward.65
= control target key start
LH: loop header
LB: loop body
LE: loop exit
PB: predicated region body
PF: predicated region fallthrough
CT: control target
= control target key end

     0   :  { %s718_s12 = smov 0   ;;  %s720_s13 = smov 0   ;;  %s784_s0 = inlined_call_operand.vmem [shape: bf16[2,512], index: 0, kind: input, shape index: {}]   ;;  %s785_s1 = inlined_call_operand.vmem [shape: bf16[512,64], index: 1, kind: input, shape index: {}]   ;;  %s786_s2 = inlined_call_operand.vmem [shape: f32[1,64], index: 2, kind: input, shape index: {}]   ;;  %s787_s3 = inlined_call_operand.vmem [shape: f32[2,64], index: 3, kind: output, shape index: {}]  }
   0x1   :  { %s722_s14 = smov 0  }
   0x2 LB: > { %s25_s15 = sadd.s32 1, %s690_s13  ;;  %p581_p0 = scmp.ge.s32.totalorder %s694_s14, 1  ;;  %s694_s14 = sphi %s722_s14, %s13_s14   ;;  %s690_s13 = sphi %s720_s13, %s789_s13   ;;  %s686_s12 = sphi %s718_s12, %s788_s12  }
   0x3   : > { %p26_p1 = scmp.ge.s32.totalorder %s25_s15, 2  ;;  %p188_p2 = scmp.lt.s32.totalorder %s694_s14, 3 }
   0x5   : > { %s791_s15 = smov (%p26_p1, %s25_s15), 0  ;;  %p189_p3 = pnand %p581_p0, %p188_p2 }
   0x6   : > { %s582_s16 = sshll.u32 (!%p189_p3), %s686_s12, 1  ;;  %s583_s17 = sshll.u32 (!%p189_p3), %s686_s12, 5 }
   0x7   : > { %192 = sbr.rel (%p189_p3) target bundleno = 284 (0x11c), region = 32  ;;  %p231_p4 = scmp.lt.s32.totalorder (!%p189_p3), %s582_s16, 3 }
   0x8   : > { %p238_p5 = scmp.lt.s32.totalorder (!%p189_p3), %s583_s17, 63  ;;  %p585_p6 = scmp.ne.s32.totalorder (!%p189_p3), %s686_s12, 0 }
   0xe   : > { %s793_s16 = smov (!%p231_p4, %s582_s16), 3  ;;  %s795_s17 = smov (!%p238_p5, %s583_s17), 63 }
   0xf   : > { %s235_s20 = scalar_lea.vmem %s784_s0, %s793_s16  ;;  %s584_s21 = sshll.u32 %s795_s17, 2  ;;  %vm261_vm0 = vcmask (!%p585_p6), 517120   ;;  %v696_v0 = vmov (!%p585_p6), 0.0  }
  0x10   : > { %s749_s24 = scalar_lea.vmem %s785_s1, %s584_s21  ;;  %260 = sbr.rel (%p585_p6) target bundleno = 23 (0x17), region = 36  ;;  %262 = vst.msk [vmem:[#allocation2] sm:$0x3] (!%p585_p6), %vm261_vm0, %v696_v0 }
  0x17 PF: > { %v656_v1 = vld [vmem:[%s749_s24 + $0x40] sm:$0xff]   ;;  %v658_v3 = vld [vmem:[%s749_s24 + $0x48] sm:$0xff]   ;;  %v660_v5 = vld [vmem:[%s749_s24 + $0x50] sm:$0xff]   ;;  %v309_v10 = vlaneseq  ;;  %v697_v14 = vmov 1966171168   ;;  %vm459_vm1 = vcmask 517120  }
  0x18   : > { %v657_v2 = vld [vmem:[%s749_s24] sm:$0xff]   ;;  %608 = vmatprep.subr.bf16.mxu0 %v656_v1  ;;  %v659_v4 = vld [vmem:[%s749_s24 + $0x8] sm:$0xff]   ;;  %v661_v6 = vld [vmem:[%s749_s24 + $0x10] sm:$0xff]   ;;  %v307_v15 = vunpack.c.l.s4 %v697_v14  ;;  %p603_p7 = scmp.ne.s32.totalorder %s686_s12, 1 }
  0x19   : > { %609 = vmatpush3.bf16.msra.mxu0 %v657_v2  ;;  %v662_v7 = vld [vmem:[%s749_s24 + $0x58] sm:$0xff]   ;;  %v664_v9 = vld [vmem:[%s749_s24 + $0x60] sm:$0xff]   ;;  %v666_v12 = vld [vmem:[%s749_s24 + $0x68] sm:$0xff]   ;;  %v310_v16 = vshrl.u32 %v309_v10, 7 }
  0x1a   : > { %610 = vmatprep.subr.bf16.mxu0 %v658_v3  ;;  %v663_v8 = vld [vmem:[%s749_s24 + $0x18] sm:$0xff]   ;;  %v665_v11 = vld [vmem:[%s749_s24 + $0x20] sm:$0xff]   ;;  %v667_v17 = vld [vmem:[%s749_s24 + $0x28] sm:$0xff]   ;;  %v308_v19 = vunpack.c.0.s8 %v307_v15 }
  0x1b   : > { %v586_v13 = vld.sshfl [vmem:[%s235_s20] sm:$0x11 pattern:$0x75316420]  ;;  %v668_v20 = vld [vmem:[%s749_s24 + $0x70] sm:$0xff]   ;;  %v670_v24 = vld [vmem:[%s749_s24 + $0x78] sm:$0xff]  }
  0x1c   : > { %v305_v18 = vcombine.high %v586_v13, %v586_v13  ;;  %v311_v21 = vsub.s32 %v308_v19, %v310_v16  ;;  %v669_v22 = vld [vmem:[%s749_s24 + $0x30] sm:$0xff]   ;;  %v671_v25 = vld [vmem:[%s749_s24 + $0x38] sm:$0xff]   ;;  %v263_v28 = vld [vmem:[#allocation2] sm:$0x3] }
  0x1d   : > { %611 = vmatpush3.bf16.msra.mxu0 %v659_v4  ;;  %v604_v35 = vld [vmem:[%s786_s2] ss:$0 sm:$0xff] (!%p603_p7) }
  0x1e   : > { %612 = vmatprep.subr.bf16.mxu0 %v660_v5  ;;  %v319_v23 = vrot.slane %v305_v18, %v311_v21  ;;  %v312_v26 = vrot.slane %v586_v13, %v311_v21 }
  0x20   : > { %450 = vmatprep.mubr.bf16.mxu0 %v319_v23 }
  0x21   : > { %613 = vmatpush3.bf16.msra.mxu0 %v661_v6 }
  0x22   : > { %614 = vmatprep.subr.bf16.mxu0 %v662_v7 }
  0x25   : > { %615 = vmatpush3.bf16.msra.mxu0 %v663_v8 }
  0x26   : > { %616 = vmatprep.subr.bf16.mxu0 %v664_v9 }
  0x29   : > { %617 = vmatpush3.bf16.msra.mxu0 %v665_v11 }
  0x2a   : > { %618 = vmatprep.subr.bf16.mxu0 %v666_v12 }
  0x2d   : > { %619 = vmatpush3.bf16.msra.mxu0 %v667_v17 }
  0x2e   : > { %620 = vmatprep.subr.bf16.mxu0 %v668_v20 }
  0x31   : > { %621 = vmatpush3.bf16.msra.mxu0 %v669_v22 }
  0x32   : > { %622 = vmatprep.subr.bf16.mxu0 %v670_v24 }
  0x35   : > { %623 = vmatpush3.bf16.msra.mxu0 %v671_v25 }
  0x38   : > { %451 = vmatmul.mubr.bf16.vlgmr.msra.gmra.mrb[0].mxu0 %v312_v26 }
 0x10b   : > { %v624_v27 = vpop.f32.mrb[0].mxu0  ;;  %464 = sbr.rel (%p603_p7) target bundleno = 284 (0x11c), region = 40 }
 0x10c   : > { %v625_v29 = vpop.f32.mrb[1].mxu0 }
 0x10d   : > { %v626_v30 = vadd.f32 %v625_v29, %v624_v27  ;;  %v627_v31 = vpop.f32.mrb[2].mxu0 }
 0x10e   : > { %v628_v32 = vpop.f32.mrb[3].mxu0 }
 0x10f   : > { %v458_v33 = vadd.f32 %v626_v30, %v263_v28 }
 0x111   : > { %460 = vst.msk [vmem:[#allocation2] sm:$0x3] %vm459_vm1, %v458_v33 }
 0x118   : > { %v465_v34 = vld [vmem:[#allocation2] sm:$0x3] }
 0x119   : > { %v473_v36 = vadd.f32 %v604_v35, %v465_v34 }
 0x11b   : > { %474 = vst.msk [vmem:[%s787_s3] sm:$0x3] %vm459_vm1, %v473_v36 }
 0x11c PF: > { %s13_s14 = sadd.s32 1, %s694_s14   ;;  %s788_s12 = smov %s690_s13 }
 0x11d   : > { %p10_p8 = scmp.ge.s32.totalorder %s13_s14, 4   ;;  %s789_s13 = smov %s791_s15 }
 0x11f   :  { %12 = sbr.rel (!%p10_p8) target bundleno = 2 (0x2), region = 76 }

// kernel: ingredient_net_forward.87
= control target key start
LH: loop header
LB: loop body
LE: loop exit
PB: predicated region body
PF: predicated region fallthrough
CT: control target
= control target key end

     0   :  { %s1051_s12 = smov 0   ;;  %s1053_s13 = smov 0   ;;  %s1228_s0 = inlined_call_operand.vmem [shape: bf16[2,128], index: 0, kind: input, shape index: {}]   ;;  %s1229_s1 = inlined_call_operand.vmem [shape: bf16[128,1024], index: 1, kind: input, shape index: {}]   ;;  %s1230_s2 = inlined_call_operand.vmem [shape: f32[1,1024], index: 2, kind: input, shape index: {}]   ;;  %s1231_s3 = inlined_call_operand.vmem [shape: bf16[2,1024], index: 3, kind: output, shape index: {}]  }
   0x1   :  { %s1055_s14 = smov 0   ;;  %s1057_s15 = smov 0  }
   0x2   :  { %s1059_s16 = smov 0  }
   0x3 LB: > { %s28_s17 = sadd.s32 1, %s1022_s15  ;;  %p76_p1 = scmp.ne.s32.totalorder %s1014_s13, %s1010_s12  ;;  %s1026_s16 = sphi %s1059_s16, %s13_s16   ;;  %s1022_s15 = sphi %s1057_s15, %s1235_s15   ;;  %s1018_s14 = sphi %s1055_s14, %s1234_s14   ;;  %s1014_s13 = sphi %s1053_s13, %s1233_s13   ;;  %s1010_s12 = sphi %s1051_s12, %s1232_s12  }
   0x4   : > { %p30_p0 = scmp.ge.s32.totalorder %s28_s17, 2  ;;  %p77_p2 = scmp.eq.s32.totalorder %s1026_s16, 0 }
   0x5   : > { %s69_s19 = sadd.s32 1, %s1014_s13  ;;  %p851_p5 = scmp.ge.s32.totalorder %s1026_s16, 2 }
   0x6   : > { %s1237_s17 = smov (%p30_p0, %s28_s17), 0  ;;  %p78_p3 = por %p77_p2, %p76_p1 }
   0x7   : > { %s65_s18 = ssub.s32 %s1022_s15, %s1237_s17  ;;  %165 = sbr.rel (%p851_p5) target bundleno = 34 (0x22), region = 20 }
   0x8   : > { %p67_p4 = scmp.eq.s32.totalorder %s65_s18, 0 }
   0xa   : > { %s1086_s20 = scalar_select %p67_p4, %s1014_s13, %s69_s19  }
   0xe   : > { %168 = sbr.rel (!%p78_p3) target bundleno = 34 (0x22), region = 24  ;;  %s170_s21 = sand.u32 (%p78_p3), 1, %s1014_s13  }
   0xf   : > { %s896_s22 = sshll.u32 (%p78_p3), %s1022_s15, 4  ;;  %s852_s23 = sshll.u32 (%p78_p3), %s170_s21, 8 }
  0x10   : > { %s1094_s26 = scalar_lea.vmem (%p78_p3), %s1229_s1, %s896_s22  ;;  %s1099_s27 = scalar_lea.vmem (%p78_p3), [#allocation3], %s852_s23 }
  0x11   : > { %v191_v0 = vld [vmem:[%s1094_s26] sm:$0xff] (%p78_p3)  ;;  %v193_v1 = vld [vmem:[%s1094_s26 + $0x8] sm:$0xff] (%p78_p3) }
  0x12   : > { %v195_v2 = vld [vmem:[%s1094_s26 + $0x20] sm:$0xff] (%p78_p3)  ;;  %192 = vst [vmem:[%s1099_s27] sm:$0xff] (%p78_p3), %v191_v0  ;;  %194 = vst [vmem:[%s1099_s27 + $0x8] sm:$0xff] (%p78_p3), %v193_v1  ;;  %v197_v3 = vld [vmem:[%s1094_s26 + $0x28] sm:$0xff] (%p78_p3) }
  0x13   : > { %196 = vst [vmem:[%s1099_s27 + $0x10] sm:$0xff] (%p78_p3), %v195_v2  ;;  %v199_v4 = vld [vmem:[%s1094_s26 + $0x40] sm:$0xff] (%p78_p3)  ;;  %v201_v5 = vld [vmem:[%s1094_s26 + $0x48] sm:$0xff] (%p78_p3)  ;;  %198 = vst [vmem:[%s1099_s27 + $0x18] sm:$0xff] (%p78_p3), %v197_v3 }
  0x14   : > { %200 = vst [vmem:[%s1099_s27 + $0x20] sm:$0xff] (%p78_p3), %v199_v4  ;;  %202 = vst [vmem:[%s1099_s27 + $0x28] sm:$0xff] (%p78_p3), %v201_v5  ;;  %v203_v6 = vld [vmem:[%s1094_s26 + $0x60] sm:$0xff] (%p78_p3)  ;;  %v205_v7 = vld [vmem:[%s1094_s26 + $0x68] sm:$0xff] (%p78_p3) }
  0x15   : > { %v207_v8 = vld [vmem:[%s1094_s26 + $0x80] sm:$0xff]  ;;  %204 = vst [vmem:[%s1099_s27 + $0x30] sm:$0xff] %v203_v6  ;;  %206 = vst [vmem:[%s1099_s27 + $0x38] sm:$0xff] %v205_v7  ;;  %v209_v9 = vld [vmem:[%s1094_s26 + $0x88] sm:$0xff] }
  0x16   : > { %208 = vst [vmem:[%s1099_s27 + $0x40] sm:$0xff] %v207_v8  ;;  %v211_v10 = vld [vmem:[%s1094_s26 + $0xa0] sm:$0xff]  ;;  %v213_v11 = vld [vmem:[%s1094_s26 + $0xa8] sm:$0xff]  ;;  %210 = vst [vmem:[%s1099_s27 + $0x48] sm:$0xff] %v209_v9 }
  0x17   : > { %212 = vst [vmem:[%s1099_s27 + $0x50] sm:$0xff] %v211_v10  ;;  %214 = vst [vmem:[%s1099_s27 + $0x58] sm:$0xff] %v213_v11  ;;  %v215_v12 = vld [vmem:[%s1094_s26 + $0xc0] sm:$0xff]  ;;  %v217_v13 = vld [vmem:[%s1094_s26 + $0xc8] sm:$0xff] }
  0x18   : > { %v219_v14 = vld [vmem:[%s1094_s26 + $0xe0] sm:$0xff]  ;;  %216 = vst [vmem:[%s1099_s27 + $0x60] sm:$0xff] %v215_v12  ;;  %218 = vst [vmem:[%s1099_s27 + $0x68] sm:$0xff] %v217_v13  ;;  %v221_v15 = vld [vmem:[%s1094_s26 + $0xe8] sm:$0xff] }
  0x19   : > { %220 = vst [vmem:[%s1099_s27 + $0x70] sm:$0xff] %v219_v14  ;;  %v223_v16 = vld [vmem:[%s1094_s26 + $0x100] sm:$0xff]  ;;  %v225_v17 = vld [vmem:[%s1094_s26 + $0x108] sm:$0xff]  ;;  %222 = vst [vmem:[%s1099_s27 + $0x78] sm:$0xff] %v221_v15 }
  0x1a   : > { %224 = vst [vmem:[%s1099_s27 + $0x80] sm:$0xff] %v223_v16  ;;  %226 = vst [vmem:[%s1099_s27 + $0x88] sm:$0xff] %v225_v17  ;;  %v227_v18 = vld [vmem:[%s1094_s26 + $0x120] sm:$0xff]  ;;  %v229_v19 = vld [vmem:[%s1094_s26 + $0x128] sm:$0xff] }
  0x1b   : > { %v231_v20 = vld [vmem:[%s1094_s26 + $0x140] sm:$0xff]  ;;  %228 = vst [vmem:[%s1099_s27 + $0x90] sm:$0xff] %v227_v18  ;;  %230 = vst [vmem:[%s1099_s27 + $0x98] sm:$0xff] %v229_v19  ;;  %v233_v21 = vld [vmem:[%s1094_s26 + $0x148] sm:$0xff] }
  0x1c   : > { %232 = vst [vmem:[%s1099_s27 + $0xa0] sm:$0xff] %v231_v20  ;;  %v235_v22 = vld [vmem:[%s1094_s26 + $0x160] sm:$0xff]  ;;  %v237_v23 = vld [vmem:[%s1094_s26 + $0x168] sm:$0xff]  ;;  %234 = vst [vmem:[%s1099_s27 + $0xa8] sm:$0xff] %v233_v21 }
  0x1d   : > { %236 = vst [vmem:[%s1099_s27 + $0xb0] sm:$0xff] %v235_v22  ;;  %238 = vst [vmem:[%s1099_s27 + $0xb8] sm:$0xff] %v237_v23  ;;  %v239_v24 = vld [vmem:[%s1094_s26 + $0x180] sm:$0xff]  ;;  %v241_v25 = vld [vmem:[%s1094_s26 + $0x188] sm:$0xff] }
  0x1e   : > { %v243_v26 = vld [vmem:[%s1094_s26 + $0x1a0] sm:$0xff]  ;;  %240 = vst [vmem:[%s1099_s27 + $0xc0] sm:$0xff] %v239_v24  ;;  %242 = vst [vmem:[%s1099_s27 + $0xc8] sm:$0xff] %v241_v25  ;;  %v245_v27 = vld [vmem:[%s1094_s26 + $0x1a8] sm:$0xff] }
  0x1f   : > { %244 = vst [vmem:[%s1099_s27 + $0xd0] sm:$0xff] %v243_v26  ;;  %v247_v28 = vld [vmem:[%s1094_s26 + $0x1c0] sm:$0xff]  ;;  %v249_v29 = vld [vmem:[%s1094_s26 + $0x1c8] sm:$0xff]  ;;  %246 = vst [vmem:[%s1099_s27 + $0xd8] sm:$0xff] %v245_v27 }
  0x20   : > { %248 = vst [vmem:[%s1099_s27 + $0xe0] sm:$0xff] %v247_v28  ;;  %250 = vst [vmem:[%s1099_s27 + $0xe8] sm:$0xff] %v249_v29  ;;  %v251_v30 = vld [vmem:[%s1094_s26 + $0x1e0] sm:$0xff]  ;;  %v253_v31 = vld [vmem:[%s1094_s26 + $0x1e8] sm:$0xff] }
  0x21   : > { %252 = vst [vmem:[%s1099_s27 + $0xf0] sm:$0xff] %v251_v30  ;;  %254 = vst [vmem:[%s1099_s27 + $0xf8] sm:$0xff] %v253_v31 }
  0x22 PF: > { %p855_p6 = scmp.ge.s32.totalorder %s1026_s16, 1  ;;  %p267_p7 = scmp.lt.s32.totalorder %s1026_s16, 3 }
  0x24   : > { %p268_p8 = pnand %p855_p6, %p267_p7 }
  0x25   : > { %s274_s28 = sand.u32 (!%p268_p8), 1, %s1010_s12   ;;  %v1028_v32 = vmov (!%p268_p8), 0   ;;  %v339_v1 = vld [vmem:[%s1228_s0] sm:$0x1] (!%p268_p8)  ;;  %s857_s6 = sshll.u32 (!%p268_p8), %s1018_s14, 2  ;;  %v623_v2 = vlaneseq (!%p268_p8) }
  0x26   : > { %271 = sbr.rel (%p268_p8) target bundleno = 309 (0x135), region = 51  ;;  %s856_s29 = sshll.u32 (!%p268_p8), %s274_s28, 8  ;;  %564 = vmatprep.mubr.bf16.mxu0 (!%p268_p8), %v1028_v32  ;;  %605 = vmatprep.mubr.bf16.mxu1 (!%p268_p8), %v1028_v32  ;;  %v1029_v4 = vmov (!%p268_p8), 1983009808  }
  0x27   : > { %s1165_s30 = scalar_lea.vmem (!%p268_p8), [#allocation3], %s856_s29  ;;  %p319_p9 = scmp.lt.s32.totalorder (!%p268_p8), %s857_s6, 7  ;;  %v624_v3 = vshrl.u32 (!%p268_p8), %v623_v2, 7  ;;  %v621_v5 = vunpack.c.l.s4 (!%p268_p8), %v1029_v4 }
  0x28   : > { %v940_v33 = vld [vmem:[%s1165_s30 + $0x4] ss:$16 sps:$4 sm:$0xff] (!%p268_p8)   ;;  %v942_v34 = vld [vmem:[%s1165_s30 + $0xc] ss:$16 sps:$4 sm:$0xff] (!%p268_p8)   ;;  %v944_v35 = vld [vmem:[%s1165_s30] ss:$16 sps:$4 sm:$0xff] (!%p268_p8)  }
  0x29   : > { %532 = vmatprep.subr.bf16.mxu0 (!%p268_p8), %v940_v33  ;;  %v945_v36 = vld [vmem:[%s1165_s30 + $0x8] ss:$16 sps:$4 sm:$0xff] (!%p268_p8)   ;;  %573 = vmatprep.subr.bf16.mxu1 (!%p268_p8), %v942_v34  ;;  %v946_v37 = vld [vmem:[%s1165_s30 + $0x24] ss:$16 sps:$4 sm:$0xff] (!%p268_p8)   ;;  %v948_v38 = vld [vmem:[%s1165_s30 + $0x2c] ss:$16 sps:$4 sm:$0xff] (!%p268_p8)   ;;  %v622_v11 = vunpack.c.0.s8 (!%p268_p8), %v621_v5 }
  0x2a   : > { %533 = vmatpush1.bf16.msra.mxu0 (!%p268_p8), %v944_v35  ;;  %574 = vmatpush1.bf16.msra.mxu1 (!%p268_p8), %v945_v36  ;;  %v950_v39 = vld [vmem:[%s1165_s30 + $0x20] ss:$16 sps:$4 sm:$0xff] (!%p268_p8)   ;;  %v951_v40 = vld [vmem:[%s1165_s30 + $0x28] ss:$16 sps:$4 sm:$0xff] (!%p268_p8)   ;;  %v952_v41 = vld [vmem:[%s1165_s30 + $0x44] ss:$16 sps:$4 sm:$0xff] (!%p268_p8)  }
  0x2b   : > { %534 = vmatprep.subr.bf16.mxu0 (!%p268_p8), %v946_v37  ;;  %575 = vmatprep.subr.bf16.mxu1 (!%p268_p8), %v948_v38  ;;  %v954_v42 = vld [vmem:[%s1165_s30 + $0x4c] ss:$16 sps:$4 sm:$0xff] (!%p268_p8)   ;;  %v956_v43 = vld [vmem:[%s1165_s30 + $0x40] ss:$16 sps:$4 sm:$0xff] (!%p268_p8)   ;;  %v957_v44 = vld [vmem:[%s1165_s30 + $0x48] ss:$16 sps:$4 sm:$0xff] (!%p268_p8)   ;;  %v625_v16 = vsub.s32 (!%p268_p8), %v622_v11, %v624_v3 }
  0x2c   : > { %v958_v45 = vld [vmem:[%s1165_s30 + $0x64] ss:$16 sps:$4 sm:$0xff] (!%p268_p8)   ;;  %v960_v46 = vld [vmem:[%s1165_s30 + $0x6c] ss:$16 sps:$4 sm:$0xff] (!%p268_p8)   ;;  %v962_v47 = vld [vmem:[%s1165_s30 + $0x60] ss:$16 sps:$4 sm:$0xff] (!%p268_p8)  }
  0x2d   : > { %v963_v48 = vld [vmem:[%s1165_s30 + $0x68] ss:$16 sps:$4 sm:$0xff]   ;;  %v964_v49 = vld [vmem:[%s1165_s30 + $0x84] ss:$16 sps:$4 sm:$0xff]   ;;  %v966_v50 = vld [vmem:[%s1165_s30 + $0x8c] ss:$16 sps:$4 sm:$0xff]  }
  0x2e   : > { %535 = vmatpush1.bf16.msra.mxu0 %v950_v39  ;;  %576 = vmatpush1.bf16.msra.mxu1 %v951_v40  ;;  %v968_v51 = vld [vmem:[%s1165_s30 + $0x80] ss:$16 sps:$4 sm:$0xff]   ;;  %v969_v52 = vld [vmem:[%s1165_s30 + $0x88] ss:$16 sps:$4 sm:$0xff]   ;;  %v970_v53 = vld [vmem:[%s1165_s30 + $0xa4] ss:$16 sps:$4 sm:$0xff]  }
  0x2f   : > { %536 = vmatprep.subr.bf16.mxu0 %v952_v41  ;;  %577 = vmatprep.subr.bf16.mxu1 %v954_v42  ;;  %v972_v54 = vld [vmem:[%s1165_s30 + $0xac] ss:$16 sps:$4 sm:$0xff]   ;;  %v974_v55 = vld [vmem:[%s1165_s30 + $0xa0] ss:$16 sps:$4 sm:$0xff]   ;;  %v975_v56 = vld [vmem:[%s1165_s30 + $0xa8] ss:$16 sps:$4 sm:$0xff]  }
  0x30   : > { %v976_v57 = vld [vmem:[%s1165_s30 + $0xc4] ss:$16 sps:$4 sm:$0xff]   ;;  %v978_v58 = vld [vmem:[%s1165_s30 + $0xcc] ss:$16 sps:$4 sm:$0xff]   ;;  %v980_v59 = vld [vmem:[%s1165_s30 + $0xc0] ss:$16 sps:$4 sm:$0xff]  }
  0x31   : > { %v981_v60 = vld [vmem:[%s1165_s30 + $0xc8] ss:$16 sps:$4 sm:$0xff]   ;;  %v982_v61 = vld [vmem:[%s1165_s30 + $0xe4] ss:$16 sps:$4 sm:$0xff]   ;;  %v984_v62 = vld [vmem:[%s1165_s30 + $0xec] ss:$16 sps:$4 sm:$0xff]  }
  0x32   : > { %537 = vmatpush1.bf16.msra.mxu0 %v956_v43  ;;  %578 = vmatpush1.bf16.msra.mxu1 %v957_v44  ;;  %v986_v63 = vld [vmem:[%s1165_s30 + $0xe0] ss:$16 sps:$4 sm:$0xff]   ;;  %v987_v0 = vld [vmem:[%s1165_s30 + $0xe8] ss:$16 sps:$4 sm:$0xff]   ;;  %s1239_s6 = smov (!%p319_p9, %s857_s6), 7  ;;  %v646_v6 = vsub.s32 0, %v624_v3 }
  0x33   : > { %538 = vmatprep.subr.bf16.mxu0 %v958_v45  ;;  %579 = vmatprep.subr.bf16.mxu1 %v960_v46  ;;  %s321_s9 = scalar_lea.vmem %s1230_s2, %s1239_s6  ;;  %v650_v7 = vsub.s32 1, %v624_v3  ;;  %v654_v8 = vsub.s32 2, %v624_v3  ;;  %v658_v9 = vsub.s32 3, %v624_v3  ;;  %v1030_v36 = vmov 1966171168   ;;  %s330_s12 = scalar_lea.vmem %s1231_s3, %s1239_s6 }
  0x34   : > { %v642_v10 = vld [vmem:[%s321_s9] sm:$0xf]  ;;  %v713_v37 = vunpack.c.l.s4 %v1030_v36 }
  0x35   : > { %v647_v12 = vrot.slane %v642_v10, %v646_v6  ;;  %v651_v13 = vrot.slane %v642_v10, %v650_v7  ;;  %v655_v14 = vrot.slane %v642_v10, %v654_v8  ;;  %v659_v15 = vrot.slane %v642_v10, %v658_v9 }
  0x36   : > { %539 = vmatpush1.bf16.msra.mxu0 %v962_v47  ;;  %580 = vmatpush1.bf16.msra.mxu1 %v963_v48  ;;  %v714_v41 = vunpack.c.0.s8 %v713_v37 }
  0x37   : > { %540 = vmatprep.subr.bf16.mxu0 %v964_v49  ;;  %581 = vmatprep.subr.bf16.mxu1 %v966_v50  ;;  %v660_v17 = vcombine.low %v647_v12, %v651_v13  ;;  %v661_v18 = vcombine.low %v655_v14, %v659_v15 }
  0x38   : > { %v717_v46 = vsub.s32 %v714_v41, %v624_v3 }
  0x39   : > { %v668_v21 = vrot.slane %v660_v17, %v625_v16  ;;  %v675_v22 = vrot.slane %v661_v18, %v625_v16 }
  0x3a   : > { %541 = vmatpush1.bf16.msra.mxu0 %v968_v51  ;;  %582 = vmatpush1.bf16.msra.mxu1 %v969_v52 }
  0x3b   : > { %542 = vmatprep.subr.bf16.mxu0 %v970_v53  ;;  %583 = vmatprep.subr.bf16.mxu1 %v972_v54  ;;  %v676_v33 = vcombine.low %v668_v21, %v675_v22 }
  0x3e   : > { %543 = vmatpush1.bf16.msra.mxu0 %v974_v55  ;;  %584 = vmatpush1.bf16.msra.mxu1 %v975_v56 }
  0x3f   : > { %544 = vmatprep.subr.bf16.mxu0 %v976_v57  ;;  %585 = vmatprep.subr.bf16.mxu1 %v978_v58 }
  0x42   : > { %545 = vmatpush1.bf16.msra.mxu0 %v980_v59  ;;  %586 = vmatpush1.bf16.msra.mxu1 %v981_v60 }
  0x43   : > { %546 = vmatprep.subr.bf16.mxu0 %v982_v61  ;;  %587 = vmatprep.subr.bf16.mxu1 %v984_v62 }
  0x46   : > { %547 = vmatpush1.bf16.msra.mxu0 %v986_v63  ;;  %588 = vmatpush1.bf16.msra.mxu1 %v987_v0 }
  0x49   : > { %565 = vmatmul.mubr.bf16.vlgmr.msra.gmra.mrb[0].mxu0 %v339_v1  ;;  %606 = vmatmul.mubr.bf16.vlgmr.msra.gmra.mrb[0].mxu1 %v339_v1 }
 0x11c   : > { %v566_v19 = vpop.f32.mrb[0].mxu0  ;;  %v607_v20 = vpop.f32.mrb[0].mxu1 }
 0x11d   : > { %v568_v23 = vpop.f32.mrb[1].mxu0  ;;  %v609_v24 = vpop.f32.mrb[1].mxu1 }
 0x11e   : > { %v618_v25 = vcombine.low %v566_v19, %v568_v23  ;;  %v619_v26 = vcombine.low %v607_v20, %v609_v24  ;;  %v570_v27 = vpop.f32.mrb[2].mxu0  ;;  %v611_v28 = vpop.f32.mrb[2].mxu1 }
 0x11f   : > { %v571_v29 = vpop.f32.mrb[3].mxu0  ;;  %v612_v30 = vpop.f32.mrb[3].mxu1 }
 0x120   : > { %v626_v31 = vrot.slane %v618_v25, %v625_v16  ;;  %v633_v32 = vrot.slane %v619_v26, %v625_v16 }
 0x122   : > { %v634_v34 = vcombine.low %v626_v31, %v633_v32 }
 0x124   : > { %v678_v35 = vadd.f32 %v676_v33, %v634_v34 }
 0x126   : > { %v679_v38 = vmax.f32 %v678_v35, 0.0 }
 0x128   : > { %v681_v39 = vcombine.high %v679_v38, %v679_v38  ;;  %v688_v40 = vrot.slane %v679_v38, %v625_v16 }
 0x12a   : > { %v695_v42 = vrot.slane %v681_v39, %v625_v16  ;;  %v696_v43 = vcombine.high %v688_v40, %v688_v40 }
 0x12c   : > { %v697_v44 = vcombine.high %v695_v42, %v695_v42  ;;  %v891_v45 = vpack.c.bf16 %v696_v43, %v688_v40 }
 0x12e   : > { %v892_v47 = vpack.c.bf16 %v697_v44, %v695_v42  ;;  %v718_v48 = vrot.slane %v891_v45, %v717_v46 }
 0x130   : > { %v725_v49 = vrot.slane %v892_v47, %v717_v46 }
 0x132   : > { %v726_v50 = vcombine.low %v718_v48, %v725_v49 }
 0x134   : > { %893 = vst.sshfl [vmem:[%s330_s12] sm:$0x55 pattern:$0x73625140] %v726_v50 }
 0x135 PF: > { %s13_s16 = sadd.s32 1, %s1026_s16   ;;  %s1232_s12 = smov %s1014_s13 }
 0x136   : > { %p10_p10 = scmp.ge.s32.totalorder %s13_s16, 4   ;;  %s1233_s13 = smov %s1086_s20 }
 0x137   : > { %s1234_s14 = smov %s1022_s15  ;;  %s1235_s15 = smov %s1237_s17 }
 0x138   :  { %12 = sbr.rel (!%p10_p10) target bundleno = 3 (0x3), region = 104 }

// kernel: ingredient_net_forward.88
= control target key start
LH: loop header
LB: loop body
LE: loop exit
PB: predicated region body
PF: predicated region fallthrough
CT: control target
= control target key end

     0   :  { %s1255_s12 = smov 0   ;;  %s1257_s13 = smov 0   ;;  %s1388_s0 = inlined_call_operand.vmem [shape: bf16[2,1024], index: 0, kind: input, shape index: {}]   ;;  %s1389_s1 = inlined_call_operand.vmem [shape: bf16[1024,512], index: 1, kind: input, shape index: {}]   ;;  %s1390_s2 = inlined_call_operand.vmem [shape: f32[1,512], index: 2, kind: input, shape index: {}]   ;;  %s1391_s3 = inlined_call_operand.vmem [shape: bf16[2,512], index: 3, kind: output, shape index: {}]  }
   0x1   :  { %s1259_s14 = smov 0  }
   0x2 LB: > { %s25_s15 = sadd.s32 1, %s1226_s13  ;;  %p1005_p0 = scmp.ge.s32.totalorder %s1230_s14, 1  ;;  %s1230_s14 = sphi %s1259_s14, %s13_s14   ;;  %s1226_s13 = sphi %s1257_s13, %s1393_s13   ;;  %s1222_s12 = sphi %s1255_s12, %s1392_s12  }
   0x3   : > { %p26_p1 = scmp.ge.s32.totalorder %s25_s15, 4  ;;  %p193_p2 = scmp.lt.s32.totalorder %s1230_s14, 5 }
   0x5   : > { %s1395_s15 = smov (%p26_p1, %s25_s15), 0  ;;  %p194_p3 = pnand %p1005_p0, %p193_p2 }
   0x6   : > { %s1006_s16 = sshll.u32 (!%p194_p3), %s1222_s12, 1  ;;  %s1007_s17 = sshll.u32 (!%p194_p3), %s1222_s12, 5 }
   0x7   : > { %197 = sbr.rel (%p194_p3) target bundleno = 334 (0x14e), region = 32  ;;  %p240_p4 = scmp.lt.s32.totalorder (!%p194_p3), %s1006_s16, 7 }
   0x8   : > { %p248_p5 = scmp.lt.s32.totalorder (!%p194_p3), %s1007_s17, 127  ;;  %p1010_p6 = scmp.ne.s32.totalorder (!%p194_p3), %s1222_s12, 0 }
   0xe   : > { %s1397_s16 = smov (!%p240_p4, %s1006_s16), 7  ;;  %s1399_s17 = smov (!%p248_p5, %s1007_s17), 127 }
   0xf   : > { %s244_s20 = scalar_lea.vmem %s1388_s0, %s1397_s16  ;;  %s1084_s21 = sshll.u32 %s1399_s17, 4  ;;  %v1232_v0 = vmov (!%p1010_p6), 0.0  }
  0x10   : > { %s1286_s24 = scalar_lea.vmem %s1389_s1, %s1084_s21  ;;  %275 = sbr.rel (%p1010_p6) target bundleno = 23 (0x17), region = 36  ;;  %276 = vst [vmem:[#allocation2] sm:$0xff] (!%p1010_p6), %v1232_v0 }
  0x17 PF: > { %v1112_v1 = vld [vmem:[%s1286_s24 + $0x4] ss:$16 sps:$4 sm:$0xff]   ;;  %v1114_v2 = vld [vmem:[%s1286_s24 + $0xc] ss:$16 sps:$4 sm:$0xff]   ;;  %v1116_v3 = vld [vmem:[%s1286_s24] ss:$16 sps:$4 sm:$0xff]   ;;  %v355_v41 = vlaneseq }
  0x18   : > { %688 = vmatprep.subr.bf16.mxu0 %v1112_v1  ;;  %v1117_v4 = vld [vmem:[%s1286_s24 + $0x8] ss:$16 sps:$4 sm:$0xff]   ;;  %729 = vmatprep.subr.bf16.mxu1 %v1114_v2  ;;  %v1118_v5 = vld [vmem:[%s1286_s24 + $0x24] ss:$16 sps:$4 sm:$0xff]   ;;  %v1120_v6 = vld [vmem:[%s1286_s24 + $0x2c] ss:$16 sps:$4 sm:$0xff]  }
  0x19   : > { %689 = vmatpush1.bf16.msra.mxu0 %v1116_v3  ;;  %730 = vmatpush1.bf16.msra.mxu1 %v1117_v4  ;;  %v1122_v7 = vld [vmem:[%s1286_s24 + $0x20] ss:$16 sps:$4 sm:$0xff]   ;;  %v1123_v8 = vld [vmem:[%s1286_s24 + $0x28] ss:$16 sps:$4 sm:$0xff]   ;;  %v1124_v9 = vld [vmem:[%s1286_s24 + $0x44] ss:$16 sps:$4 sm:$0xff]  }
  0x1a   : > { %690 = vmatprep.subr.bf16.mxu0 %v1118_v5  ;;  %731 = vmatprep.subr.bf16.mxu1 %v1120_v6  ;;  %v1126_v10 = vld [vmem:[%s1286_s24 + $0x4c] ss:$16 sps:$4 sm:$0xff]   ;;  %v1128_v11 = vld [vmem:[%s1286_s24 + $0x40] ss:$16 sps:$4 sm:$0xff]   ;;  %v1129_v12 = vld [vmem:[%s1286_s24 + $0x48] ss:$16 sps:$4 sm:$0xff]  }
  0x1b   : > { %v1130_v13 = vld [vmem:[%s1286_s24 + $0x64] ss:$16 sps:$4 sm:$0xff]   ;;  %v1132_v14 = vld [vmem:[%s1286_s24 + $0x6c] ss:$16 sps:$4 sm:$0xff]   ;;  %v1134_v15 = vld [vmem:[%s1286_s24 + $0x60] ss:$16 sps:$4 sm:$0xff]  }
  0x1c   : > { %v1135_v16 = vld [vmem:[%s1286_s24 + $0x68] ss:$16 sps:$4 sm:$0xff]   ;;  %v1136_v17 = vld [vmem:[%s1286_s24 + $0x84] ss:$16 sps:$4 sm:$0xff]   ;;  %v1138_v18 = vld [vmem:[%s1286_s24 + $0x8c] ss:$16 sps:$4 sm:$0xff]  }
  0x1d   : > { %691 = vmatpush1.bf16.msra.mxu0 %v1122_v7  ;;  %732 = vmatpush1.bf16.msra.mxu1 %v1123_v8  ;;  %v1140_v19 = vld [vmem:[%s1286_s24 + $0x80] ss:$16 sps:$4 sm:$0xff]   ;;  %v1141_v20 = vld [vmem:[%s1286_s24 + $0x88] ss:$16 sps:$4 sm:$0xff]   ;;  %v1142_v21 = vld [vmem:[%s1286_s24 + $0xa4] ss:$16 sps:$4 sm:$0xff]  }
  0x1e   : > { %692 = vmatprep.subr.bf16.mxu0 %v1124_v9  ;;  %733 = vmatprep.subr.bf16.mxu1 %v1126_v10  ;;  %v1144_v22 = vld [vmem:[%s1286_s24 + $0xac] ss:$16 sps:$4 sm:$0xff]   ;;  %v1146_v23 = vld [vmem:[%s1286_s24 + $0xa0] ss:$16 sps:$4 sm:$0xff]   ;;  %v1147_v24 = vld [vmem:[%s1286_s24 + $0xa8] ss:$16 sps:$4 sm:$0xff]  }
  0x1f   : > { %v1148_v25 = vld [vmem:[%s1286_s24 + $0xc4] ss:$16 sps:$4 sm:$0xff]   ;;  %v1150_v26 = vld [vmem:[%s1286_s24 + $0xcc] ss:$16 sps:$4 sm:$0xff]   ;;  %v1152_v27 = vld [vmem:[%s1286_s24 + $0xc0] ss:$16 sps:$4 sm:$0xff]  }
  0x20   : > { %v1153_v28 = vld [vmem:[%s1286_s24 + $0xc8] ss:$16 sps:$4 sm:$0xff]   ;;  %v1154_v29 = vld [vmem:[%s1286_s24 + $0xe4] ss:$16 sps:$4 sm:$0xff]   ;;  %v1156_v30 = vld [vmem:[%s1286_s24 + $0xec] ss:$16 sps:$4 sm:$0xff]  }
  0x21   : > { %693 = vmatpush1.bf16.msra.mxu0 %v1128_v11  ;;  %734 = vmatpush1.bf16.msra.mxu1 %v1129_v12  ;;  %v1158_v31 = vld [vmem:[%s1286_s24 + $0xe0] ss:$16 sps:$4 sm:$0xff]   ;;  %v1159_v32 = vld [vmem:[%s1286_s24 + $0xe8] ss:$16 sps:$4 sm:$0xff]   ;;  %v1160_v33 = vld [vmem:[%s1286_s24 + $0x104] ss:$16 sps:$4 sm:$0xff]  }
  0x22   : > { %694 = vmatprep.subr.bf16.mxu0 %v1130_v13  ;;  %735 = vmatprep.subr.bf16.mxu1 %v1132_v14  ;;  %v1162_v34 = vld [vmem:[%s1286_s24 + $0x10c] ss:$16 sps:$4 sm:$0xff]   ;;  %v1164_v35 = vld [vmem:[%s1286_s24 + $0x100] ss:$16 sps:$4 sm:$0xff]   ;;  %v1165_v36 = vld [vmem:[%s1286_s24 + $0x108] ss:$16 sps:$4 sm:$0xff]  }
  0x23   : > { %v1166_v37 = vld [vmem:[%s1286_s24 + $0x124] ss:$16 sps:$4 sm:$0xff]   ;;  %v1168_v38 = vld [vmem:[%s1286_s24 + $0x12c] ss:$16 sps:$4 sm:$0xff]   ;;  %v1233_v39 = vmov 1966171168  }
  0x24   : > { %v353_v40 = vunpack.c.l.s4 %v1233_v39  ;;  %v1170_v42 = vld [vmem:[%s1286_s24 + $0x120] ss:$16 sps:$4 sm:$0xff]   ;;  %v1171_v43 = vld [vmem:[%s1286_s24 + $0x128] ss:$16 sps:$4 sm:$0xff]   ;;  %v1172_v44 = vld [vmem:[%s1286_s24 + $0x144] ss:$16 sps:$4 sm:$0xff]  }
  0x25   : > { %695 = vmatpush1.bf16.msra.mxu0 %v1134_v15  ;;  %736 = vmatpush1.bf16.msra.mxu1 %v1135_v16  ;;  %v1174_v45 = vld [vmem:[%s1286_s24 + $0x14c] ss:$16 sps:$4 sm:$0xff]   ;;  %v1331_v47 = vshrl.u32 %v355_v41, 7  ;;  %v1176_v48 = vld [vmem:[%s1286_s24 + $0x140] ss:$16 sps:$4 sm:$0xff]   ;;  %p1076_p7 = scmp.ne.s32.totalorder %s1222_s12, 3 }
  0x26   : > { %696 = vmatprep.subr.bf16.mxu0 %v1136_v17  ;;  %737 = vmatprep.subr.bf16.mxu1 %v1138_v18  ;;  %v354_v46 = vunpack.c.0.s8 %v353_v40  ;;  %v1177_v49 = vld [vmem:[%s1286_s24 + $0x148] ss:$16 sps:$4 sm:$0xff]   ;;  %v1178_v50 = vld [vmem:[%s1286_s24 + $0x164] ss:$16 sps:$4 sm:$0xff]   ;;  %v1180_v51 = vld [vmem:[%s1286_s24 + $0x16c] ss:$16 sps:$4 sm:$0xff]  }
  0x27   : > { %v1011_v53 = vld.sshfl [vmem:[%s244_s20] sm:$0x11 pattern:$0x75316420]  ;;  %v1183_v55 = vld [vmem:[%s1286_s24 + $0x168] ss:$16 sps:$4 sm:$0xff]  }
  0x28   : > { %v1338_v52 = vsub.s32 %v354_v46, %v1331_v47  ;;  %v1182_v54 = vld [vmem:[%s1286_s24 + $0x160] ss:$16 sps:$4 sm:$0xff]   ;;  %v351_v56 = vcombine.high %v1011_v53, %v1011_v53  ;;  %v1184_v57 = vld [vmem:[%s1286_s24 + $0x184] ss:$16 sps:$4 sm:$0xff]   ;;  %v1186_v58 = vld [vmem:[%s1286_s24 + $0x18c] ss:$16 sps:$4 sm:$0xff]  }
  0x29   : > { %697 = vmatpush1.bf16.msra.mxu0 %v1140_v19  ;;  %738 = vmatpush1.bf16.msra.mxu1 %v1141_v20  ;;  %v1188_v60 = vld [vmem:[%s1286_s24 + $0x180] ss:$16 sps:$4 sm:$0xff]   ;;  %v1189_v61 = vld [vmem:[%s1286_s24 + $0x188] ss:$16 sps:$4 sm:$0xff]   ;;  %v1190_v62 = vld [vmem:[%s1286_s24 + $0x1a4] ss:$16 sps:$4 sm:$0xff]  }
  0x2a   : > { %698 = vmatprep.subr.bf16.mxu0 %v1142_v21  ;;  %739 = vmatprep.subr.bf16.mxu1 %v1144_v22  ;;  %v365_v59 = vrot.slane %v351_v56, %v1338_v52  ;;  %v1192_v63 = vld [vmem:[%s1286_s24 + $0x1ac] ss:$16 sps:$4 sm:$0xff]   ;;  %v1194_v0 = vld [vmem:[%s1286_s24 + $0x1a0] ss:$16 sps:$4 sm:$0xff]   ;;  %v1195_v1 = vld [vmem:[%s1286_s24 + $0x1a8] ss:$16 sps:$4 sm:$0xff]   ;;  %v358_v10 = vrot.slane %v1011_v53, %v1338_v52 }
  0x2b   : > { %v1196_v2 = vld [vmem:[%s1286_s24 + $0x1c4] ss:$16 sps:$4 sm:$0xff]   ;;  %v1198_v3 = vld [vmem:[%s1286_s24 + $0x1cc] ss:$16 sps:$4 sm:$0xff]   ;;  %v1200_v4 = vld [vmem:[%s1286_s24 + $0x1c0] ss:$16 sps:$4 sm:$0xff]  }
  0x2c   : > { %720 = vmatprep.mubr.bf16.mxu0 %v365_v59  ;;  %761 = vmatprep.mubr.bf16.mxu1 %v365_v59  ;;  %v1201_v5 = vld [vmem:[%s1286_s24 + $0x1c8] ss:$16 sps:$4 sm:$0xff]   ;;  %v1202_v6 = vld [vmem:[%s1286_s24 + $0x1e4] ss:$16 sps:$4 sm:$0xff]   ;;  %v1204_v7 = vld [vmem:[%s1286_s24 + $0x1ec] ss:$16 sps:$4 sm:$0xff]  }
  0x2d   : > { %699 = vmatpush1.bf16.msra.mxu0 %v1146_v23  ;;  %740 = vmatpush1.bf16.msra.mxu1 %v1147_v24  ;;  %v1206_v8 = vld [vmem:[%s1286_s24 + $0x1e0] ss:$16 sps:$4 sm:$0xff]   ;;  %v1207_v9 = vld [vmem:[%s1286_s24 + $0x1e8] ss:$16 sps:$4 sm:$0xff]   ;;  %v1234_v11 = vmov 1983009808  }
  0x2e   : > { %700 = vmatprep.subr.bf16.mxu0 %v1148_v25  ;;  %741 = vmatprep.subr.bf16.mxu1 %v1150_v26  ;;  %v777_v12 = vunpack.c.l.s4 %v1234_v11 }
  0x30   : > { %v778_v13 = vunpack.c.0.s8 %v777_v12 }
  0x31   : > { %701 = vmatpush1.bf16.msra.mxu0 %v1152_v27  ;;  %742 = vmatpush1.bf16.msra.mxu1 %v1153_v28  ;;  %v277_v27 = vld [vmem:[#allocation2] sm:$0xff] }
  0x32   : > { %702 = vmatprep.subr.bf16.mxu0 %v1154_v29  ;;  %743 = vmatprep.subr.bf16.mxu1 %v1156_v30  ;;  %v781_v16 = vsub.s32 %v778_v13, %v1331_v47  ;;  %v799_v30 = vld [vmem:[%s1390_s2] sm:$0xf] (!%p1076_p7) }
  0x35   : > { %703 = vmatpush1.bf16.msra.mxu0 %v1158_v31  ;;  %744 = vmatpush1.bf16.msra.mxu1 %v1159_v32  ;;  %v803_v31 = vsub.s32 (!%p1076_p7), 0, %v1331_v47  ;;  %v807_v32 = vsub.s32 (!%p1076_p7), 1, %v1331_v47 }
  0x36   : > { %704 = vmatprep.subr.bf16.mxu0 %v1160_v33  ;;  %745 = vmatprep.subr.bf16.mxu1 %v1162_v34  ;;  %v811_v33 = vsub.s32 (!%p1076_p7), 2, %v1331_v47  ;;  %v815_v34 = vsub.s32 (!%p1076_p7), 3, %v1331_v47 }
  0x39   : > { %705 = vmatpush1.bf16.msra.mxu0 %v1164_v35  ;;  %746 = vmatpush1.bf16.msra.mxu1 %v1165_v36  ;;  %v804_v35 = vrot.slane (!%p1076_p7), %v799_v30, %v803_v31  ;;  %v808_v36 = vrot.slane (!%p1076_p7), %v799_v30, %v807_v32 }
  0x3a   : > { %706 = vmatprep.subr.bf16.mxu0 %v1166_v37  ;;  %747 = vmatprep.subr.bf16.mxu1 %v1168_v38  ;;  %v812_v37 = vrot.slane (!%p1076_p7), %v799_v30, %v811_v33  ;;  %v816_v38 = vrot.slane (!%p1076_p7), %v799_v30, %v815_v34 }
  0x3b   : > { %v817_v39 = vcombine.low (!%p1076_p7), %v804_v35, %v808_v36 }
  0x3c   : > { %v818_v40 = vcombine.low (!%p1076_p7), %v812_v37, %v816_v38 }
  0x3d   : > { %707 = vmatpush1.bf16.msra.mxu0 %v1170_v42  ;;  %748 = vmatpush1.bf16.msra.mxu1 %v1171_v43  ;;  %v825_v41 = vrot.slane (!%p1076_p7), %v817_v39, %v781_v16 }
  0x3e   : > { %708 = vmatprep.subr.bf16.mxu0 %v1172_v44  ;;  %749 = vmatprep.subr.bf16.mxu1 %v1174_v45  ;;  %v832_v42 = vrot.slane (!%p1076_p7), %v818_v40, %v781_v16 }
  0x40   : > { %v833_v44 = vcombine.low (!%p1076_p7), %v825_v41, %v832_v42 }
  0x41   : > { %709 = vmatpush1.bf16.msra.mxu0 %v1176_v48  ;;  %750 = vmatpush1.bf16.msra.mxu1 %v1177_v49 }
  0x42   : > { %710 = vmatprep.subr.bf16.mxu0 %v1178_v50  ;;  %751 = vmatprep.subr.bf16.mxu1 %v1180_v51 }
  0x45   : > { %711 = vmatpush1.bf16.msra.mxu0 %v1182_v54  ;;  %752 = vmatpush1.bf16.msra.mxu1 %v1183_v55 }
  0x46   : > { %712 = vmatprep.subr.bf16.mxu0 %v1184_v57  ;;  %753 = vmatprep.subr.bf16.mxu1 %v1186_v58 }
  0x49   : > { %713 = vmatpush1.bf16.msra.mxu0 %v1188_v60  ;;  %754 = vmatpush1.bf16.msra.mxu1 %v1189_v61 }
  0x4a   : > { %714 = vmatprep.subr.bf16.mxu0 %v1190_v62  ;;  %755 = vmatprep.subr.bf16.mxu1 %v1192_v63 }
  0x4d   : > { %715 = vmatpush1.bf16.msra.mxu0 %v1194_v0  ;;  %756 = vmatpush1.bf16.msra.mxu1 %v1195_v1 }
  0x4e   : > { %716 = vmatprep.subr.bf16.mxu0 %v1196_v2  ;;  %757 = vmatprep.subr.bf16.mxu1 %v1198_v3 }
  0x51   : > { %717 = vmatpush1.bf16.msra.mxu0 %v1200_v4  ;;  %758 = vmatpush1.bf16.msra.mxu1 %v1201_v5 }
  0x52   : > { %718 = vmatprep.subr.bf16.mxu0 %v1202_v6  ;;  %759 = vmatprep.subr.bf16.mxu1 %v1204_v7 }
  0x55   : > { %719 = vmatpush1.bf16.msra.mxu0 %v1206_v8  ;;  %760 = vmatpush1.bf16.msra.mxu1 %v1207_v9 }
  0x58   : > { %721 = vmatmul.mubr.bf16.vlgmr.msra.gmra.mrb[0].mxu0 %v358_v10  ;;  %762 = vmatmul.mubr.bf16.vlgmr.msra.gmra.mrb[0].mxu1 %v358_v10 }
 0x12b   : > { %v722_v14 = vpop.f32.mrb[0].mxu0  ;;  %v763_v15 = vpop.f32.mrb[0].mxu1 }
 0x12c   : > { %v724_v17 = vpop.f32.mrb[1].mxu0  ;;  %v765_v18 = vpop.f32.mrb[1].mxu1 }
 0x12d   : > { %v774_v19 = vcombine.low %v722_v14, %v724_v17  ;;  %v775_v20 = vcombine.low %v763_v15, %v765_v18  ;;  %v726_v21 = vpop.f32.mrb[2].mxu0  ;;  %v767_v22 = vpop.f32.mrb[2].mxu1 }
 0x12e   : > { %v727_v23 = vpop.f32.mrb[3].mxu0  ;;  %v768_v24 = vpop.f32.mrb[3].mxu1 }
 0x12f   : > { %v782_v25 = vrot.slane %v774_v19, %v781_v16  ;;  %v789_v26 = vrot.slane %v775_v20, %v781_v16  ;;  %797 = sbr.rel (%p1076_p7) target bundleno = 334 (0x14e), region = 40 }
 0x131   : > { %v790_v28 = vcombine.low %v782_v25, %v789_v26 }
 0x133   : > { %v792_v29 = vadd.f32 %v790_v28, %v277_v27 }
 0x135   : > { %793 = vst [vmem:[#allocation2] sm:$0xff] %v792_v29 }
 0x13c   : > { %v798_v43 = vld [vmem:[#allocation2] sm:$0xff] }
 0x13d   : > { %v835_v45 = vadd.f32 %v833_v44, %v798_v43 }
 0x13f   : > { %v836_v46 = vmax.f32 %v835_v45, 0.0 }
 0x141   : > { %v838_v48 = vcombine.high %v836_v46, %v836_v46  ;;  %v845_v49 = vrot.slane %v836_v46, %v781_v16 }
 0x143   : > { %v852_v50 = vrot.slane %v838_v48, %v781_v16  ;;  %v853_v51 = vcombine.high %v845_v49, %v845_v49 }
 0x145   : > { %v854_v53 = vcombine.high %v852_v50, %v852_v50  ;;  %v1077_v54 = vpack.c.bf16 %v853_v51, %v845_v49 }
 0x147   : > { %v1078_v55 = vpack.c.bf16 %v854_v53, %v852_v50  ;;  %v875_v47 = vrot.slane %v1077_v54, %v1338_v52 }
 0x149   : > { %v882_v56 = vrot.slane %v1078_v55, %v1338_v52 }
 0x14b   : > { %v883_v57 = vcombine.low %v875_v47, %v882_v56 }
 0x14d   : > { %1079 = vst.sshfl [vmem:[%s1391_s3] sm:$0x55 pattern:$0x73625140] %v883_v57 }
 0x14e PF: > { %s13_s14 = sadd.s32 1, %s1230_s14   ;;  %s1392_s12 = smov %s1226_s13 }
 0x14f   : > { %p10_p8 = scmp.ge.s32.totalorder %s13_s14, 6   ;;  %s1393_s13 = smov %s1395_s15 }
 0x151   :  { %12 = sbr.rel (!%p10_p8) target bundleno = 2 (0x2), region = 76 }

// kernel: ingredient_net_forward.89
= control target key start
LH: loop header
LB: loop body
LE: loop exit
PB: predicated region body
PF: predicated region fallthrough
CT: control target
= control target key end

     0   :  { %8 = vsyncpa [#allocation4], 0  ;;  %s736_s12 = smov 0   ;;  %s738_s13 = smov 0   ;;  %s828_s0 = inlined_call_operand.vmem [shape: bf16[2,512], index: 0, kind: input, shape index: {}]   ;;  %s829_s1 = inlined_call_operand.vmem [shape: bf16[512,8], index: 1, kind: input, shape index: {}]   ;;  %s830_s2 = inlined_call_operand.vmem [shape: f32[1,8], index: 2, kind: input, shape index: {}]   ;;  %s831_s3 = inlined_call_operand.hbm [shape: f32[2,8], index: 3, kind: output, shape index: {}]  }
   0x1   :  { %s740_s14 = smov 0  }
   0x2 LB: > { %s556_s15 = sadd.s32 4294967295, %s711_s14   ;;  %s26_s16 = sadd.s32 1, %s707_s13  ;;  %s711_s14 = sphi %s740_s14, %s14_s14   ;;  %s707_s13 = sphi %s738_s13, %s834_s13   ;;  %s703_s12 = sphi %s736_s12, %s833_s12  }
   0x3   : > { %p27_p0 = scmp.ge.s32.totalorder %s26_s16, 2  ;;  %p560_p1 = scmp.ge.s32.totalorder %s711_s14, 1 }
   0x4   : > { %p189_p2 = scmp.lt.s32.totalorder %s711_s14, 3 }
   0x5   : > { %s836_s16 = smov (%p27_p0, %s26_s16), 0 }
   0x6   : > { %p190_p3 = pnand %p560_p1, %p189_p2 }
   0x7   : > { %s561_s17 = sshll.u32 (!%p190_p3), %s703_s12, 1  ;;  %s562_s18 = sshll.u32 (!%p190_p3), %s703_s12, 5 }
   0x8   : > { %193 = sbr.rel (%p190_p3) target bundleno = 310 (0x136), region = 32  ;;  %p225_p4 = scmp.lt.s32.totalorder (!%p190_p3), %s561_s17, 3 }
   0x9   : > { %p232_p5 = scmp.lt.s32.totalorder (!%p190_p3), %s562_s18, 63  ;;  %p564_p6 = scmp.ne.s32.totalorder (!%p190_p3), %s703_s12, 0 }
   0xf   : > { %s838_s17 = smov (!%p225_p4, %s561_s17), 3  ;;  %s840_s18 = smov (!%p232_p5, %s562_s18), 63 }
  0x10   : > { %s229_s21 = scalar_lea.vmem %s828_s0, %s838_s17  ;;  %s563_s22 = sshll.u32 %s840_s18, 2  ;;  %vm248_vm0 = vcmask (!%p564_p6), 58368   ;;  %v713_v0 = vmov (!%p564_p6), 0.0  }
  0x11   : > { %s768_s25 = scalar_lea.vmem %s829_s1, %s563_s22  ;;  %247 = sbr.rel (%p564_p6) target bundleno = 24 (0x18), region = 36  ;;  %249 = vst.msk [vmem:[#allocation2] sm:$0x3] (!%p564_p6), %vm248_vm0, %v713_v0 }
  0x18 PF: > { %v643_v1 = vld [vmem:[%s768_s25 + $0x40] sm:$0xff]   ;;  %v645_v3 = vld [vmem:[%s768_s25 + $0x48] sm:$0xff]   ;;  %v647_v5 = vld [vmem:[%s768_s25 + $0x50] sm:$0xff]   ;;  %v296_v10 = vlaneseq  ;;  %v714_v14 = vmov 1966171168   ;;  %vm446_vm1 = vcmask 58368  }
  0x19   : > { %v644_v2 = vld [vmem:[%s768_s25] sm:$0xff]   ;;  %588 = vmatprep.subr.bf16.mxu0 %v643_v1  ;;  %v646_v4 = vld [vmem:[%s768_s25 + $0x8] sm:$0xff]   ;;  %v648_v6 = vld [vmem:[%s768_s25 + $0x10] sm:$0xff]   ;;  %v294_v15 = vunpack.c.l.s4 %v714_v14  ;;  %p582_p7 = scmp.ne.s32.totalorder %s703_s12, 1 }
  0x1a   : > { %589 = vmatpush3.bf16.msra.mxu0 %v644_v2  ;;  %v649_v7 = vld [vmem:[%s768_s25 + $0x58] sm:$0xff]   ;;  %v651_v9 = vld [vmem:[%s768_s25 + $0x60] sm:$0xff]   ;;  %v653_v12 = vld [vmem:[%s768_s25 + $0x68] sm:$0xff]   ;;  %v297_v16 = vshrl.u32 %v296_v10, 7 }
  0x1b   : > { %590 = vmatprep.subr.bf16.mxu0 %v645_v3  ;;  %v650_v8 = vld [vmem:[%s768_s25 + $0x18] sm:$0xff]   ;;  %v652_v11 = vld [vmem:[%s768_s25 + $0x20] sm:$0xff]   ;;  %v654_v17 = vld [vmem:[%s768_s25 + $0x28] sm:$0xff]   ;;  %v295_v19 = vunpack.c.0.s8 %v294_v15 }
  0x1c   : > { %v565_v13 = vld.sshfl [vmem:[%s229_s21] sm:$0x11 pattern:$0x75316420]  ;;  %v655_v20 = vld [vmem:[%s768_s25 + $0x70] sm:$0xff]   ;;  %v657_v24 = vld [vmem:[%s768_s25 + $0x78] sm:$0xff]  }
  0x1d   : > { %v292_v18 = vcombine.high %v565_v13, %v565_v13  ;;  %v298_v21 = vsub.s32 %v295_v19, %v297_v16  ;;  %v656_v22 = vld [vmem:[%s768_s25 + $0x30] sm:$0xff]   ;;  %v658_v25 = vld [vmem:[%s768_s25 + $0x38] sm:$0xff]   ;;  %v250_v28 = vld [vmem:[#allocation2] sm:$0x3] }
  0x1e   : > { %591 = vmatpush3.bf16.msra.mxu0 %v646_v4  ;;  %v583_v35 = vld [vmem:[%s830_s2] ss:$0 sm:$0xff] (!%p582_p7) }
  0x1f   : > { %592 = vmatprep.subr.bf16.mxu0 %v647_v5  ;;  %v306_v23 = vrot.slane %v292_v18, %v298_v21  ;;  %v299_v26 = vrot.slane %v565_v13, %v298_v21 }
  0x21   : > { %437 = vmatprep.mubr.bf16.mxu0 %v306_v23 }
  0x22   : > { %593 = vmatpush3.bf16.msra.mxu0 %v648_v6 }
  0x23   : > { %594 = vmatprep.subr.bf16.mxu0 %v649_v7 }
  0x26   : > { %595 = vmatpush3.bf16.msra.mxu0 %v650_v8 }
  0x27   : > { %596 = vmatprep.subr.bf16.mxu0 %v651_v9 }
  0x2a   : > { %597 = vmatpush3.bf16.msra.mxu0 %v652_v11 }
  0x2b   : > { %598 = vmatprep.subr.bf16.mxu0 %v653_v12 }
  0x2e   : > { %599 = vmatpush3.bf16.msra.mxu0 %v654_v17 }
  0x2f   : > { %600 = vmatprep.subr.bf16.mxu0 %v655_v20 }
  0x32   : > { %601 = vmatpush3.bf16.msra.mxu0 %v656_v22 }
  0x33   : > { %602 = vmatprep.subr.bf16.mxu0 %v657_v24 }
  0x36   : > { %603 = vmatpush3.bf16.msra.mxu0 %v658_v25 }
  0x39   : > { %438 = vmatmul.mubr.bf16.vlgmr.msra.gmra.mrb[0].mxu0 %v299_v26 }
 0x10c   : > { %v604_v27 = vpop.f32.mrb[0].mxu0  ;;  %451 = sbr.rel (%p582_p7) target bundleno = 285 (0x11d), region = 40 }
 0x10d   : > { %v605_v29 = vpop.f32.mrb[1].mxu0 }
 0x10e   : > { %v606_v30 = vadd.f32 %v605_v29, %v604_v27  ;;  %v607_v31 = vpop.f32.mrb[2].mxu0 }
 0x10f   : > { %v608_v32 = vpop.f32.mrb[3].mxu0 }
 0x110   : > { %v445_v33 = vadd.f32 %v606_v30, %v250_v28 }
 0x112   : > { %447 = vst.msk [vmem:[#allocation2] sm:$0x3] %vm446_vm1, %v445_v33 }
 0x119   : > { %v452_v34 = vld [vmem:[#allocation2] sm:$0x3] }
 0x11a   : > { %v460_v36 = vadd.f32 %v583_v35, %v452_v34 }
 0x11c   : > { %461 = vst.msk [vmem:[#allocation3] sm:$0x3] %vm446_vm1, %v460_v36 }
 0x11d PF: > { %p793_p8 = scmp.eq.s32.totalorder %s556_s15, 1  ;;  %s715_s29 = smov [#allocation3]  }
 0x11e   : > { %s472_s30 = sshll.u32 %s715_s29, 4  ;;  %s473_s30 = int_to_ptr.vmem [resolvable:$true] %s472_s30 }
 0x11f   : > { %s659_s4 = scalar_lea.vmem %s473_s30, 32  ;;  %p666_p12 = scmp.lt.s32.totalorder %s473_s30, %s473_s30 }
 0x120   : > { %p660_p9 = scmp.ne.s32.totalorder %s473_s30, %s659_s4  ;;  %p667_p13 = scmp.lt.s32.totalorder %s659_s4, %s659_s4 }
 0x122   : > { %p661_p10 = pnand %p660_p9, %p793_p8  ;;  %p668_p0 = por %p667_p13, %p666_p12 }
 0x124   : > { %p662_p11 = pneg %p661_p10 }
 0x126   : > { %p669_p1 = pnand %p668_p0, %p662_p11 }
 0x128   : > { %672 = shalt.err (!%p669_p1)
}
 0x129   : > { %s673_s7 = scalar_lea.hbm %s831_s3, 32 }
 0x12a   : > { %p674_p2 = scmp.ne.s32.totalorder %s831_s3, %s673_s7  ;;  %p679_p5 = scmp.lt.u32.totalorder %s673_s7, %s831_s3 }
 0x12c   : > { %p675_p3 = pnand %p674_p2, %p793_p8 }
 0x12e   : > { %p676_p4 = pneg %p675_p3 }
 0x130   : > { %p681_p6 = pnand %p679_p5, %p676_p4 }
 0x132   : > { %684 = shalt.err (!%p681_p6)
}
 0x133   : > { %611 = dma.vmem_to_hbm [thread:$0]  (%p793_p8), %s473_s30, 32, %s831_s3, [#allocation4]  }
 0x134   : > { %698 = dma.done.wait (%p793_p8), [#allocation4], 32  }
 0x135   : > { %700 = vsyncadd (%p793_p8), [#allocation4], 4294967264 }
 0x136 PF: > { %s14_s14 = sadd.s32 1, %s711_s14   ;;  %s833_s12 = smov %s707_s13 }
 0x137   : > { %p11_p7 = scmp.ge.s32.totalorder %s14_s14, 4   ;;  %s834_s13 = smov %s836_s16 }
 0x139   :  { %13 = sbr.rel (!%p11_p7) target bundleno = 2 (0x2), region = 74 }
 0x140   :  { %485 = vsyncpa [#allocation4], 1 }
 0x141   :  { %487 = vsyncpa [#allocation4 + $0x1], 1 }

</bundles_post_ra>
